<compile_context>
chip_gen: v5e
topology: v5e:2x2
jax: 0.10.0
libtpu: 0.0.40
codegen_flags: <defaults>
</compile_context>

<pallas_src>
import jax
import jax.numpy as jnp
from jax.experimental import pallas as pl
from jax.experimental.pallas import tpu as pltpu

BN_EPS = 1e-5
LEAKY_SLOPE = 0.2
LANE = 128

# Budget for the "weight-resident, full-K" GEMM path (double-buffered tiles).
_FULL_K_BUDGET = 40 * 1024 * 1024


# --------------------------------------------------------------------------
# Tiling helpers
# --------------------------------------------------------------------------
def _round_up(x, m):
    return (x + m - 1) // m * m


def _pick_divisor_tile(m, target):
    """Largest tile <= target dividing m (fall back to full m)."""
    if m <= target:
        return m
    t = target
    while t > 8 and m % t != 0:
        t //= 2
    return t if m % t == 0 else m


def _pick_k_tile(kp, target=512):
    """kp is a multiple of 128; largest multiple of 128 <= target dividing kp."""
    t = max((min(kp, target) // LANE) * LANE, LANE)
    while kp % t != 0:
        t -= LANE
    return t


def _vmem_limit(*buffer_bytes):
    total = int(sum(buffer_bytes) * 1.25) + (1 << 20)
    return min(max(total, 32 * 1024 * 1024), 52 * 1024 * 1024)


def _apply_activation(acc, activation):
    if activation == "leaky":
        return jnp.where(acc >= 0, acc, LEAKY_SLOPE * acc)
    if activation == "sigmoid":
        return jax.nn.sigmoid(acc)
    return acc


# --------------------------------------------------------------------------
# Pallas kernel 1a: single-shot (weight-resident) GEMM, grid over M tiles only
# --------------------------------------------------------------------------
def _make_single_gemm_kernel(compute_stats: bool, activation: str):
    if compute_stats:
        def kernel(x_ref, w_ref, y_ref, sum_ref, sq_ref):
            acc = jnp.dot(x_ref[...], w_ref[...],
                          preferred_element_type=jnp.float32)
            # Per-M-tile partial BN statistics from the f32 accumulator
            # (pre-activation conv output); finalized in plain JAX.
            sum_ref[...] = jnp.sum(acc, axis=0, keepdims=True)[None, :, :]
            sq_ref[...] = jnp.sum(acc * acc, axis=0, keepdims=True)[None, :, :]
            y_ref[...] = _apply_activation(acc, activation).astype(y_ref.dtype)
    else:
        def kernel(x_ref, w_ref, y_ref):
            acc = jnp.dot(x_ref[...], w_ref[...],
                          preferred_element_type=jnp.float32)
            y_ref[...] = _apply_activation(acc, activation).astype(y_ref.dtype)
    return kernel


# --------------------------------------------------------------------------
# Pallas kernel 1b: K-tiled GEMM with f32 VMEM accumulator (fallback for
# layers whose full-K footprint does not fit the VMEM budget, e.g. conv4 at
# depths=128 on v7x).
# --------------------------------------------------------------------------
def _make_loop_gemm_kernel(compute_stats: bool, activation: str):
    def body(x_ref, w_ref, y_ref, sum_ref, sq_ref, acc_ref):
        k = pl.program_id(1)

        @pl.when(k == 0)
        def _():
            acc_ref[...] = jnp.zeros_like(acc_ref)

        acc_ref[...] += jnp.dot(x_ref[...], w_ref[...],
                                preferred_element_type=jnp.float32)

        @pl.when(k == pl.num_programs(1) - 1)
        def _():
            acc = acc_ref[...]
            if compute_stats:
                sum_ref[...] = jnp.sum(acc, axis=0, keepdims=True)[None, :, :]
                sq_ref[...] = jnp.sum(acc * acc, axis=0,
                                      keepdims=True)[None, :, :]
            y_ref[...] = _apply_activation(acc, activation).astype(y_ref.dtype)

    if compute_stats:
        def kernel(x_ref, w_ref, y_ref, sum_ref, sq_ref, acc_ref):
            body(x_ref, w_ref, y_ref, sum_ref, sq_ref, acc_ref)
    else:
        def kernel(x_ref, w_ref, y_ref, acc_ref):
            body(x_ref, w_ref, y_ref, None, None, acc_ref)
    return kernel


def conv_gemm(x_mat, w_mat, *, activation, compute_stats, out_dtype,
              tile_m, tile_k=512):
    """y = act(x @ w) with optional per-tile BN partial stats.

    Returns arrays with M possibly padded up to a tile multiple (caller
    slices back to the true row count)."""
    M, K = x_mat.shape
    Kw, C = w_mat.shape
    assert K == Kw, (K, Kw)

    tm = min(M, tile_m)
    Mp = _round_up(M, tm)
    if Mp > M:
        x_mat = jnp.pad(x_mat, ((0, Mp - M), (0, 0)))
    gm = Mp // tm

    out_itemsize = jnp.dtype(out_dtype).itemsize
    stats_bytes = 4 * 8 * C * 4 if compute_stats else 0

    full_k_bytes = (2 * tm * K * 2          # x tile, double-buffered, bf16
                    + 2 * K * C * 2         # full weight, double-buffered, bf16
                    + 2 * tm * C * out_itemsize
                    + stats_bytes)

    if full_k_bytes <= _FULL_K_BUDGET:
        # ---- weight-resident single-shot GEMM: grid over M tiles only ----
        out_shape = [jax.ShapeDtypeStruct((Mp, C), out_dtype)]
        out_specs = [pl.BlockSpec((tm, C), lambda i: (i, 0))]
        if compute_stats:
            out_shape += [jax.ShapeDtypeStruct((gm, 1, C), jnp.float32)] * 2
            out_specs += [pl.BlockSpec((1, 1, C), lambda i: (i, 0, 0))] * 2
        return pl.pallas_call(
            _make_single_gemm_kernel(compute_stats, activation),
            out_shape=tuple(out_shape) if compute_stats else out_shape[0],
            grid=(gm,),
            in_specs=[
                pl.BlockSpec((tm, K), lambda i: (i, 0)),
                pl.BlockSpec((K, C), lambda i: (0, 0)),   # constant block idx
            ],
            out_specs=tuple(out_specs) if compute_stats else out_specs[0],
            compiler_params=pltpu.CompilerParams(
                dimension_semantics=("parallel",),
                vmem_limit_bytes=_vmem_limit(full_k_bytes),
            ),
        )(x_mat, w_mat)

    # ---- K-tiled fallback (large weights; K zero-padded to lane multiple) --
    # TODO(synk): on v7x a "parallel" C grid axis would keep both TensorCores
    # busy when gm == 1 at small batch.
    Kp = _round_up(K, LANE)
    if Kp > K:
        x_mat = jnp.pad(x_mat, ((0, 0), (0, Kp - K)))
        w_mat = jnp.pad(w_mat, ((0, Kp - K), (0, 0)))
    tk = _pick_k_tile(Kp, tile_k)
    gk = Kp // tk

    out_shape = [jax.ShapeDtypeStruct((Mp, C), out_dtype)]
    out_specs = [pl.BlockSpec((tm, C), lambda i, k: (i, 0))]
    if compute_stats:
        out_shape += [jax.ShapeDtypeStruct((gm, 1, C), jnp.float32)] * 2
        out_specs += [pl.BlockSpec((1, 1, C), lambda i, k: (i, 0, 0))] * 2

    vmem = _vmem_limit(
        2 * tm * tk * 2,             # x tile, double-buffered, bf16
        2 * tk * C * 2,              # w tile, double-buffered, bf16
        2 * tm * C * out_itemsize,   # output tile
        tm * C * 4,                  # f32 accumulator scratch
        stats_bytes,
    )
    return pl.pallas_call(
        _make_loop_gemm_kernel(compute_stats, activation),
        out_shape=tuple(out_shape) if compute_stats else out_shape[0],
        grid=(gm, gk),
        in_specs=[
            pl.BlockSpec((tm, tk), lambda i, k: (i, k)),
            pl.BlockSpec((tk, C), lambda i, k: (k, 0)),
        ],
        out_specs=tuple(out_specs) if compute_stats else out_specs[0],
        scratch_shapes=[pltpu.VMEM((tm, C), jnp.float32)],
        compiler_params=pltpu.CompilerParams(
            dimension_semantics=("parallel", "arbitrary"),
            vmem_limit_bytes=vmem,
        ),
    )(x_mat, w_mat)


# --------------------------------------------------------------------------
# Pallas kernel 2: apply BatchNorm affine (precomputed scale/shift) + LeakyReLU
# bf16 in / bf16 out, f32 math inside.
# --------------------------------------------------------------------------
def _bn_leaky_kernel(y_ref, scale_ref, shift_ref, o_ref):
    o = y_ref[...].astype(jnp.float32) * scale_ref[...] + shift_ref[...]
    o_ref[...] = jnp.where(o >= 0, o, LEAKY_SLOPE * o).astype(o_ref.dtype)


def bn_leaky_apply(y, scale, shift, *, out_dtype, tile_m=2048):
    M, C = y.shape
    tm = _pick_divisor_tile(M, tile_m)
    vmem = _vmem_limit(2 * tm * C * jnp.dtype(y.dtype).itemsize,
                       2 * tm * C * jnp.dtype(out_dtype).itemsize,
                       4 * 8 * C * 4)
    return pl.pallas_call(
        _bn_leaky_kernel,
        out_shape=jax.ShapeDtypeStruct((M, C), out_dtype),
        grid=(M // tm,),
        in_specs=[
            pl.BlockSpec((tm, C), lambda i: (i, 0)),
            pl.BlockSpec((1, C), lambda i: (0, 0)),
            pl.BlockSpec((1, C), lambda i: (0, 0)),
        ],
        out_specs=pl.BlockSpec((tm, C), lambda i: (i, 0)),
        compiler_params=pltpu.CompilerParams(
            dimension_semantics=("parallel",),
            vmem_limit_bytes=vmem,
        ),
    )(y, scale, shift)


# --------------------------------------------------------------------------
# Glue: im2col patch extraction (pure data movement, plain JAX, bf16 output)
# --------------------------------------------------------------------------
def _im2col(x_nhwc, kh, kw, stride, pad):
    # TODO(synk): the im2col HBM round trip (~4x amplified activation write +
    # re-read) could be removed by feeding per-tap slabs from the NHWC
    # activation kept in memory_space=pl.ANY via strided make_async_copy.
    N, H, W, C = x_nhwc.shape
    if pad:
        x_nhwc = jnp.pad(x_nhwc, ((0, 0), (pad, pad), (pad, pad), (0, 0)))
    Ho = (H + 2 * pad - kh) // stride + 1
    Wo = (W + 2 * pad - kw) // stride + 1
    taps = [
        x_nhwc[:, i:i + stride * Ho:stride, j:j + stride * Wo:stride, :]
        for i in range(kh) for j in range(kw)
    ]
    p = jnp.stack(taps, axis=3)                       # (N, Ho, Wo, KH*KW, C)
    mat = p.reshape(N * Ho * Wo, kh * kw * C)         # no K zero-padding
    return mat.astype(jnp.bfloat16), (N, Ho, Wo)


def conv_plain(x_nhwc, w_mat, kh, kw, stride, pad, *, activation, out_dtype,
               tile_m):
    x_mat, (N, Ho, Wo) = _im2col(x_nhwc, kh, kw, stride, pad)
    M = x_mat.shape[0]
    C = w_mat.shape[1]
    y = conv_gemm(x_mat, w_mat, activation=activation, compute_stats=False,
                  out_dtype=out_dtype, tile_m=tile_m)
    return y[:M].reshape(N, Ho, Wo, C)


def conv_bn_leaky(x_nhwc, w_mat, gamma, beta, kh, kw, stride, pad, *,
                  gemm_tile_m=512, bn_tile_m=2048):
    x_mat, (N, Ho, Wo) = _im2col(x_nhwc, kh, kw, stride, pad)
    M = x_mat.shape[0]
    C = w_mat.shape[1]
    # Pass 1: GEMM (bf16 output) + per-tile column sum / sum-of-squares (f32).
    y, tsum, tsq = conv_gemm(x_mat, w_mat, activation="none",
                             compute_stats=True, out_dtype=jnp.bfloat16,
                             tile_m=gemm_tile_m)
    # Finalize batch statistics in f32 (padded zero rows contribute nothing,
    # divisor is the true row count).
    total = jnp.sum(tsum[:, 0, :], axis=0)
    total_sq = jnp.sum(tsq[:, 0, :], axis=0)
    mean = total / M
    # TODO(synk): E[x^2]-E[x]^2 is cancellation-prone for large |mean|/std;
    # acceptable at DCGAN activation scales.
    var = jnp.maximum(total_sq / M - mean * mean, 0.0)   # biased batch variance
    inv = jax.lax.rsqrt(var + BN_EPS)
    scale = (gamma * inv)[None, :].astype(jnp.float32)          # (1, C)
    shift = (beta - mean * gamma * inv)[None, :].astype(jnp.float32)
    # Pass 2: tiled normalize + LeakyReLU, bf16 inter-layer activation.
    out = bn_leaky_apply(y, scale, shift, out_dtype=jnp.bfloat16,
                         tile_m=bn_tile_m)
    return out[:M].reshape(N, Ho, Wo, C)


# --------------------------------------------------------------------------
# The Discriminator module (deterministic synthetic parameters)
# --------------------------------------------------------------------------
class DiscriminatorPallas:
    def __init__(self, num_colors=3, depths=128, image_size=64, key=None):
        if key is None:
            key = jax.random.PRNGKey(0)
        d = depths
        chans = [
            (num_colors, d),      # conv1
            (d, d * 2),           # conv2
            (d * 2, d * 4),       # conv3
            (d * 4, d * 8),       # conv4
            (d * 8, 1),           # conv5
        ]
        keys = jax.random.split(key, len(chans))
        self.w_mats = []
        self.gammas = []
        self.betas = []
        for li, (k, (cin, cout)) in enumerate(zip(keys, chans)):
            # DCGAN-style init: N(0, 0.02)
            w = 0.02 * jax.random.normal(k, (cout, cin, 4, 4), dtype=jnp.float32)
            # conv5: pad Cout 1 -> 128 with zero columns (lane-dense stores);
            # the real channel is sliced out after the GEMM.
            c_pad = LANE if li == len(chans) - 1 else None
            self.w_mats.append(self._prep_weight(w, c_pad=c_pad))
            self.gammas.append(jnp.ones((cout,), jnp.float32))
            self.betas.append(jnp.zeros((cout,), jnp.float32))
        self.final_size = image_size // 16

    @staticmethod
    def _prep_weight(w_oihw, c_pad=None):
        # OIHW -> (KH, KW, Cin, Cout) -> (K, Cout), bf16 (no K padding here;
        # the GEMM wrapper pads K only when it falls back to the K-tiled path).
        cout, cin, kh, kw = w_oihw.shape
        K = kh * kw * cin
        w = jnp.transpose(w_oihw, (2, 3, 1, 0)).reshape(K, cout)
        if c_pad is not None and c_pad > cout:
            w = jnp.pad(w, ((0, 0), (0, c_pad - cout)))
        return w.astype(jnp.bfloat16)

    def __call__(self, x_nchw):
        x = jnp.transpose(x_nchw, (0, 2, 3, 1)).astype(jnp.bfloat16)  # -> NHWC
        # conv1: stride 2, pad 1, no BN, LeakyReLU(0.2); mem-bound -> big tiles.
        x = conv_plain(x, self.w_mats[0], 4, 4, 2, 1, activation="leaky",
                       out_dtype=jnp.bfloat16, tile_m=2048)
        # conv2..conv4: stride 2, pad 1, BN (batch stats) + LeakyReLU(0.2).
        # TODO(synk): PyTorch eval-mode (running stats) parity is not modeled;
        # this is the training-mode forward.
        for i in (1, 2, 3):
            x = conv_bn_leaky(x, self.w_mats[i], self.gammas[i], self.betas[i],
                              4, 4, 2, 1)
        # conv5: stride 1, pad 0, Sigmoid; Cout lane-padded to 128, f32 output.
        x = conv_plain(x, self.w_mats[4], 4, 4, 1, 0, activation="sigmoid",
                       out_dtype=jnp.float32, tile_m=256)
        x = x[..., :1]                       # drop the zero-weight pad columns
        # x is (N, 1, 1, 1) -> squeeze like torch.
        return jnp.squeeze(x)


if __name__ == "__main__":
    # Spatial must be 64 so conv5 (k=4, s=1, p=0) sees a 4x4 map; keep batch and
    # channel widths small for the smoke test.
    batch, num_colors, depths, image_size = 2, 3, 8, 64

    key = jax.random.PRNGKey(0)
    k_x, k_w = jax.random.split(key)
    x = jax.random.normal(k_x, (batch, num_colors, image_size, image_size),
                          dtype=jnp.float32)

    model = DiscriminatorPallas(num_colors=num_colors, depths=depths,
                                image_size=image_size, key=k_w)
    fwd = jax.jit(lambda inp: model(inp))
    out = jax.block_until_ready(fwd(x))

    assert out.shape == (batch,), f"unexpected output shape {out.shape}"
    assert bool(jnp.all(jnp.isfinite(out)))
    print("KERNEL_OK")
</pallas_src>

<mosaic_0001>
module attributes {stable_mosaic.version = 11 : i64} {
  func.func @kernel(%arg0: i32, %arg1: memref<2048x48xbf16, #tpu.memory_space<vmem>>, %arg2: memref<48x8xbf16, #tpu.memory_space<vmem>>, %arg3: memref<2048x8xbf16, #tpu.memory_space<vmem>>) attributes {dimension_semantics = [#tpu.dimension_semantics<parallel>], iteration_bounds = array<i64: 1>, scalar_prefetch = 0 : i64, scratch_operands = 0 : i64, tpu.core_type = #tpu.core_type<tc>, window_params = [{transform_indices = @transform_0, window_bounds = array<i64: 2048, 48>}, {pipeline_mode = #tpu.pipeline_mode<synchronous>, transform_indices = @transform_1, window_bounds = array<i64: 48, 8>}, {transform_indices = @transform_2, window_bounds = array<i64: 2048, 8>}]} {
    %c0 = arith.constant 0 : index
    %c0_0 = arith.constant 0 : index
    %0 = vector.load %arg1[%c0, %c0_0] : memref<2048x48xbf16, #tpu.memory_space<vmem>>, vector<2048x48xbf16>
    %c0_1 = arith.constant 0 : index
    %c0_2 = arith.constant 0 : index
    %1 = vector.load %arg2[%c0_1, %c0_2] : memref<48x8xbf16, #tpu.memory_space<vmem>>, vector<48x8xbf16>
    %cst = arith.constant dense<0.000000e+00> : vector<2048x8xf32>
    %2 = tpu.matmul %0, %1, %cst {dimension_numbers = #tpu.dot_dimension_numbers<[1], [0], [0], [1], [0, 0, 1, 1], [], []>} : vector<2048x48xbf16>, vector<48x8xbf16>, vector<2048x8xf32> -> vector<2048x8xf32>
    %cst_3 = arith.constant 0.000000e+00 : f32
    %3 = vector.broadcast %cst_3 : f32 to vector<2048x8xf32>
    %4 = arith.cmpf oge, %2, %3 : vector<2048x8xf32>
    %cst_4 = arith.constant 2.000000e-01 : f32
    %5 = vector.broadcast %cst_4 : f32 to vector<2048x8xf32>
    %6 = arith.mulf %5, %2 : vector<2048x8xf32>
    %7 = arith.select %4, %2, %6 : vector<2048x8xi1>, vector<2048x8xf32>
    %8 = arith.truncf %7 : vector<2048x8xf32> to vector<2048x8xbf16>
    %c0_5 = arith.constant 0 : index
    %c0_6 = arith.constant 0 : index
    %9 = vector.load %arg3[%c0_5, %c0_6] : memref<2048x8xbf16, #tpu.memory_space<vmem>>, vector<2048x8xbf16>
    tpu.vector_store %arg3[%c0_5, %c0_6], %8 {strides = array<i32>} : memref<2048x8xbf16, #tpu.memory_space<vmem>>, vector<2048x8xbf16>,
    return
  }
  func.func @transform_0(%arg0: i32) -> (i32, i32) {
    %c0_i32 = arith.constant 0 : i32
    %c0_i32_0 = arith.constant 0 : i32
    return %arg0, %c0_i32 : i32, i32
  }
  func.func @transform_1(%arg0: i32) -> (i32, i32) {
    %c0_i32 = arith.constant 0 : i32
    %c0_i32_0 = arith.constant 0 : i32
    %c0_i32_1 = arith.constant 0 : i32
    return %c0_i32, %c0_i32_0 : i32, i32
  }
  func.func @transform_2(%arg0: i32) -> (i32, i32) {
    %c0_i32 = arith.constant 0 : i32
    %c0_i32_0 = arith.constant 0 : i32
    return %arg0, %c0_i32 : i32, i32
  }
}

module attributes {stable_mosaic.version = 11 : i64} {
  func.func @kernel(%arg0: i32, %arg1: memref<512x128xbf16, #tpu.memory_space<vmem>>, %arg2: memref<128x16xbf16, #tpu.memory_space<vmem>>, %arg3: memref<512x16xbf16, #tpu.memory_space<vmem>>, %arg4: memref<1x1x16xf32, #tpu.memory_space<vmem>>, %arg5: memref<1x1x16xf32, #tpu.memory_space<vmem>>) attributes {dimension_semantics = [#tpu.dimension_semantics<parallel>], iteration_bounds = array<i64: 1>, scalar_prefetch = 0 : i64, scratch_operands = 0 : i64, tpu.core_type = #tpu.core_type<tc>, window_params = [{transform_indices = @transform_0, window_bounds = array<i64: 512, 128>}, {pipeline_mode = #tpu.pipeline_mode<synchronous>, transform_indices = @transform_1, window_bounds = array<i64: 128, 16>}, {transform_indices = @transform_2, window_bounds = array<i64: 512, 16>}, {transform_indices = @transform_3, window_bounds = array<i64: 1, 1, 16>}, {transform_indices = @transform_4, window_bounds = array<i64: 1, 1, 16>}]} {
    %c0 = arith.constant 0 : index
    %c0_0 = arith.constant 0 : index
    %0 = vector.load %arg1[%c0, %c0_0] : memref<512x128xbf16, #tpu.memory_space<vmem>>, vector<512x128xbf16>
    %c0_1 = arith.constant 0 : index
    %c0_2 = arith.constant 0 : index
    %1 = vector.load %arg2[%c0_1, %c0_2] : memref<128x16xbf16, #tpu.memory_space<vmem>>, vector<128x16xbf16>
    %cst = arith.constant dense<0.000000e+00> : vector<512x16xf32>
    %2 = tpu.matmul %0, %1, %cst {dimension_numbers = #tpu.dot_dimension_numbers<[1], [0], [0], [1], [0, 0, 1, 1], [], []>} : vector<512x128xbf16>, vector<128x16xbf16>, vector<512x16xf32> -> vector<512x16xf32>
    %cst_3 = arith.constant dense<0.000000e+00> : vector<16xf32>
    %3 = vector.multi_reduction <add>, %2, %cst_3 [0] : vector<512x16xf32> to vector<16xf32>
    %4 = vector.shape_cast %3 : vector<16xf32> to vector<1x16xf32>
    %5 = vector.shape_cast %4 : vector<1x16xf32> to vector<1x1x16xf32>
    %c0_4 = arith.constant 0 : index
    %c0_5 = arith.constant 0 : index
    %c0_6 = arith.constant 0 : index
    %6 = vector.load %arg4[%c0_4, %c0_5, %c0_6] : memref<1x1x16xf32, #tpu.memory_space<vmem>>, vector<1x1x16xf32>
    tpu.vector_store %arg4[%c0_4, %c0_5, %c0_6], %5 {strides = array<i32>} : memref<1x1x16xf32, #tpu.memory_space<vmem>>, vector<1x1x16xf32>,
    %7 = arith.mulf %2, %2 : vector<512x16xf32>
    %cst_7 = arith.constant dense<0.000000e+00> : vector<16xf32>
    %8 = vector.multi_reduction <add>, %7, %cst_7 [0] : vector<512x16xf32> to vector<16xf32>
    %9 = vector.shape_cast %8 : vector<16xf32> to vector<1x16xf32>
    %10 = vector.shape_cast %9 : vector<1x16xf32> to vector<1x1x16xf32>
    %c0_8 = arith.constant 0 : index
    %c0_9 = arith.constant 0 : index
    %c0_10 = arith.constant 0 : index
    %11 = vector.load %arg5[%c0_8, %c0_9, %c0_10] : memref<1x1x16xf32, #tpu.memory_space<vmem>>, vector<1x1x16xf32>
    tpu.vector_store %arg5[%c0_8, %c0_9, %c0_10], %10 {strides = array<i32>} : memref<1x1x16xf32, #tpu.memory_space<vmem>>, vector<1x1x16xf32>,
    %12 = arith.truncf %2 : vector<512x16xf32> to vector<512x16xbf16>
    %c0_11 = arith.constant 0 : index
    %c0_12 = arith.constant 0 : index
    %13 = vector.load %arg3[%c0_11, %c0_12] : memref<512x16xbf16, #tpu.memory_space<vmem>>, vector<512x16xbf16>
    tpu.vector_store %arg3[%c0_11, %c0_12], %12 {strides = array<i32>} : memref<512x16xbf16, #tpu.memory_space<vmem>>, vector<512x16xbf16>,
    return
  }
  func.func @transform_0(%arg0: i32) -> (i32, i32) {
    %c0_i32 = arith.constant 0 : i32
    %c0_i32_0 = arith.constant 0 : i32
    return %arg0, %c0_i32 : i32, i32
  }
  func.func @transform_1(%arg0: i32) -> (i32, i32) {
    %c0_i32 = arith.constant 0 : i32
    %c0_i32_0 = arith.constant 0 : i32
    %c0_i32_1 = arith.constant 0 : i32
    return %c0_i32, %c0_i32_0 : i32, i32
  }
  func.func @transform_2(%arg0: i32) -> (i32, i32) {
    %c0_i32 = arith.constant 0 : i32
    %c0_i32_0 = arith.constant 0 : i32
    return %arg0, %c0_i32 : i32, i32
  }
  func.func @transform_3(%arg0: i32) -> (i32, i32, i32) {
    %c0_i32 = arith.constant 0 : i32
    %c0_i32_0 = arith.constant 0 : i32
    %c0_i32_1 = arith.constant 0 : i32
    return %arg0, %c0_i32, %c0_i32_0 : i32, i32, i32
  }
  func.func @transform_4(%arg0: i32) -> (i32, i32, i32) {
    %c0_i32 = arith.constant 0 : i32
    %c0_i32_0 = arith.constant 0 : i32
    %c0_i32_1 = arith.constant 0 : i32
    return %arg0, %c0_i32, %c0_i32_0 : i32, i32, i32
  }
}

module attributes {stable_mosaic.version = 11 : i64} {
  func.func @_bn_leaky_kernel(%arg0: i32, %arg1: memref<512x16xbf16, #tpu.memory_space<vmem>>, %arg2: memref<1x16xf32, #tpu.memory_space<vmem>>, %arg3: memref<1x16xf32, #tpu.memory_space<vmem>>, %arg4: memref<512x16xbf16, #tpu.memory_space<vmem>>) attributes {dimension_semantics = [#tpu.dimension_semantics<parallel>], iteration_bounds = array<i64: 1>, scalar_prefetch = 0 : i64, scratch_operands = 0 : i64, tpu.core_type = #tpu.core_type<tc>, window_params = [{transform_indices = @transform_0, window_bounds = array<i64: 512, 16>}, {pipeline_mode = #tpu.pipeline_mode<synchronous>, transform_indices = @transform_1, window_bounds = array<i64: 1, 16>}, {pipeline_mode = #tpu.pipeline_mode<synchronous>, transform_indices = @transform_2, window_bounds = array<i64: 1, 16>}, {transform_indices = @transform_3, window_bounds = array<i64: 512, 16>}]} {
    %c0 = arith.constant 0 : index
    %c0_0 = arith.constant 0 : index
    %0 = vector.load %arg1[%c0, %c0_0] : memref<512x16xbf16, #tpu.memory_space<vmem>>, vector<512x16xbf16>
    %1 = arith.extf %0 : vector<512x16xbf16> to vector<512x16xf32>
    %c0_1 = arith.constant 0 : index
    %c0_2 = arith.constant 0 : index
    %2 = vector.load %arg2[%c0_1, %c0_2] : memref<1x16xf32, #tpu.memory_space<vmem>>, vector<1x16xf32>
    %3 = vector.broadcast %2 : vector<1x16xf32> to vector<512x16xf32>
    %4 = arith.mulf %1, %3 : vector<512x16xf32>
    %c0_3 = arith.constant 0 : index
    %c0_4 = arith.constant 0 : index
    %5 = vector.load %arg3[%c0_3, %c0_4] : memref<1x16xf32, #tpu.memory_space<vmem>>, vector<1x16xf32>
    %6 = vector.broadcast %5 : vector<1x16xf32> to vector<512x16xf32>
    %7 = arith.addf %4, %6 : vector<512x16xf32>
    %cst = arith.constant 0.000000e+00 : f32
    %8 = vector.broadcast %cst : f32 to vector<512x16xf32>
    %9 = arith.cmpf oge, %7, %8 : vector<512x16xf32>
    %cst_5 = arith.constant 2.000000e-01 : f32
    %10 = vector.broadcast %cst_5 : f32 to vector<512x16xf32>
    %11 = arith.mulf %10, %7 : vector<512x16xf32>
    %12 = arith.select %9, %7, %11 : vector<512x16xi1>, vector<512x16xf32>
    %13 = arith.truncf %12 : vector<512x16xf32> to vector<512x16xbf16>
    %c0_6 = arith.constant 0 : index
    %c0_7 = arith.constant 0 : index
    %14 = vector.load %arg4[%c0_6, %c0_7] : memref<512x16xbf16, #tpu.memory_space<vmem>>, vector<512x16xbf16>
    tpu.vector_store %arg4[%c0_6, %c0_7], %13 {strides = array<i32>} : memref<512x16xbf16, #tpu.memory_space<vmem>>, vector<512x16xbf16>,
    return
  }
  func.func @transform_0(%arg0: i32) -> (i32, i32) {
    %c0_i32 = arith.constant 0 : i32
    %c0_i32_0 = arith.constant 0 : i32
    return %arg0, %c0_i32 : i32, i32
  }
  func.func @transform_1(%arg0: i32) -> (i32, i32) {
    %c0_i32 = arith.constant 0 : i32
    %c0_i32_0 = arith.constant 0 : i32
    %c0_i32_1 = arith.constant 0 : i32
    return %c0_i32, %c0_i32_0 : i32, i32
  }
  func.func @transform_2(%arg0: i32) -> (i32, i32) {
    %c0_i32 = arith.constant 0 : i32
    %c0_i32_0 = arith.constant 0 : i32
    %c0_i32_1 = arith.constant 0 : i32
    return %c0_i32, %c0_i32_0 : i32, i32
  }
  func.func @transform_3(%arg0: i32) -> (i32, i32) {
    %c0_i32 = arith.constant 0 : i32
    %c0_i32_0 = arith.constant 0 : i32
    return %arg0, %c0_i32 : i32, i32
  }
}

module attributes {stable_mosaic.version = 11 : i64} {
  func.func @kernel(%arg0: i32, %arg1: memref<128x256xbf16, #tpu.memory_space<vmem>>, %arg2: memref<256x32xbf16, #tpu.memory_space<vmem>>, %arg3: memref<128x32xbf16, #tpu.memory_space<vmem>>, %arg4: memref<1x1x32xf32, #tpu.memory_space<vmem>>, %arg5: memref<1x1x32xf32, #tpu.memory_space<vmem>>) attributes {dimension_semantics = [#tpu.dimension_semantics<parallel>], iteration_bounds = array<i64: 1>, scalar_prefetch = 0 : i64, scratch_operands = 0 : i64, tpu.core_type = #tpu.core_type<tc>, window_params = [{transform_indices = @transform_0, window_bounds = array<i64: 128, 256>}, {pipeline_mode = #tpu.pipeline_mode<synchronous>, transform_indices = @transform_1, window_bounds = array<i64: 256, 32>}, {transform_indices = @transform_2, window_bounds = array<i64: 128, 32>}, {transform_indices = @transform_3, window_bounds = array<i64: 1, 1, 32>}, {transform_indices = @transform_4, window_bounds = array<i64: 1, 1, 32>}]} {
    %c0 = arith.constant 0 : index
    %c0_0 = arith.constant 0 : index
    %0 = vector.load %arg1[%c0, %c0_0] : memref<128x256xbf16, #tpu.memory_space<vmem>>, vector<128x256xbf16>
    %c0_1 = arith.constant 0 : index
    %c0_2 = arith.constant 0 : index
    %1 = vector.load %arg2[%c0_1, %c0_2] : memref<256x32xbf16, #tpu.memory_space<vmem>>, vector<256x32xbf16>
    %cst = arith.constant dense<0.000000e+00> : vector<128x32xf32>
    %2 = tpu.matmul %0, %1, %cst {dimension_numbers = #tpu.dot_dimension_numbers<[1], [0], [0], [1], [0, 0, 1, 1], [], []>} : vector<128x256xbf16>, vector<256x32xbf16>, vector<128x32xf32> -> vector<128x32xf32>
    %cst_3 = arith.constant dense<0.000000e+00> : vector<32xf32>
    %3 = vector.multi_reduction <add>, %2, %cst_3 [0] : vector<128x32xf32> to vector<32xf32>
    %4 = vector.shape_cast %3 : vector<32xf32> to vector<1x32xf32>
    %5 = vector.shape_cast %4 : vector<1x32xf32> to vector<1x1x32xf32>
    %c0_4 = arith.constant 0 : index
    %c0_5 = arith.constant 0 : index
    %c0_6 = arith.constant 0 : index
    %6 = vector.load %arg4[%c0_4, %c0_5, %c0_6] : memref<1x1x32xf32, #tpu.memory_space<vmem>>, vector<1x1x32xf32>
    tpu.vector_store %arg4[%c0_4, %c0_5, %c0_6], %5 {strides = array<i32>} : memref<1x1x32xf32, #tpu.memory_space<vmem>>, vector<1x1x32xf32>,
    %7 = arith.mulf %2, %2 : vector<128x32xf32>
    %cst_7 = arith.constant dense<0.000000e+00> : vector<32xf32>
    %8 = vector.multi_reduction <add>, %7, %cst_7 [0] : vector<128x32xf32> to vector<32xf32>
    %9 = vector.shape_cast %8 : vector<32xf32> to vector<1x32xf32>
    %10 = vector.shape_cast %9 : vector<1x32xf32> to vector<1x1x32xf32>
    %c0_8 = arith.constant 0 : index
    %c0_9 = arith.constant 0 : index
    %c0_10 = arith.constant 0 : index
    %11 = vector.load %arg5[%c0_8, %c0_9, %c0_10] : memref<1x1x32xf32, #tpu.memory_space<vmem>>, vector<1x1x32xf32>
    tpu.vector_store %arg5[%c0_8, %c0_9, %c0_10], %10 {strides = array<i32>} : memref<1x1x32xf32, #tpu.memory_space<vmem>>, vector<1x1x32xf32>,
    %12 = arith.truncf %2 : vector<128x32xf32> to vector<128x32xbf16>
    %c0_11 = arith.constant 0 : index
    %c0_12 = arith.constant 0 : index
    %13 = vector.load %arg3[%c0_11, %c0_12] : memref<128x32xbf16, #tpu.memory_space<vmem>>, vector<128x32xbf16>
    tpu.vector_store %arg3[%c0_11, %c0_12], %12 {strides = array<i32>} : memref<128x32xbf16, #tpu.memory_space<vmem>>, vector<128x32xbf16>,
    return
  }
  func.func @transform_0(%arg0: i32) -> (i32, i32) {
    %c0_i32 = arith.constant 0 : i32
    %c0_i32_0 = arith.constant 0 : i32
    return %arg0, %c0_i32 : i32, i32
  }
  func.func @transform_1(%arg0: i32) -> (i32, i32) {
    %c0_i32 = arith.constant 0 : i32
    %c0_i32_0 = arith.constant 0 : i32
    %c0_i32_1 = arith.constant 0 : i32
    return %c0_i32, %c0_i32_0 : i32, i32
  }
  func.func @transform_2(%arg0: i32) -> (i32, i32) {
    %c0_i32 = arith.constant 0 : i32
    %c0_i32_0 = arith.constant 0 : i32
    return %arg0, %c0_i32 : i32, i32
  }
  func.func @transform_3(%arg0: i32) -> (i32, i32, i32) {
    %c0_i32 = arith.constant 0 : i32
    %c0_i32_0 = arith.constant 0 : i32
    %c0_i32_1 = arith.constant 0 : i32
    return %arg0, %c0_i32, %c0_i32_0 : i32, i32, i32
  }
  func.func @transform_4(%arg0: i32) -> (i32, i32, i32) {
    %c0_i32 = arith.constant 0 : i32
    %c0_i32_0 = arith.constant 0 : i32
    %c0_i32_1 = arith.constant 0 : i32
    return %arg0, %c0_i32, %c0_i32_0 : i32, i32, i32
  }
}

module attributes {stable_mosaic.version = 11 : i64} {
  func.func @_bn_leaky_kernel(%arg0: i32, %arg1: memref<128x32xbf16, #tpu.memory_space<vmem>>, %arg2: memref<1x32xf32, #tpu.memory_space<vmem>>, %arg3: memref<1x32xf32, #tpu.memory_space<vmem>>, %arg4: memref<128x32xbf16, #tpu.memory_space<vmem>>) attributes {dimension_semantics = [#tpu.dimension_semantics<parallel>], iteration_bounds = array<i64: 1>, scalar_prefetch = 0 : i64, scratch_operands = 0 : i64, tpu.core_type = #tpu.core_type<tc>, window_params = [{transform_indices = @transform_0, window_bounds = array<i64: 128, 32>}, {pipeline_mode = #tpu.pipeline_mode<synchronous>, transform_indices = @transform_1, window_bounds = array<i64: 1, 32>}, {pipeline_mode = #tpu.pipeline_mode<synchronous>, transform_indices = @transform_2, window_bounds = array<i64: 1, 32>}, {transform_indices = @transform_3, window_bounds = array<i64: 128, 32>}]} {
    %c0 = arith.constant 0 : index
    %c0_0 = arith.constant 0 : index
    %0 = vector.load %arg1[%c0, %c0_0] : memref<128x32xbf16, #tpu.memory_space<vmem>>, vector<128x32xbf16>
    %1 = arith.extf %0 : vector<128x32xbf16> to vector<128x32xf32>
    %c0_1 = arith.constant 0 : index
    %c0_2 = arith.constant 0 : index
    %2 = vector.load %arg2[%c0_1, %c0_2] : memref<1x32xf32, #tpu.memory_space<vmem>>, vector<1x32xf32>
    %3 = vector.broadcast %2 : vector<1x32xf32> to vector<128x32xf32>
    %4 = arith.mulf %1, %3 : vector<128x32xf32>
    %c0_3 = arith.constant 0 : index
    %c0_4 = arith.constant 0 : index
    %5 = vector.load %arg3[%c0_3, %c0_4] : memref<1x32xf32, #tpu.memory_space<vmem>>, vector<1x32xf32>
    %6 = vector.broadcast %5 : vector<1x32xf32> to vector<128x32xf32>
    %7 = arith.addf %4, %6 : vector<128x32xf32>
    %cst = arith.constant 0.000000e+00 : f32
    %8 = vector.broadcast %cst : f32 to vector<128x32xf32>
    %9 = arith.cmpf oge, %7, %8 : vector<128x32xf32>
    %cst_5 = arith.constant 2.000000e-01 : f32
    %10 = vector.broadcast %cst_5 : f32 to vector<128x32xf32>
    %11 = arith.mulf %10, %7 : vector<128x32xf32>
    %12 = arith.select %9, %7, %11 : vector<128x32xi1>, vector<128x32xf32>
    %13 = arith.truncf %12 : vector<128x32xf32> to vector<128x32xbf16>
    %c0_6 = arith.constant 0 : index
    %c0_7 = arith.constant 0 : index
    %14 = vector.load %arg4[%c0_6, %c0_7] : memref<128x32xbf16, #tpu.memory_space<vmem>>, vector<128x32xbf16>
    tpu.vector_store %arg4[%c0_6, %c0_7], %13 {strides = array<i32>} : memref<128x32xbf16, #tpu.memory_space<vmem>>, vector<128x32xbf16>,
    return
  }
  func.func @transform_0(%arg0: i32) -> (i32, i32) {
    %c0_i32 = arith.constant 0 : i32
    %c0_i32_0 = arith.constant 0 : i32
    return %arg0, %c0_i32 : i32, i32
  }
  func.func @transform_1(%arg0: i32) -> (i32, i32) {
    %c0_i32 = arith.constant 0 : i32
    %c0_i32_0 = arith.constant 0 : i32
    %c0_i32_1 = arith.constant 0 : i32
    return %c0_i32, %c0_i32_0 : i32, i32
  }
  func.func @transform_2(%arg0: i32) -> (i32, i32) {
    %c0_i32 = arith.constant 0 : i32
    %c0_i32_0 = arith.constant 0 : i32
    %c0_i32_1 = arith.constant 0 : i32
    return %c0_i32, %c0_i32_0 : i32, i32
  }
  func.func @transform_3(%arg0: i32) -> (i32, i32) {
    %c0_i32 = arith.constant 0 : i32
    %c0_i32_0 = arith.constant 0 : i32
    return %arg0, %c0_i32 : i32, i32
  }
}

module attributes {stable_mosaic.version = 11 : i64} {
  func.func @kernel(%arg0: i32, %arg1: memref<32x512xbf16, #tpu.memory_space<vmem>>, %arg2: memref<512x64xbf16, #tpu.memory_space<vmem>>, %arg3: memref<32x64xbf16, #tpu.memory_space<vmem>>, %arg4: memref<1x1x64xf32, #tpu.memory_space<vmem>>, %arg5: memref<1x1x64xf32, #tpu.memory_space<vmem>>) attributes {dimension_semantics = [#tpu.dimension_semantics<parallel>], iteration_bounds = array<i64: 1>, scalar_prefetch = 0 : i64, scratch_operands = 0 : i64, tpu.core_type = #tpu.core_type<tc>, window_params = [{transform_indices = @transform_0, window_bounds = array<i64: 32, 512>}, {pipeline_mode = #tpu.pipeline_mode<synchronous>, transform_indices = @transform_1, window_bounds = array<i64: 512, 64>}, {transform_indices = @transform_2, window_bounds = array<i64: 32, 64>}, {transform_indices = @transform_3, window_bounds = array<i64: 1, 1, 64>}, {transform_indices = @transform_4, window_bounds = array<i64: 1, 1, 64>}]} {
    %c0 = arith.constant 0 : index
    %c0_0 = arith.constant 0 : index
    %0 = vector.load %arg1[%c0, %c0_0] : memref<32x512xbf16, #tpu.memory_space<vmem>>, vector<32x512xbf16>
    %c0_1 = arith.constant 0 : index
    %c0_2 = arith.constant 0 : index
    %1 = vector.load %arg2[%c0_1, %c0_2] : memref<512x64xbf16, #tpu.memory_space<vmem>>, vector<512x64xbf16>
    %cst = arith.constant dense<0.000000e+00> : vector<32x64xf32>
    %2 = tpu.matmul %0, %1, %cst {dimension_numbers = #tpu.dot_dimension_numbers<[1], [0], [0], [1], [0, 0, 1, 1], [], []>} : vector<32x512xbf16>, vector<512x64xbf16>, vector<32x64xf32> -> vector<32x64xf32>
    %cst_3 = arith.constant dense<0.000000e+00> : vector<64xf32>
    %3 = vector.multi_reduction <add>, %2, %cst_3 [0] : vector<32x64xf32> to vector<64xf32>
    %4 = vector.shape_cast %3 : vector<64xf32> to vector<1x64xf32>
    %5 = vector.shape_cast %4 : vector<1x64xf32> to vector<1x1x64xf32>
    %c0_4 = arith.constant 0 : index
    %c0_5 = arith.constant 0 : index
    %c0_6 = arith.constant 0 : index
    %6 = vector.load %arg4[%c0_4, %c0_5, %c0_6] : memref<1x1x64xf32, #tpu.memory_space<vmem>>, vector<1x1x64xf32>
    tpu.vector_store %arg4[%c0_4, %c0_5, %c0_6], %5 {strides = array<i32>} : memref<1x1x64xf32, #tpu.memory_space<vmem>>, vector<1x1x64xf32>,
    %7 = arith.mulf %2, %2 : vector<32x64xf32>
    %cst_7 = arith.constant dense<0.000000e+00> : vector<64xf32>
    %8 = vector.multi_reduction <add>, %7, %cst_7 [0] : vector<32x64xf32> to vector<64xf32>
    %9 = vector.shape_cast %8 : vector<64xf32> to vector<1x64xf32>
    %10 = vector.shape_cast %9 : vector<1x64xf32> to vector<1x1x64xf32>
    %c0_8 = arith.constant 0 : index
    %c0_9 = arith.constant 0 : index
    %c0_10 = arith.constant 0 : index
    %11 = vector.load %arg5[%c0_8, %c0_9, %c0_10] : memref<1x1x64xf32, #tpu.memory_space<vmem>>, vector<1x1x64xf32>
    tpu.vector_store %arg5[%c0_8, %c0_9, %c0_10], %10 {strides = array<i32>} : memref<1x1x64xf32, #tpu.memory_space<vmem>>, vector<1x1x64xf32>,
    %12 = arith.truncf %2 : vector<32x64xf32> to vector<32x64xbf16>
    %c0_11 = arith.constant 0 : index
    %c0_12 = arith.constant 0 : index
    %13 = vector.load %arg3[%c0_11, %c0_12] : memref<32x64xbf16, #tpu.memory_space<vmem>>, vector<32x64xbf16>
    tpu.vector_store %arg3[%c0_11, %c0_12], %12 {strides = array<i32>} : memref<32x64xbf16, #tpu.memory_space<vmem>>, vector<32x64xbf16>,
    return
  }
  func.func @transform_0(%arg0: i32) -> (i32, i32) {
    %c0_i32 = arith.constant 0 : i32
    %c0_i32_0 = arith.constant 0 : i32
    return %arg0, %c0_i32 : i32, i32
  }
  func.func @transform_1(%arg0: i32) -> (i32, i32) {
    %c0_i32 = arith.constant 0 : i32
    %c0_i32_0 = arith.constant 0 : i32
    %c0_i32_1 = arith.constant 0 : i32
    return %c0_i32, %c0_i32_0 : i32, i32
  }
  func.func @transform_2(%arg0: i32) -> (i32, i32) {
    %c0_i32 = arith.constant 0 : i32
    %c0_i32_0 = arith.constant 0 : i32
    return %arg0, %c0_i32 : i32, i32
  }
  func.func @transform_3(%arg0: i32) -> (i32, i32, i32) {
    %c0_i32 = arith.constant 0 : i32
    %c0_i32_0 = arith.constant 0 : i32
    %c0_i32_1 = arith.constant 0 : i32
    return %arg0, %c0_i32, %c0_i32_0 : i32, i32, i32
  }
  func.func @transform_4(%arg0: i32) -> (i32, i32, i32) {
    %c0_i32 = arith.constant 0 : i32
    %c0_i32_0 = arith.constant 0 : i32
    %c0_i32_1 = arith.constant 0 : i32
    return %arg0, %c0_i32, %c0_i32_0 : i32, i32, i32
  }
}

module attributes {stable_mosaic.version = 11 : i64} {
  func.func @_bn_leaky_kernel(%arg0: i32, %arg1: memref<32x64xbf16, #tpu.memory_space<vmem>>, %arg2: memref<1x64xf32, #tpu.memory_space<vmem>>, %arg3: memref<1x64xf32, #tpu.memory_space<vmem>>, %arg4: memref<32x64xbf16, #tpu.memory_space<vmem>>) attributes {dimension_semantics = [#tpu.dimension_semantics<parallel>], iteration_bounds = array<i64: 1>, scalar_prefetch = 0 : i64, scratch_operands = 0 : i64, tpu.core_type = #tpu.core_type<tc>, window_params = [{transform_indices = @transform_0, window_bounds = array<i64: 32, 64>}, {pipeline_mode = #tpu.pipeline_mode<synchronous>, transform_indices = @transform_1, window_bounds = array<i64: 1, 64>}, {pipeline_mode = #tpu.pipeline_mode<synchronous>, transform_indices = @transform_2, window_bounds = array<i64: 1, 64>}, {transform_indices = @transform_3, window_bounds = array<i64: 32, 64>}]} {
    %c0 = arith.constant 0 : index
    %c0_0 = arith.constant 0 : index
    %0 = vector.load %arg1[%c0, %c0_0] : memref<32x64xbf16, #tpu.memory_space<vmem>>, vector<32x64xbf16>
    %1 = arith.extf %0 : vector<32x64xbf16> to vector<32x64xf32>
    %c0_1 = arith.constant 0 : index
    %c0_2 = arith.constant 0 : index
    %2 = vector.load %arg2[%c0_1, %c0_2] : memref<1x64xf32, #tpu.memory_space<vmem>>, vector<1x64xf32>
    %3 = vector.broadcast %2 : vector<1x64xf32> to vector<32x64xf32>
    %4 = arith.mulf %1, %3 : vector<32x64xf32>
    %c0_3 = arith.constant 0 : index
    %c0_4 = arith.constant 0 : index
    %5 = vector.load %arg3[%c0_3, %c0_4] : memref<1x64xf32, #tpu.memory_space<vmem>>, vector<1x64xf32>
    %6 = vector.broadcast %5 : vector<1x64xf32> to vector<32x64xf32>
    %7 = arith.addf %4, %6 : vector<32x64xf32>
    %cst = arith.constant 0.000000e+00 : f32
    %8 = vector.broadcast %cst : f32 to vector<32x64xf32>
    %9 = arith.cmpf oge, %7, %8 : vector<32x64xf32>
    %cst_5 = arith.constant 2.000000e-01 : f32
    %10 = vector.broadcast %cst_5 : f32 to vector<32x64xf32>
    %11 = arith.mulf %10, %7 : vector<32x64xf32>
    %12 = arith.select %9, %7, %11 : vector<32x64xi1>, vector<32x64xf32>
    %13 = arith.truncf %12 : vector<32x64xf32> to vector<32x64xbf16>
    %c0_6 = arith.constant 0 : index
    %c0_7 = arith.constant 0 : index
    %14 = vector.load %arg4[%c0_6, %c0_7] : memref<32x64xbf16, #tpu.memory_space<vmem>>, vector<32x64xbf16>
    tpu.vector_store %arg4[%c0_6, %c0_7], %13 {strides = array<i32>} : memref<32x64xbf16, #tpu.memory_space<vmem>>, vector<32x64xbf16>,
    return
  }
  func.func @transform_0(%arg0: i32) -> (i32, i32) {
    %c0_i32 = arith.constant 0 : i32
    %c0_i32_0 = arith.constant 0 : i32
    return %arg0, %c0_i32 : i32, i32
  }
  func.func @transform_1(%arg0: i32) -> (i32, i32) {
    %c0_i32 = arith.constant 0 : i32
    %c0_i32_0 = arith.constant 0 : i32
    %c0_i32_1 = arith.constant 0 : i32
    return %c0_i32, %c0_i32_0 : i32, i32
  }
  func.func @transform_2(%arg0: i32) -> (i32, i32) {
    %c0_i32 = arith.constant 0 : i32
    %c0_i32_0 = arith.constant 0 : i32
    %c0_i32_1 = arith.constant 0 : i32
    return %c0_i32, %c0_i32_0 : i32, i32
  }
  func.func @transform_3(%arg0: i32) -> (i32, i32) {
    %c0_i32 = arith.constant 0 : i32
    %c0_i32_0 = arith.constant 0 : i32
    return %arg0, %c0_i32 : i32, i32
  }
}

module attributes {stable_mosaic.version = 11 : i64} {
  func.func @kernel(%arg0: i32, %arg1: memref<2x1024xbf16, #tpu.memory_space<vmem>>, %arg2: memref<1024x128xbf16, #tpu.memory_space<vmem>>, %arg3: memref<2x128xf32, #tpu.memory_space<vmem>>) attributes {dimension_semantics = [#tpu.dimension_semantics<parallel>], iteration_bounds = array<i64: 1>, scalar_prefetch = 0 : i64, scratch_operands = 0 : i64, tpu.core_type = #tpu.core_type<tc>, window_params = [{transform_indices = @transform_0, window_bounds = array<i64: 2, 1024>}, {pipeline_mode = #tpu.pipeline_mode<synchronous>, transform_indices = @transform_1, window_bounds = array<i64: 1024, 128>}, {transform_indices = @transform_2, window_bounds = array<i64: 2, 128>}]} {
    %c0 = arith.constant 0 : index
    %c0_0 = arith.constant 0 : index
    %0 = vector.load %arg1[%c0, %c0_0] : memref<2x1024xbf16, #tpu.memory_space<vmem>>, vector<2x1024xbf16>
    %c0_1 = arith.constant 0 : index
    %c0_2 = arith.constant 0 : index
    %1 = vector.load %arg2[%c0_1, %c0_2] : memref<1024x128xbf16, #tpu.memory_space<vmem>>, vector<1024x128xbf16>
    %cst = arith.constant dense<0.000000e+00> : vector<2x128xf32>
    %2 = tpu.matmul %0, %1, %cst {dimension_numbers = #tpu.dot_dimension_numbers<[1], [0], [0], [1], [0, 0, 1, 1], [], []>} : vector<2x1024xbf16>, vector<1024x128xbf16>, vector<2x128xf32> -> vector<2x128xf32>
    %3 = arith.negf %2 : vector<2x128xf32>
    %4 = math.exp %3 : vector<2x128xf32>
    %cst_3 = arith.constant 1.000000e+00 : f32
    %5 = vector.broadcast %cst_3 : f32 to vector<2x128xf32>
    %6 = arith.addf %5, %4 : vector<2x128xf32>
    %7 = arith.divf %5, %6 : vector<2x128xf32>
    %c0_4 = arith.constant 0 : index
    %c0_5 = arith.constant 0 : index
    %8 = vector.load %arg3[%c0_4, %c0_5] : memref<2x128xf32, #tpu.memory_space<vmem>>, vector<2x128xf32>
    tpu.vector_store %arg3[%c0_4, %c0_5], %7 {strides = array<i32>} : memref<2x128xf32, #tpu.memory_space<vmem>>, vector<2x128xf32>,
    return
  }
  func.func @transform_0(%arg0: i32) -> (i32, i32) {
    %c0_i32 = arith.constant 0 : i32
    %c0_i32_0 = arith.constant 0 : i32
    return %arg0, %c0_i32 : i32, i32
  }
  func.func @transform_1(%arg0: i32) -> (i32, i32) {
    %c0_i32 = arith.constant 0 : i32
    %c0_i32_0 = arith.constant 0 : i32
    %c0_i32_1 = arith.constant 0 : i32
    return %c0_i32, %c0_i32_0 : i32, i32
  }
  func.func @transform_2(%arg0: i32) -> (i32, i32) {
    %c0_i32 = arith.constant 0 : i32
    %c0_i32_0 = arith.constant 0 : i32
    return %arg0, %c0_i32 : i32, i32
  }
}

</mosaic_0001>

<bundles_post_ra>
// kernel: _lambda_.8
= control target key start
LH: loop header
LB: loop body
LE: loop exit
PB: predicated region body
PF: predicated region fallthrough
CT: control target
= control target key end

     0   :  { %vm932_vm0 = vcmask 392192   ;;  %vm2990_vm3 = vcmask 60416   ;;  %s5603_s1 = inlined_call_operand.vmem [shape: bf16[48,8], index: 1, kind: input, shape index: {}]   ;;  %s5604_s0 = inlined_call_operand.vmem [shape: bf16[2048,48], index: 0, kind: input, shape index: {}]   ;;  %s5605_s2 = inlined_call_operand.vmem [shape: bf16[2048,8], index: 2, kind: output, shape index: {}]  }
   0x1   :  { %v4033_v0 = vld [vmem:[%s5603_s1 + $0x10] sm:$0xff]  ;;  %v4032_v1 = vld [vmem:[%s5603_s1 + $0x8] sm:$0xff]  ;;  %v4031_v2 = vld [vmem:[%s5603_s1] sm:$0xff] }
   0x2   :  { %1322 = vmatpush.bf16.msra.mxu0 %v4033_v0  ;;  %4034 = vmatpush.bf16.msra.mxu1 %v4033_v0  ;;  %v3903_v3 = vld [vmem:[%s5604_s0] sm:$0xff]  ;;  %v3904_v7 = vld [vmem:[%s5604_s0 + $0x8] sm:$0xff]  ;;  %v3905_v11 = vld [vmem:[%s5604_s0 + $0x10] sm:$0xff] }
   0x3   :  { %4035 = vmatpush.bf16.msra.mxu2 %v4033_v0  ;;  %4036 = vmatpush.bf16.msra.mxu3 %v4033_v0  ;;  %v3935_v4 = vld [vmem:[%s5604_s0 + $0x100] sm:$0xff]  ;;  %v3936_v8 = vld [vmem:[%s5604_s0 + $0x108] sm:$0xff]  ;;  %v3937_v12 = vld [vmem:[%s5604_s0 + $0x110] sm:$0xff] }
   0x4   :  { %v3967_v5 = vld [vmem:[%s5604_s0 + $0x200] sm:$0xff]  ;;  %v3968_v9 = vld [vmem:[%s5604_s0 + $0x208] sm:$0xff]  ;;  %v3969_v13 = vld [vmem:[%s5604_s0 + $0x210] sm:$0xff] }
   0x5   :  { %v3999_v6 = vld [vmem:[%s5604_s0 + $0x300] sm:$0xff]  ;;  %v4000_v10 = vld [vmem:[%s5604_s0 + $0x308] sm:$0xff]  ;;  %v4001_v14 = vld [vmem:[%s5604_s0 + $0x310] sm:$0xff] }
   0x6   :  { %1323 = vmatpush.bf16.msra.mxu0 %v4032_v1  ;;  %4037 = vmatpush.bf16.msra.mxu1 %v4032_v1  ;;  %v3906_v15 = vld [vmem:[%s5604_s0 + $0x18] sm:$0xff]  ;;  %v3907_v19 = vld [vmem:[%s5604_s0 + $0x20] sm:$0xff]  ;;  %v3908_v23 = vld [vmem:[%s5604_s0 + $0x28] sm:$0xff] }
   0x7   :  { %4038 = vmatpush.bf16.msra.mxu2 %v4032_v1  ;;  %4039 = vmatpush.bf16.msra.mxu3 %v4032_v1  ;;  %v3938_v16 = vld [vmem:[%s5604_s0 + $0x118] sm:$0xff]  ;;  %v3939_v20 = vld [vmem:[%s5604_s0 + $0x120] sm:$0xff]  ;;  %v3940_v24 = vld [vmem:[%s5604_s0 + $0x128] sm:$0xff] }
   0x8   :  { %v3970_v17 = vld [vmem:[%s5604_s0 + $0x218] sm:$0xff]  ;;  %v3971_v21 = vld [vmem:[%s5604_s0 + $0x220] sm:$0xff]  ;;  %v3972_v25 = vld [vmem:[%s5604_s0 + $0x228] sm:$0xff] }
   0x9   :  { %v4002_v18 = vld [vmem:[%s5604_s0 + $0x318] sm:$0xff]  ;;  %v4003_v22 = vld [vmem:[%s5604_s0 + $0x320] sm:$0xff]  ;;  %v4004_v26 = vld [vmem:[%s5604_s0 + $0x328] sm:$0xff] }
   0xa   :  { %1324 = vmatpush.bf16.msra.mxu0 %v4031_v2  ;;  %4040 = vmatpush.bf16.msra.mxu1 %v4031_v2  ;;  %v3909_v27 = vld [vmem:[%s5604_s0 + $0x30] sm:$0xff]  ;;  %v3910_v31 = vld [vmem:[%s5604_s0 + $0x38] sm:$0xff]  ;;  %v3911_v35 = vld [vmem:[%s5604_s0 + $0x40] sm:$0xff] }
   0xb   :  { %4041 = vmatpush.bf16.msra.mxu2 %v4031_v2  ;;  %4042 = vmatpush.bf16.msra.mxu3 %v4031_v2  ;;  %v3941_v28 = vld [vmem:[%s5604_s0 + $0x130] sm:$0xff]  ;;  %v3942_v32 = vld [vmem:[%s5604_s0 + $0x138] sm:$0xff]  ;;  %v3943_v36 = vld [vmem:[%s5604_s0 + $0x140] sm:$0xff] }
   0xc   :  { %v3973_v29 = vld [vmem:[%s5604_s0 + $0x230] sm:$0xff]  ;;  %v3974_v33 = vld [vmem:[%s5604_s0 + $0x238] sm:$0xff]  ;;  %v3975_v39 = vld [vmem:[%s5604_s0 + $0x240] sm:$0xff] }
   0xd   :  { %3775 = vmatmul.msk.bf16.vlgmr.msra.gmra.mxu0 %vm932_vm0, %v3903_v3  ;;  %3807 = vmatmul.msk.bf16.vlgmr.msra.gmra.mxu1 %vm932_vm0, %v3935_v4  ;;  %v4005_v30 = vld [vmem:[%s5604_s0 + $0x330] sm:$0xff]  ;;  %v4006_v34 = vld [vmem:[%s5604_s0 + $0x338] sm:$0xff]  ;;  %v4007_v40 = vld [vmem:[%s5604_s0 + $0x340] sm:$0xff] }
   0xe   :  { %3839 = vmatmul.msk.bf16.vlgmr.msra.gmra.mxu2 %vm932_vm0, %v3967_v5  ;;  %3871 = vmatmul.msk.bf16.vlgmr.msra.gmra.mxu3 %vm932_vm0, %v3999_v6  ;;  %v3912_v63 = vld [vmem:[%s5604_s0 + $0x48] sm:$0xff] }
   0xf   :  { %v3944_v2 = vld [vmem:[%s5604_s0 + $0x148] sm:$0xff] }
  0x10   :  { %v3976_v3 = vld [vmem:[%s5604_s0 + $0x248] sm:$0xff] }
  0x11   :  { %v4008_v4 = vld [vmem:[%s5604_s0 + $0x348] sm:$0xff] }
  0x1d   :  { %3776 = vmatmul.msk.bf16.gmra.mxu0 %vm932_vm0, %v3904_v7  ;;  %3808 = vmatmul.msk.bf16.gmra.mxu1 %vm932_vm0, %v3936_v8 }
  0x1e   :  { %3840 = vmatmul.msk.bf16.gmra.mxu2 %vm932_vm0, %v3968_v9  ;;  %3872 = vmatmul.msk.bf16.gmra.mxu3 %vm932_vm0, %v4000_v10 }
  0x2d   :  { %3777 = vmatmul.msk.bf16.gmra.mxu0 %vm932_vm0, %v3905_v11  ;;  %3809 = vmatmul.msk.bf16.gmra.mxu1 %vm932_vm0, %v3937_v12 }
  0x2e   :  { %3841 = vmatmul.msk.bf16.gmra.mxu2 %vm932_vm0, %v3969_v13  ;;  %3873 = vmatmul.msk.bf16.gmra.mxu3 %vm932_vm0, %v4001_v14 }
  0x3d   :  { %3778 = vmatmul.msk.bf16.gmra.mxu0 %vm932_vm0, %v3906_v15  ;;  %3810 = vmatmul.msk.bf16.gmra.mxu1 %vm932_vm0, %v3938_v16 }
  0x3e   :  { %3842 = vmatmul.msk.bf16.gmra.mxu2 %vm932_vm0, %v3970_v17  ;;  %3874 = vmatmul.msk.bf16.gmra.mxu3 %vm932_vm0, %v4002_v18 }
  0x4d   :  { %3779 = vmatmul.msk.bf16.gmra.mxu0 %vm932_vm0, %v3907_v19  ;;  %3811 = vmatmul.msk.bf16.gmra.mxu1 %vm932_vm0, %v3939_v20 }
  0x4e   :  { %3843 = vmatmul.msk.bf16.gmra.mxu2 %vm932_vm0, %v3971_v21  ;;  %3875 = vmatmul.msk.bf16.gmra.mxu3 %vm932_vm0, %v4003_v22 }
  0x5d   :  { %3780 = vmatmul.msk.bf16.gmra.mxu0 %vm932_vm0, %v3908_v23  ;;  %3812 = vmatmul.msk.bf16.gmra.mxu1 %vm932_vm0, %v3940_v24 }
  0x5e   :  { %3844 = vmatmul.msk.bf16.gmra.mxu2 %vm932_vm0, %v3972_v25  ;;  %3876 = vmatmul.msk.bf16.gmra.mxu3 %vm932_vm0, %v4004_v26 }
  0x6d   :  { %3781 = vmatmul.msk.bf16.gmra.mxu0 %vm932_vm0, %v3909_v27  ;;  %3813 = vmatmul.msk.bf16.gmra.mxu1 %vm932_vm0, %v3941_v28 }
  0x6e   :  { %3845 = vmatmul.msk.bf16.gmra.mxu2 %vm932_vm0, %v3973_v29  ;;  %3877 = vmatmul.msk.bf16.gmra.mxu3 %vm932_vm0, %v4005_v30 }
  0x7d   :  { %3782 = vmatmul.msk.bf16.gmra.mxu0 %vm932_vm0, %v3910_v31  ;;  %3814 = vmatmul.msk.bf16.gmra.mxu1 %vm932_vm0, %v3942_v32 }
  0x7e   :  { %3846 = vmatmul.msk.bf16.gmra.mxu2 %vm932_vm0, %v3974_v33  ;;  %3878 = vmatmul.msk.bf16.gmra.mxu3 %vm932_vm0, %v4006_v34 }
  0x8a   :  { %v1326_v37 = vpop.f32.mrf.mxu0  ;;  %v1486_v38 = vpop.f32.mrf.mxu1 }
  0x8b   :  { %vm1966_vm1 = vcmp.ge.f32.partialorder %v1326_v37, 0.0  ;;  %v2222_v41 = vmul.f32 0.2, %v1326_v37  ;;  %vm2030_vm2 = vcmp.ge.f32.partialorder %v1486_v38, 0.0  ;;  %v2286_v42 = vmul.f32 0.2, %v1486_v38 }
  0x8d   :  { %v2478_v43 = vsel %vm1966_vm1, %v1326_v37, %v2222_v41  ;;  %v2542_v44 = vsel %vm2030_vm2, %v1486_v38, %v2286_v42  ;;  %3783 = vmatmul.msk.bf16.gmra.mxu0 %vm932_vm0, %v3911_v35  ;;  %3815 = vmatmul.msk.bf16.gmra.mxu1 %vm932_vm0, %v3943_v36  ;;  %v3913_v35 = vld [vmem:[%s5604_s0 + $0x50] sm:$0xff] }
  0x8e   :  { %v2734_v45 = vpack.c.bf16 %v2478_v43, %v2478_v43  ;;  %v2798_v46 = vpack.c.bf16 %v2542_v44, %v2542_v44  ;;  %3847 = vmatmul.msk.bf16.gmra.mxu2 %vm932_vm0, %v3975_v39  ;;  %3879 = vmatmul.msk.bf16.gmra.mxu3 %vm932_vm0, %v4007_v40  ;;  %v3945_v38 = vld [vmem:[%s5604_s0 + $0x150] sm:$0xff] }
  0x8f   :  { %v3977_v39 = vld [vmem:[%s5604_s0 + $0x250] sm:$0xff] }
  0x90   :  { %2991 = vst.msk [vmem:[%s5605_s2] sm:$0xf] %vm2990_vm3, %v2734_v45  ;;  %v4009_v40 = vld [vmem:[%s5604_s0 + $0x350] sm:$0xff] }
  0x91   :  { %3055 = vst.msk [vmem:[%s5605_s2 + $0x100] sm:$0xf] %vm2990_vm3, %v2798_v46  ;;  %v1646_v47 = vpop.f32.mrf.mxu2  ;;  %v1806_v48 = vpop.f32.mrf.mxu3 }
  0x92   :  { %vm2094_vm4 = vcmp.ge.f32.partialorder %v1646_v47, 0.0  ;;  %v2350_v49 = vmul.f32 0.2, %v1646_v47  ;;  %vm2158_vm5 = vcmp.ge.f32.partialorder %v1806_v48, 0.0  ;;  %v2414_v50 = vmul.f32 0.2, %v1806_v48  ;;  %v1328_v51 = vpop.f32.mrf.mxu0  ;;  %v1488_v52 = vpop.f32.mrf.mxu1 }
  0x93   :  { %vm1967_vm6 = vcmp.ge.f32.partialorder %v1328_v51, 0.0  ;;  %v2223_v53 = vmul.f32 0.2, %v1328_v51  ;;  %vm2031_vm7 = vcmp.ge.f32.partialorder %v1488_v52, 0.0  ;;  %v2287_v54 = vmul.f32 0.2, %v1488_v52 }
  0x94   :  { %v2606_v55 = vsel %vm2094_vm4, %v1646_v47, %v2350_v49  ;;  %v2670_v56 = vsel %vm2158_vm5, %v1806_v48, %v2414_v50 }
  0x95   :  { %v2862_v57 = vpack.c.bf16 %v2606_v55, %v2606_v55  ;;  %v2926_v58 = vpack.c.bf16 %v2670_v56, %v2670_v56  ;;  %v2479_v59 = vsel %vm1967_vm6, %v1328_v51, %v2223_v53  ;;  %v2543_v60 = vsel %vm2031_vm7, %v1488_v52, %v2287_v54 }
  0x96   :  { %v2735_v61 = vpack.c.bf16 %v2479_v59, %v2479_v59  ;;  %v2799_v62 = vpack.c.bf16 %v2543_v60, %v2543_v60 }
  0x97   :  { %3119 = vst.msk [vmem:[%s5605_s2 + $0x200] sm:$0xf] %vm2990_vm3, %v2862_v57 }
  0x98   :  { %3183 = vst.msk [vmem:[%s5605_s2 + $0x300] sm:$0xf] %vm2990_vm3, %v2926_v58 }
  0x99   :  { %2992 = vst.msk [vmem:[%s5605_s2 + $0x4] sm:$0xf] %vm2990_vm3, %v2735_v61  ;;  %v1648_v0 = vpop.f32.mrf.mxu2  ;;  %v1808_v1 = vpop.f32.mrf.mxu3 }
  0x9a   :  { %3056 = vst.msk [vmem:[%s5605_s2 + $0x104] sm:$0xf] %vm2990_vm3, %v2799_v62  ;;  %vm2095_vm8 = vcmp.ge.f32.partialorder %v1648_v0, 0.0  ;;  %v2351_v5 = vmul.f32 0.2, %v1648_v0  ;;  %vm2159_vm9 = vcmp.ge.f32.partialorder %v1808_v1, 0.0  ;;  %v1331_v6 = vpop.f32.mrf.mxu0  ;;  %v1491_v7 = vpop.f32.mrf.mxu1 }
  0x9b   :  { %v2415_v8 = vmul.f32 0.2, %v1808_v1  ;;  %vm1968_vm10 = vcmp.ge.f32.partialorder %v1331_v6, 0.0  ;;  %v2224_v9 = vmul.f32 0.2, %v1331_v6  ;;  %vm2032_vm11 = vcmp.ge.f32.partialorder %v1491_v7, 0.0 }
  0x9c   :  { %v2607_v10 = vsel %vm2095_vm8, %v1648_v0, %v2351_v5  ;;  %v2288_v11 = vmul.f32 0.2, %v1491_v7 }
  0x9d   :  { %v2863_v12 = vpack.c.bf16 %v2607_v10, %v2607_v10  ;;  %v2671_v13 = vsel %vm2159_vm9, %v1808_v1, %v2415_v8  ;;  %v2480_v14 = vsel %vm1968_vm10, %v1331_v6, %v2224_v9  ;;  %3784 = vmatmul.msk.bf16.gmra.mxu0 %vm932_vm0, %v3912_v63  ;;  %3816 = vmatmul.msk.bf16.gmra.mxu1 %vm932_vm0, %v3944_v2  ;;  %v3946_v10 = vld [vmem:[%s5604_s0 + $0x158] sm:$0xff] }
  0x9e   :  { %v2927_v15 = vpack.c.bf16 %v2671_v13, %v2671_v13  ;;  %v2736_v16 = vpack.c.bf16 %v2480_v14, %v2480_v14  ;;  %v2544_v17 = vsel %vm2032_vm11, %v1491_v7, %v2288_v11  ;;  %3848 = vmatmul.msk.bf16.gmra.mxu2 %vm932_vm0, %v3976_v3  ;;  %3880 = vmatmul.msk.bf16.gmra.mxu3 %vm932_vm0, %v4008_v4  ;;  %v3914_v7 = vld [vmem:[%s5604_s0 + $0x58] sm:$0xff] }
  0x9f   :  { %3120 = vst.msk [vmem:[%s5605_s2 + $0x204] sm:$0xf] %vm2990_vm3, %v2863_v12  ;;  %v2800_v18 = vpack.c.bf16 %v2544_v17, %v2544_v17  ;;  %v3978_v11 = vld [vmem:[%s5604_s0 + $0x258] sm:$0xff] }
  0xa0   :  { %3184 = vst.msk [vmem:[%s5605_s2 + $0x304] sm:$0xf] %vm2990_vm3, %v2927_v15  ;;  %v4010_v12 = vld [vmem:[%s5604_s0 + $0x358] sm:$0xff] }
  0xa1   :  { %2993 = vst.msk [vmem:[%s5605_s2 + $0x8] sm:$0xf] %vm2990_vm3, %v2736_v16  ;;  %v1651_v19 = vpop.f32.mrf.mxu2  ;;  %v1811_v20 = vpop.f32.mrf.mxu3 }
  0xa2   :  { %3057 = vst.msk [vmem:[%s5605_s2 + $0x108] sm:$0xf] %vm2990_vm3, %v2800_v18  ;;  %vm2096_vm12 = vcmp.ge.f32.partialorder %v1651_v19, 0.0  ;;  %v2352_v21 = vmul.f32 0.2, %v1651_v19  ;;  %vm2160_vm13 = vcmp.ge.f32.partialorder %v1811_v20, 0.0  ;;  %v1333_v22 = vpop.f32.mrf.mxu0  ;;  %v1493_v23 = vpop.f32.mrf.mxu1 }
  0xa3   :  { %v2416_v24 = vmul.f32 0.2, %v1811_v20  ;;  %vm1969_vm14 = vcmp.ge.f32.partialorder %v1333_v22, 0.0  ;;  %v2225_v25 = vmul.f32 0.2, %v1333_v22  ;;  %vm2033_vm15 = vcmp.ge.f32.partialorder %v1493_v23, 0.0 }
  0xa4   :  { %v2608_v26 = vsel %vm2096_vm12, %v1651_v19, %v2352_v21  ;;  %v2289_v27 = vmul.f32 0.2, %v1493_v23 }
  0xa5   :  { %v2864_v28 = vpack.c.bf16 %v2608_v26, %v2608_v26  ;;  %v2672_v29 = vsel %vm2160_vm13, %v1811_v20, %v2416_v24  ;;  %v2481_v30 = vsel %vm1969_vm14, %v1333_v22, %v2225_v25 }
  0xa6   :  { %v2928_v31 = vpack.c.bf16 %v2672_v29, %v2672_v29  ;;  %v2737_v32 = vpack.c.bf16 %v2481_v30, %v2481_v30  ;;  %v2545_v33 = vsel %vm2033_vm15, %v1493_v23, %v2289_v27 }
  0xa7   :  { %3121 = vst.msk [vmem:[%s5605_s2 + $0x208] sm:$0xf] %vm2990_vm3, %v2864_v28  ;;  %v2801_v34 = vpack.c.bf16 %v2545_v33, %v2545_v33 }
  0xa8   :  { %3185 = vst.msk [vmem:[%s5605_s2 + $0x308] sm:$0xf] %vm2990_vm3, %v2928_v31 }
  0xa9   :  { %2994 = vst.msk [vmem:[%s5605_s2 + $0xc] sm:$0xf] %vm2990_vm3, %v2737_v32  ;;  %v1653_v36 = vpop.f32.mrf.mxu2  ;;  %v1813_v37 = vpop.f32.mrf.mxu3 }
  0xaa   :  { %3058 = vst.msk [vmem:[%s5605_s2 + $0x10c] sm:$0xf] %vm2990_vm3, %v2801_v34  ;;  %vm2097_vm1 = vcmp.ge.f32.partialorder %v1653_v36, 0.0  ;;  %v2353_v41 = vmul.f32 0.2, %v1653_v36  ;;  %vm2161_vm2 = vcmp.ge.f32.partialorder %v1813_v37, 0.0  ;;  %v1336_v42 = vpop.f32.mrf.mxu0  ;;  %v1496_v43 = vpop.f32.mrf.mxu1 }
  0xab   :  { %v2417_v44 = vmul.f32 0.2, %v1813_v37  ;;  %vm1970_vm4 = vcmp.ge.f32.partialorder %v1336_v42, 0.0  ;;  %v2226_v45 = vmul.f32 0.2, %v1336_v42  ;;  %vm2034_vm5 = vcmp.ge.f32.partialorder %v1496_v43, 0.0 }
  0xac   :  { %v2609_v46 = vsel %vm2097_vm1, %v1653_v36, %v2353_v41  ;;  %v2290_v47 = vmul.f32 0.2, %v1496_v43 }
  0xad   :  { %v2865_v48 = vpack.c.bf16 %v2609_v46, %v2609_v46  ;;  %v2673_v49 = vsel %vm2161_vm2, %v1813_v37, %v2417_v44  ;;  %v2482_v50 = vsel %vm1970_vm4, %v1336_v42, %v2226_v45  ;;  %3785 = vmatmul.msk.bf16.gmra.mxu0 %vm932_vm0, %v3913_v35  ;;  %3817 = vmatmul.msk.bf16.gmra.mxu1 %vm932_vm0, %v3945_v38  ;;  %v3947_v46 = vld [vmem:[%s5604_s0 + $0x160] sm:$0xff] }
  0xae   :  { %v2929_v51 = vpack.c.bf16 %v2673_v49, %v2673_v49  ;;  %v2738_v52 = vpack.c.bf16 %v2482_v50, %v2482_v50  ;;  %v2546_v53 = vsel %vm2034_vm5, %v1496_v43, %v2290_v47  ;;  %3849 = vmatmul.msk.bf16.gmra.mxu2 %vm932_vm0, %v3977_v39  ;;  %3881 = vmatmul.msk.bf16.gmra.mxu3 %vm932_vm0, %v4009_v40  ;;  %v3915_v43 = vld [vmem:[%s5604_s0 + $0x60] sm:$0xff] }
  0xaf   :  { %3122 = vst.msk [vmem:[%s5605_s2 + $0x20c] sm:$0xf] %vm2990_vm3, %v2865_v48  ;;  %v2802_v54 = vpack.c.bf16 %v2546_v53, %v2546_v53  ;;  %v3979_v47 = vld [vmem:[%s5604_s0 + $0x260] sm:$0xff] }
  0xb0   :  { %3186 = vst.msk [vmem:[%s5605_s2 + $0x30c] sm:$0xf] %vm2990_vm3, %v2929_v51  ;;  %v4011_v48 = vld [vmem:[%s5604_s0 + $0x360] sm:$0xff] }
  0xb1   :  { %2995 = vst.msk [vmem:[%s5605_s2 + $0x10] sm:$0xf] %vm2990_vm3, %v2738_v52  ;;  %v1656_v55 = vpop.f32.mrf.mxu2  ;;  %v1816_v56 = vpop.f32.mrf.mxu3 }
  0xb2   :  { %3059 = vst.msk [vmem:[%s5605_s2 + $0x110] sm:$0xf] %vm2990_vm3, %v2802_v54  ;;  %vm2098_vm6 = vcmp.ge.f32.partialorder %v1656_v55, 0.0  ;;  %v2354_v57 = vmul.f32 0.2, %v1656_v55  ;;  %vm2162_vm7 = vcmp.ge.f32.partialorder %v1816_v56, 0.0  ;;  %v1338_v58 = vpop.f32.mrf.mxu0  ;;  %v1498_v59 = vpop.f32.mrf.mxu1 }
  0xb3   :  { %v2418_v60 = vmul.f32 0.2, %v1816_v56  ;;  %vm1971_vm8 = vcmp.ge.f32.partialorder %v1338_v58, 0.0  ;;  %v2227_v61 = vmul.f32 0.2, %v1338_v58  ;;  %vm2035_vm9 = vcmp.ge.f32.partialorder %v1498_v59, 0.0 }
  0xb4   :  { %v2610_v62 = vsel %vm2098_vm6, %v1656_v55, %v2354_v57  ;;  %v2291_v63 = vmul.f32 0.2, %v1498_v59 }
  0xb5   :  { %v2866_v0 = vpack.c.bf16 %v2610_v62, %v2610_v62  ;;  %v2674_v1 = vsel %vm2162_vm7, %v1816_v56, %v2418_v60  ;;  %v2483_v2 = vsel %vm1971_vm8, %v1338_v58, %v2227_v61 }
  0xb6   :  { %v2930_v3 = vpack.c.bf16 %v2674_v1, %v2674_v1  ;;  %v2739_v4 = vpack.c.bf16 %v2483_v2, %v2483_v2  ;;  %v2547_v5 = vsel %vm2035_vm9, %v1498_v59, %v2291_v63 }
  0xb7   :  { %3123 = vst.msk [vmem:[%s5605_s2 + $0x210] sm:$0xf] %vm2990_vm3, %v2866_v0  ;;  %v2803_v6 = vpack.c.bf16 %v2547_v5, %v2547_v5 }
  0xb8   :  { %3187 = vst.msk [vmem:[%s5605_s2 + $0x310] sm:$0xf] %vm2990_vm3, %v2930_v3 }
  0xb9   :  { %2996 = vst.msk [vmem:[%s5605_s2 + $0x14] sm:$0xf] %vm2990_vm3, %v2739_v4  ;;  %v1658_v8 = vpop.f32.mrf.mxu2  ;;  %v1818_v9 = vpop.f32.mrf.mxu3 }
  0xba   :  { %3060 = vst.msk [vmem:[%s5605_s2 + $0x114] sm:$0xf] %vm2990_vm3, %v2803_v6  ;;  %vm2099_vm10 = vcmp.ge.f32.partialorder %v1658_v8, 0.0  ;;  %v2355_v13 = vmul.f32 0.2, %v1658_v8  ;;  %vm2163_vm11 = vcmp.ge.f32.partialorder %v1818_v9, 0.0  ;;  %v1341_v14 = vpop.f32.mrf.mxu0  ;;  %v1501_v15 = vpop.f32.mrf.mxu1 }
  0xbb   :  { %v2419_v16 = vmul.f32 0.2, %v1818_v9  ;;  %vm1972_vm12 = vcmp.ge.f32.partialorder %v1341_v14, 0.0  ;;  %v2228_v17 = vmul.f32 0.2, %v1341_v14  ;;  %vm2036_vm13 = vcmp.ge.f32.partialorder %v1501_v15, 0.0 }
  0xbc   :  { %v2611_v18 = vsel %vm2099_vm10, %v1658_v8, %v2355_v13  ;;  %v2292_v19 = vmul.f32 0.2, %v1501_v15 }
  0xbd   :  { %v2867_v20 = vpack.c.bf16 %v2611_v18, %v2611_v18  ;;  %v2675_v21 = vsel %vm2163_vm11, %v1818_v9, %v2419_v16  ;;  %v2484_v22 = vsel %vm1972_vm12, %v1341_v14, %v2228_v17  ;;  %3786 = vmatmul.msk.bf16.gmra.mxu0 %vm932_vm0, %v3914_v7  ;;  %3818 = vmatmul.msk.bf16.gmra.mxu1 %vm932_vm0, %v3946_v10  ;;  %v3948_v18 = vld [vmem:[%s5604_s0 + $0x168] sm:$0xff] }
  0xbe   :  { %v2931_v23 = vpack.c.bf16 %v2675_v21, %v2675_v21  ;;  %v2740_v24 = vpack.c.bf16 %v2484_v22, %v2484_v22  ;;  %v2548_v25 = vsel %vm2036_vm13, %v1501_v15, %v2292_v19  ;;  %3850 = vmatmul.msk.bf16.gmra.mxu2 %vm932_vm0, %v3978_v11  ;;  %3882 = vmatmul.msk.bf16.gmra.mxu3 %vm932_vm0, %v4010_v12  ;;  %v3916_v15 = vld [vmem:[%s5604_s0 + $0x68] sm:$0xff] }
  0xbf   :  { %3124 = vst.msk [vmem:[%s5605_s2 + $0x214] sm:$0xf] %vm2990_vm3, %v2867_v20  ;;  %v2804_v26 = vpack.c.bf16 %v2548_v25, %v2548_v25  ;;  %v3980_v19 = vld [vmem:[%s5604_s0 + $0x268] sm:$0xff] }
  0xc0   :  { %3188 = vst.msk [vmem:[%s5605_s2 + $0x314] sm:$0xf] %vm2990_vm3, %v2931_v23  ;;  %v4012_v20 = vld [vmem:[%s5604_s0 + $0x368] sm:$0xff] }
  0xc1   :  { %2997 = vst.msk [vmem:[%s5605_s2 + $0x18] sm:$0xf] %vm2990_vm3, %v2740_v24  ;;  %v1661_v27 = vpop.f32.mrf.mxu2  ;;  %v1821_v28 = vpop.f32.mrf.mxu3 }
  0xc2   :  { %3061 = vst.msk [vmem:[%s5605_s2 + $0x118] sm:$0xf] %vm2990_vm3, %v2804_v26  ;;  %vm2100_vm14 = vcmp.ge.f32.partialorder %v1661_v27, 0.0  ;;  %v2356_v29 = vmul.f32 0.2, %v1661_v27  ;;  %vm2164_vm15 = vcmp.ge.f32.partialorder %v1821_v28, 0.0  ;;  %v1343_v30 = vpop.f32.mrf.mxu0  ;;  %v1503_v31 = vpop.f32.mrf.mxu1 }
  0xc3   :  { %v2420_v32 = vmul.f32 0.2, %v1821_v28  ;;  %vm1973_vm1 = vcmp.ge.f32.partialorder %v1343_v30, 0.0  ;;  %v2229_v33 = vmul.f32 0.2, %v1343_v30  ;;  %vm2037_vm2 = vcmp.ge.f32.partialorder %v1503_v31, 0.0 }
  0xc4   :  { %v2612_v34 = vsel %vm2100_vm14, %v1661_v27, %v2356_v29  ;;  %v2293_v35 = vmul.f32 0.2, %v1503_v31 }
  0xc5   :  { %v2868_v36 = vpack.c.bf16 %v2612_v34, %v2612_v34  ;;  %v2676_v37 = vsel %vm2164_vm15, %v1821_v28, %v2420_v32  ;;  %v2485_v38 = vsel %vm1973_vm1, %v1343_v30, %v2229_v33 }
  0xc6   :  { %v2932_v39 = vpack.c.bf16 %v2676_v37, %v2676_v37  ;;  %v2741_v40 = vpack.c.bf16 %v2485_v38, %v2485_v38  ;;  %v2549_v41 = vsel %vm2037_vm2, %v1503_v31, %v2293_v35 }
  0xc7   :  { %3125 = vst.msk [vmem:[%s5605_s2 + $0x218] sm:$0xf] %vm2990_vm3, %v2868_v36  ;;  %v2805_v42 = vpack.c.bf16 %v2549_v41, %v2549_v41 }
  0xc8   :  { %3189 = vst.msk [vmem:[%s5605_s2 + $0x318] sm:$0xf] %vm2990_vm3, %v2932_v39 }
  0xc9   :  { %2998 = vst.msk [vmem:[%s5605_s2 + $0x1c] sm:$0xf] %vm2990_vm3, %v2741_v40  ;;  %v1663_v44 = vpop.f32.mrf.mxu2  ;;  %v1823_v45 = vpop.f32.mrf.mxu3 }
  0xca   :  { %3062 = vst.msk [vmem:[%s5605_s2 + $0x11c] sm:$0xf] %vm2990_vm3, %v2805_v42  ;;  %vm2101_vm4 = vcmp.ge.f32.partialorder %v1663_v44, 0.0  ;;  %v2357_v49 = vmul.f32 0.2, %v1663_v44  ;;  %vm2165_vm5 = vcmp.ge.f32.partialorder %v1823_v45, 0.0  ;;  %v1346_v50 = vpop.f32.mrf.mxu0  ;;  %v1506_v51 = vpop.f32.mrf.mxu1 }
  0xcb   :  { %v2421_v52 = vmul.f32 0.2, %v1823_v45  ;;  %vm1974_vm6 = vcmp.ge.f32.partialorder %v1346_v50, 0.0  ;;  %v2230_v53 = vmul.f32 0.2, %v1346_v50  ;;  %vm2038_vm7 = vcmp.ge.f32.partialorder %v1506_v51, 0.0 }
  0xcc   :  { %v2613_v54 = vsel %vm2101_vm4, %v1663_v44, %v2357_v49  ;;  %v2294_v55 = vmul.f32 0.2, %v1506_v51 }
  0xcd   :  { %v2869_v56 = vpack.c.bf16 %v2613_v54, %v2613_v54  ;;  %v2677_v57 = vsel %vm2165_vm5, %v1823_v45, %v2421_v52  ;;  %v2486_v58 = vsel %vm1974_vm6, %v1346_v50, %v2230_v53  ;;  %3787 = vmatmul.msk.bf16.gmra.mxu0 %vm932_vm0, %v3915_v43  ;;  %3819 = vmatmul.msk.bf16.gmra.mxu1 %vm932_vm0, %v3947_v46  ;;  %v3949_v54 = vld [vmem:[%s5604_s0 + $0x170] sm:$0xff] }
  0xce   :  { %v2933_v59 = vpack.c.bf16 %v2677_v57, %v2677_v57  ;;  %v2742_v60 = vpack.c.bf16 %v2486_v58, %v2486_v58  ;;  %v2550_v61 = vsel %vm2038_vm7, %v1506_v51, %v2294_v55  ;;  %3851 = vmatmul.msk.bf16.gmra.mxu2 %vm932_vm0, %v3979_v47  ;;  %3883 = vmatmul.msk.bf16.gmra.mxu3 %vm932_vm0, %v4011_v48  ;;  %v3917_v51 = vld [vmem:[%s5604_s0 + $0x70] sm:$0xff] }
  0xcf   :  { %3126 = vst.msk [vmem:[%s5605_s2 + $0x21c] sm:$0xf] %vm2990_vm3, %v2869_v56  ;;  %v2806_v62 = vpack.c.bf16 %v2550_v61, %v2550_v61  ;;  %v3981_v55 = vld [vmem:[%s5604_s0 + $0x270] sm:$0xff] }
  0xd0   :  { %3190 = vst.msk [vmem:[%s5605_s2 + $0x31c] sm:$0xf] %vm2990_vm3, %v2933_v59  ;;  %v4013_v56 = vld [vmem:[%s5604_s0 + $0x370] sm:$0xff] }
  0xd1   :  { %2999 = vst.msk [vmem:[%s5605_s2 + $0x20] sm:$0xf] %vm2990_vm3, %v2742_v60  ;;  %v1666_v63 = vpop.f32.mrf.mxu2  ;;  %v1826_v0 = vpop.f32.mrf.mxu3 }
  0xd2   :  { %3063 = vst.msk [vmem:[%s5605_s2 + $0x120] sm:$0xf] %vm2990_vm3, %v2806_v62  ;;  %vm2102_vm8 = vcmp.ge.f32.partialorder %v1666_v63, 0.0  ;;  %v2358_v1 = vmul.f32 0.2, %v1666_v63  ;;  %vm2166_vm9 = vcmp.ge.f32.partialorder %v1826_v0, 0.0  ;;  %v1348_v2 = vpop.f32.mrf.mxu0  ;;  %v1508_v3 = vpop.f32.mrf.mxu1 }
  0xd3   :  { %v2422_v4 = vmul.f32 0.2, %v1826_v0  ;;  %vm1975_vm10 = vcmp.ge.f32.partialorder %v1348_v2, 0.0  ;;  %v2231_v5 = vmul.f32 0.2, %v1348_v2  ;;  %vm2039_vm11 = vcmp.ge.f32.partialorder %v1508_v3, 0.0 }
  0xd4   :  { %v2614_v6 = vsel %vm2102_vm8, %v1666_v63, %v2358_v1  ;;  %v2295_v7 = vmul.f32 0.2, %v1508_v3 }
  0xd5   :  { %v2870_v8 = vpack.c.bf16 %v2614_v6, %v2614_v6  ;;  %v2678_v9 = vsel %vm2166_vm9, %v1826_v0, %v2422_v4  ;;  %v2487_v10 = vsel %vm1975_vm10, %v1348_v2, %v2231_v5 }
  0xd6   :  { %v2934_v11 = vpack.c.bf16 %v2678_v9, %v2678_v9  ;;  %v2743_v12 = vpack.c.bf16 %v2487_v10, %v2487_v10  ;;  %v2551_v13 = vsel %vm2039_vm11, %v1508_v3, %v2295_v7 }
  0xd7   :  { %3127 = vst.msk [vmem:[%s5605_s2 + $0x220] sm:$0xf] %vm2990_vm3, %v2870_v8  ;;  %v2807_v14 = vpack.c.bf16 %v2551_v13, %v2551_v13 }
  0xd8   :  { %3191 = vst.msk [vmem:[%s5605_s2 + $0x320] sm:$0xf] %vm2990_vm3, %v2934_v11 }
  0xd9   :  { %3000 = vst.msk [vmem:[%s5605_s2 + $0x24] sm:$0xf] %vm2990_vm3, %v2743_v12  ;;  %v1668_v16 = vpop.f32.mrf.mxu2  ;;  %v1828_v17 = vpop.f32.mrf.mxu3 }
  0xda   :  { %3064 = vst.msk [vmem:[%s5605_s2 + $0x124] sm:$0xf] %vm2990_vm3, %v2807_v14  ;;  %vm2103_vm12 = vcmp.ge.f32.partialorder %v1668_v16, 0.0  ;;  %v2359_v21 = vmul.f32 0.2, %v1668_v16  ;;  %vm2167_vm13 = vcmp.ge.f32.partialorder %v1828_v17, 0.0  ;;  %v1351_v22 = vpop.f32.mrf.mxu0  ;;  %v1511_v23 = vpop.f32.mrf.mxu1 }
  0xdb   :  { %v2423_v24 = vmul.f32 0.2, %v1828_v17  ;;  %vm1976_vm14 = vcmp.ge.f32.partialorder %v1351_v22, 0.0  ;;  %v2232_v25 = vmul.f32 0.2, %v1351_v22  ;;  %vm2040_vm15 = vcmp.ge.f32.partialorder %v1511_v23, 0.0 }
  0xdc   :  { %v2615_v26 = vsel %vm2103_vm12, %v1668_v16, %v2359_v21  ;;  %v2296_v27 = vmul.f32 0.2, %v1511_v23 }
  0xdd   :  { %v2871_v28 = vpack.c.bf16 %v2615_v26, %v2615_v26  ;;  %v2679_v29 = vsel %vm2167_vm13, %v1828_v17, %v2423_v24  ;;  %v2488_v30 = vsel %vm1976_vm14, %v1351_v22, %v2232_v25  ;;  %3788 = vmatmul.msk.bf16.gmra.mxu0 %vm932_vm0, %v3916_v15  ;;  %3820 = vmatmul.msk.bf16.gmra.mxu1 %vm932_vm0, %v3948_v18  ;;  %v3950_v26 = vld [vmem:[%s5604_s0 + $0x178] sm:$0xff] }
  0xde   :  { %v2935_v31 = vpack.c.bf16 %v2679_v29, %v2679_v29  ;;  %v2744_v32 = vpack.c.bf16 %v2488_v30, %v2488_v30  ;;  %v2552_v33 = vsel %vm2040_vm15, %v1511_v23, %v2296_v27  ;;  %3852 = vmatmul.msk.bf16.gmra.mxu2 %vm932_vm0, %v3980_v19  ;;  %3884 = vmatmul.msk.bf16.gmra.mxu3 %vm932_vm0, %v4012_v20  ;;  %v3918_v23 = vld [vmem:[%s5604_s0 + $0x78] sm:$0xff] }
  0xdf   :  { %3128 = vst.msk [vmem:[%s5605_s2 + $0x224] sm:$0xf] %vm2990_vm3, %v2871_v28  ;;  %v2808_v34 = vpack.c.bf16 %v2552_v33, %v2552_v33  ;;  %v3982_v27 = vld [vmem:[%s5604_s0 + $0x278] sm:$0xff] }
  0xe0   :  { %3192 = vst.msk [vmem:[%s5605_s2 + $0x324] sm:$0xf] %vm2990_vm3, %v2935_v31  ;;  %v4014_v28 = vld [vmem:[%s5604_s0 + $0x378] sm:$0xff] }
  0xe1   :  { %3001 = vst.msk [vmem:[%s5605_s2 + $0x28] sm:$0xf] %vm2990_vm3, %v2744_v32  ;;  %v1671_v35 = vpop.f32.mrf.mxu2  ;;  %v1831_v36 = vpop.f32.mrf.mxu3 }
  0xe2   :  { %3065 = vst.msk [vmem:[%s5605_s2 + $0x128] sm:$0xf] %vm2990_vm3, %v2808_v34  ;;  %vm2104_vm1 = vcmp.ge.f32.partialorder %v1671_v35, 0.0  ;;  %v2360_v37 = vmul.f32 0.2, %v1671_v35  ;;  %vm2168_vm2 = vcmp.ge.f32.partialorder %v1831_v36, 0.0  ;;  %v1353_v38 = vpop.f32.mrf.mxu0  ;;  %v1513_v39 = vpop.f32.mrf.mxu1 }
  0xe3   :  { %v2424_v40 = vmul.f32 0.2, %v1831_v36  ;;  %vm1977_vm4 = vcmp.ge.f32.partialorder %v1353_v38, 0.0  ;;  %v2233_v41 = vmul.f32 0.2, %v1353_v38  ;;  %vm2041_vm5 = vcmp.ge.f32.partialorder %v1513_v39, 0.0 }
  0xe4   :  { %v2616_v42 = vsel %vm2104_vm1, %v1671_v35, %v2360_v37  ;;  %v2297_v43 = vmul.f32 0.2, %v1513_v39 }
  0xe5   :  { %v2872_v44 = vpack.c.bf16 %v2616_v42, %v2616_v42  ;;  %v2680_v45 = vsel %vm2168_vm2, %v1831_v36, %v2424_v40  ;;  %v2489_v46 = vsel %vm1977_vm4, %v1353_v38, %v2233_v41 }
  0xe6   :  { %v2936_v47 = vpack.c.bf16 %v2680_v45, %v2680_v45  ;;  %v2745_v48 = vpack.c.bf16 %v2489_v46, %v2489_v46  ;;  %v2553_v49 = vsel %vm2041_vm5, %v1513_v39, %v2297_v43 }
  0xe7   :  { %3129 = vst.msk [vmem:[%s5605_s2 + $0x228] sm:$0xf] %vm2990_vm3, %v2872_v44  ;;  %v2809_v50 = vpack.c.bf16 %v2553_v49, %v2553_v49 }
  0xe8   :  { %3193 = vst.msk [vmem:[%s5605_s2 + $0x328] sm:$0xf] %vm2990_vm3, %v2936_v47 }
  0xe9   :  { %3002 = vst.msk [vmem:[%s5605_s2 + $0x2c] sm:$0xf] %vm2990_vm3, %v2745_v48  ;;  %v1673_v52 = vpop.f32.mrf.mxu2  ;;  %v1833_v53 = vpop.f32.mrf.mxu3 }
  0xea   :  { %3066 = vst.msk [vmem:[%s5605_s2 + $0x12c] sm:$0xf] %vm2990_vm3, %v2809_v50  ;;  %vm2105_vm6 = vcmp.ge.f32.partialorder %v1673_v52, 0.0  ;;  %v2361_v57 = vmul.f32 0.2, %v1673_v52  ;;  %vm2169_vm7 = vcmp.ge.f32.partialorder %v1833_v53, 0.0  ;;  %v1356_v58 = vpop.f32.mrf.mxu0  ;;  %v1516_v59 = vpop.f32.mrf.mxu1 }
  0xeb   :  { %v2425_v60 = vmul.f32 0.2, %v1833_v53  ;;  %vm1978_vm8 = vcmp.ge.f32.partialorder %v1356_v58, 0.0  ;;  %v2234_v61 = vmul.f32 0.2, %v1356_v58  ;;  %vm2042_vm9 = vcmp.ge.f32.partialorder %v1516_v59, 0.0 }
  0xec   :  { %v2617_v62 = vsel %vm2105_vm6, %v1673_v52, %v2361_v57  ;;  %v2298_v63 = vmul.f32 0.2, %v1516_v59 }
  0xed   :  { %v2873_v0 = vpack.c.bf16 %v2617_v62, %v2617_v62  ;;  %v2681_v1 = vsel %vm2169_vm7, %v1833_v53, %v2425_v60  ;;  %v2490_v2 = vsel %vm1978_vm8, %v1356_v58, %v2234_v61  ;;  %3789 = vmatmul.msk.bf16.gmra.mxu0 %vm932_vm0, %v3917_v51  ;;  %3821 = vmatmul.msk.bf16.gmra.mxu1 %vm932_vm0, %v3949_v54  ;;  %v3951_v62 = vld [vmem:[%s5604_s0 + $0x180] sm:$0xff] }
  0xee   :  { %v2937_v3 = vpack.c.bf16 %v2681_v1, %v2681_v1  ;;  %v2746_v4 = vpack.c.bf16 %v2490_v2, %v2490_v2  ;;  %v2554_v5 = vsel %vm2042_vm9, %v1516_v59, %v2298_v63  ;;  %3853 = vmatmul.msk.bf16.gmra.mxu2 %vm932_vm0, %v3981_v55  ;;  %3885 = vmatmul.msk.bf16.gmra.mxu3 %vm932_vm0, %v4013_v56  ;;  %v3919_v59 = vld [vmem:[%s5604_s0 + $0x80] sm:$0xff] }
  0xef   :  { %3130 = vst.msk [vmem:[%s5605_s2 + $0x22c] sm:$0xf] %vm2990_vm3, %v2873_v0  ;;  %v2810_v6 = vpack.c.bf16 %v2554_v5, %v2554_v5  ;;  %v3983_v63 = vld [vmem:[%s5604_s0 + $0x280] sm:$0xff] }
  0xf0   :  { %3194 = vst.msk [vmem:[%s5605_s2 + $0x32c] sm:$0xf] %vm2990_vm3, %v2937_v3  ;;  %v4015_v0 = vld [vmem:[%s5604_s0 + $0x380] sm:$0xff] }
  0xf1   :  { %3003 = vst.msk [vmem:[%s5605_s2 + $0x30] sm:$0xf] %vm2990_vm3, %v2746_v4  ;;  %v1676_v7 = vpop.f32.mrf.mxu2  ;;  %v1836_v8 = vpop.f32.mrf.mxu3 }
  0xf2   :  { %3067 = vst.msk [vmem:[%s5605_s2 + $0x130] sm:$0xf] %vm2990_vm3, %v2810_v6  ;;  %vm2106_vm10 = vcmp.ge.f32.partialorder %v1676_v7, 0.0  ;;  %v2362_v9 = vmul.f32 0.2, %v1676_v7  ;;  %vm2170_vm11 = vcmp.ge.f32.partialorder %v1836_v8, 0.0  ;;  %v1358_v10 = vpop.f32.mrf.mxu0  ;;  %v1518_v11 = vpop.f32.mrf.mxu1 }
  0xf3   :  { %v2426_v12 = vmul.f32 0.2, %v1836_v8  ;;  %vm1979_vm12 = vcmp.ge.f32.partialorder %v1358_v10, 0.0  ;;  %v2235_v13 = vmul.f32 0.2, %v1358_v10  ;;  %vm2043_vm13 = vcmp.ge.f32.partialorder %v1518_v11, 0.0 }
  0xf4   :  { %v2618_v14 = vsel %vm2106_vm10, %v1676_v7, %v2362_v9  ;;  %v2299_v15 = vmul.f32 0.2, %v1518_v11 }
  0xf5   :  { %v2874_v16 = vpack.c.bf16 %v2618_v14, %v2618_v14  ;;  %v2682_v17 = vsel %vm2170_vm11, %v1836_v8, %v2426_v12  ;;  %v2491_v18 = vsel %vm1979_vm12, %v1358_v10, %v2235_v13 }
  0xf6   :  { %v2938_v19 = vpack.c.bf16 %v2682_v17, %v2682_v17  ;;  %v2747_v20 = vpack.c.bf16 %v2491_v18, %v2491_v18  ;;  %v2555_v21 = vsel %vm2043_vm13, %v1518_v11, %v2299_v15 }
  0xf7   :  { %3131 = vst.msk [vmem:[%s5605_s2 + $0x230] sm:$0xf] %vm2990_vm3, %v2874_v16  ;;  %v2811_v22 = vpack.c.bf16 %v2555_v21, %v2555_v21 }
  0xf8   :  { %3195 = vst.msk [vmem:[%s5605_s2 + $0x330] sm:$0xf] %vm2990_vm3, %v2938_v19 }
  0xf9   :  { %3004 = vst.msk [vmem:[%s5605_s2 + $0x34] sm:$0xf] %vm2990_vm3, %v2747_v20  ;;  %v1678_v24 = vpop.f32.mrf.mxu2  ;;  %v1838_v25 = vpop.f32.mrf.mxu3 }
  0xfa   :  { %3068 = vst.msk [vmem:[%s5605_s2 + $0x134] sm:$0xf] %vm2990_vm3, %v2811_v22  ;;  %vm2107_vm14 = vcmp.ge.f32.partialorder %v1678_v24, 0.0  ;;  %v2363_v29 = vmul.f32 0.2, %v1678_v24  ;;  %vm2171_vm15 = vcmp.ge.f32.partialorder %v1838_v25, 0.0  ;;  %v1361_v30 = vpop.f32.mrf.mxu0  ;;  %v1521_v31 = vpop.f32.mrf.mxu1 }
  0xfb   :  { %v2427_v32 = vmul.f32 0.2, %v1838_v25  ;;  %vm1980_vm1 = vcmp.ge.f32.partialorder %v1361_v30, 0.0  ;;  %v2236_v33 = vmul.f32 0.2, %v1361_v30  ;;  %vm2044_vm2 = vcmp.ge.f32.partialorder %v1521_v31, 0.0 }
  0xfc   :  { %v2619_v34 = vsel %vm2107_vm14, %v1678_v24, %v2363_v29  ;;  %v2300_v35 = vmul.f32 0.2, %v1521_v31 }
  0xfd   :  { %v2875_v36 = vpack.c.bf16 %v2619_v34, %v2619_v34  ;;  %v2683_v37 = vsel %vm2171_vm15, %v1838_v25, %v2427_v32  ;;  %v2492_v38 = vsel %vm1980_vm1, %v1361_v30, %v2236_v33  ;;  %3790 = vmatmul.msk.bf16.gmra.mxu0 %vm932_vm0, %v3918_v23  ;;  %3822 = vmatmul.msk.bf16.gmra.mxu1 %vm932_vm0, %v3950_v26  ;;  %v3952_v34 = vld [vmem:[%s5604_s0 + $0x188] sm:$0xff] }
  0xfe   :  { %v2939_v39 = vpack.c.bf16 %v2683_v37, %v2683_v37  ;;  %v2748_v40 = vpack.c.bf16 %v2492_v38, %v2492_v38  ;;  %v2556_v41 = vsel %vm2044_vm2, %v1521_v31, %v2300_v35  ;;  %3854 = vmatmul.msk.bf16.gmra.mxu2 %vm932_vm0, %v3982_v27  ;;  %3886 = vmatmul.msk.bf16.gmra.mxu3 %vm932_vm0, %v4014_v28  ;;  %v3920_v31 = vld [vmem:[%s5604_s0 + $0x88] sm:$0xff] }
  0xff   :  { %3132 = vst.msk [vmem:[%s5605_s2 + $0x234] sm:$0xf] %vm2990_vm3, %v2875_v36  ;;  %v2812_v42 = vpack.c.bf16 %v2556_v41, %v2556_v41  ;;  %v3984_v35 = vld [vmem:[%s5604_s0 + $0x288] sm:$0xff] }
 0x100   :  { %3196 = vst.msk [vmem:[%s5605_s2 + $0x334] sm:$0xf] %vm2990_vm3, %v2939_v39  ;;  %v4016_v36 = vld [vmem:[%s5604_s0 + $0x388] sm:$0xff] }
 0x101   :  { %3005 = vst.msk [vmem:[%s5605_s2 + $0x38] sm:$0xf] %vm2990_vm3, %v2748_v40  ;;  %v1681_v43 = vpop.f32.mrf.mxu2  ;;  %v1841_v44 = vpop.f32.mrf.mxu3 }
 0x102   :  { %3069 = vst.msk [vmem:[%s5605_s2 + $0x138] sm:$0xf] %vm2990_vm3, %v2812_v42  ;;  %vm2108_vm4 = vcmp.ge.f32.partialorder %v1681_v43, 0.0  ;;  %v2364_v45 = vmul.f32 0.2, %v1681_v43  ;;  %vm2172_vm5 = vcmp.ge.f32.partialorder %v1841_v44, 0.0  ;;  %v1363_v46 = vpop.f32.mrf.mxu0  ;;  %v1523_v47 = vpop.f32.mrf.mxu1 }
 0x103   :  { %v2428_v48 = vmul.f32 0.2, %v1841_v44  ;;  %vm1981_vm6 = vcmp.ge.f32.partialorder %v1363_v46, 0.0  ;;  %v2237_v49 = vmul.f32 0.2, %v1363_v46  ;;  %vm2045_vm7 = vcmp.ge.f32.partialorder %v1523_v47, 0.0 }
 0x104   :  { %v2620_v50 = vsel %vm2108_vm4, %v1681_v43, %v2364_v45  ;;  %v2301_v51 = vmul.f32 0.2, %v1523_v47 }
 0x105   :  { %v2876_v52 = vpack.c.bf16 %v2620_v50, %v2620_v50  ;;  %v2684_v53 = vsel %vm2172_vm5, %v1841_v44, %v2428_v48  ;;  %v2493_v54 = vsel %vm1981_vm6, %v1363_v46, %v2237_v49 }
 0x106   :  { %v2940_v55 = vpack.c.bf16 %v2684_v53, %v2684_v53  ;;  %v2749_v56 = vpack.c.bf16 %v2493_v54, %v2493_v54  ;;  %v2557_v57 = vsel %vm2045_vm7, %v1523_v47, %v2301_v51 }
 0x107   :  { %3133 = vst.msk [vmem:[%s5605_s2 + $0x238] sm:$0xf] %vm2990_vm3, %v2876_v52  ;;  %v2813_v58 = vpack.c.bf16 %v2557_v57, %v2557_v57 }
 0x108   :  { %3197 = vst.msk [vmem:[%s5605_s2 + $0x338] sm:$0xf] %vm2990_vm3, %v2940_v55 }
 0x109   :  { %3006 = vst.msk [vmem:[%s5605_s2 + $0x3c] sm:$0xf] %vm2990_vm3, %v2749_v56  ;;  %v1683_v60 = vpop.f32.mrf.mxu2  ;;  %v1843_v61 = vpop.f32.mrf.mxu3 }
 0x10a   :  { %3070 = vst.msk [vmem:[%s5605_s2 + $0x13c] sm:$0xf] %vm2990_vm3, %v2813_v58  ;;  %vm2109_vm8 = vcmp.ge.f32.partialorder %v1683_v60, 0.0  ;;  %v2365_v1 = vmul.f32 0.2, %v1683_v60  ;;  %vm2173_vm9 = vcmp.ge.f32.partialorder %v1843_v61, 0.0  ;;  %v1366_v2 = vpop.f32.mrf.mxu0  ;;  %v1526_v3 = vpop.f32.mrf.mxu1 }
 0x10b   :  { %v2429_v4 = vmul.f32 0.2, %v1843_v61  ;;  %vm1982_vm10 = vcmp.ge.f32.partialorder %v1366_v2, 0.0  ;;  %v2238_v5 = vmul.f32 0.2, %v1366_v2  ;;  %vm2046_vm11 = vcmp.ge.f32.partialorder %v1526_v3, 0.0 }
 0x10c   :  { %v2621_v6 = vsel %vm2109_vm8, %v1683_v60, %v2365_v1  ;;  %v2302_v7 = vmul.f32 0.2, %v1526_v3 }
 0x10d   :  { %v2877_v8 = vpack.c.bf16 %v2621_v6, %v2621_v6  ;;  %v2685_v9 = vsel %vm2173_vm9, %v1843_v61, %v2429_v4  ;;  %v2494_v10 = vsel %vm1982_vm10, %v1366_v2, %v2238_v5  ;;  %3791 = vmatmul.msk.bf16.gmra.mxu0 %vm932_vm0, %v3919_v59  ;;  %3823 = vmatmul.msk.bf16.gmra.mxu1 %vm932_vm0, %v3951_v62  ;;  %v3953_v6 = vld [vmem:[%s5604_s0 + $0x190] sm:$0xff] }
 0x10e   :  { %v2941_v11 = vpack.c.bf16 %v2685_v9, %v2685_v9  ;;  %v2750_v12 = vpack.c.bf16 %v2494_v10, %v2494_v10  ;;  %v2558_v13 = vsel %vm2046_vm11, %v1526_v3, %v2302_v7  ;;  %3855 = vmatmul.msk.bf16.gmra.mxu2 %vm932_vm0, %v3983_v63  ;;  %3887 = vmatmul.msk.bf16.gmra.mxu3 %vm932_vm0, %v4015_v0  ;;  %v3921_v3 = vld [vmem:[%s5604_s0 + $0x90] sm:$0xff] }
 0x10f   :  { %3134 = vst.msk [vmem:[%s5605_s2 + $0x23c] sm:$0xf] %vm2990_vm3, %v2877_v8  ;;  %v2814_v14 = vpack.c.bf16 %v2558_v13, %v2558_v13  ;;  %v3985_v7 = vld [vmem:[%s5604_s0 + $0x290] sm:$0xff] }
 0x110   :  { %3198 = vst.msk [vmem:[%s5605_s2 + $0x33c] sm:$0xf] %vm2990_vm3, %v2941_v11  ;;  %v4017_v8 = vld [vmem:[%s5604_s0 + $0x390] sm:$0xff] }
 0x111   :  { %3007 = vst.msk [vmem:[%s5605_s2 + $0x40] sm:$0xf] %vm2990_vm3, %v2750_v12  ;;  %v1686_v15 = vpop.f32.mrf.mxu2  ;;  %v1846_v16 = vpop.f32.mrf.mxu3 }
 0x112   :  { %3071 = vst.msk [vmem:[%s5605_s2 + $0x140] sm:$0xf] %vm2990_vm3, %v2814_v14  ;;  %vm2110_vm12 = vcmp.ge.f32.partialorder %v1686_v15, 0.0  ;;  %v2366_v17 = vmul.f32 0.2, %v1686_v15  ;;  %vm2174_vm13 = vcmp.ge.f32.partialorder %v1846_v16, 0.0  ;;  %v1368_v18 = vpop.f32.mrf.mxu0  ;;  %v1528_v19 = vpop.f32.mrf.mxu1 }
 0x113   :  { %v2430_v20 = vmul.f32 0.2, %v1846_v16  ;;  %vm1983_vm14 = vcmp.ge.f32.partialorder %v1368_v18, 0.0  ;;  %v2239_v21 = vmul.f32 0.2, %v1368_v18  ;;  %vm2047_vm15 = vcmp.ge.f32.partialorder %v1528_v19, 0.0 }
 0x114   :  { %v2622_v22 = vsel %vm2110_vm12, %v1686_v15, %v2366_v17  ;;  %v2303_v23 = vmul.f32 0.2, %v1528_v19 }
 0x115   :  { %v2878_v24 = vpack.c.bf16 %v2622_v22, %v2622_v22  ;;  %v2686_v25 = vsel %vm2174_vm13, %v1846_v16, %v2430_v20  ;;  %v2495_v26 = vsel %vm1983_vm14, %v1368_v18, %v2239_v21 }
 0x116   :  { %v2942_v27 = vpack.c.bf16 %v2686_v25, %v2686_v25  ;;  %v2751_v28 = vpack.c.bf16 %v2495_v26, %v2495_v26  ;;  %v2559_v29 = vsel %vm2047_vm15, %v1528_v19, %v2303_v23 }
 0x117   :  { %3135 = vst.msk [vmem:[%s5605_s2 + $0x240] sm:$0xf] %vm2990_vm3, %v2878_v24  ;;  %v2815_v30 = vpack.c.bf16 %v2559_v29, %v2559_v29 }
 0x118   :  { %3199 = vst.msk [vmem:[%s5605_s2 + $0x340] sm:$0xf] %vm2990_vm3, %v2942_v27 }
 0x119   :  { %3008 = vst.msk [vmem:[%s5605_s2 + $0x44] sm:$0xf] %vm2990_vm3, %v2751_v28  ;;  %v1688_v32 = vpop.f32.mrf.mxu2  ;;  %v1848_v33 = vpop.f32.mrf.mxu3 }
 0x11a   :  { %3072 = vst.msk [vmem:[%s5605_s2 + $0x144] sm:$0xf] %vm2990_vm3, %v2815_v30  ;;  %vm2111_vm1 = vcmp.ge.f32.partialorder %v1688_v32, 0.0  ;;  %v2367_v37 = vmul.f32 0.2, %v1688_v32  ;;  %vm2175_vm2 = vcmp.ge.f32.partialorder %v1848_v33, 0.0  ;;  %v1371_v38 = vpop.f32.mrf.mxu0  ;;  %v1531_v39 = vpop.f32.mrf.mxu1 }
 0x11b   :  { %v2431_v40 = vmul.f32 0.2, %v1848_v33  ;;  %vm1984_vm4 = vcmp.ge.f32.partialorder %v1371_v38, 0.0  ;;  %v2240_v41 = vmul.f32 0.2, %v1371_v38  ;;  %vm2048_vm5 = vcmp.ge.f32.partialorder %v1531_v39, 0.0 }
 0x11c   :  { %v2623_v42 = vsel %vm2111_vm1, %v1688_v32, %v2367_v37  ;;  %v2304_v43 = vmul.f32 0.2, %v1531_v39 }
 0x11d   :  { %v2879_v44 = vpack.c.bf16 %v2623_v42, %v2623_v42  ;;  %v2687_v45 = vsel %vm2175_vm2, %v1848_v33, %v2431_v40  ;;  %v2496_v46 = vsel %vm1984_vm4, %v1371_v38, %v2240_v41  ;;  %3792 = vmatmul.msk.bf16.gmra.mxu0 %vm932_vm0, %v3920_v31  ;;  %3824 = vmatmul.msk.bf16.gmra.mxu1 %vm932_vm0, %v3952_v34  ;;  %v3954_v42 = vld [vmem:[%s5604_s0 + $0x198] sm:$0xff] }
 0x11e   :  { %v2943_v47 = vpack.c.bf16 %v2687_v45, %v2687_v45  ;;  %v2752_v48 = vpack.c.bf16 %v2496_v46, %v2496_v46  ;;  %v2560_v49 = vsel %vm2048_vm5, %v1531_v39, %v2304_v43  ;;  %3856 = vmatmul.msk.bf16.gmra.mxu2 %vm932_vm0, %v3984_v35  ;;  %3888 = vmatmul.msk.bf16.gmra.mxu3 %vm932_vm0, %v4016_v36  ;;  %v3922_v39 = vld [vmem:[%s5604_s0 + $0x98] sm:$0xff] }
 0x11f   :  { %3136 = vst.msk [vmem:[%s5605_s2 + $0x244] sm:$0xf] %vm2990_vm3, %v2879_v44  ;;  %v2816_v50 = vpack.c.bf16 %v2560_v49, %v2560_v49  ;;  %v3986_v43 = vld [vmem:[%s5604_s0 + $0x298] sm:$0xff] }
 0x120   :  { %3200 = vst.msk [vmem:[%s5605_s2 + $0x344] sm:$0xf] %vm2990_vm3, %v2943_v47  ;;  %v4018_v44 = vld [vmem:[%s5604_s0 + $0x398] sm:$0xff] }
 0x121   :  { %3009 = vst.msk [vmem:[%s5605_s2 + $0x48] sm:$0xf] %vm2990_vm3, %v2752_v48  ;;  %v1691_v51 = vpop.f32.mrf.mxu2  ;;  %v1851_v52 = vpop.f32.mrf.mxu3 }
 0x122   :  { %3073 = vst.msk [vmem:[%s5605_s2 + $0x148] sm:$0xf] %vm2990_vm3, %v2816_v50  ;;  %vm2112_vm6 = vcmp.ge.f32.partialorder %v1691_v51, 0.0  ;;  %v2368_v53 = vmul.f32 0.2, %v1691_v51  ;;  %vm2176_vm7 = vcmp.ge.f32.partialorder %v1851_v52, 0.0  ;;  %v1373_v54 = vpop.f32.mrf.mxu0  ;;  %v1533_v55 = vpop.f32.mrf.mxu1 }
 0x123   :  { %v2432_v56 = vmul.f32 0.2, %v1851_v52  ;;  %vm1985_vm8 = vcmp.ge.f32.partialorder %v1373_v54, 0.0  ;;  %v2241_v57 = vmul.f32 0.2, %v1373_v54  ;;  %vm2049_vm9 = vcmp.ge.f32.partialorder %v1533_v55, 0.0 }
 0x124   :  { %v2624_v58 = vsel %vm2112_vm6, %v1691_v51, %v2368_v53  ;;  %v2305_v59 = vmul.f32 0.2, %v1533_v55 }
 0x125   :  { %v2880_v60 = vpack.c.bf16 %v2624_v58, %v2624_v58  ;;  %v2688_v61 = vsel %vm2176_vm7, %v1851_v52, %v2432_v56  ;;  %v2497_v62 = vsel %vm1985_vm8, %v1373_v54, %v2241_v57 }
 0x126   :  { %v2944_v63 = vpack.c.bf16 %v2688_v61, %v2688_v61  ;;  %v2753_v0 = vpack.c.bf16 %v2497_v62, %v2497_v62  ;;  %v2561_v1 = vsel %vm2049_vm9, %v1533_v55, %v2305_v59 }
 0x127   :  { %3137 = vst.msk [vmem:[%s5605_s2 + $0x248] sm:$0xf] %vm2990_vm3, %v2880_v60  ;;  %v2817_v2 = vpack.c.bf16 %v2561_v1, %v2561_v1 }
 0x128   :  { %3201 = vst.msk [vmem:[%s5605_s2 + $0x348] sm:$0xf] %vm2990_vm3, %v2944_v63 }
 0x129   :  { %3010 = vst.msk [vmem:[%s5605_s2 + $0x4c] sm:$0xf] %vm2990_vm3, %v2753_v0  ;;  %v1693_v4 = vpop.f32.mrf.mxu2  ;;  %v1853_v5 = vpop.f32.mrf.mxu3 }
 0x12a   :  { %3074 = vst.msk [vmem:[%s5605_s2 + $0x14c] sm:$0xf] %vm2990_vm3, %v2817_v2  ;;  %vm2113_vm10 = vcmp.ge.f32.partialorder %v1693_v4, 0.0  ;;  %v2369_v9 = vmul.f32 0.2, %v1693_v4  ;;  %vm2177_vm11 = vcmp.ge.f32.partialorder %v1853_v5, 0.0  ;;  %v1376_v10 = vpop.f32.mrf.mxu0  ;;  %v1536_v11 = vpop.f32.mrf.mxu1 }
 0x12b   :  { %v2433_v12 = vmul.f32 0.2, %v1853_v5  ;;  %vm1986_vm12 = vcmp.ge.f32.partialorder %v1376_v10, 0.0  ;;  %v2242_v13 = vmul.f32 0.2, %v1376_v10  ;;  %vm2050_vm13 = vcmp.ge.f32.partialorder %v1536_v11, 0.0 }
 0x12c   :  { %v2625_v14 = vsel %vm2113_vm10, %v1693_v4, %v2369_v9  ;;  %v2306_v15 = vmul.f32 0.2, %v1536_v11 }
 0x12d   :  { %v2881_v16 = vpack.c.bf16 %v2625_v14, %v2625_v14  ;;  %v2689_v17 = vsel %vm2177_vm11, %v1853_v5, %v2433_v12  ;;  %v2498_v18 = vsel %vm1986_vm12, %v1376_v10, %v2242_v13  ;;  %3793 = vmatmul.msk.bf16.gmra.mxu0 %vm932_vm0, %v3921_v3  ;;  %3825 = vmatmul.msk.bf16.gmra.mxu1 %vm932_vm0, %v3953_v6  ;;  %v3955_v14 = vld [vmem:[%s5604_s0 + $0x1a0] sm:$0xff] }
 0x12e   :  { %v2945_v19 = vpack.c.bf16 %v2689_v17, %v2689_v17  ;;  %v2754_v20 = vpack.c.bf16 %v2498_v18, %v2498_v18  ;;  %v2562_v21 = vsel %vm2050_vm13, %v1536_v11, %v2306_v15  ;;  %3857 = vmatmul.msk.bf16.gmra.mxu2 %vm932_vm0, %v3985_v7  ;;  %3889 = vmatmul.msk.bf16.gmra.mxu3 %vm932_vm0, %v4017_v8  ;;  %v3923_v11 = vld [vmem:[%s5604_s0 + $0xa0] sm:$0xff] }
 0x12f   :  { %3138 = vst.msk [vmem:[%s5605_s2 + $0x24c] sm:$0xf] %vm2990_vm3, %v2881_v16  ;;  %v2818_v22 = vpack.c.bf16 %v2562_v21, %v2562_v21  ;;  %v3987_v15 = vld [vmem:[%s5604_s0 + $0x2a0] sm:$0xff] }
 0x130   :  { %3202 = vst.msk [vmem:[%s5605_s2 + $0x34c] sm:$0xf] %vm2990_vm3, %v2945_v19  ;;  %v4019_v16 = vld [vmem:[%s5604_s0 + $0x3a0] sm:$0xff] }
 0x131   :  { %3011 = vst.msk [vmem:[%s5605_s2 + $0x50] sm:$0xf] %vm2990_vm3, %v2754_v20  ;;  %v1696_v23 = vpop.f32.mrf.mxu2  ;;  %v1856_v24 = vpop.f32.mrf.mxu3 }
 0x132   :  { %3075 = vst.msk [vmem:[%s5605_s2 + $0x150] sm:$0xf] %vm2990_vm3, %v2818_v22  ;;  %vm2114_vm14 = vcmp.ge.f32.partialorder %v1696_v23, 0.0  ;;  %v2370_v25 = vmul.f32 0.2, %v1696_v23  ;;  %vm2178_vm15 = vcmp.ge.f32.partialorder %v1856_v24, 0.0  ;;  %v1378_v26 = vpop.f32.mrf.mxu0  ;;  %v1538_v27 = vpop.f32.mrf.mxu1 }
 0x133   :  { %v2434_v28 = vmul.f32 0.2, %v1856_v24  ;;  %vm1987_vm1 = vcmp.ge.f32.partialorder %v1378_v26, 0.0  ;;  %v2243_v29 = vmul.f32 0.2, %v1378_v26  ;;  %vm2051_vm2 = vcmp.ge.f32.partialorder %v1538_v27, 0.0 }
 0x134   :  { %v2626_v30 = vsel %vm2114_vm14, %v1696_v23, %v2370_v25  ;;  %v2307_v31 = vmul.f32 0.2, %v1538_v27 }
 0x135   :  { %v2882_v32 = vpack.c.bf16 %v2626_v30, %v2626_v30  ;;  %v2690_v33 = vsel %vm2178_vm15, %v1856_v24, %v2434_v28  ;;  %v2499_v34 = vsel %vm1987_vm1, %v1378_v26, %v2243_v29 }
 0x136   :  { %v2946_v35 = vpack.c.bf16 %v2690_v33, %v2690_v33  ;;  %v2755_v36 = vpack.c.bf16 %v2499_v34, %v2499_v34  ;;  %v2563_v37 = vsel %vm2051_vm2, %v1538_v27, %v2307_v31 }
 0x137   :  { %3139 = vst.msk [vmem:[%s5605_s2 + $0x250] sm:$0xf] %vm2990_vm3, %v2882_v32  ;;  %v2819_v38 = vpack.c.bf16 %v2563_v37, %v2563_v37 }
 0x138   :  { %3203 = vst.msk [vmem:[%s5605_s2 + $0x350] sm:$0xf] %vm2990_vm3, %v2946_v35 }
 0x139   :  { %3012 = vst.msk [vmem:[%s5605_s2 + $0x54] sm:$0xf] %vm2990_vm3, %v2755_v36  ;;  %v1698_v40 = vpop.f32.mrf.mxu2  ;;  %v1858_v41 = vpop.f32.mrf.mxu3 }
 0x13a   :  { %3076 = vst.msk [vmem:[%s5605_s2 + $0x154] sm:$0xf] %vm2990_vm3, %v2819_v38  ;;  %vm2115_vm4 = vcmp.ge.f32.partialorder %v1698_v40, 0.0  ;;  %v2371_v45 = vmul.f32 0.2, %v1698_v40  ;;  %vm2179_vm5 = vcmp.ge.f32.partialorder %v1858_v41, 0.0  ;;  %v1381_v46 = vpop.f32.mrf.mxu0  ;;  %v1541_v47 = vpop.f32.mrf.mxu1 }
 0x13b   :  { %v2435_v48 = vmul.f32 0.2, %v1858_v41  ;;  %vm1988_vm6 = vcmp.ge.f32.partialorder %v1381_v46, 0.0  ;;  %v2244_v49 = vmul.f32 0.2, %v1381_v46  ;;  %vm2052_vm7 = vcmp.ge.f32.partialorder %v1541_v47, 0.0 }
 0x13c   :  { %v2627_v50 = vsel %vm2115_vm4, %v1698_v40, %v2371_v45  ;;  %v2308_v51 = vmul.f32 0.2, %v1541_v47 }
 0x13d   :  { %v2883_v52 = vpack.c.bf16 %v2627_v50, %v2627_v50  ;;  %v2691_v53 = vsel %vm2179_vm5, %v1858_v41, %v2435_v48  ;;  %v2500_v54 = vsel %vm1988_vm6, %v1381_v46, %v2244_v49  ;;  %3794 = vmatmul.msk.bf16.gmra.mxu0 %vm932_vm0, %v3922_v39  ;;  %3826 = vmatmul.msk.bf16.gmra.mxu1 %vm932_vm0, %v3954_v42  ;;  %v3956_v50 = vld [vmem:[%s5604_s0 + $0x1a8] sm:$0xff] }
 0x13e   :  { %v2947_v55 = vpack.c.bf16 %v2691_v53, %v2691_v53  ;;  %v2756_v56 = vpack.c.bf16 %v2500_v54, %v2500_v54  ;;  %v2564_v57 = vsel %vm2052_vm7, %v1541_v47, %v2308_v51  ;;  %3858 = vmatmul.msk.bf16.gmra.mxu2 %vm932_vm0, %v3986_v43  ;;  %3890 = vmatmul.msk.bf16.gmra.mxu3 %vm932_vm0, %v4018_v44  ;;  %v3924_v47 = vld [vmem:[%s5604_s0 + $0xa8] sm:$0xff] }
 0x13f   :  { %3140 = vst.msk [vmem:[%s5605_s2 + $0x254] sm:$0xf] %vm2990_vm3, %v2883_v52  ;;  %v2820_v58 = vpack.c.bf16 %v2564_v57, %v2564_v57  ;;  %v3988_v51 = vld [vmem:[%s5604_s0 + $0x2a8] sm:$0xff] }
 0x140   :  { %3204 = vst.msk [vmem:[%s5605_s2 + $0x354] sm:$0xf] %vm2990_vm3, %v2947_v55  ;;  %v4020_v52 = vld [vmem:[%s5604_s0 + $0x3a8] sm:$0xff] }
 0x141   :  { %3013 = vst.msk [vmem:[%s5605_s2 + $0x58] sm:$0xf] %vm2990_vm3, %v2756_v56  ;;  %v1701_v59 = vpop.f32.mrf.mxu2  ;;  %v1861_v60 = vpop.f32.mrf.mxu3 }
 0x142   :  { %3077 = vst.msk [vmem:[%s5605_s2 + $0x158] sm:$0xf] %vm2990_vm3, %v2820_v58  ;;  %vm2116_vm8 = vcmp.ge.f32.partialorder %v1701_v59, 0.0  ;;  %v2372_v61 = vmul.f32 0.2, %v1701_v59  ;;  %vm2180_vm9 = vcmp.ge.f32.partialorder %v1861_v60, 0.0  ;;  %v1383_v62 = vpop.f32.mrf.mxu0  ;;  %v1543_v63 = vpop.f32.mrf.mxu1 }
 0x143   :  { %v2436_v0 = vmul.f32 0.2, %v1861_v60  ;;  %vm1989_vm10 = vcmp.ge.f32.partialorder %v1383_v62, 0.0  ;;  %v2245_v1 = vmul.f32 0.2, %v1383_v62  ;;  %vm2053_vm11 = vcmp.ge.f32.partialorder %v1543_v63, 0.0 }
 0x144   :  { %v2628_v2 = vsel %vm2116_vm8, %v1701_v59, %v2372_v61  ;;  %v2309_v3 = vmul.f32 0.2, %v1543_v63 }
 0x145   :  { %v2884_v4 = vpack.c.bf16 %v2628_v2, %v2628_v2  ;;  %v2692_v5 = vsel %vm2180_vm9, %v1861_v60, %v2436_v0  ;;  %v2501_v6 = vsel %vm1989_vm10, %v1383_v62, %v2245_v1 }
 0x146   :  { %v2948_v7 = vpack.c.bf16 %v2692_v5, %v2692_v5  ;;  %v2757_v8 = vpack.c.bf16 %v2501_v6, %v2501_v6  ;;  %v2565_v9 = vsel %vm2053_vm11, %v1543_v63, %v2309_v3 }
 0x147   :  { %3141 = vst.msk [vmem:[%s5605_s2 + $0x258] sm:$0xf] %vm2990_vm3, %v2884_v4  ;;  %v2821_v10 = vpack.c.bf16 %v2565_v9, %v2565_v9 }
 0x148   :  { %3205 = vst.msk [vmem:[%s5605_s2 + $0x358] sm:$0xf] %vm2990_vm3, %v2948_v7 }
 0x149   :  { %3014 = vst.msk [vmem:[%s5605_s2 + $0x5c] sm:$0xf] %vm2990_vm3, %v2757_v8  ;;  %v1703_v12 = vpop.f32.mrf.mxu2  ;;  %v1863_v13 = vpop.f32.mrf.mxu3 }
 0x14a   :  { %3078 = vst.msk [vmem:[%s5605_s2 + $0x15c] sm:$0xf] %vm2990_vm3, %v2821_v10  ;;  %vm2117_vm12 = vcmp.ge.f32.partialorder %v1703_v12, 0.0  ;;  %v2373_v17 = vmul.f32 0.2, %v1703_v12  ;;  %vm2181_vm13 = vcmp.ge.f32.partialorder %v1863_v13, 0.0  ;;  %v1386_v18 = vpop.f32.mrf.mxu0  ;;  %v1546_v19 = vpop.f32.mrf.mxu1 }
 0x14b   :  { %v2437_v20 = vmul.f32 0.2, %v1863_v13  ;;  %vm1990_vm14 = vcmp.ge.f32.partialorder %v1386_v18, 0.0  ;;  %v2246_v21 = vmul.f32 0.2, %v1386_v18  ;;  %vm2054_vm15 = vcmp.ge.f32.partialorder %v1546_v19, 0.0 }
 0x14c   :  { %v2629_v22 = vsel %vm2117_vm12, %v1703_v12, %v2373_v17  ;;  %v2310_v23 = vmul.f32 0.2, %v1546_v19 }
 0x14d   :  { %v2885_v24 = vpack.c.bf16 %v2629_v22, %v2629_v22  ;;  %v2693_v25 = vsel %vm2181_vm13, %v1863_v13, %v2437_v20  ;;  %v2502_v26 = vsel %vm1990_vm14, %v1386_v18, %v2246_v21  ;;  %3795 = vmatmul.msk.bf16.gmra.mxu0 %vm932_vm0, %v3923_v11  ;;  %3827 = vmatmul.msk.bf16.gmra.mxu1 %vm932_vm0, %v3955_v14  ;;  %v3957_v22 = vld [vmem:[%s5604_s0 + $0x1b0] sm:$0xff] }
 0x14e   :  { %v2949_v27 = vpack.c.bf16 %v2693_v25, %v2693_v25  ;;  %v2758_v28 = vpack.c.bf16 %v2502_v26, %v2502_v26  ;;  %v2566_v29 = vsel %vm2054_vm15, %v1546_v19, %v2310_v23  ;;  %3859 = vmatmul.msk.bf16.gmra.mxu2 %vm932_vm0, %v3987_v15  ;;  %3891 = vmatmul.msk.bf16.gmra.mxu3 %vm932_vm0, %v4019_v16  ;;  %v3925_v19 = vld [vmem:[%s5604_s0 + $0xb0] sm:$0xff] }
 0x14f   :  { %3142 = vst.msk [vmem:[%s5605_s2 + $0x25c] sm:$0xf] %vm2990_vm3, %v2885_v24  ;;  %v2822_v30 = vpack.c.bf16 %v2566_v29, %v2566_v29  ;;  %v3989_v23 = vld [vmem:[%s5604_s0 + $0x2b0] sm:$0xff] }
 0x150   :  { %3206 = vst.msk [vmem:[%s5605_s2 + $0x35c] sm:$0xf] %vm2990_vm3, %v2949_v27  ;;  %v4021_v24 = vld [vmem:[%s5604_s0 + $0x3b0] sm:$0xff] }
 0x151   :  { %3015 = vst.msk [vmem:[%s5605_s2 + $0x60] sm:$0xf] %vm2990_vm3, %v2758_v28  ;;  %v1706_v31 = vpop.f32.mrf.mxu2  ;;  %v1866_v32 = vpop.f32.mrf.mxu3 }
 0x152   :  { %3079 = vst.msk [vmem:[%s5605_s2 + $0x160] sm:$0xf] %vm2990_vm3, %v2822_v30  ;;  %vm2118_vm1 = vcmp.ge.f32.partialorder %v1706_v31, 0.0  ;;  %v2374_v33 = vmul.f32 0.2, %v1706_v31  ;;  %vm2182_vm2 = vcmp.ge.f32.partialorder %v1866_v32, 0.0  ;;  %v1388_v34 = vpop.f32.mrf.mxu0  ;;  %v1548_v35 = vpop.f32.mrf.mxu1 }
 0x153   :  { %v2438_v36 = vmul.f32 0.2, %v1866_v32  ;;  %vm1991_vm4 = vcmp.ge.f32.partialorder %v1388_v34, 0.0  ;;  %v2247_v37 = vmul.f32 0.2, %v1388_v34  ;;  %vm2055_vm5 = vcmp.ge.f32.partialorder %v1548_v35, 0.0 }
 0x154   :  { %v2630_v38 = vsel %vm2118_vm1, %v1706_v31, %v2374_v33  ;;  %v2311_v39 = vmul.f32 0.2, %v1548_v35 }
 0x155   :  { %v2886_v40 = vpack.c.bf16 %v2630_v38, %v2630_v38  ;;  %v2694_v41 = vsel %vm2182_vm2, %v1866_v32, %v2438_v36  ;;  %v2503_v42 = vsel %vm1991_vm4, %v1388_v34, %v2247_v37 }
 0x156   :  { %v2950_v43 = vpack.c.bf16 %v2694_v41, %v2694_v41  ;;  %v2759_v44 = vpack.c.bf16 %v2503_v42, %v2503_v42  ;;  %v2567_v45 = vsel %vm2055_vm5, %v1548_v35, %v2311_v39 }
 0x157   :  { %3143 = vst.msk [vmem:[%s5605_s2 + $0x260] sm:$0xf] %vm2990_vm3, %v2886_v40  ;;  %v2823_v46 = vpack.c.bf16 %v2567_v45, %v2567_v45 }
 0x158   :  { %3207 = vst.msk [vmem:[%s5605_s2 + $0x360] sm:$0xf] %vm2990_vm3, %v2950_v43 }
 0x159   :  { %3016 = vst.msk [vmem:[%s5605_s2 + $0x64] sm:$0xf] %vm2990_vm3, %v2759_v44  ;;  %v1708_v48 = vpop.f32.mrf.mxu2  ;;  %v1868_v49 = vpop.f32.mrf.mxu3 }
 0x15a   :  { %3080 = vst.msk [vmem:[%s5605_s2 + $0x164] sm:$0xf] %vm2990_vm3, %v2823_v46  ;;  %vm2119_vm6 = vcmp.ge.f32.partialorder %v1708_v48, 0.0  ;;  %v2375_v53 = vmul.f32 0.2, %v1708_v48  ;;  %vm2183_vm7 = vcmp.ge.f32.partialorder %v1868_v49, 0.0  ;;  %v1391_v54 = vpop.f32.mrf.mxu0  ;;  %v1551_v55 = vpop.f32.mrf.mxu1 }
 0x15b   :  { %v2439_v56 = vmul.f32 0.2, %v1868_v49  ;;  %vm1992_vm8 = vcmp.ge.f32.partialorder %v1391_v54, 0.0  ;;  %v2248_v57 = vmul.f32 0.2, %v1391_v54  ;;  %vm2056_vm9 = vcmp.ge.f32.partialorder %v1551_v55, 0.0 }
 0x15c   :  { %v2631_v58 = vsel %vm2119_vm6, %v1708_v48, %v2375_v53  ;;  %v2312_v59 = vmul.f32 0.2, %v1551_v55 }
 0x15d   :  { %v2887_v60 = vpack.c.bf16 %v2631_v58, %v2631_v58  ;;  %v2695_v61 = vsel %vm2183_vm7, %v1868_v49, %v2439_v56  ;;  %v2504_v62 = vsel %vm1992_vm8, %v1391_v54, %v2248_v57  ;;  %3796 = vmatmul.msk.bf16.gmra.mxu0 %vm932_vm0, %v3924_v47  ;;  %3828 = vmatmul.msk.bf16.gmra.mxu1 %vm932_vm0, %v3956_v50  ;;  %v3958_v58 = vld [vmem:[%s5604_s0 + $0x1b8] sm:$0xff] }
 0x15e   :  { %v2951_v63 = vpack.c.bf16 %v2695_v61, %v2695_v61  ;;  %v2760_v0 = vpack.c.bf16 %v2504_v62, %v2504_v62  ;;  %v2568_v1 = vsel %vm2056_vm9, %v1551_v55, %v2312_v59  ;;  %3860 = vmatmul.msk.bf16.gmra.mxu2 %vm932_vm0, %v3988_v51  ;;  %3892 = vmatmul.msk.bf16.gmra.mxu3 %vm932_vm0, %v4020_v52  ;;  %v3926_v55 = vld [vmem:[%s5604_s0 + $0xb8] sm:$0xff] }
 0x15f   :  { %3144 = vst.msk [vmem:[%s5605_s2 + $0x264] sm:$0xf] %vm2990_vm3, %v2887_v60  ;;  %v2824_v2 = vpack.c.bf16 %v2568_v1, %v2568_v1  ;;  %v3990_v59 = vld [vmem:[%s5604_s0 + $0x2b8] sm:$0xff] }
 0x160   :  { %3208 = vst.msk [vmem:[%s5605_s2 + $0x364] sm:$0xf] %vm2990_vm3, %v2951_v63  ;;  %v4022_v60 = vld [vmem:[%s5604_s0 + $0x3b8] sm:$0xff] }
 0x161   :  { %3017 = vst.msk [vmem:[%s5605_s2 + $0x68] sm:$0xf] %vm2990_vm3, %v2760_v0  ;;  %v1711_v3 = vpop.f32.mrf.mxu2  ;;  %v1871_v4 = vpop.f32.mrf.mxu3 }
 0x162   :  { %3081 = vst.msk [vmem:[%s5605_s2 + $0x168] sm:$0xf] %vm2990_vm3, %v2824_v2  ;;  %vm2120_vm10 = vcmp.ge.f32.partialorder %v1711_v3, 0.0  ;;  %v2376_v5 = vmul.f32 0.2, %v1711_v3  ;;  %vm2184_vm11 = vcmp.ge.f32.partialorder %v1871_v4, 0.0  ;;  %v1393_v6 = vpop.f32.mrf.mxu0  ;;  %v1553_v7 = vpop.f32.mrf.mxu1 }
 0x163   :  { %v2440_v8 = vmul.f32 0.2, %v1871_v4  ;;  %vm1993_vm12 = vcmp.ge.f32.partialorder %v1393_v6, 0.0  ;;  %v2249_v9 = vmul.f32 0.2, %v1393_v6  ;;  %vm2057_vm13 = vcmp.ge.f32.partialorder %v1553_v7, 0.0 }
 0x164   :  { %v2632_v10 = vsel %vm2120_vm10, %v1711_v3, %v2376_v5  ;;  %v2313_v11 = vmul.f32 0.2, %v1553_v7 }
 0x165   :  { %v2888_v12 = vpack.c.bf16 %v2632_v10, %v2632_v10  ;;  %v2696_v13 = vsel %vm2184_vm11, %v1871_v4, %v2440_v8  ;;  %v2505_v14 = vsel %vm1993_vm12, %v1393_v6, %v2249_v9 }
 0x166   :  { %v2952_v15 = vpack.c.bf16 %v2696_v13, %v2696_v13  ;;  %v2761_v16 = vpack.c.bf16 %v2505_v14, %v2505_v14  ;;  %v2569_v17 = vsel %vm2057_vm13, %v1553_v7, %v2313_v11 }
 0x167   :  { %3145 = vst.msk [vmem:[%s5605_s2 + $0x268] sm:$0xf] %vm2990_vm3, %v2888_v12  ;;  %v2825_v18 = vpack.c.bf16 %v2569_v17, %v2569_v17 }
 0x168   :  { %3209 = vst.msk [vmem:[%s5605_s2 + $0x368] sm:$0xf] %vm2990_vm3, %v2952_v15 }
 0x169   :  { %3018 = vst.msk [vmem:[%s5605_s2 + $0x6c] sm:$0xf] %vm2990_vm3, %v2761_v16  ;;  %v1713_v20 = vpop.f32.mrf.mxu2  ;;  %v1873_v21 = vpop.f32.mrf.mxu3 }
 0x16a   :  { %3082 = vst.msk [vmem:[%s5605_s2 + $0x16c] sm:$0xf] %vm2990_vm3, %v2825_v18  ;;  %vm2121_vm14 = vcmp.ge.f32.partialorder %v1713_v20, 0.0  ;;  %v2377_v25 = vmul.f32 0.2, %v1713_v20  ;;  %vm2185_vm15 = vcmp.ge.f32.partialorder %v1873_v21, 0.0  ;;  %v1396_v26 = vpop.f32.mrf.mxu0  ;;  %v1556_v27 = vpop.f32.mrf.mxu1 }
 0x16b   :  { %v2441_v28 = vmul.f32 0.2, %v1873_v21  ;;  %vm1994_vm1 = vcmp.ge.f32.partialorder %v1396_v26, 0.0  ;;  %v2250_v29 = vmul.f32 0.2, %v1396_v26  ;;  %vm2058_vm2 = vcmp.ge.f32.partialorder %v1556_v27, 0.0 }
 0x16c   :  { %v2633_v30 = vsel %vm2121_vm14, %v1713_v20, %v2377_v25  ;;  %v2314_v31 = vmul.f32 0.2, %v1556_v27 }
 0x16d   :  { %v2889_v32 = vpack.c.bf16 %v2633_v30, %v2633_v30  ;;  %v2697_v33 = vsel %vm2185_vm15, %v1873_v21, %v2441_v28  ;;  %v2506_v34 = vsel %vm1994_vm1, %v1396_v26, %v2250_v29  ;;  %3797 = vmatmul.msk.bf16.gmra.mxu0 %vm932_vm0, %v3925_v19  ;;  %3829 = vmatmul.msk.bf16.gmra.mxu1 %vm932_vm0, %v3957_v22  ;;  %v3959_v30 = vld [vmem:[%s5604_s0 + $0x1c0] sm:$0xff] }
 0x16e   :  { %v2953_v35 = vpack.c.bf16 %v2697_v33, %v2697_v33  ;;  %v2762_v36 = vpack.c.bf16 %v2506_v34, %v2506_v34  ;;  %v2570_v37 = vsel %vm2058_vm2, %v1556_v27, %v2314_v31  ;;  %3861 = vmatmul.msk.bf16.gmra.mxu2 %vm932_vm0, %v3989_v23  ;;  %3893 = vmatmul.msk.bf16.gmra.mxu3 %vm932_vm0, %v4021_v24  ;;  %v3927_v27 = vld [vmem:[%s5604_s0 + $0xc0] sm:$0xff] }
 0x16f   :  { %3146 = vst.msk [vmem:[%s5605_s2 + $0x26c] sm:$0xf] %vm2990_vm3, %v2889_v32  ;;  %v2826_v38 = vpack.c.bf16 %v2570_v37, %v2570_v37  ;;  %v3991_v31 = vld [vmem:[%s5604_s0 + $0x2c0] sm:$0xff] }
 0x170   :  { %3210 = vst.msk [vmem:[%s5605_s2 + $0x36c] sm:$0xf] %vm2990_vm3, %v2953_v35  ;;  %v4023_v32 = vld [vmem:[%s5604_s0 + $0x3c0] sm:$0xff] }
 0x171   :  { %3019 = vst.msk [vmem:[%s5605_s2 + $0x70] sm:$0xf] %vm2990_vm3, %v2762_v36  ;;  %v1716_v39 = vpop.f32.mrf.mxu2  ;;  %v1876_v40 = vpop.f32.mrf.mxu3 }
 0x172   :  { %3083 = vst.msk [vmem:[%s5605_s2 + $0x170] sm:$0xf] %vm2990_vm3, %v2826_v38  ;;  %vm2122_vm4 = vcmp.ge.f32.partialorder %v1716_v39, 0.0  ;;  %v2378_v41 = vmul.f32 0.2, %v1716_v39  ;;  %vm2186_vm5 = vcmp.ge.f32.partialorder %v1876_v40, 0.0  ;;  %v1398_v42 = vpop.f32.mrf.mxu0  ;;  %v1558_v43 = vpop.f32.mrf.mxu1 }
 0x173   :  { %v2442_v44 = vmul.f32 0.2, %v1876_v40  ;;  %vm1995_vm6 = vcmp.ge.f32.partialorder %v1398_v42, 0.0  ;;  %v2251_v45 = vmul.f32 0.2, %v1398_v42  ;;  %vm2059_vm7 = vcmp.ge.f32.partialorder %v1558_v43, 0.0 }
 0x174   :  { %v2634_v46 = vsel %vm2122_vm4, %v1716_v39, %v2378_v41  ;;  %v2315_v47 = vmul.f32 0.2, %v1558_v43 }
 0x175   :  { %v2890_v48 = vpack.c.bf16 %v2634_v46, %v2634_v46  ;;  %v2698_v49 = vsel %vm2186_vm5, %v1876_v40, %v2442_v44  ;;  %v2507_v50 = vsel %vm1995_vm6, %v1398_v42, %v2251_v45 }
 0x176   :  { %v2954_v51 = vpack.c.bf16 %v2698_v49, %v2698_v49  ;;  %v2763_v52 = vpack.c.bf16 %v2507_v50, %v2507_v50  ;;  %v2571_v53 = vsel %vm2059_vm7, %v1558_v43, %v2315_v47 }
 0x177   :  { %3147 = vst.msk [vmem:[%s5605_s2 + $0x270] sm:$0xf] %vm2990_vm3, %v2890_v48  ;;  %v2827_v54 = vpack.c.bf16 %v2571_v53, %v2571_v53 }
 0x178   :  { %3211 = vst.msk [vmem:[%s5605_s2 + $0x370] sm:$0xf] %vm2990_vm3, %v2954_v51 }
 0x179   :  { %3020 = vst.msk [vmem:[%s5605_s2 + $0x74] sm:$0xf] %vm2990_vm3, %v2763_v52  ;;  %v1718_v56 = vpop.f32.mrf.mxu2  ;;  %v1878_v57 = vpop.f32.mrf.mxu3 }
 0x17a   :  { %3084 = vst.msk [vmem:[%s5605_s2 + $0x174] sm:$0xf] %vm2990_vm3, %v2827_v54  ;;  %vm2123_vm8 = vcmp.ge.f32.partialorder %v1718_v56, 0.0  ;;  %v2379_v61 = vmul.f32 0.2, %v1718_v56  ;;  %vm2187_vm9 = vcmp.ge.f32.partialorder %v1878_v57, 0.0  ;;  %v1401_v62 = vpop.f32.mrf.mxu0  ;;  %v1561_v63 = vpop.f32.mrf.mxu1 }
 0x17b   :  { %v2443_v0 = vmul.f32 0.2, %v1878_v57  ;;  %vm1996_vm10 = vcmp.ge.f32.partialorder %v1401_v62, 0.0  ;;  %v2252_v1 = vmul.f32 0.2, %v1401_v62  ;;  %vm2060_vm11 = vcmp.ge.f32.partialorder %v1561_v63, 0.0 }
 0x17c   :  { %v2635_v2 = vsel %vm2123_vm8, %v1718_v56, %v2379_v61  ;;  %v2316_v3 = vmul.f32 0.2, %v1561_v63 }
 0x17d   :  { %v2891_v4 = vpack.c.bf16 %v2635_v2, %v2635_v2  ;;  %v2699_v5 = vsel %vm2187_vm9, %v1878_v57, %v2443_v0  ;;  %v2508_v6 = vsel %vm1996_vm10, %v1401_v62, %v2252_v1  ;;  %3798 = vmatmul.msk.bf16.gmra.mxu0 %vm932_vm0, %v3926_v55  ;;  %3830 = vmatmul.msk.bf16.gmra.mxu1 %vm932_vm0, %v3958_v58  ;;  %v3960_v2 = vld [vmem:[%s5604_s0 + $0x1c8] sm:$0xff] }
 0x17e   :  { %v2955_v7 = vpack.c.bf16 %v2699_v5, %v2699_v5  ;;  %v2764_v8 = vpack.c.bf16 %v2508_v6, %v2508_v6  ;;  %v2572_v9 = vsel %vm2060_vm11, %v1561_v63, %v2316_v3  ;;  %3862 = vmatmul.msk.bf16.gmra.mxu2 %vm932_vm0, %v3990_v59  ;;  %3894 = vmatmul.msk.bf16.gmra.mxu3 %vm932_vm0, %v4022_v60  ;;  %v3928_v63 = vld [vmem:[%s5604_s0 + $0xc8] sm:$0xff] }
 0x17f   :  { %3148 = vst.msk [vmem:[%s5605_s2 + $0x274] sm:$0xf] %vm2990_vm3, %v2891_v4  ;;  %v2828_v10 = vpack.c.bf16 %v2572_v9, %v2572_v9  ;;  %v3992_v3 = vld [vmem:[%s5604_s0 + $0x2c8] sm:$0xff] }
 0x180   :  { %3212 = vst.msk [vmem:[%s5605_s2 + $0x374] sm:$0xf] %vm2990_vm3, %v2955_v7  ;;  %v4024_v4 = vld [vmem:[%s5604_s0 + $0x3c8] sm:$0xff] }
 0x181   :  { %3021 = vst.msk [vmem:[%s5605_s2 + $0x78] sm:$0xf] %vm2990_vm3, %v2764_v8  ;;  %v1721_v11 = vpop.f32.mrf.mxu2  ;;  %v1881_v12 = vpop.f32.mrf.mxu3 }
 0x182   :  { %3085 = vst.msk [vmem:[%s5605_s2 + $0x178] sm:$0xf] %vm2990_vm3, %v2828_v10  ;;  %vm2124_vm12 = vcmp.ge.f32.partialorder %v1721_v11, 0.0  ;;  %v2380_v13 = vmul.f32 0.2, %v1721_v11  ;;  %vm2188_vm13 = vcmp.ge.f32.partialorder %v1881_v12, 0.0  ;;  %v1403_v14 = vpop.f32.mrf.mxu0  ;;  %v1563_v15 = vpop.f32.mrf.mxu1 }
 0x183   :  { %v2444_v16 = vmul.f32 0.2, %v1881_v12  ;;  %vm1997_vm14 = vcmp.ge.f32.partialorder %v1403_v14, 0.0  ;;  %v2253_v17 = vmul.f32 0.2, %v1403_v14  ;;  %vm2061_vm15 = vcmp.ge.f32.partialorder %v1563_v15, 0.0 }
 0x184   :  { %v2636_v18 = vsel %vm2124_vm12, %v1721_v11, %v2380_v13  ;;  %v2317_v19 = vmul.f32 0.2, %v1563_v15 }
 0x185   :  { %v2892_v20 = vpack.c.bf16 %v2636_v18, %v2636_v18  ;;  %v2700_v21 = vsel %vm2188_vm13, %v1881_v12, %v2444_v16  ;;  %v2509_v22 = vsel %vm1997_vm14, %v1403_v14, %v2253_v17 }
 0x186   :  { %v2956_v23 = vpack.c.bf16 %v2700_v21, %v2700_v21  ;;  %v2765_v24 = vpack.c.bf16 %v2509_v22, %v2509_v22  ;;  %v2573_v25 = vsel %vm2061_vm15, %v1563_v15, %v2317_v19 }
 0x187   :  { %3149 = vst.msk [vmem:[%s5605_s2 + $0x278] sm:$0xf] %vm2990_vm3, %v2892_v20  ;;  %v2829_v26 = vpack.c.bf16 %v2573_v25, %v2573_v25 }
 0x188   :  { %3213 = vst.msk [vmem:[%s5605_s2 + $0x378] sm:$0xf] %vm2990_vm3, %v2956_v23 }
 0x189   :  { %3022 = vst.msk [vmem:[%s5605_s2 + $0x7c] sm:$0xf] %vm2990_vm3, %v2765_v24  ;;  %v1723_v28 = vpop.f32.mrf.mxu2  ;;  %v1883_v29 = vpop.f32.mrf.mxu3 }
 0x18a   :  { %3086 = vst.msk [vmem:[%s5605_s2 + $0x17c] sm:$0xf] %vm2990_vm3, %v2829_v26  ;;  %vm2125_vm1 = vcmp.ge.f32.partialorder %v1723_v28, 0.0  ;;  %v2381_v33 = vmul.f32 0.2, %v1723_v28  ;;  %vm2189_vm2 = vcmp.ge.f32.partialorder %v1883_v29, 0.0  ;;  %v1406_v34 = vpop.f32.mrf.mxu0  ;;  %v1566_v35 = vpop.f32.mrf.mxu1 }
 0x18b   :  { %v2445_v36 = vmul.f32 0.2, %v1883_v29  ;;  %vm1998_vm4 = vcmp.ge.f32.partialorder %v1406_v34, 0.0  ;;  %v2254_v37 = vmul.f32 0.2, %v1406_v34  ;;  %vm2062_vm5 = vcmp.ge.f32.partialorder %v1566_v35, 0.0 }
 0x18c   :  { %v2637_v38 = vsel %vm2125_vm1, %v1723_v28, %v2381_v33  ;;  %v2318_v39 = vmul.f32 0.2, %v1566_v35 }
 0x18d   :  { %v2893_v40 = vpack.c.bf16 %v2637_v38, %v2637_v38  ;;  %v2701_v41 = vsel %vm2189_vm2, %v1883_v29, %v2445_v36  ;;  %v2510_v42 = vsel %vm1998_vm4, %v1406_v34, %v2254_v37  ;;  %3799 = vmatmul.msk.bf16.gmra.mxu0 %vm932_vm0, %v3927_v27  ;;  %3831 = vmatmul.msk.bf16.gmra.mxu1 %vm932_vm0, %v3959_v30  ;;  %v3961_v38 = vld [vmem:[%s5604_s0 + $0x1d0] sm:$0xff] }
 0x18e   :  { %v2957_v43 = vpack.c.bf16 %v2701_v41, %v2701_v41  ;;  %v2766_v44 = vpack.c.bf16 %v2510_v42, %v2510_v42  ;;  %v2574_v45 = vsel %vm2062_vm5, %v1566_v35, %v2318_v39  ;;  %3863 = vmatmul.msk.bf16.gmra.mxu2 %vm932_vm0, %v3991_v31  ;;  %3895 = vmatmul.msk.bf16.gmra.mxu3 %vm932_vm0, %v4023_v32  ;;  %v3929_v35 = vld [vmem:[%s5604_s0 + $0xd0] sm:$0xff] }
 0x18f   :  { %3150 = vst.msk [vmem:[%s5605_s2 + $0x27c] sm:$0xf] %vm2990_vm3, %v2893_v40  ;;  %v2830_v46 = vpack.c.bf16 %v2574_v45, %v2574_v45  ;;  %v3993_v39 = vld [vmem:[%s5604_s0 + $0x2d0] sm:$0xff] }
 0x190   :  { %3214 = vst.msk [vmem:[%s5605_s2 + $0x37c] sm:$0xf] %vm2990_vm3, %v2957_v43  ;;  %v4025_v40 = vld [vmem:[%s5604_s0 + $0x3d0] sm:$0xff] }
 0x191   :  { %3023 = vst.msk [vmem:[%s5605_s2 + $0x80] sm:$0xf] %vm2990_vm3, %v2766_v44  ;;  %v1726_v47 = vpop.f32.mrf.mxu2  ;;  %v1886_v48 = vpop.f32.mrf.mxu3 }
 0x192   :  { %3087 = vst.msk [vmem:[%s5605_s2 + $0x180] sm:$0xf] %vm2990_vm3, %v2830_v46  ;;  %vm2126_vm6 = vcmp.ge.f32.partialorder %v1726_v47, 0.0  ;;  %v2382_v49 = vmul.f32 0.2, %v1726_v47  ;;  %vm2190_vm7 = vcmp.ge.f32.partialorder %v1886_v48, 0.0  ;;  %v1408_v50 = vpop.f32.mrf.mxu0  ;;  %v1568_v51 = vpop.f32.mrf.mxu1 }
 0x193   :  { %v2446_v52 = vmul.f32 0.2, %v1886_v48  ;;  %vm1999_vm8 = vcmp.ge.f32.partialorder %v1408_v50, 0.0  ;;  %v2255_v53 = vmul.f32 0.2, %v1408_v50  ;;  %vm2063_vm9 = vcmp.ge.f32.partialorder %v1568_v51, 0.0 }
 0x194   :  { %v2638_v54 = vsel %vm2126_vm6, %v1726_v47, %v2382_v49  ;;  %v2319_v55 = vmul.f32 0.2, %v1568_v51 }
 0x195   :  { %v2894_v56 = vpack.c.bf16 %v2638_v54, %v2638_v54  ;;  %v2702_v57 = vsel %vm2190_vm7, %v1886_v48, %v2446_v52  ;;  %v2511_v58 = vsel %vm1999_vm8, %v1408_v50, %v2255_v53 }
 0x196   :  { %v2958_v59 = vpack.c.bf16 %v2702_v57, %v2702_v57  ;;  %v2767_v60 = vpack.c.bf16 %v2511_v58, %v2511_v58  ;;  %v2575_v61 = vsel %vm2063_vm9, %v1568_v51, %v2319_v55 }
 0x197   :  { %3151 = vst.msk [vmem:[%s5605_s2 + $0x280] sm:$0xf] %vm2990_vm3, %v2894_v56  ;;  %v2831_v62 = vpack.c.bf16 %v2575_v61, %v2575_v61 }
 0x198   :  { %3215 = vst.msk [vmem:[%s5605_s2 + $0x380] sm:$0xf] %vm2990_vm3, %v2958_v59 }
 0x199   :  { %3024 = vst.msk [vmem:[%s5605_s2 + $0x84] sm:$0xf] %vm2990_vm3, %v2767_v60  ;;  %v1728_v0 = vpop.f32.mrf.mxu2  ;;  %v1888_v1 = vpop.f32.mrf.mxu3 }
 0x19a   :  { %3088 = vst.msk [vmem:[%s5605_s2 + $0x184] sm:$0xf] %vm2990_vm3, %v2831_v62  ;;  %vm2127_vm10 = vcmp.ge.f32.partialorder %v1728_v0, 0.0  ;;  %v2383_v5 = vmul.f32 0.2, %v1728_v0  ;;  %vm2191_vm11 = vcmp.ge.f32.partialorder %v1888_v1, 0.0  ;;  %v1411_v6 = vpop.f32.mrf.mxu0  ;;  %v1571_v7 = vpop.f32.mrf.mxu1 }
 0x19b   :  { %v2447_v8 = vmul.f32 0.2, %v1888_v1  ;;  %vm2000_vm12 = vcmp.ge.f32.partialorder %v1411_v6, 0.0  ;;  %v2256_v9 = vmul.f32 0.2, %v1411_v6  ;;  %vm2064_vm13 = vcmp.ge.f32.partialorder %v1571_v7, 0.0 }
 0x19c   :  { %v2639_v10 = vsel %vm2127_vm10, %v1728_v0, %v2383_v5  ;;  %v2320_v11 = vmul.f32 0.2, %v1571_v7 }
 0x19d   :  { %v2895_v12 = vpack.c.bf16 %v2639_v10, %v2639_v10  ;;  %v2703_v13 = vsel %vm2191_vm11, %v1888_v1, %v2447_v8  ;;  %v2512_v14 = vsel %vm2000_vm12, %v1411_v6, %v2256_v9  ;;  %3800 = vmatmul.msk.bf16.gmra.mxu0 %vm932_vm0, %v3928_v63  ;;  %3832 = vmatmul.msk.bf16.gmra.mxu1 %vm932_vm0, %v3960_v2  ;;  %v3962_v10 = vld [vmem:[%s5604_s0 + $0x1d8] sm:$0xff] }
 0x19e   :  { %v2959_v15 = vpack.c.bf16 %v2703_v13, %v2703_v13  ;;  %v2768_v16 = vpack.c.bf16 %v2512_v14, %v2512_v14  ;;  %v2576_v17 = vsel %vm2064_vm13, %v1571_v7, %v2320_v11  ;;  %3864 = vmatmul.msk.bf16.gmra.mxu2 %vm932_vm0, %v3992_v3  ;;  %3896 = vmatmul.msk.bf16.gmra.mxu3 %vm932_vm0, %v4024_v4  ;;  %v3930_v7 = vld [vmem:[%s5604_s0 + $0xd8] sm:$0xff] }
 0x19f   :  { %3152 = vst.msk [vmem:[%s5605_s2 + $0x284] sm:$0xf] %vm2990_vm3, %v2895_v12  ;;  %v2832_v18 = vpack.c.bf16 %v2576_v17, %v2576_v17  ;;  %v3994_v11 = vld [vmem:[%s5604_s0 + $0x2d8] sm:$0xff] }
 0x1a0   :  { %3216 = vst.msk [vmem:[%s5605_s2 + $0x384] sm:$0xf] %vm2990_vm3, %v2959_v15  ;;  %v4026_v12 = vld [vmem:[%s5604_s0 + $0x3d8] sm:$0xff] }
 0x1a1   :  { %3025 = vst.msk [vmem:[%s5605_s2 + $0x88] sm:$0xf] %vm2990_vm3, %v2768_v16  ;;  %v1731_v19 = vpop.f32.mrf.mxu2  ;;  %v1891_v20 = vpop.f32.mrf.mxu3 }
 0x1a2   :  { %3089 = vst.msk [vmem:[%s5605_s2 + $0x188] sm:$0xf] %vm2990_vm3, %v2832_v18  ;;  %vm2128_vm14 = vcmp.ge.f32.partialorder %v1731_v19, 0.0  ;;  %v2384_v21 = vmul.f32 0.2, %v1731_v19  ;;  %vm2192_vm15 = vcmp.ge.f32.partialorder %v1891_v20, 0.0  ;;  %v1413_v22 = vpop.f32.mrf.mxu0  ;;  %v1573_v23 = vpop.f32.mrf.mxu1 }
 0x1a3   :  { %v2448_v24 = vmul.f32 0.2, %v1891_v20  ;;  %vm2001_vm1 = vcmp.ge.f32.partialorder %v1413_v22, 0.0  ;;  %v2257_v25 = vmul.f32 0.2, %v1413_v22  ;;  %vm2065_vm2 = vcmp.ge.f32.partialorder %v1573_v23, 0.0 }
 0x1a4   :  { %v2640_v26 = vsel %vm2128_vm14, %v1731_v19, %v2384_v21  ;;  %v2321_v27 = vmul.f32 0.2, %v1573_v23 }
 0x1a5   :  { %v2896_v28 = vpack.c.bf16 %v2640_v26, %v2640_v26  ;;  %v2704_v29 = vsel %vm2192_vm15, %v1891_v20, %v2448_v24  ;;  %v2513_v30 = vsel %vm2001_vm1, %v1413_v22, %v2257_v25 }
 0x1a6   :  { %v2960_v31 = vpack.c.bf16 %v2704_v29, %v2704_v29  ;;  %v2769_v32 = vpack.c.bf16 %v2513_v30, %v2513_v30  ;;  %v2577_v33 = vsel %vm2065_vm2, %v1573_v23, %v2321_v27 }
 0x1a7   :  { %3153 = vst.msk [vmem:[%s5605_s2 + $0x288] sm:$0xf] %vm2990_vm3, %v2896_v28  ;;  %v2833_v34 = vpack.c.bf16 %v2577_v33, %v2577_v33 }
 0x1a8   :  { %3217 = vst.msk [vmem:[%s5605_s2 + $0x388] sm:$0xf] %vm2990_vm3, %v2960_v31 }
 0x1a9   :  { %3026 = vst.msk [vmem:[%s5605_s2 + $0x8c] sm:$0xf] %vm2990_vm3, %v2769_v32  ;;  %v1733_v36 = vpop.f32.mrf.mxu2  ;;  %v1893_v37 = vpop.f32.mrf.mxu3 }
 0x1aa   :  { %3090 = vst.msk [vmem:[%s5605_s2 + $0x18c] sm:$0xf] %vm2990_vm3, %v2833_v34  ;;  %vm2129_vm4 = vcmp.ge.f32.partialorder %v1733_v36, 0.0  ;;  %v2385_v41 = vmul.f32 0.2, %v1733_v36  ;;  %vm2193_vm5 = vcmp.ge.f32.partialorder %v1893_v37, 0.0  ;;  %v1416_v42 = vpop.f32.mrf.mxu0  ;;  %v1576_v43 = vpop.f32.mrf.mxu1 }
 0x1ab   :  { %v2449_v44 = vmul.f32 0.2, %v1893_v37  ;;  %vm2002_vm6 = vcmp.ge.f32.partialorder %v1416_v42, 0.0  ;;  %v2258_v45 = vmul.f32 0.2, %v1416_v42  ;;  %vm2066_vm7 = vcmp.ge.f32.partialorder %v1576_v43, 0.0 }
 0x1ac   :  { %v2641_v46 = vsel %vm2129_vm4, %v1733_v36, %v2385_v41  ;;  %v2322_v47 = vmul.f32 0.2, %v1576_v43 }
 0x1ad   :  { %v2897_v48 = vpack.c.bf16 %v2641_v46, %v2641_v46  ;;  %v2705_v49 = vsel %vm2193_vm5, %v1893_v37, %v2449_v44  ;;  %v2514_v50 = vsel %vm2002_vm6, %v1416_v42, %v2258_v45  ;;  %3801 = vmatmul.msk.bf16.gmra.mxu0 %vm932_vm0, %v3929_v35  ;;  %3833 = vmatmul.msk.bf16.gmra.mxu1 %vm932_vm0, %v3961_v38  ;;  %v3963_v46 = vld [vmem:[%s5604_s0 + $0x1e0] sm:$0xff] }
 0x1ae   :  { %v2961_v51 = vpack.c.bf16 %v2705_v49, %v2705_v49  ;;  %v2770_v52 = vpack.c.bf16 %v2514_v50, %v2514_v50  ;;  %v2578_v53 = vsel %vm2066_vm7, %v1576_v43, %v2322_v47  ;;  %3865 = vmatmul.msk.bf16.gmra.mxu2 %vm932_vm0, %v3993_v39  ;;  %3897 = vmatmul.msk.bf16.gmra.mxu3 %vm932_vm0, %v4025_v40  ;;  %v3931_v43 = vld [vmem:[%s5604_s0 + $0xe0] sm:$0xff] }
 0x1af   :  { %3154 = vst.msk [vmem:[%s5605_s2 + $0x28c] sm:$0xf] %vm2990_vm3, %v2897_v48  ;;  %v2834_v54 = vpack.c.bf16 %v2578_v53, %v2578_v53  ;;  %v3995_v47 = vld [vmem:[%s5604_s0 + $0x2e0] sm:$0xff] }
 0x1b0   :  { %3218 = vst.msk [vmem:[%s5605_s2 + $0x38c] sm:$0xf] %vm2990_vm3, %v2961_v51  ;;  %v4027_v48 = vld [vmem:[%s5604_s0 + $0x3e0] sm:$0xff] }
 0x1b1   :  { %3027 = vst.msk [vmem:[%s5605_s2 + $0x90] sm:$0xf] %vm2990_vm3, %v2770_v52  ;;  %v1736_v55 = vpop.f32.mrf.mxu2  ;;  %v1896_v56 = vpop.f32.mrf.mxu3 }
 0x1b2   :  { %3091 = vst.msk [vmem:[%s5605_s2 + $0x190] sm:$0xf] %vm2990_vm3, %v2834_v54  ;;  %vm2130_vm8 = vcmp.ge.f32.partialorder %v1736_v55, 0.0  ;;  %v2386_v57 = vmul.f32 0.2, %v1736_v55  ;;  %vm2194_vm9 = vcmp.ge.f32.partialorder %v1896_v56, 0.0  ;;  %v1418_v58 = vpop.f32.mrf.mxu0  ;;  %v1578_v59 = vpop.f32.mrf.mxu1 }
 0x1b3   :  { %v2450_v60 = vmul.f32 0.2, %v1896_v56  ;;  %vm2003_vm10 = vcmp.ge.f32.partialorder %v1418_v58, 0.0  ;;  %v2259_v61 = vmul.f32 0.2, %v1418_v58  ;;  %vm2067_vm11 = vcmp.ge.f32.partialorder %v1578_v59, 0.0 }
 0x1b4   :  { %v2642_v62 = vsel %vm2130_vm8, %v1736_v55, %v2386_v57  ;;  %v2323_v63 = vmul.f32 0.2, %v1578_v59 }
 0x1b5   :  { %v2898_v0 = vpack.c.bf16 %v2642_v62, %v2642_v62  ;;  %v2706_v1 = vsel %vm2194_vm9, %v1896_v56, %v2450_v60  ;;  %v2515_v2 = vsel %vm2003_vm10, %v1418_v58, %v2259_v61 }
 0x1b6   :  { %v2962_v3 = vpack.c.bf16 %v2706_v1, %v2706_v1  ;;  %v2771_v4 = vpack.c.bf16 %v2515_v2, %v2515_v2  ;;  %v2579_v5 = vsel %vm2067_vm11, %v1578_v59, %v2323_v63 }
 0x1b7   :  { %3155 = vst.msk [vmem:[%s5605_s2 + $0x290] sm:$0xf] %vm2990_vm3, %v2898_v0  ;;  %v2835_v6 = vpack.c.bf16 %v2579_v5, %v2579_v5 }
 0x1b8   :  { %3219 = vst.msk [vmem:[%s5605_s2 + $0x390] sm:$0xf] %vm2990_vm3, %v2962_v3 }
 0x1b9   :  { %3028 = vst.msk [vmem:[%s5605_s2 + $0x94] sm:$0xf] %vm2990_vm3, %v2771_v4  ;;  %v1738_v8 = vpop.f32.mrf.mxu2  ;;  %v1898_v9 = vpop.f32.mrf.mxu3 }
 0x1ba   :  { %3092 = vst.msk [vmem:[%s5605_s2 + $0x194] sm:$0xf] %vm2990_vm3, %v2835_v6  ;;  %vm2131_vm12 = vcmp.ge.f32.partialorder %v1738_v8, 0.0  ;;  %v2387_v13 = vmul.f32 0.2, %v1738_v8  ;;  %vm2195_vm13 = vcmp.ge.f32.partialorder %v1898_v9, 0.0  ;;  %v1421_v14 = vpop.f32.mrf.mxu0  ;;  %v1581_v15 = vpop.f32.mrf.mxu1 }
 0x1bb   :  { %v2451_v16 = vmul.f32 0.2, %v1898_v9  ;;  %vm2004_vm14 = vcmp.ge.f32.partialorder %v1421_v14, 0.0  ;;  %v2260_v17 = vmul.f32 0.2, %v1421_v14  ;;  %vm2068_vm15 = vcmp.ge.f32.partialorder %v1581_v15, 0.0 }
 0x1bc   :  { %v2643_v18 = vsel %vm2131_vm12, %v1738_v8, %v2387_v13  ;;  %v2324_v19 = vmul.f32 0.2, %v1581_v15 }
 0x1bd   :  { %v2899_v20 = vpack.c.bf16 %v2643_v18, %v2643_v18  ;;  %v2707_v21 = vsel %vm2195_vm13, %v1898_v9, %v2451_v16  ;;  %v2516_v22 = vsel %vm2004_vm14, %v1421_v14, %v2260_v17  ;;  %3802 = vmatmul.msk.bf16.gmra.mxu0 %vm932_vm0, %v3930_v7  ;;  %3834 = vmatmul.msk.bf16.gmra.mxu1 %vm932_vm0, %v3962_v10  ;;  %v3964_v18 = vld [vmem:[%s5604_s0 + $0x1e8] sm:$0xff] }
 0x1be   :  { %v2963_v23 = vpack.c.bf16 %v2707_v21, %v2707_v21  ;;  %v2772_v24 = vpack.c.bf16 %v2516_v22, %v2516_v22  ;;  %v2580_v25 = vsel %vm2068_vm15, %v1581_v15, %v2324_v19  ;;  %3866 = vmatmul.msk.bf16.gmra.mxu2 %vm932_vm0, %v3994_v11  ;;  %3898 = vmatmul.msk.bf16.gmra.mxu3 %vm932_vm0, %v4026_v12  ;;  %v3932_v15 = vld [vmem:[%s5604_s0 + $0xe8] sm:$0xff] }
 0x1bf   :  { %3156 = vst.msk [vmem:[%s5605_s2 + $0x294] sm:$0xf] %vm2990_vm3, %v2899_v20  ;;  %v2836_v26 = vpack.c.bf16 %v2580_v25, %v2580_v25  ;;  %v3996_v19 = vld [vmem:[%s5604_s0 + $0x2e8] sm:$0xff] }
 0x1c0   :  { %3220 = vst.msk [vmem:[%s5605_s2 + $0x394] sm:$0xf] %vm2990_vm3, %v2963_v23  ;;  %v4028_v20 = vld [vmem:[%s5604_s0 + $0x3e8] sm:$0xff] }
 0x1c1   :  { %3029 = vst.msk [vmem:[%s5605_s2 + $0x98] sm:$0xf] %vm2990_vm3, %v2772_v24  ;;  %v1741_v27 = vpop.f32.mrf.mxu2  ;;  %v1901_v28 = vpop.f32.mrf.mxu3 }
 0x1c2   :  { %3093 = vst.msk [vmem:[%s5605_s2 + $0x198] sm:$0xf] %vm2990_vm3, %v2836_v26  ;;  %vm2132_vm1 = vcmp.ge.f32.partialorder %v1741_v27, 0.0  ;;  %v2388_v29 = vmul.f32 0.2, %v1741_v27  ;;  %vm2196_vm2 = vcmp.ge.f32.partialorder %v1901_v28, 0.0  ;;  %v1423_v30 = vpop.f32.mrf.mxu0  ;;  %v1583_v31 = vpop.f32.mrf.mxu1 }
 0x1c3   :  { %v2452_v32 = vmul.f32 0.2, %v1901_v28  ;;  %vm2005_vm4 = vcmp.ge.f32.partialorder %v1423_v30, 0.0  ;;  %v2261_v33 = vmul.f32 0.2, %v1423_v30  ;;  %vm2069_vm5 = vcmp.ge.f32.partialorder %v1583_v31, 0.0 }
 0x1c4   :  { %v2644_v34 = vsel %vm2132_vm1, %v1741_v27, %v2388_v29  ;;  %v2325_v35 = vmul.f32 0.2, %v1583_v31 }
 0x1c5   :  { %v2900_v36 = vpack.c.bf16 %v2644_v34, %v2644_v34  ;;  %v2708_v37 = vsel %vm2196_vm2, %v1901_v28, %v2452_v32  ;;  %v2517_v38 = vsel %vm2005_vm4, %v1423_v30, %v2261_v33 }
 0x1c6   :  { %v2964_v39 = vpack.c.bf16 %v2708_v37, %v2708_v37  ;;  %v2773_v40 = vpack.c.bf16 %v2517_v38, %v2517_v38  ;;  %v2581_v41 = vsel %vm2069_vm5, %v1583_v31, %v2325_v35 }
 0x1c7   :  { %3157 = vst.msk [vmem:[%s5605_s2 + $0x298] sm:$0xf] %vm2990_vm3, %v2900_v36  ;;  %v2837_v42 = vpack.c.bf16 %v2581_v41, %v2581_v41 }
 0x1c8   :  { %3221 = vst.msk [vmem:[%s5605_s2 + $0x398] sm:$0xf] %vm2990_vm3, %v2964_v39 }
 0x1c9   :  { %3030 = vst.msk [vmem:[%s5605_s2 + $0x9c] sm:$0xf] %vm2990_vm3, %v2773_v40  ;;  %v1743_v44 = vpop.f32.mrf.mxu2  ;;  %v1903_v45 = vpop.f32.mrf.mxu3 }
 0x1ca   :  { %3094 = vst.msk [vmem:[%s5605_s2 + $0x19c] sm:$0xf] %vm2990_vm3, %v2837_v42  ;;  %vm2133_vm6 = vcmp.ge.f32.partialorder %v1743_v44, 0.0  ;;  %v2389_v49 = vmul.f32 0.2, %v1743_v44  ;;  %vm2197_vm7 = vcmp.ge.f32.partialorder %v1903_v45, 0.0  ;;  %v1426_v50 = vpop.f32.mrf.mxu0  ;;  %v1586_v51 = vpop.f32.mrf.mxu1 }
 0x1cb   :  { %v2453_v52 = vmul.f32 0.2, %v1903_v45  ;;  %vm2006_vm8 = vcmp.ge.f32.partialorder %v1426_v50, 0.0  ;;  %v2262_v53 = vmul.f32 0.2, %v1426_v50  ;;  %vm2070_vm9 = vcmp.ge.f32.partialorder %v1586_v51, 0.0 }
 0x1cc   :  { %v2645_v54 = vsel %vm2133_vm6, %v1743_v44, %v2389_v49  ;;  %v2326_v55 = vmul.f32 0.2, %v1586_v51 }
 0x1cd   :  { %v2901_v56 = vpack.c.bf16 %v2645_v54, %v2645_v54  ;;  %v2709_v57 = vsel %vm2197_vm7, %v1903_v45, %v2453_v52  ;;  %v2518_v58 = vsel %vm2006_vm8, %v1426_v50, %v2262_v53  ;;  %3803 = vmatmul.msk.bf16.gmra.mxu0 %vm932_vm0, %v3931_v43  ;;  %3835 = vmatmul.msk.bf16.gmra.mxu1 %vm932_vm0, %v3963_v46  ;;  %v3965_v54 = vld [vmem:[%s5604_s0 + $0x1f0] sm:$0xff] }
 0x1ce   :  { %v2965_v59 = vpack.c.bf16 %v2709_v57, %v2709_v57  ;;  %v2774_v60 = vpack.c.bf16 %v2518_v58, %v2518_v58  ;;  %v2582_v61 = vsel %vm2070_vm9, %v1586_v51, %v2326_v55  ;;  %3867 = vmatmul.msk.bf16.gmra.mxu2 %vm932_vm0, %v3995_v47  ;;  %3899 = vmatmul.msk.bf16.gmra.mxu3 %vm932_vm0, %v4027_v48  ;;  %v3933_v51 = vld [vmem:[%s5604_s0 + $0xf0] sm:$0xff] }
 0x1cf   :  { %3158 = vst.msk [vmem:[%s5605_s2 + $0x29c] sm:$0xf] %vm2990_vm3, %v2901_v56  ;;  %v2838_v62 = vpack.c.bf16 %v2582_v61, %v2582_v61  ;;  %v3997_v55 = vld [vmem:[%s5604_s0 + $0x2f0] sm:$0xff] }
 0x1d0   :  { %3222 = vst.msk [vmem:[%s5605_s2 + $0x39c] sm:$0xf] %vm2990_vm3, %v2965_v59  ;;  %v4029_v56 = vld [vmem:[%s5604_s0 + $0x3f0] sm:$0xff] }
 0x1d1   :  { %3031 = vst.msk [vmem:[%s5605_s2 + $0xa0] sm:$0xf] %vm2990_vm3, %v2774_v60  ;;  %v1746_v63 = vpop.f32.mrf.mxu2  ;;  %v1906_v0 = vpop.f32.mrf.mxu3 }
 0x1d2   :  { %3095 = vst.msk [vmem:[%s5605_s2 + $0x1a0] sm:$0xf] %vm2990_vm3, %v2838_v62  ;;  %vm2134_vm10 = vcmp.ge.f32.partialorder %v1746_v63, 0.0  ;;  %v2390_v1 = vmul.f32 0.2, %v1746_v63  ;;  %vm2198_vm11 = vcmp.ge.f32.partialorder %v1906_v0, 0.0  ;;  %v1428_v2 = vpop.f32.mrf.mxu0  ;;  %v1588_v3 = vpop.f32.mrf.mxu1 }
 0x1d3   :  { %v2454_v4 = vmul.f32 0.2, %v1906_v0  ;;  %vm2007_vm12 = vcmp.ge.f32.partialorder %v1428_v2, 0.0  ;;  %v2263_v5 = vmul.f32 0.2, %v1428_v2  ;;  %vm2071_vm13 = vcmp.ge.f32.partialorder %v1588_v3, 0.0 }
 0x1d4   :  { %v2646_v6 = vsel %vm2134_vm10, %v1746_v63, %v2390_v1  ;;  %v2327_v7 = vmul.f32 0.2, %v1588_v3 }
 0x1d5   :  { %v2902_v8 = vpack.c.bf16 %v2646_v6, %v2646_v6  ;;  %v2710_v9 = vsel %vm2198_vm11, %v1906_v0, %v2454_v4  ;;  %v2519_v10 = vsel %vm2007_vm12, %v1428_v2, %v2263_v5 }
 0x1d6   :  { %v2966_v11 = vpack.c.bf16 %v2710_v9, %v2710_v9  ;;  %v2775_v12 = vpack.c.bf16 %v2519_v10, %v2519_v10  ;;  %v2583_v13 = vsel %vm2071_vm13, %v1588_v3, %v2327_v7 }
 0x1d7   :  { %3159 = vst.msk [vmem:[%s5605_s2 + $0x2a0] sm:$0xf] %vm2990_vm3, %v2902_v8  ;;  %v2839_v14 = vpack.c.bf16 %v2583_v13, %v2583_v13 }
 0x1d8   :  { %3223 = vst.msk [vmem:[%s5605_s2 + $0x3a0] sm:$0xf] %vm2990_vm3, %v2966_v11 }
 0x1d9   :  { %3032 = vst.msk [vmem:[%s5605_s2 + $0xa4] sm:$0xf] %vm2990_vm3, %v2775_v12  ;;  %v1748_v16 = vpop.f32.mrf.mxu2  ;;  %v1908_v17 = vpop.f32.mrf.mxu3 }
 0x1da   :  { %3096 = vst.msk [vmem:[%s5605_s2 + $0x1a4] sm:$0xf] %vm2990_vm3, %v2839_v14  ;;  %vm2135_vm14 = vcmp.ge.f32.partialorder %v1748_v16, 0.0  ;;  %v2391_v21 = vmul.f32 0.2, %v1748_v16  ;;  %vm2199_vm15 = vcmp.ge.f32.partialorder %v1908_v17, 0.0  ;;  %v1431_v22 = vpop.f32.mrf.mxu0  ;;  %v1591_v23 = vpop.f32.mrf.mxu1 }
 0x1db   :  { %v2455_v24 = vmul.f32 0.2, %v1908_v17  ;;  %vm2008_vm1 = vcmp.ge.f32.partialorder %v1431_v22, 0.0  ;;  %v2264_v25 = vmul.f32 0.2, %v1431_v22  ;;  %vm2072_vm2 = vcmp.ge.f32.partialorder %v1591_v23, 0.0 }
 0x1dc   :  { %v2647_v26 = vsel %vm2135_vm14, %v1748_v16, %v2391_v21  ;;  %v2328_v27 = vmul.f32 0.2, %v1591_v23 }
 0x1dd   :  { %v2903_v28 = vpack.c.bf16 %v2647_v26, %v2647_v26  ;;  %v2711_v29 = vsel %vm2199_vm15, %v1908_v17, %v2455_v24  ;;  %v2520_v30 = vsel %vm2008_vm1, %v1431_v22, %v2264_v25  ;;  %3804 = vmatmul.msk.bf16.gmra.mxu0 %vm932_vm0, %v3932_v15  ;;  %3836 = vmatmul.msk.bf16.gmra.mxu1 %vm932_vm0, %v3964_v18  ;;  %v3966_v26 = vld [vmem:[%s5604_s0 + $0x1f8] sm:$0xff] }
 0x1de   :  { %v2967_v31 = vpack.c.bf16 %v2711_v29, %v2711_v29  ;;  %v2776_v32 = vpack.c.bf16 %v2520_v30, %v2520_v30  ;;  %v2584_v33 = vsel %vm2072_vm2, %v1591_v23, %v2328_v27  ;;  %3868 = vmatmul.msk.bf16.gmra.mxu2 %vm932_vm0, %v3996_v19  ;;  %3900 = vmatmul.msk.bf16.gmra.mxu3 %vm932_vm0, %v4028_v20  ;;  %v3934_v23 = vld [vmem:[%s5604_s0 + $0xf8] sm:$0xff] }
 0x1df   :  { %3160 = vst.msk [vmem:[%s5605_s2 + $0x2a4] sm:$0xf] %vm2990_vm3, %v2903_v28  ;;  %v2840_v34 = vpack.c.bf16 %v2584_v33, %v2584_v33  ;;  %v3998_v27 = vld [vmem:[%s5604_s0 + $0x2f8] sm:$0xff] }
 0x1e0   :  { %3224 = vst.msk [vmem:[%s5605_s2 + $0x3a4] sm:$0xf] %vm2990_vm3, %v2967_v31  ;;  %v4030_v28 = vld [vmem:[%s5604_s0 + $0x3f8] sm:$0xff] }
 0x1e1   :  { %3033 = vst.msk [vmem:[%s5605_s2 + $0xa8] sm:$0xf] %vm2990_vm3, %v2776_v32  ;;  %v1751_v35 = vpop.f32.mrf.mxu2  ;;  %v1911_v36 = vpop.f32.mrf.mxu3 }
 0x1e2   :  { %3097 = vst.msk [vmem:[%s5605_s2 + $0x1a8] sm:$0xf] %vm2990_vm3, %v2840_v34  ;;  %vm2136_vm4 = vcmp.ge.f32.partialorder %v1751_v35, 0.0  ;;  %v2392_v37 = vmul.f32 0.2, %v1751_v35  ;;  %vm2200_vm5 = vcmp.ge.f32.partialorder %v1911_v36, 0.0  ;;  %v1433_v38 = vpop.f32.mrf.mxu0  ;;  %v1593_v39 = vpop.f32.mrf.mxu1 }
 0x1e3   :  { %v2456_v40 = vmul.f32 0.2, %v1911_v36  ;;  %vm2009_vm6 = vcmp.ge.f32.partialorder %v1433_v38, 0.0  ;;  %v2265_v41 = vmul.f32 0.2, %v1433_v38  ;;  %vm2073_vm7 = vcmp.ge.f32.partialorder %v1593_v39, 0.0 }
 0x1e4   :  { %v2648_v42 = vsel %vm2136_vm4, %v1751_v35, %v2392_v37  ;;  %v2329_v43 = vmul.f32 0.2, %v1593_v39 }
 0x1e5   :  { %v2904_v44 = vpack.c.bf16 %v2648_v42, %v2648_v42  ;;  %v2712_v45 = vsel %vm2200_vm5, %v1911_v36, %v2456_v40  ;;  %v2521_v46 = vsel %vm2009_vm6, %v1433_v38, %v2265_v41 }
 0x1e6   :  { %v2968_v47 = vpack.c.bf16 %v2712_v45, %v2712_v45  ;;  %v2777_v48 = vpack.c.bf16 %v2521_v46, %v2521_v46  ;;  %v2585_v49 = vsel %vm2073_vm7, %v1593_v39, %v2329_v43 }
 0x1e7   :  { %3161 = vst.msk [vmem:[%s5605_s2 + $0x2a8] sm:$0xf] %vm2990_vm3, %v2904_v44  ;;  %v2841_v50 = vpack.c.bf16 %v2585_v49, %v2585_v49 }
 0x1e8   :  { %3225 = vst.msk [vmem:[%s5605_s2 + $0x3a8] sm:$0xf] %vm2990_vm3, %v2968_v47 }
 0x1e9   :  { %3034 = vst.msk [vmem:[%s5605_s2 + $0xac] sm:$0xf] %vm2990_vm3, %v2777_v48  ;;  %v1753_v52 = vpop.f32.mrf.mxu2  ;;  %v1913_v53 = vpop.f32.mrf.mxu3 }
 0x1ea   :  { %3098 = vst.msk [vmem:[%s5605_s2 + $0x1ac] sm:$0xf] %vm2990_vm3, %v2841_v50  ;;  %vm2137_vm8 = vcmp.ge.f32.partialorder %v1753_v52, 0.0  ;;  %v2393_v57 = vmul.f32 0.2, %v1753_v52  ;;  %vm2201_vm9 = vcmp.ge.f32.partialorder %v1913_v53, 0.0  ;;  %v1436_v58 = vpop.f32.mrf.mxu0  ;;  %v1596_v59 = vpop.f32.mrf.mxu1 }
 0x1eb   :  { %v2457_v60 = vmul.f32 0.2, %v1913_v53  ;;  %vm2010_vm10 = vcmp.ge.f32.partialorder %v1436_v58, 0.0  ;;  %v2266_v61 = vmul.f32 0.2, %v1436_v58  ;;  %vm2074_vm11 = vcmp.ge.f32.partialorder %v1596_v59, 0.0 }
 0x1ec   :  { %v2649_v62 = vsel %vm2137_vm8, %v1753_v52, %v2393_v57  ;;  %v2330_v63 = vmul.f32 0.2, %v1596_v59 }
 0x1ed   :  { %v2905_v0 = vpack.c.bf16 %v2649_v62, %v2649_v62  ;;  %v2713_v1 = vsel %vm2201_vm9, %v1913_v53, %v2457_v60  ;;  %v2522_v2 = vsel %vm2010_vm10, %v1436_v58, %v2266_v61  ;;  %3805 = vmatmul.msk.bf16.gmra.mxu0 %vm932_vm0, %v3933_v51  ;;  %3837 = vmatmul.msk.bf16.gmra.mxu1 %vm932_vm0, %v3965_v54 }
 0x1ee   :  { %v2969_v3 = vpack.c.bf16 %v2713_v1, %v2713_v1  ;;  %v2778_v4 = vpack.c.bf16 %v2522_v2, %v2522_v2  ;;  %v2586_v5 = vsel %vm2074_vm11, %v1596_v59, %v2330_v63  ;;  %3869 = vmatmul.msk.bf16.gmra.mxu2 %vm932_vm0, %v3997_v55  ;;  %3901 = vmatmul.msk.bf16.gmra.mxu3 %vm932_vm0, %v4029_v56 }
 0x1ef   :  { %3162 = vst.msk [vmem:[%s5605_s2 + $0x2ac] sm:$0xf] %vm2990_vm3, %v2905_v0  ;;  %v2842_v6 = vpack.c.bf16 %v2586_v5, %v2586_v5 }
 0x1f0   :  { %3226 = vst.msk [vmem:[%s5605_s2 + $0x3ac] sm:$0xf] %vm2990_vm3, %v2969_v3 }
 0x1f1   :  { %3035 = vst.msk [vmem:[%s5605_s2 + $0xb0] sm:$0xf] %vm2990_vm3, %v2778_v4  ;;  %v1756_v7 = vpop.f32.mrf.mxu2  ;;  %v1916_v8 = vpop.f32.mrf.mxu3 }
 0x1f2   :  { %3099 = vst.msk [vmem:[%s5605_s2 + $0x1b0] sm:$0xf] %vm2990_vm3, %v2842_v6  ;;  %vm2138_vm12 = vcmp.ge.f32.partialorder %v1756_v7, 0.0  ;;  %v2394_v9 = vmul.f32 0.2, %v1756_v7  ;;  %vm2202_vm13 = vcmp.ge.f32.partialorder %v1916_v8, 0.0  ;;  %v1438_v10 = vpop.f32.mrf.mxu0  ;;  %v1598_v11 = vpop.f32.mrf.mxu1 }
 0x1f3   :  { %v2458_v12 = vmul.f32 0.2, %v1916_v8  ;;  %vm2011_vm14 = vcmp.ge.f32.partialorder %v1438_v10, 0.0  ;;  %v2267_v13 = vmul.f32 0.2, %v1438_v10  ;;  %vm2075_vm15 = vcmp.ge.f32.partialorder %v1598_v11, 0.0 }
 0x1f4   :  { %v2650_v14 = vsel %vm2138_vm12, %v1756_v7, %v2394_v9  ;;  %v2331_v15 = vmul.f32 0.2, %v1598_v11 }
 0x1f5   :  { %v2906_v16 = vpack.c.bf16 %v2650_v14, %v2650_v14  ;;  %v2714_v17 = vsel %vm2202_vm13, %v1916_v8, %v2458_v12  ;;  %v2523_v18 = vsel %vm2011_vm14, %v1438_v10, %v2267_v13 }
 0x1f6   :  { %v2970_v19 = vpack.c.bf16 %v2714_v17, %v2714_v17  ;;  %v2779_v20 = vpack.c.bf16 %v2523_v18, %v2523_v18  ;;  %v2587_v21 = vsel %vm2075_vm15, %v1598_v11, %v2331_v15 }
 0x1f7   :  { %3163 = vst.msk [vmem:[%s5605_s2 + $0x2b0] sm:$0xf] %vm2990_vm3, %v2906_v16  ;;  %v2843_v22 = vpack.c.bf16 %v2587_v21, %v2587_v21 }
 0x1f8   :  { %3227 = vst.msk [vmem:[%s5605_s2 + $0x3b0] sm:$0xf] %vm2990_vm3, %v2970_v19 }
 0x1f9   :  { %3036 = vst.msk [vmem:[%s5605_s2 + $0xb4] sm:$0xf] %vm2990_vm3, %v2779_v20  ;;  %v1758_v24 = vpop.f32.mrf.mxu2  ;;  %v1918_v25 = vpop.f32.mrf.mxu3 }
 0x1fa   :  { %3100 = vst.msk [vmem:[%s5605_s2 + $0x1b4] sm:$0xf] %vm2990_vm3, %v2843_v22  ;;  %vm2139_vm1 = vcmp.ge.f32.partialorder %v1758_v24, 0.0  ;;  %v2395_v29 = vmul.f32 0.2, %v1758_v24  ;;  %vm2203_vm2 = vcmp.ge.f32.partialorder %v1918_v25, 0.0  ;;  %v1441_v30 = vpop.f32.mrf.mxu0  ;;  %v1601_v31 = vpop.f32.mrf.mxu1 }
 0x1fb   :  { %v2459_v32 = vmul.f32 0.2, %v1918_v25  ;;  %vm2012_vm4 = vcmp.ge.f32.partialorder %v1441_v30, 0.0  ;;  %v2268_v33 = vmul.f32 0.2, %v1441_v30  ;;  %vm2076_vm5 = vcmp.ge.f32.partialorder %v1601_v31, 0.0 }
 0x1fc   :  { %v2651_v34 = vsel %vm2139_vm1, %v1758_v24, %v2395_v29  ;;  %v2332_v35 = vmul.f32 0.2, %v1601_v31 }
 0x1fd   :  { %v2907_v36 = vpack.c.bf16 %v2651_v34, %v2651_v34  ;;  %v2715_v37 = vsel %vm2203_vm2, %v1918_v25, %v2459_v32  ;;  %v2524_v38 = vsel %vm2012_vm4, %v1441_v30, %v2268_v33  ;;  %3806 = vmatmul.msk.bf16.gmra.mxu0 %vm932_vm0, %v3934_v23  ;;  %3838 = vmatmul.msk.bf16.gmra.mxu1 %vm932_vm0, %v3966_v26 }
 0x1fe   :  { %v2971_v39 = vpack.c.bf16 %v2715_v37, %v2715_v37  ;;  %v2780_v40 = vpack.c.bf16 %v2524_v38, %v2524_v38  ;;  %v2588_v41 = vsel %vm2076_vm5, %v1601_v31, %v2332_v35  ;;  %3870 = vmatmul.msk.bf16.gmra.mxu2 %vm932_vm0, %v3998_v27  ;;  %3902 = vmatmul.msk.bf16.gmra.mxu3 %vm932_vm0, %v4030_v28 }
 0x1ff   :  { %3164 = vst.msk [vmem:[%s5605_s2 + $0x2b4] sm:$0xf] %vm2990_vm3, %v2907_v36  ;;  %v2844_v42 = vpack.c.bf16 %v2588_v41, %v2588_v41 }
 0x200   :  { %3228 = vst.msk [vmem:[%s5605_s2 + $0x3b4] sm:$0xf] %vm2990_vm3, %v2971_v39 }
 0x201   :  { %3037 = vst.msk [vmem:[%s5605_s2 + $0xb8] sm:$0xf] %vm2990_vm3, %v2780_v40  ;;  %v1761_v43 = vpop.f32.mrf.mxu2  ;;  %v1921_v44 = vpop.f32.mrf.mxu3 }
 0x202   :  { %3101 = vst.msk [vmem:[%s5605_s2 + $0x1b8] sm:$0xf] %vm2990_vm3, %v2844_v42  ;;  %vm2140_vm0 = vcmp.ge.f32.partialorder %v1761_v43, 0.0  ;;  %v2396_v45 = vmul.f32 0.2, %v1761_v43  ;;  %vm2204_vm6 = vcmp.ge.f32.partialorder %v1921_v44, 0.0  ;;  %v1443_v46 = vpop.f32.mrf.mxu0  ;;  %v1603_v47 = vpop.f32.mrf.mxu1 }
 0x203   :  { %v2460_v48 = vmul.f32 0.2, %v1921_v44  ;;  %vm2013_vm7 = vcmp.ge.f32.partialorder %v1443_v46, 0.0  ;;  %v2269_v49 = vmul.f32 0.2, %v1443_v46  ;;  %vm2077_vm8 = vcmp.ge.f32.partialorder %v1603_v47, 0.0 }
 0x204   :  { %v2652_v50 = vsel %vm2140_vm0, %v1761_v43, %v2396_v45  ;;  %v2333_v51 = vmul.f32 0.2, %v1603_v47 }
 0x205   :  { %v2908_v52 = vpack.c.bf16 %v2652_v50, %v2652_v50  ;;  %v2716_v53 = vsel %vm2204_vm6, %v1921_v44, %v2460_v48  ;;  %v2525_v54 = vsel %vm2013_vm7, %v1443_v46, %v2269_v49 }
 0x206   :  { %v2972_v55 = vpack.c.bf16 %v2716_v53, %v2716_v53  ;;  %v2781_v56 = vpack.c.bf16 %v2525_v54, %v2525_v54  ;;  %v2589_v57 = vsel %vm2077_vm8, %v1603_v47, %v2333_v51 }
 0x207   :  { %3165 = vst.msk [vmem:[%s5605_s2 + $0x2b8] sm:$0xf] %vm2990_vm3, %v2908_v52  ;;  %v2845_v58 = vpack.c.bf16 %v2589_v57, %v2589_v57 }
 0x208   :  { %3229 = vst.msk [vmem:[%s5605_s2 + $0x3b8] sm:$0xf] %vm2990_vm3, %v2972_v55 }
 0x209   :  { %3038 = vst.msk [vmem:[%s5605_s2 + $0xbc] sm:$0xf] %vm2990_vm3, %v2781_v56  ;;  %v1763_v59 = vpop.f32.mrf.mxu2  ;;  %v1923_v60 = vpop.f32.mrf.mxu3 }
 0x20a   :  { %3102 = vst.msk [vmem:[%s5605_s2 + $0x1bc] sm:$0xf] %vm2990_vm3, %v2845_v58  ;;  %vm2141_vm9 = vcmp.ge.f32.partialorder %v1763_v59, 0.0  ;;  %v2397_v61 = vmul.f32 0.2, %v1763_v59  ;;  %vm2205_vm10 = vcmp.ge.f32.partialorder %v1923_v60, 0.0  ;;  %v1446_v62 = vpop.f32.mrf.mxu0  ;;  %v1606_v63 = vpop.f32.mrf.mxu1 }
 0x20b   :  { %v2461_v0 = vmul.f32 0.2, %v1923_v60  ;;  %vm2014_vm11 = vcmp.ge.f32.partialorder %v1446_v62, 0.0  ;;  %v2270_v1 = vmul.f32 0.2, %v1446_v62  ;;  %vm2078_vm12 = vcmp.ge.f32.partialorder %v1606_v63, 0.0 }
 0x20c   :  { %v2653_v2 = vsel %vm2141_vm9, %v1763_v59, %v2397_v61  ;;  %v2334_v3 = vmul.f32 0.2, %v1606_v63 }
 0x20d   :  { %v2909_v4 = vpack.c.bf16 %v2653_v2, %v2653_v2  ;;  %v2717_v5 = vsel %vm2205_vm10, %v1923_v60, %v2461_v0  ;;  %v2526_v6 = vsel %vm2014_vm11, %v1446_v62, %v2270_v1 }
 0x20e   :  { %v2973_v7 = vpack.c.bf16 %v2717_v5, %v2717_v5  ;;  %v2782_v8 = vpack.c.bf16 %v2526_v6, %v2526_v6  ;;  %v2590_v9 = vsel %vm2078_vm12, %v1606_v63, %v2334_v3 }
 0x20f   :  { %3166 = vst.msk [vmem:[%s5605_s2 + $0x2bc] sm:$0xf] %vm2990_vm3, %v2909_v4  ;;  %v2846_v10 = vpack.c.bf16 %v2590_v9, %v2590_v9 }
 0x210   :  { %3230 = vst.msk [vmem:[%s5605_s2 + $0x3bc] sm:$0xf] %vm2990_vm3, %v2973_v7 }
 0x211   :  { %3039 = vst.msk [vmem:[%s5605_s2 + $0xc0] sm:$0xf] %vm2990_vm3, %v2782_v8  ;;  %v1766_v11 = vpop.f32.mrf.mxu2  ;;  %v1926_v12 = vpop.f32.mrf.mxu3 }
 0x212   :  { %3103 = vst.msk [vmem:[%s5605_s2 + $0x1c0] sm:$0xf] %vm2990_vm3, %v2846_v10  ;;  %vm2142_vm13 = vcmp.ge.f32.partialorder %v1766_v11, 0.0  ;;  %v2398_v13 = vmul.f32 0.2, %v1766_v11  ;;  %vm2206_vm14 = vcmp.ge.f32.partialorder %v1926_v12, 0.0  ;;  %v1448_v14 = vpop.f32.mrf.mxu0  ;;  %v1608_v15 = vpop.f32.mrf.mxu1 }
 0x213   :  { %v2462_v16 = vmul.f32 0.2, %v1926_v12  ;;  %vm2015_vm15 = vcmp.ge.f32.partialorder %v1448_v14, 0.0  ;;  %v2271_v17 = vmul.f32 0.2, %v1448_v14  ;;  %vm2079_vm1 = vcmp.ge.f32.partialorder %v1608_v15, 0.0 }
 0x214   :  { %v2654_v18 = vsel %vm2142_vm13, %v1766_v11, %v2398_v13  ;;  %v2335_v19 = vmul.f32 0.2, %v1608_v15 }
 0x215   :  { %v2910_v20 = vpack.c.bf16 %v2654_v18, %v2654_v18  ;;  %v2718_v21 = vsel %vm2206_vm14, %v1926_v12, %v2462_v16  ;;  %v2527_v22 = vsel %vm2015_vm15, %v1448_v14, %v2271_v17 }
 0x216   :  { %v2974_v23 = vpack.c.bf16 %v2718_v21, %v2718_v21  ;;  %v2783_v24 = vpack.c.bf16 %v2527_v22, %v2527_v22  ;;  %v2591_v25 = vsel %vm2079_vm1, %v1608_v15, %v2335_v19 }
 0x217   :  { %3167 = vst.msk [vmem:[%s5605_s2 + $0x2c0] sm:$0xf] %vm2990_vm3, %v2910_v20  ;;  %v2847_v26 = vpack.c.bf16 %v2591_v25, %v2591_v25 }
 0x218   :  { %3231 = vst.msk [vmem:[%s5605_s2 + $0x3c0] sm:$0xf] %vm2990_vm3, %v2974_v23 }
 0x219   :  { %3040 = vst.msk [vmem:[%s5605_s2 + $0xc4] sm:$0xf] %vm2990_vm3, %v2783_v24  ;;  %v1768_v27 = vpop.f32.mrf.mxu2  ;;  %v1928_v28 = vpop.f32.mrf.mxu3 }
 0x21a   :  { %3104 = vst.msk [vmem:[%s5605_s2 + $0x1c4] sm:$0xf] %vm2990_vm3, %v2847_v26  ;;  %vm2143_vm2 = vcmp.ge.f32.partialorder %v1768_v27, 0.0  ;;  %v2399_v29 = vmul.f32 0.2, %v1768_v27  ;;  %vm2207_vm4 = vcmp.ge.f32.partialorder %v1928_v28, 0.0  ;;  %v1451_v30 = vpop.f32.mrf.mxu0  ;;  %v1611_v31 = vpop.f32.mrf.mxu1 }
 0x21b   :  { %v2463_v32 = vmul.f32 0.2, %v1928_v28  ;;  %vm2016_vm5 = vcmp.ge.f32.partialorder %v1451_v30, 0.0  ;;  %v2272_v33 = vmul.f32 0.2, %v1451_v30  ;;  %vm2080_vm0 = vcmp.ge.f32.partialorder %v1611_v31, 0.0 }
 0x21c   :  { %v2655_v34 = vsel %vm2143_vm2, %v1768_v27, %v2399_v29  ;;  %v2336_v35 = vmul.f32 0.2, %v1611_v31 }
 0x21d   :  { %v2911_v36 = vpack.c.bf16 %v2655_v34, %v2655_v34  ;;  %v2719_v37 = vsel %vm2207_vm4, %v1928_v28, %v2463_v32  ;;  %v2528_v38 = vsel %vm2016_vm5, %v1451_v30, %v2272_v33 }
 0x21e   :  { %v2975_v39 = vpack.c.bf16 %v2719_v37, %v2719_v37  ;;  %v2784_v40 = vpack.c.bf16 %v2528_v38, %v2528_v38  ;;  %v2592_v41 = vsel %vm2080_vm0, %v1611_v31, %v2336_v35 }
 0x21f   :  { %3168 = vst.msk [vmem:[%s5605_s2 + $0x2c4] sm:$0xf] %vm2990_vm3, %v2911_v36  ;;  %v2848_v42 = vpack.c.bf16 %v2592_v41, %v2592_v41 }
 0x220   :  { %3232 = vst.msk [vmem:[%s5605_s2 + $0x3c4] sm:$0xf] %vm2990_vm3, %v2975_v39 }
 0x221   :  { %3041 = vst.msk [vmem:[%s5605_s2 + $0xc8] sm:$0xf] %vm2990_vm3, %v2784_v40  ;;  %v1771_v43 = vpop.f32.mrf.mxu2  ;;  %v1931_v44 = vpop.f32.mrf.mxu3 }
 0x222   :  { %3105 = vst.msk [vmem:[%s5605_s2 + $0x1c8] sm:$0xf] %vm2990_vm3, %v2848_v42  ;;  %vm2144_vm6 = vcmp.ge.f32.partialorder %v1771_v43, 0.0  ;;  %v2400_v45 = vmul.f32 0.2, %v1771_v43  ;;  %vm2208_vm7 = vcmp.ge.f32.partialorder %v1931_v44, 0.0  ;;  %v1453_v46 = vpop.f32.mrf.mxu0  ;;  %v1613_v47 = vpop.f32.mrf.mxu1 }
 0x223   :  { %v2464_v48 = vmul.f32 0.2, %v1931_v44  ;;  %vm2017_vm8 = vcmp.ge.f32.partialorder %v1453_v46, 0.0  ;;  %v2273_v49 = vmul.f32 0.2, %v1453_v46  ;;  %vm2081_vm9 = vcmp.ge.f32.partialorder %v1613_v47, 0.0 }
 0x224   :  { %v2656_v50 = vsel %vm2144_vm6, %v1771_v43, %v2400_v45  ;;  %v2337_v51 = vmul.f32 0.2, %v1613_v47 }
 0x225   :  { %v2912_v52 = vpack.c.bf16 %v2656_v50, %v2656_v50  ;;  %v2720_v53 = vsel %vm2208_vm7, %v1931_v44, %v2464_v48  ;;  %v2529_v54 = vsel %vm2017_vm8, %v1453_v46, %v2273_v49 }
 0x226   :  { %v2976_v55 = vpack.c.bf16 %v2720_v53, %v2720_v53  ;;  %v2785_v56 = vpack.c.bf16 %v2529_v54, %v2529_v54  ;;  %v2593_v57 = vsel %vm2081_vm9, %v1613_v47, %v2337_v51 }
 0x227   :  { %3169 = vst.msk [vmem:[%s5605_s2 + $0x2c8] sm:$0xf] %vm2990_vm3, %v2912_v52  ;;  %v2849_v58 = vpack.c.bf16 %v2593_v57, %v2593_v57 }
 0x228   :  { %3233 = vst.msk [vmem:[%s5605_s2 + $0x3c8] sm:$0xf] %vm2990_vm3, %v2976_v55 }
 0x229   :  { %3042 = vst.msk [vmem:[%s5605_s2 + $0xcc] sm:$0xf] %vm2990_vm3, %v2785_v56  ;;  %v1773_v59 = vpop.f32.mrf.mxu2  ;;  %v1933_v60 = vpop.f32.mrf.mxu3 }
 0x22a   :  { %3106 = vst.msk [vmem:[%s5605_s2 + $0x1cc] sm:$0xf] %vm2990_vm3, %v2849_v58  ;;  %vm2145_vm10 = vcmp.ge.f32.partialorder %v1773_v59, 0.0  ;;  %v2401_v61 = vmul.f32 0.2, %v1773_v59  ;;  %vm2209_vm11 = vcmp.ge.f32.partialorder %v1933_v60, 0.0  ;;  %v1456_v62 = vpop.f32.mrf.mxu0  ;;  %v1616_v63 = vpop.f32.mrf.mxu1 }
 0x22b   :  { %v2465_v0 = vmul.f32 0.2, %v1933_v60  ;;  %vm2018_vm12 = vcmp.ge.f32.partialorder %v1456_v62, 0.0  ;;  %v2274_v1 = vmul.f32 0.2, %v1456_v62  ;;  %vm2082_vm13 = vcmp.ge.f32.partialorder %v1616_v63, 0.0 }
 0x22c   :  { %v2657_v2 = vsel %vm2145_vm10, %v1773_v59, %v2401_v61  ;;  %v2338_v3 = vmul.f32 0.2, %v1616_v63 }
 0x22d   :  { %v2913_v4 = vpack.c.bf16 %v2657_v2, %v2657_v2  ;;  %v2721_v5 = vsel %vm2209_vm11, %v1933_v60, %v2465_v0  ;;  %v2530_v6 = vsel %vm2018_vm12, %v1456_v62, %v2274_v1 }
 0x22e   :  { %v2977_v7 = vpack.c.bf16 %v2721_v5, %v2721_v5  ;;  %v2786_v8 = vpack.c.bf16 %v2530_v6, %v2530_v6  ;;  %v2594_v9 = vsel %vm2082_vm13, %v1616_v63, %v2338_v3 }
 0x22f   :  { %3170 = vst.msk [vmem:[%s5605_s2 + $0x2cc] sm:$0xf] %vm2990_vm3, %v2913_v4  ;;  %v2850_v10 = vpack.c.bf16 %v2594_v9, %v2594_v9 }
 0x230   :  { %3234 = vst.msk [vmem:[%s5605_s2 + $0x3cc] sm:$0xf] %vm2990_vm3, %v2977_v7 }
 0x231   :  { %3043 = vst.msk [vmem:[%s5605_s2 + $0xd0] sm:$0xf] %vm2990_vm3, %v2786_v8  ;;  %v1776_v11 = vpop.f32.mrf.mxu2  ;;  %v1936_v12 = vpop.f32.mrf.mxu3 }
 0x232   :  { %3107 = vst.msk [vmem:[%s5605_s2 + $0x1d0] sm:$0xf] %vm2990_vm3, %v2850_v10  ;;  %vm2146_vm14 = vcmp.ge.f32.partialorder %v1776_v11, 0.0  ;;  %v2402_v13 = vmul.f32 0.2, %v1776_v11  ;;  %vm2210_vm15 = vcmp.ge.f32.partialorder %v1936_v12, 0.0  ;;  %v1458_v14 = vpop.f32.mrf.mxu0  ;;  %v1618_v15 = vpop.f32.mrf.mxu1 }
 0x233   :  { %v2466_v16 = vmul.f32 0.2, %v1936_v12  ;;  %vm2019_vm1 = vcmp.ge.f32.partialorder %v1458_v14, 0.0  ;;  %v2275_v17 = vmul.f32 0.2, %v1458_v14  ;;  %vm2083_vm2 = vcmp.ge.f32.partialorder %v1618_v15, 0.0 }
 0x234   :  { %v2658_v18 = vsel %vm2146_vm14, %v1776_v11, %v2402_v13  ;;  %v2339_v19 = vmul.f32 0.2, %v1618_v15 }
 0x235   :  { %v2914_v20 = vpack.c.bf16 %v2658_v18, %v2658_v18  ;;  %v2722_v21 = vsel %vm2210_vm15, %v1936_v12, %v2466_v16  ;;  %v2531_v22 = vsel %vm2019_vm1, %v1458_v14, %v2275_v17 }
 0x236   :  { %v2978_v23 = vpack.c.bf16 %v2722_v21, %v2722_v21  ;;  %v2787_v24 = vpack.c.bf16 %v2531_v22, %v2531_v22  ;;  %v2595_v25 = vsel %vm2083_vm2, %v1618_v15, %v2339_v19 }
 0x237   :  { %3171 = vst.msk [vmem:[%s5605_s2 + $0x2d0] sm:$0xf] %vm2990_vm3, %v2914_v20  ;;  %v2851_v26 = vpack.c.bf16 %v2595_v25, %v2595_v25 }
 0x238   :  { %3235 = vst.msk [vmem:[%s5605_s2 + $0x3d0] sm:$0xf] %vm2990_vm3, %v2978_v23 }
 0x239   :  { %3044 = vst.msk [vmem:[%s5605_s2 + $0xd4] sm:$0xf] %vm2990_vm3, %v2787_v24  ;;  %v1778_v27 = vpop.f32.mrf.mxu2  ;;  %v1938_v28 = vpop.f32.mrf.mxu3 }
 0x23a   :  { %3108 = vst.msk [vmem:[%s5605_s2 + $0x1d4] sm:$0xf] %vm2990_vm3, %v2851_v26  ;;  %vm2147_vm4 = vcmp.ge.f32.partialorder %v1778_v27, 0.0  ;;  %v2403_v29 = vmul.f32 0.2, %v1778_v27  ;;  %vm2211_vm5 = vcmp.ge.f32.partialorder %v1938_v28, 0.0  ;;  %v1461_v30 = vpop.f32.mrf.mxu0  ;;  %v1621_v31 = vpop.f32.mrf.mxu1 }
 0x23b   :  { %v2467_v32 = vmul.f32 0.2, %v1938_v28  ;;  %vm2020_vm0 = vcmp.ge.f32.partialorder %v1461_v30, 0.0  ;;  %v2276_v33 = vmul.f32 0.2, %v1461_v30  ;;  %vm2084_vm6 = vcmp.ge.f32.partialorder %v1621_v31, 0.0 }
 0x23c   :  { %v2659_v34 = vsel %vm2147_vm4, %v1778_v27, %v2403_v29  ;;  %v2340_v35 = vmul.f32 0.2, %v1621_v31 }
 0x23d   :  { %v2915_v36 = vpack.c.bf16 %v2659_v34, %v2659_v34  ;;  %v2723_v37 = vsel %vm2211_vm5, %v1938_v28, %v2467_v32  ;;  %v2532_v38 = vsel %vm2020_vm0, %v1461_v30, %v2276_v33 }
 0x23e   :  { %v2979_v39 = vpack.c.bf16 %v2723_v37, %v2723_v37  ;;  %v2788_v40 = vpack.c.bf16 %v2532_v38, %v2532_v38  ;;  %v2596_v41 = vsel %vm2084_vm6, %v1621_v31, %v2340_v35 }
 0x23f   :  { %3172 = vst.msk [vmem:[%s5605_s2 + $0x2d4] sm:$0xf] %vm2990_vm3, %v2915_v36  ;;  %v2852_v42 = vpack.c.bf16 %v2596_v41, %v2596_v41 }
 0x240   :  { %3236 = vst.msk [vmem:[%s5605_s2 + $0x3d4] sm:$0xf] %vm2990_vm3, %v2979_v39 }
 0x241   :  { %3045 = vst.msk [vmem:[%s5605_s2 + $0xd8] sm:$0xf] %vm2990_vm3, %v2788_v40  ;;  %v1781_v43 = vpop.f32.mrf.mxu2  ;;  %v1941_v44 = vpop.f32.mrf.mxu3 }
 0x242   :  { %3109 = vst.msk [vmem:[%s5605_s2 + $0x1d8] sm:$0xf] %vm2990_vm3, %v2852_v42  ;;  %vm2148_vm7 = vcmp.ge.f32.partialorder %v1781_v43, 0.0  ;;  %v2404_v45 = vmul.f32 0.2, %v1781_v43  ;;  %vm2212_vm8 = vcmp.ge.f32.partialorder %v1941_v44, 0.0  ;;  %v1463_v46 = vpop.f32.mrf.mxu0  ;;  %v1623_v47 = vpop.f32.mrf.mxu1 }
 0x243   :  { %v2468_v48 = vmul.f32 0.2, %v1941_v44  ;;  %vm2021_vm9 = vcmp.ge.f32.partialorder %v1463_v46, 0.0  ;;  %v2277_v49 = vmul.f32 0.2, %v1463_v46  ;;  %vm2085_vm10 = vcmp.ge.f32.partialorder %v1623_v47, 0.0 }
 0x244   :  { %v2660_v50 = vsel %vm2148_vm7, %v1781_v43, %v2404_v45  ;;  %v2341_v51 = vmul.f32 0.2, %v1623_v47 }
 0x245   :  { %v2916_v52 = vpack.c.bf16 %v2660_v50, %v2660_v50  ;;  %v2724_v53 = vsel %vm2212_vm8, %v1941_v44, %v2468_v48  ;;  %v2533_v54 = vsel %vm2021_vm9, %v1463_v46, %v2277_v49 }
 0x246   :  { %v2980_v55 = vpack.c.bf16 %v2724_v53, %v2724_v53  ;;  %v2789_v56 = vpack.c.bf16 %v2533_v54, %v2533_v54  ;;  %v2597_v57 = vsel %vm2085_vm10, %v1623_v47, %v2341_v51 }
 0x247   :  { %3173 = vst.msk [vmem:[%s5605_s2 + $0x2d8] sm:$0xf] %vm2990_vm3, %v2916_v52  ;;  %v2853_v58 = vpack.c.bf16 %v2597_v57, %v2597_v57 }
 0x248   :  { %3237 = vst.msk [vmem:[%s5605_s2 + $0x3d8] sm:$0xf] %vm2990_vm3, %v2980_v55 }
 0x249   :  { %3046 = vst.msk [vmem:[%s5605_s2 + $0xdc] sm:$0xf] %vm2990_vm3, %v2789_v56  ;;  %v1783_v59 = vpop.f32.mrf.mxu2  ;;  %v1943_v60 = vpop.f32.mrf.mxu3 }
 0x24a   :  { %3110 = vst.msk [vmem:[%s5605_s2 + $0x1dc] sm:$0xf] %vm2990_vm3, %v2853_v58  ;;  %vm2149_vm11 = vcmp.ge.f32.partialorder %v1783_v59, 0.0  ;;  %v2405_v61 = vmul.f32 0.2, %v1783_v59  ;;  %vm2213_vm12 = vcmp.ge.f32.partialorder %v1943_v60, 0.0  ;;  %v1466_v62 = vpop.f32.mrf.mxu0  ;;  %v1626_v63 = vpop.f32.mrf.mxu1 }
 0x24b   :  { %v2469_v0 = vmul.f32 0.2, %v1943_v60  ;;  %vm2022_vm13 = vcmp.ge.f32.partialorder %v1466_v62, 0.0  ;;  %v2278_v1 = vmul.f32 0.2, %v1466_v62  ;;  %vm2086_vm14 = vcmp.ge.f32.partialorder %v1626_v63, 0.0 }
 0x24c   :  { %v2661_v2 = vsel %vm2149_vm11, %v1783_v59, %v2405_v61  ;;  %v2342_v3 = vmul.f32 0.2, %v1626_v63 }
 0x24d   :  { %v2917_v4 = vpack.c.bf16 %v2661_v2, %v2661_v2  ;;  %v2725_v5 = vsel %vm2213_vm12, %v1943_v60, %v2469_v0  ;;  %v2534_v6 = vsel %vm2022_vm13, %v1466_v62, %v2278_v1 }
 0x24e   :  { %v2981_v7 = vpack.c.bf16 %v2725_v5, %v2725_v5  ;;  %v2790_v8 = vpack.c.bf16 %v2534_v6, %v2534_v6  ;;  %v2598_v9 = vsel %vm2086_vm14, %v1626_v63, %v2342_v3 }
 0x24f   :  { %3174 = vst.msk [vmem:[%s5605_s2 + $0x2dc] sm:$0xf] %vm2990_vm3, %v2917_v4  ;;  %v2854_v10 = vpack.c.bf16 %v2598_v9, %v2598_v9 }
 0x250   :  { %3238 = vst.msk [vmem:[%s5605_s2 + $0x3dc] sm:$0xf] %vm2990_vm3, %v2981_v7 }
 0x251   :  { %3047 = vst.msk [vmem:[%s5605_s2 + $0xe0] sm:$0xf] %vm2990_vm3, %v2790_v8  ;;  %v1786_v11 = vpop.f32.mrf.mxu2  ;;  %v1946_v12 = vpop.f32.mrf.mxu3 }
 0x252   :  { %3111 = vst.msk [vmem:[%s5605_s2 + $0x1e0] sm:$0xf] %vm2990_vm3, %v2854_v10  ;;  %vm2150_vm15 = vcmp.ge.f32.partialorder %v1786_v11, 0.0  ;;  %v2406_v13 = vmul.f32 0.2, %v1786_v11  ;;  %vm2214_vm1 = vcmp.ge.f32.partialorder %v1946_v12, 0.0  ;;  %v1468_v14 = vpop.f32.mrf.mxu0  ;;  %v1628_v15 = vpop.f32.mrf.mxu1 }
 0x253   :  { %v2470_v16 = vmul.f32 0.2, %v1946_v12  ;;  %vm2023_vm2 = vcmp.ge.f32.partialorder %v1468_v14, 0.0  ;;  %v2279_v17 = vmul.f32 0.2, %v1468_v14  ;;  %vm2087_vm4 = vcmp.ge.f32.partialorder %v1628_v15, 0.0 }
 0x254   :  { %v2662_v18 = vsel %vm2150_vm15, %v1786_v11, %v2406_v13  ;;  %v2343_v19 = vmul.f32 0.2, %v1628_v15 }
 0x255   :  { %v2918_v20 = vpack.c.bf16 %v2662_v18, %v2662_v18  ;;  %v2726_v21 = vsel %vm2214_vm1, %v1946_v12, %v2470_v16  ;;  %v2535_v22 = vsel %vm2023_vm2, %v1468_v14, %v2279_v17 }
 0x256   :  { %v2982_v23 = vpack.c.bf16 %v2726_v21, %v2726_v21  ;;  %v2791_v24 = vpack.c.bf16 %v2535_v22, %v2535_v22  ;;  %v2599_v25 = vsel %vm2087_vm4, %v1628_v15, %v2343_v19 }
 0x257   :  { %3175 = vst.msk [vmem:[%s5605_s2 + $0x2e0] sm:$0xf] %vm2990_vm3, %v2918_v20  ;;  %v2855_v26 = vpack.c.bf16 %v2599_v25, %v2599_v25 }
 0x258   :  { %3239 = vst.msk [vmem:[%s5605_s2 + $0x3e0] sm:$0xf] %vm2990_vm3, %v2982_v23 }
 0x259   :  { %3048 = vst.msk [vmem:[%s5605_s2 + $0xe4] sm:$0xf] %vm2990_vm3, %v2791_v24  ;;  %v1788_v27 = vpop.f32.mrf.mxu2  ;;  %v1948_v28 = vpop.f32.mrf.mxu3 }
 0x25a   :  { %3112 = vst.msk [vmem:[%s5605_s2 + $0x1e4] sm:$0xf] %vm2990_vm3, %v2855_v26  ;;  %vm2151_vm5 = vcmp.ge.f32.partialorder %v1788_v27, 0.0  ;;  %v2407_v29 = vmul.f32 0.2, %v1788_v27  ;;  %vm2215_vm0 = vcmp.ge.f32.partialorder %v1948_v28, 0.0  ;;  %v1471_v30 = vpop.f32.mrf.mxu0  ;;  %v1631_v31 = vpop.f32.mrf.mxu1 }
 0x25b   :  { %v2471_v32 = vmul.f32 0.2, %v1948_v28  ;;  %vm2024_vm6 = vcmp.ge.f32.partialorder %v1471_v30, 0.0  ;;  %v2280_v33 = vmul.f32 0.2, %v1471_v30  ;;  %vm2088_vm7 = vcmp.ge.f32.partialorder %v1631_v31, 0.0 }
 0x25c   :  { %v2663_v34 = vsel %vm2151_vm5, %v1788_v27, %v2407_v29  ;;  %v2344_v35 = vmul.f32 0.2, %v1631_v31 }
 0x25d   :  { %v2919_v36 = vpack.c.bf16 %v2663_v34, %v2663_v34  ;;  %v2727_v37 = vsel %vm2215_vm0, %v1948_v28, %v2471_v32  ;;  %v2536_v38 = vsel %vm2024_vm6, %v1471_v30, %v2280_v33 }
 0x25e   :  { %v2983_v39 = vpack.c.bf16 %v2727_v37, %v2727_v37  ;;  %v2792_v40 = vpack.c.bf16 %v2536_v38, %v2536_v38  ;;  %v2600_v41 = vsel %vm2088_vm7, %v1631_v31, %v2344_v35 }
 0x25f   :  { %3176 = vst.msk [vmem:[%s5605_s2 + $0x2e4] sm:$0xf] %vm2990_vm3, %v2919_v36  ;;  %v2856_v42 = vpack.c.bf16 %v2600_v41, %v2600_v41 }
 0x260   :  { %3240 = vst.msk [vmem:[%s5605_s2 + $0x3e4] sm:$0xf] %vm2990_vm3, %v2983_v39 }
 0x261   :  { %3049 = vst.msk [vmem:[%s5605_s2 + $0xe8] sm:$0xf] %vm2990_vm3, %v2792_v40  ;;  %v1791_v43 = vpop.f32.mrf.mxu2  ;;  %v1951_v44 = vpop.f32.mrf.mxu3 }
 0x262   :  { %3113 = vst.msk [vmem:[%s5605_s2 + $0x1e8] sm:$0xf] %vm2990_vm3, %v2856_v42  ;;  %vm2152_vm8 = vcmp.ge.f32.partialorder %v1791_v43, 0.0  ;;  %v2408_v45 = vmul.f32 0.2, %v1791_v43  ;;  %vm2216_vm9 = vcmp.ge.f32.partialorder %v1951_v44, 0.0  ;;  %v1473_v46 = vpop.f32.mrf.mxu0  ;;  %v1633_v47 = vpop.f32.mrf.mxu1 }
 0x263   :  { %v2472_v48 = vmul.f32 0.2, %v1951_v44  ;;  %vm2025_vm10 = vcmp.ge.f32.partialorder %v1473_v46, 0.0  ;;  %v2281_v49 = vmul.f32 0.2, %v1473_v46  ;;  %vm2089_vm11 = vcmp.ge.f32.partialorder %v1633_v47, 0.0 }
 0x264   :  { %v2664_v50 = vsel %vm2152_vm8, %v1791_v43, %v2408_v45  ;;  %v2345_v51 = vmul.f32 0.2, %v1633_v47 }
 0x265   :  { %v2920_v52 = vpack.c.bf16 %v2664_v50, %v2664_v50  ;;  %v2728_v53 = vsel %vm2216_vm9, %v1951_v44, %v2472_v48  ;;  %v2537_v54 = vsel %vm2025_vm10, %v1473_v46, %v2281_v49 }
 0x266   :  { %v2984_v55 = vpack.c.bf16 %v2728_v53, %v2728_v53  ;;  %v2793_v56 = vpack.c.bf16 %v2537_v54, %v2537_v54  ;;  %v2601_v57 = vsel %vm2089_vm11, %v1633_v47, %v2345_v51 }
 0x267   :  { %3177 = vst.msk [vmem:[%s5605_s2 + $0x2e8] sm:$0xf] %vm2990_vm3, %v2920_v52  ;;  %v2857_v58 = vpack.c.bf16 %v2601_v57, %v2601_v57 }
 0x268   :  { %3241 = vst.msk [vmem:[%s5605_s2 + $0x3e8] sm:$0xf] %vm2990_vm3, %v2984_v55 }
 0x269   :  { %3050 = vst.msk [vmem:[%s5605_s2 + $0xec] sm:$0xf] %vm2990_vm3, %v2793_v56  ;;  %v1793_v59 = vpop.f32.mrf.mxu2  ;;  %v1953_v60 = vpop.f32.mrf.mxu3 }
 0x26a   :  { %3114 = vst.msk [vmem:[%s5605_s2 + $0x1ec] sm:$0xf] %vm2990_vm3, %v2857_v58  ;;  %vm2153_vm12 = vcmp.ge.f32.partialorder %v1793_v59, 0.0  ;;  %v2409_v61 = vmul.f32 0.2, %v1793_v59  ;;  %vm2217_vm13 = vcmp.ge.f32.partialorder %v1953_v60, 0.0  ;;  %v1476_v62 = vpop.f32.mrf.mxu0  ;;  %v1636_v63 = vpop.f32.mrf.mxu1 }
 0x26b   :  { %v2473_v0 = vmul.f32 0.2, %v1953_v60  ;;  %vm2026_vm14 = vcmp.ge.f32.partialorder %v1476_v62, 0.0  ;;  %v2282_v1 = vmul.f32 0.2, %v1476_v62  ;;  %vm2090_vm15 = vcmp.ge.f32.partialorder %v1636_v63, 0.0 }
 0x26c   :  { %v2665_v2 = vsel %vm2153_vm12, %v1793_v59, %v2409_v61  ;;  %v2346_v3 = vmul.f32 0.2, %v1636_v63 }
 0x26d   :  { %v2921_v4 = vpack.c.bf16 %v2665_v2, %v2665_v2  ;;  %v2729_v5 = vsel %vm2217_vm13, %v1953_v60, %v2473_v0  ;;  %v2538_v6 = vsel %vm2026_vm14, %v1476_v62, %v2282_v1 }
 0x26e   :  { %v2985_v7 = vpack.c.bf16 %v2729_v5, %v2729_v5  ;;  %v2794_v8 = vpack.c.bf16 %v2538_v6, %v2538_v6  ;;  %v2602_v9 = vsel %vm2090_vm15, %v1636_v63, %v2346_v3 }
 0x26f   :  { %3178 = vst.msk [vmem:[%s5605_s2 + $0x2ec] sm:$0xf] %vm2990_vm3, %v2921_v4  ;;  %v2858_v10 = vpack.c.bf16 %v2602_v9, %v2602_v9 }
 0x270   :  { %3242 = vst.msk [vmem:[%s5605_s2 + $0x3ec] sm:$0xf] %vm2990_vm3, %v2985_v7 }
 0x271   :  { %3051 = vst.msk [vmem:[%s5605_s2 + $0xf0] sm:$0xf] %vm2990_vm3, %v2794_v8  ;;  %v1796_v11 = vpop.f32.mrf.mxu2  ;;  %v1956_v12 = vpop.f32.mrf.mxu3 }
 0x272   :  { %3115 = vst.msk [vmem:[%s5605_s2 + $0x1f0] sm:$0xf] %vm2990_vm3, %v2858_v10  ;;  %vm2154_vm1 = vcmp.ge.f32.partialorder %v1796_v11, 0.0  ;;  %v2410_v13 = vmul.f32 0.2, %v1796_v11  ;;  %vm2218_vm2 = vcmp.ge.f32.partialorder %v1956_v12, 0.0  ;;  %v1478_v14 = vpop.f32.mrf.mxu0  ;;  %v1638_v15 = vpop.f32.mrf.mxu1 }
 0x273   :  { %v2474_v16 = vmul.f32 0.2, %v1956_v12  ;;  %vm2027_vm4 = vcmp.ge.f32.partialorder %v1478_v14, 0.0  ;;  %v2283_v17 = vmul.f32 0.2, %v1478_v14  ;;  %vm2091_vm5 = vcmp.ge.f32.partialorder %v1638_v15, 0.0 }
 0x274   :  { %v2666_v18 = vsel %vm2154_vm1, %v1796_v11, %v2410_v13  ;;  %v2347_v19 = vmul.f32 0.2, %v1638_v15 }
 0x275   :  { %v2922_v20 = vpack.c.bf16 %v2666_v18, %v2666_v18  ;;  %v2730_v21 = vsel %vm2218_vm2, %v1956_v12, %v2474_v16  ;;  %v2539_v22 = vsel %vm2027_vm4, %v1478_v14, %v2283_v17 }
 0x276   :  { %v2986_v23 = vpack.c.bf16 %v2730_v21, %v2730_v21  ;;  %v2795_v24 = vpack.c.bf16 %v2539_v22, %v2539_v22  ;;  %v2603_v25 = vsel %vm2091_vm5, %v1638_v15, %v2347_v19 }
 0x277   :  { %3179 = vst.msk [vmem:[%s5605_s2 + $0x2f0] sm:$0xf] %vm2990_vm3, %v2922_v20  ;;  %v2859_v26 = vpack.c.bf16 %v2603_v25, %v2603_v25 }
 0x278   :  { %3243 = vst.msk [vmem:[%s5605_s2 + $0x3f0] sm:$0xf] %vm2990_vm3, %v2986_v23 }
 0x279   :  { %3052 = vst.msk [vmem:[%s5605_s2 + $0xf4] sm:$0xf] %vm2990_vm3, %v2795_v24  ;;  %v1798_v27 = vpop.f32.mrf.mxu2  ;;  %v1958_v28 = vpop.f32.mrf.mxu3 }
 0x27a   :  { %3116 = vst.msk [vmem:[%s5605_s2 + $0x1f4] sm:$0xf] %vm2990_vm3, %v2859_v26  ;;  %vm2155_vm0 = vcmp.ge.f32.partialorder %v1798_v27, 0.0  ;;  %v2411_v29 = vmul.f32 0.2, %v1798_v27  ;;  %vm2219_vm6 = vcmp.ge.f32.partialorder %v1958_v28, 0.0  ;;  %v1481_v30 = vpop.f32.mrf.mxu0  ;;  %v1641_v31 = vpop.f32.mrf.mxu1 }
 0x27b   :  { %v2475_v32 = vmul.f32 0.2, %v1958_v28  ;;  %vm2028_vm7 = vcmp.ge.f32.partialorder %v1481_v30, 0.0  ;;  %v2284_v33 = vmul.f32 0.2, %v1481_v30  ;;  %vm2092_vm8 = vcmp.ge.f32.partialorder %v1641_v31, 0.0 }
 0x27c   :  { %v2667_v34 = vsel %vm2155_vm0, %v1798_v27, %v2411_v29  ;;  %v2348_v35 = vmul.f32 0.2, %v1641_v31 }
 0x27d   :  { %v2923_v36 = vpack.c.bf16 %v2667_v34, %v2667_v34  ;;  %v2731_v37 = vsel %vm2219_vm6, %v1958_v28, %v2475_v32  ;;  %v2540_v38 = vsel %vm2028_vm7, %v1481_v30, %v2284_v33 }
 0x27e   :  { %v2987_v39 = vpack.c.bf16 %v2731_v37, %v2731_v37  ;;  %v2796_v40 = vpack.c.bf16 %v2540_v38, %v2540_v38  ;;  %v2604_v41 = vsel %vm2092_vm8, %v1641_v31, %v2348_v35 }
 0x27f   :  { %3180 = vst.msk [vmem:[%s5605_s2 + $0x2f4] sm:$0xf] %vm2990_vm3, %v2923_v36  ;;  %v2860_v42 = vpack.c.bf16 %v2604_v41, %v2604_v41 }
 0x280   :  { %3244 = vst.msk [vmem:[%s5605_s2 + $0x3f4] sm:$0xf] %vm2990_vm3, %v2987_v39 }
 0x281   :  { %3053 = vst.msk [vmem:[%s5605_s2 + $0xf8] sm:$0xf] %vm2990_vm3, %v2796_v40  ;;  %v1801_v43 = vpop.f32.mrf.mxu2  ;;  %v1961_v44 = vpop.f32.mrf.mxu3 }
 0x282   :  { %3117 = vst.msk [vmem:[%s5605_s2 + $0x1f8] sm:$0xf] %vm2990_vm3, %v2860_v42  ;;  %vm2156_vm9 = vcmp.ge.f32.partialorder %v1801_v43, 0.0  ;;  %v2412_v45 = vmul.f32 0.2, %v1801_v43  ;;  %vm2220_vm10 = vcmp.ge.f32.partialorder %v1961_v44, 0.0  ;;  %v1483_v46 = vpop.f32.mrf.mxu0  ;;  %v1643_v47 = vpop.f32.mrf.mxu1 }
 0x283   :  { %v2476_v48 = vmul.f32 0.2, %v1961_v44  ;;  %vm2029_vm11 = vcmp.ge.f32.partialorder %v1483_v46, 0.0  ;;  %v2285_v49 = vmul.f32 0.2, %v1483_v46  ;;  %vm2093_vm12 = vcmp.ge.f32.partialorder %v1643_v47, 0.0 }
 0x284   :  { %v2668_v50 = vsel %vm2156_vm9, %v1801_v43, %v2412_v45  ;;  %v2349_v51 = vmul.f32 0.2, %v1643_v47 }
 0x285   :  { %v2924_v52 = vpack.c.bf16 %v2668_v50, %v2668_v50  ;;  %v2732_v53 = vsel %vm2220_vm10, %v1961_v44, %v2476_v48  ;;  %v2541_v54 = vsel %vm2029_vm11, %v1483_v46, %v2285_v49 }
 0x286   :  { %v2988_v55 = vpack.c.bf16 %v2732_v53, %v2732_v53  ;;  %v2797_v56 = vpack.c.bf16 %v2541_v54, %v2541_v54  ;;  %v2605_v57 = vsel %vm2093_vm12, %v1643_v47, %v2349_v51 }
 0x287   :  { %3181 = vst.msk [vmem:[%s5605_s2 + $0x2f8] sm:$0xf] %vm2990_vm3, %v2924_v52  ;;  %v2861_v58 = vpack.c.bf16 %v2605_v57, %v2605_v57 }
 0x288   :  { %3245 = vst.msk [vmem:[%s5605_s2 + $0x3f8] sm:$0xf] %vm2990_vm3, %v2988_v55 }
 0x289   :  { %3054 = vst.msk [vmem:[%s5605_s2 + $0xfc] sm:$0xf] %vm2990_vm3, %v2797_v56  ;;  %v1803_v59 = vpop.f32.mrf.mxu2  ;;  %v1963_v60 = vpop.f32.mrf.mxu3 }
 0x28a   :  { %3118 = vst.msk [vmem:[%s5605_s2 + $0x1fc] sm:$0xf] %vm2990_vm3, %v2861_v58  ;;  %vm2157_vm13 = vcmp.ge.f32.partialorder %v1803_v59, 0.0  ;;  %v2413_v61 = vmul.f32 0.2, %v1803_v59  ;;  %vm2221_vm14 = vcmp.ge.f32.partialorder %v1963_v60, 0.0 }
 0x28b   :  { %v2477_v62 = vmul.f32 0.2, %v1963_v60 }
 0x28c   :  { %v2669_v63 = vsel %vm2157_vm13, %v1803_v59, %v2413_v61 }
 0x28d   :  { %v2925_v0 = vpack.c.bf16 %v2669_v63, %v2669_v63  ;;  %v2733_v1 = vsel %vm2221_vm14, %v1963_v60, %v2477_v62 }
 0x28e   :  { %v2989_v2 = vpack.c.bf16 %v2733_v1, %v2733_v1 }
 0x28f   :  { %3182 = vst.msk [vmem:[%s5605_s2 + $0x2fc] sm:$0xf] %vm2990_vm3, %v2925_v0 }
 0x290   :  { %3246 = vst.msk [vmem:[%s5605_s2 + $0x3fc] sm:$0xf] %vm2990_vm3, %v2989_v2 }

// kernel: _lambda_.9
= control target key start
LH: loop header
LB: loop body
LE: loop exit
PB: predicated region body
PF: predicated region fallthrough
CT: control target
= control target key end

     0   :  { %vm901_vm0 = vcmask 125952   ;;  %vm503_vm1 = vcmask 130048   ;;  %vm637_vm2 = vcmask 122880   ;;  %s2121_s1 = inlined_call_operand.vmem [shape: bf16[128,16], index: 1, kind: input, shape index: {}]   ;;  %s2122_s0 = inlined_call_operand.vmem [shape: bf16[512,128], index: 0, kind: input, shape index: {}]   ;;  %s2123_s2 = inlined_call_operand.vmem [shape: bf16[512,16], index: 2, kind: output, shape index: {0}]   ;;  %s2124_s3 = inlined_call_operand.vmem [shape: f32[1,1,16], index: 3, kind: output, shape index: {1}]   ;;  %s2125_s4 = inlined_call_operand.vmem [shape: f32[1,1,16], index: 4, kind: output, shape index: {2}]  }
   0x1   :  { %v1177_v0 = vld [vmem:[%s2121_s1 + $0x38] sm:$0xff]  ;;  %v1176_v1 = vld [vmem:[%s2121_s1 + $0x30] sm:$0xff]  ;;  %v1175_v2 = vld [vmem:[%s2121_s1 + $0x28] sm:$0xff] }
   0x2   :  { %334 = vmatpush.bf16.msra.mxu0 %v1177_v0  ;;  %1178 = vmatpush.bf16.msra.mxu1 %v1177_v0  ;;  %v1174_v3 = vld [vmem:[%s2121_s1 + $0x20] sm:$0xff]  ;;  %v1173_v4 = vld [vmem:[%s2121_s1 + $0x18] sm:$0xff]  ;;  %v1172_v5 = vld [vmem:[%s2121_s1 + $0x10] sm:$0xff] }
   0x3   :  { %1179 = vmatpush.bf16.msra.mxu2 %v1177_v0  ;;  %1180 = vmatpush.bf16.msra.mxu3 %v1177_v0  ;;  %v1171_v6 = vld [vmem:[%s2121_s1 + $0x8] sm:$0xff]  ;;  %v1170_v7 = vld [vmem:[%s2121_s1] sm:$0xff]  ;;  %v1140_v13 = vld [vmem:[%s2122_s0 + $0x10] sm:$0xff] }
   0x4   :  { %v1138_v8 = vld [vmem:[%s2122_s0] sm:$0xff]  ;;  %v1139_v10 = vld [vmem:[%s2122_s0 + $0x8] sm:$0xff]  ;;  %v1148_v14 = vld [vmem:[%s2122_s0 + $0x50] sm:$0xff] }
   0x5   :  { %v1146_v9 = vld [vmem:[%s2122_s0 + $0x40] sm:$0xff]  ;;  %v1147_v11 = vld [vmem:[%s2122_s0 + $0x48] sm:$0xff]  ;;  %v1141_v16 = vld [vmem:[%s2122_s0 + $0x18] sm:$0xff] }
   0x6   :  { %335 = vmatpush.bf16.msra.mxu0 %v1176_v1  ;;  %1181 = vmatpush.bf16.msra.mxu1 %v1176_v1  ;;  %v1154_v12 = vld [vmem:[%s2122_s0 + $0x80] sm:$0xff]  ;;  %v1155_v15 = vld [vmem:[%s2122_s0 + $0x88] sm:$0xff]  ;;  %v1149_v17 = vld [vmem:[%s2122_s0 + $0x58] sm:$0xff] }
   0x7   :  { %1182 = vmatpush.bf16.msra.mxu2 %v1176_v1  ;;  %1183 = vmatpush.bf16.msra.mxu3 %v1176_v1  ;;  %v1156_v18 = vld [vmem:[%s2122_s0 + $0x90] sm:$0xff]  ;;  %v1162_v19 = vld [vmem:[%s2122_s0 + $0xc0] sm:$0xff]  ;;  %v1157_v22 = vld [vmem:[%s2122_s0 + $0x98] sm:$0xff] }
   0x8   :  { %v1142_v20 = vld [vmem:[%s2122_s0 + $0x20] sm:$0xff]  ;;  %v1163_v23 = vld [vmem:[%s2122_s0 + $0xc8] sm:$0xff]  ;;  %v1164_v27 = vld [vmem:[%s2122_s0 + $0xd0] sm:$0xff] }
   0x9   :  { %v1150_v21 = vld [vmem:[%s2122_s0 + $0x60] sm:$0xff]  ;;  %v1143_v24 = vld [vmem:[%s2122_s0 + $0x28] sm:$0xff]  ;;  %v1144_v28 = vld [vmem:[%s2122_s0 + $0x30] sm:$0xff] }
   0xa   :  { %336 = vmatpush.bf16.msra.mxu0 %v1175_v2  ;;  %1184 = vmatpush.bf16.msra.mxu1 %v1175_v2  ;;  %v1151_v25 = vld [vmem:[%s2122_s0 + $0x68] sm:$0xff]  ;;  %v1158_v26 = vld [vmem:[%s2122_s0 + $0xa0] sm:$0xff]  ;;  %v1152_v29 = vld [vmem:[%s2122_s0 + $0x70] sm:$0xff] }
   0xb   :  { %1185 = vmatpush.bf16.msra.mxu2 %v1175_v2  ;;  %1186 = vmatpush.bf16.msra.mxu3 %v1175_v2  ;;  %v1159_v30 = vld [vmem:[%s2122_s0 + $0xa8] sm:$0xff]  ;;  %v1165_v31 = vld [vmem:[%s2122_s0 + $0xd8] sm:$0xff]  ;;  %v1160_v34 = vld [vmem:[%s2122_s0 + $0xb0] sm:$0xff] }
   0xc   :  { %v1145_v32 = vld [vmem:[%s2122_s0 + $0x38] sm:$0xff]  ;;  %v1166_v35 = vld [vmem:[%s2122_s0 + $0xe0] sm:$0xff]  ;;  %v1167_v41 = vld [vmem:[%s2122_s0 + $0xe8] sm:$0xff] }
   0xd   :  { %v1153_v33 = vld [vmem:[%s2122_s0 + $0x78] sm:$0xff]  ;;  %v1168_v62 = vld [vmem:[%s2122_s0 + $0xf0] sm:$0xff] }
   0xe   :  { %337 = vmatpush.bf16.msra.mxu0 %v1174_v3  ;;  %1187 = vmatpush.bf16.msra.mxu1 %v1174_v3  ;;  %v1161_v40 = vld [vmem:[%s2122_s0 + $0xb8] sm:$0xff] }
   0xf   :  { %1188 = vmatpush.bf16.msra.mxu2 %v1174_v3  ;;  %1189 = vmatpush.bf16.msra.mxu3 %v1174_v3 }
  0x12   :  { %338 = vmatpush.bf16.msra.mxu0 %v1173_v4  ;;  %1190 = vmatpush.bf16.msra.mxu1 %v1173_v4 }
  0x13   :  { %1191 = vmatpush.bf16.msra.mxu2 %v1173_v4  ;;  %1192 = vmatpush.bf16.msra.mxu3 %v1173_v4 }
  0x16   :  { %339 = vmatpush.bf16.msra.mxu0 %v1172_v5  ;;  %1193 = vmatpush.bf16.msra.mxu1 %v1172_v5 }
  0x17   :  { %1194 = vmatpush.bf16.msra.mxu2 %v1172_v5  ;;  %1195 = vmatpush.bf16.msra.mxu3 %v1172_v5 }
  0x1a   :  { %340 = vmatpush.bf16.msra.mxu0 %v1171_v6  ;;  %1196 = vmatpush.bf16.msra.mxu1 %v1171_v6 }
  0x1b   :  { %1197 = vmatpush.bf16.msra.mxu2 %v1171_v6  ;;  %1198 = vmatpush.bf16.msra.mxu3 %v1171_v6 }
  0x1e   :  { %341 = vmatpush.bf16.msra.mxu0 %v1170_v7  ;;  %1199 = vmatpush.bf16.msra.mxu1 %v1170_v7 }
  0x1f   :  { %1200 = vmatpush.bf16.msra.mxu2 %v1170_v7  ;;  %1201 = vmatpush.bf16.msra.mxu3 %v1170_v7 }
  0x21   :  { %342 = vmatmul.bf16.vlgmr.msra.gmra.mxu0 %v1138_v8  ;;  %382 = vmatmul.bf16.vlgmr.msra.gmra.mxu1 %v1146_v9 }
  0x22   :  { %422 = vmatmul.bf16.vlgmr.msra.gmra.mxu2 %v1154_v12  ;;  %462 = vmatmul.bf16.vlgmr.msra.gmra.mxu3 %v1162_v19 }
  0x31   :  { %347 = vmatmul.bf16.gmra.mxu0 %v1139_v10  ;;  %387 = vmatmul.bf16.gmra.mxu1 %v1147_v11 }
  0x32   :  { %427 = vmatmul.bf16.gmra.mxu2 %v1155_v15  ;;  %467 = vmatmul.bf16.gmra.mxu3 %v1163_v23 }
  0x41   :  { %352 = vmatmul.bf16.gmra.mxu0 %v1140_v13  ;;  %392 = vmatmul.bf16.gmra.mxu1 %v1148_v14 }
  0x42   :  { %432 = vmatmul.bf16.gmra.mxu2 %v1156_v18  ;;  %472 = vmatmul.bf16.gmra.mxu3 %v1164_v27 }
  0x51   :  { %357 = vmatmul.bf16.gmra.mxu0 %v1141_v16  ;;  %397 = vmatmul.bf16.gmra.mxu1 %v1149_v17 }
  0x52   :  { %437 = vmatmul.bf16.gmra.mxu2 %v1157_v22  ;;  %477 = vmatmul.bf16.gmra.mxu3 %v1165_v31 }
  0x61   :  { %362 = vmatmul.bf16.gmra.mxu0 %v1142_v20  ;;  %402 = vmatmul.bf16.gmra.mxu1 %v1150_v21  ;;  %v1169_v21 = vld [vmem:[%s2122_s0 + $0xf8] sm:$0xff] }
  0x62   :  { %442 = vmatmul.bf16.gmra.mxu2 %v1158_v26  ;;  %482 = vmatmul.bf16.gmra.mxu3 %v1166_v35 }
  0x71   :  { %367 = vmatmul.bf16.gmra.mxu0 %v1143_v24  ;;  %407 = vmatmul.bf16.gmra.mxu1 %v1151_v25 }
  0x72   :  { %447 = vmatmul.bf16.gmra.mxu2 %v1159_v30  ;;  %487 = vmatmul.bf16.gmra.mxu3 %v1167_v41 }
  0x81   :  { %372 = vmatmul.bf16.gmra.mxu0 %v1144_v28  ;;  %412 = vmatmul.bf16.gmra.mxu1 %v1152_v29 }
  0x82   :  { %452 = vmatmul.bf16.gmra.mxu2 %v1160_v34  ;;  %492 = vmatmul.bf16.gmra.mxu3 %v1168_v62 }
  0x91   :  { %377 = vmatmul.bf16.gmra.mxu0 %v1145_v32  ;;  %417 = vmatmul.bf16.gmra.mxu1 %v1153_v33 }
  0x92   :  { %457 = vmatmul.bf16.gmra.mxu2 %v1161_v40  ;;  %497 = vmatmul.bf16.gmra.mxu3 %v1169_v21 }
  0x9e   :  { %v343_v36 = vpop.f32.mrf.mxu0  ;;  %v1335_v37 = vpop.f32.mrf.mxu1 }
  0x9f   :  { %v837_v38 = vpack.c.bf16 %v343_v36, %v343_v36  ;;  %v853_v39 = vpack.c.bf16 %v1335_v37, %v1335_v37  ;;  %v639_v42 = vmul.f32 %v343_v36, %v343_v36  ;;  %v504_v45 = vsel %vm503_vm1, %v343_v36, 0.0 }
  0xa1   :  { %902 = vst.msk [vmem:[%s2123_s2] sm:$0xf] %vm901_vm0, %v837_v38  ;;  %v703_v51 = vsel %vm503_vm1, %v639_v42, 0.0 }
  0xa2   :  { %918 = vst.msk [vmem:[%s2123_s2 + $0x40] sm:$0xf] %vm901_vm0, %v853_v39 }
  0xa5   :  { %v1389_v5 = vpop.f32.mrf.mxu2  ;;  %v1493_v40 = vpop.f32.mrf.mxu3 }
  0xa6   :  { %v345_v43 = vpop.f32.mrf.mxu0  ;;  %v1353_v44 = vpop.f32.mrf.mxu1  ;;  %v869_v10 = vpack.c.bf16 %v1389_v5, %v1389_v5 }
  0xa7   :  { %v505_v46 = vsel %vm503_vm1, %v345_v43, 0.0  ;;  %v640_v47 = vmul.f32 %v345_v43, %v345_v43  ;;  %v838_v48 = vpack.c.bf16 %v345_v43, %v345_v43  ;;  %v854_v50 = vpack.c.bf16 %v1353_v44, %v1353_v44 }
  0xa8   :  { %v506_v49 = vadd.f32 %v505_v46, %v504_v45  ;;  %934 = vst.msk [vmem:[%s2123_s2 + $0x80] sm:$0xf] %vm901_vm0, %v869_v10  ;;  %v885_v43 = vpack.c.bf16 %v1493_v40, %v1493_v40 }
  0xa9   :  { %v704_v52 = vsel %vm503_vm1, %v640_v47, 0.0  ;;  %903 = vst.msk [vmem:[%s2123_s2 + $0x4] sm:$0xf] %vm901_vm0, %v838_v48 }
  0xaa   :  { %v705_v53 = vadd.f32 %v704_v52, %v703_v51  ;;  %919 = vst.msk [vmem:[%s2123_s2 + $0x44] sm:$0xf] %vm901_vm0, %v854_v50 }
  0xab   :  { %950 = vst.msk [vmem:[%s2123_s2 + $0xc0] sm:$0xf] %vm901_vm0, %v885_v43 }
  0xad   :  { %v1411_v16 = vpop.f32.mrf.mxu2 }
  0xae   :  { %v348_v54 = vpop.f32.mrf.mxu0  ;;  %v1369_v55 = vpop.f32.mrf.mxu1  ;;  %v870_v20 = vpack.c.bf16 %v1411_v16, %v1411_v16 }
  0xaf   :  { %v507_v56 = vsel %vm503_vm1, %v348_v54, 0.0  ;;  %v641_v57 = vmul.f32 %v348_v54, %v348_v54  ;;  %v839_v58 = vpack.c.bf16 %v348_v54, %v348_v54  ;;  %v855_v60 = vpack.c.bf16 %v1369_v55, %v1369_v55 }
  0xb0   :  { %v508_v59 = vadd.f32 %v507_v56, %v506_v49  ;;  %935 = vst.msk [vmem:[%s2123_s2 + $0x84] sm:$0xf] %vm901_vm0, %v870_v20  ;;  %v1525_v49 = vpop.f32.mrf.mxu3 }
  0xb1   :  { %v706_v61 = vsel %vm503_vm1, %v641_v57, 0.0  ;;  %904 = vst.msk [vmem:[%s2123_s2 + $0x8] sm:$0xf] %vm901_vm0, %v839_v58  ;;  %v886_v52 = vpack.c.bf16 %v1525_v49, %v1525_v49 }
  0xb2   :  { %v707_v63 = vadd.f32 %v706_v61, %v705_v53  ;;  %920 = vst.msk [vmem:[%s2123_s2 + $0x48] sm:$0xf] %vm901_vm0, %v855_v60 }
  0xb3   :  { %951 = vst.msk [vmem:[%s2123_s2 + $0xc4] sm:$0xf] %vm901_vm0, %v886_v52 }
  0xb5   :  { %v1443_v26 = vpop.f32.mrf.mxu2 }
  0xb6   :  { %v350_v0 = vpop.f32.mrf.mxu0  ;;  %v1386_v1 = vpop.f32.mrf.mxu1  ;;  %v871_v28 = vpack.c.bf16 %v1443_v26, %v1443_v26 }
  0xb7   :  { %v509_v2 = vsel %vm503_vm1, %v350_v0, 0.0  ;;  %v642_v3 = vmul.f32 %v350_v0, %v350_v0  ;;  %v840_v4 = vpack.c.bf16 %v350_v0, %v350_v0  ;;  %v856_v7 = vpack.c.bf16 %v1386_v1, %v1386_v1 }
  0xb8   :  { %v510_v6 = vadd.f32 %v509_v2, %v508_v59  ;;  %936 = vst.msk [vmem:[%s2123_s2 + $0x88] sm:$0xf] %vm901_vm0, %v871_v28  ;;  %v1557_v58 = vpop.f32.mrf.mxu3 }
  0xb9   :  { %v708_v8 = vsel %vm503_vm1, %v642_v3, 0.0  ;;  %905 = vst.msk [vmem:[%s2123_s2 + $0xc] sm:$0xf] %vm901_vm0, %v840_v4  ;;  %v887_v61 = vpack.c.bf16 %v1557_v58, %v1557_v58 }
  0xba   :  { %v709_v9 = vadd.f32 %v708_v8, %v707_v63  ;;  %921 = vst.msk [vmem:[%s2123_s2 + $0x4c] sm:$0xf] %vm901_vm0, %v856_v7 }
  0xbb   :  { %952 = vst.msk [vmem:[%s2123_s2 + $0xc8] sm:$0xf] %vm901_vm0, %v887_v61 }
  0xbd   :  { %v1467_v32 = vpop.f32.mrf.mxu2 }
  0xbe   :  { %v353_v11 = vpop.f32.mrf.mxu0  ;;  %v1408_v12 = vpop.f32.mrf.mxu1  ;;  %v872_v34 = vpack.c.bf16 %v1467_v32, %v1467_v32 }
  0xbf   :  { %v511_v13 = vsel %vm503_vm1, %v353_v11, 0.0  ;;  %v643_v14 = vmul.f32 %v353_v11, %v353_v11  ;;  %v841_v15 = vpack.c.bf16 %v353_v11, %v353_v11  ;;  %v857_v18 = vpack.c.bf16 %v1408_v12, %v1408_v12 }
  0xc0   :  { %v1413_v17 = vadd.f32 %v511_v13, %v510_v6  ;;  %937 = vst.msk [vmem:[%s2123_s2 + $0x8c] sm:$0xf] %vm901_vm0, %v872_v34  ;;  %v1589_v3 = vpop.f32.mrf.mxu3 }
  0xc1   :  { %v710_v19 = vsel %vm503_vm1, %v643_v14, 0.0  ;;  %906 = vst.msk [vmem:[%s2123_s2 + $0x10] sm:$0xf] %vm901_vm0, %v841_v15  ;;  %v888_v7 = vpack.c.bf16 %v1589_v3, %v1589_v3 }
  0xc2   :  { %v1427_v22 = vadd.f32 %v710_v19, %v709_v9  ;;  %922 = vst.msk [vmem:[%s2123_s2 + $0x50] sm:$0xf] %vm901_vm0, %v857_v18 }
  0xc3   :  { %953 = vst.msk [vmem:[%s2123_s2 + $0xcc] sm:$0xf] %vm901_vm0, %v888_v7 }
  0xc5   :  { %v1491_v39 = vpop.f32.mrf.mxu2 }
  0xc6   :  { %v1437_v23 = vpop.f32.mrf.mxu0  ;;  %v1439_v24 = vpop.f32.mrf.mxu1  ;;  %v873_v42 = vpack.c.bf16 %v1491_v39, %v1491_v39 }
  0xc7   :  { %v842_v25 = vpack.c.bf16 %v1437_v23, %v1437_v23  ;;  %v858_v27 = vpack.c.bf16 %v1439_v24, %v1439_v24  ;;  %v644_v19 = vmul.f32 %v1437_v23, %v1437_v23  ;;  %v513_v28 = vsel %vm503_vm1, %v1437_v23, 0.0 }
  0xc8   :  { %938 = vst.msk [vmem:[%s2123_s2 + $0x90] sm:$0xf] %vm901_vm0, %v873_v42  ;;  %v1617_v13 = vpop.f32.mrf.mxu3  ;;  %v514_v43 = vadd.f32 %v513_v28, %v1413_v17 }
  0xc9   :  { %907 = vst.msk [vmem:[%s2123_s2 + $0x14] sm:$0xf] %vm901_vm0, %v842_v25  ;;  %v889_v34 = vpack.c.bf16 %v1617_v13, %v1617_v13  ;;  %v712_v23 = vsel %vm503_vm1, %v644_v19, 0.0 }
  0xca   :  { %923 = vst.msk [vmem:[%s2123_s2 + $0x54] sm:$0xf] %vm901_vm0, %v858_v27  ;;  %v713_v17 = vadd.f32 %v712_v23, %v1427_v22 }
  0xcb   :  { %954 = vst.msk [vmem:[%s2123_s2 + $0xd0] sm:$0xf] %vm901_vm0, %v889_v34 }
  0xcd   :  { %v1523_v48 = vpop.f32.mrf.mxu2 }
  0xce   :  { %v1461_v29 = vpop.f32.mrf.mxu0  ;;  %v1463_v30 = vpop.f32.mrf.mxu1  ;;  %v874_v51 = vpack.c.bf16 %v1523_v48, %v1523_v48 }
  0xcf   :  { %v843_v31 = vpack.c.bf16 %v1461_v29, %v1461_v29  ;;  %v859_v33 = vpack.c.bf16 %v1463_v30, %v1463_v30 }
  0xd0   :  { %939 = vst.msk [vmem:[%s2123_s2 + $0x94] sm:$0xf] %vm901_vm0, %v874_v51  ;;  %v1635_v25 = vpop.f32.mrf.mxu3 }
  0xd1   :  { %908 = vst.msk [vmem:[%s2123_s2 + $0x18] sm:$0xf] %vm901_vm0, %v843_v31  ;;  %v645_v31 = vmul.f32 %v1461_v29, %v1461_v29 }
  0xd2   :  { %924 = vst.msk [vmem:[%s2123_s2 + $0x58] sm:$0xf] %vm901_vm0, %v859_v33 }
  0xd5   :  { %v1555_v57 = vpop.f32.mrf.mxu2 }
  0xd6   :  { %v1485_v35 = vpop.f32.mrf.mxu0  ;;  %v1487_v36 = vpop.f32.mrf.mxu1  ;;  %v875_v60 = vpack.c.bf16 %v1555_v57, %v1555_v57 }
  0xd7   :  { %v844_v38 = vpack.c.bf16 %v1485_v35, %v1485_v35  ;;  %v860_v41 = vpack.c.bf16 %v1487_v36, %v1487_v36 }
  0xd8   :  { %940 = vst.msk [vmem:[%s2123_s2 + $0x98] sm:$0xf] %vm901_vm0, %v875_v60  ;;  %v1696_v22 = vpop.f32.mrf.mxu3 }
  0xd9   :  { %909 = vst.msk [vmem:[%s2123_s2 + $0x1c] sm:$0xf] %vm901_vm0, %v844_v38  ;;  %v515_v38 = vsel %vm503_vm1, %v1461_v29, 0.0  ;;  %v890_v29 = vpack.c.bf16 %v1635_v25, %v1635_v25 }
  0xda   :  { %925 = vst.msk [vmem:[%s2123_s2 + $0x5c] sm:$0xf] %vm901_vm0, %v860_v41  ;;  %v646_v41 = vmul.f32 %v1485_v35, %v1485_v35  ;;  %v516_v52 = vadd.f32 %v515_v38, %v514_v43 }
  0xdb   :  { %955 = vst.msk [vmem:[%s2123_s2 + $0xd4] sm:$0xf] %vm901_vm0, %v890_v29 }
  0xdd   :  { %v1587_v2 = vpop.f32.mrf.mxu2 }
  0xde   :  { %v1513_v45 = vpop.f32.mrf.mxu0  ;;  %v1515_v46 = vpop.f32.mrf.mxu1  ;;  %v876_v6 = vpack.c.bf16 %v1587_v2, %v1587_v2 }
  0xdf   :  { %v845_v47 = vpack.c.bf16 %v1513_v45, %v1513_v45  ;;  %v861_v50 = vpack.c.bf16 %v1515_v46, %v1515_v46  ;;  %v647_v51 = vmul.f32 %v1513_v45, %v1513_v45  ;;  %v519_v60 = vsel %vm503_vm1, %v1513_v45, 0.0 }
  0xe0   :  { %941 = vst.msk [vmem:[%s2123_s2 + $0x9c] sm:$0xf] %vm901_vm0, %v876_v6 }
  0xe1   :  { %910 = vst.msk [vmem:[%s2123_s2 + $0x20] sm:$0xf] %vm901_vm0, %v845_v47  ;;  %v714_v47 = vsel %vm503_vm1, %v645_v31, 0.0 }
  0xe2   :  { %926 = vst.msk [vmem:[%s2123_s2 + $0x60] sm:$0xf] %vm901_vm0, %v861_v50  ;;  %v517_v50 = vsel %vm503_vm1, %v1485_v35, 0.0  ;;  %v716_v35 = vsel %vm503_vm1, %v646_v41, 0.0  ;;  %v715_v6 = vadd.f32 %v714_v47, %v713_v17 }
  0xe3   :  { %v518_v7 = vadd.f32 %v517_v50, %v516_v52 }
  0xe5   :  { %v1615_v11 = vpop.f32.mrf.mxu2 }
  0xe6   :  { %v1549_v53 = vpop.f32.mrf.mxu0  ;;  %v1551_v54 = vpop.f32.mrf.mxu1  ;;  %v877_v33 = vpack.c.bf16 %v1615_v11, %v1615_v11 }
  0xe7   :  { %v846_v56 = vpack.c.bf16 %v1549_v53, %v1549_v53  ;;  %v862_v59 = vpack.c.bf16 %v1551_v54, %v1551_v54  ;;  %v648_v61 = vmul.f32 %v1549_v53, %v1549_v53  ;;  %v521_v19 = vsel %vm503_vm1, %v1549_v53, 0.0 }
  0xe8   :  { %942 = vst.msk [vmem:[%s2123_s2 + $0xa0] sm:$0xf] %vm901_vm0, %v877_v33 }
  0xe9   :  { %911 = vst.msk [vmem:[%s2123_s2 + $0x24] sm:$0xf] %vm901_vm0, %v846_v56  ;;  %v720_v28 = vsel %vm503_vm1, %v648_v61, 0.0 }
  0xea   :  { %927 = vst.msk [vmem:[%s2123_s2 + $0x64] sm:$0xf] %vm901_vm0, %v862_v59 }
  0xed   :  { %v1633_v21 = vpop.f32.mrf.mxu2 }
  0xee   :  { %v1577_v62 = vpop.f32.mrf.mxu0  ;;  %v1579_v63 = vpop.f32.mrf.mxu1  ;;  %v878_v42 = vpack.c.bf16 %v1633_v21, %v1633_v21 }
  0xef   :  { %v847_v0 = vpack.c.bf16 %v1577_v62, %v1577_v62  ;;  %v863_v4 = vpack.c.bf16 %v1579_v63, %v1579_v63  ;;  %v649_v45 = vmul.f32 %v1577_v62, %v1577_v62  ;;  %v523_v53 = vsel %vm503_vm1, %v1577_v62, 0.0 }
  0xf0   :  { %943 = vst.msk [vmem:[%s2123_s2 + $0xa4] sm:$0xf] %vm901_vm0, %v878_v42 }
  0xf1   :  { %912 = vst.msk [vmem:[%s2123_s2 + $0x28] sm:$0xf] %vm901_vm0, %v847_v0  ;;  %v722_v23 = vsel %vm503_vm1, %v649_v45, 0.0 }
  0xf2   :  { %928 = vst.msk [vmem:[%s2123_s2 + $0x68] sm:$0xf] %vm901_vm0, %v863_v4 }
  0xf5   :  { %v1694_v4 = vpop.f32.mrf.mxu2 }
  0xf6   :  { %v370_v8 = vpop.f32.mrf.mxu0  ;;  %v1613_v9 = vpop.f32.mrf.mxu1 }
  0xf7   :  { %v848_v10 = vpack.c.bf16 %v370_v8, %v370_v8  ;;  %v864_v14 = vpack.c.bf16 %v1613_v9, %v1613_v9  ;;  %v650_v31 = vmul.f32 %v370_v8, %v370_v8  ;;  %v525_v38 = vsel %vm503_vm1, %v370_v8, 0.0 }
  0xf9   :  { %913 = vst.msk [vmem:[%s2123_s2 + $0x2c] sm:$0xf] %vm901_vm0, %v848_v10  ;;  %v724_v50 = vsel %vm503_vm1, %v650_v31, 0.0 }
  0xfa   :  { %929 = vst.msk [vmem:[%s2123_s2 + $0x6c] sm:$0xf] %vm901_vm0, %v864_v14  ;;  %v718_v14 = vsel %vm503_vm1, %v647_v51, 0.0 }
  0xfd   :  { %v1722_v62 = vpop.f32.mrf.mxu2 }
  0xfe   :  { %v373_v15 = vpop.f32.mrf.mxu0  ;;  %v1629_v18 = vpop.f32.mrf.mxu1 }
  0xff   :  { %v849_v20 = vpack.c.bf16 %v373_v15, %v373_v15  ;;  %v865_v27 = vpack.c.bf16 %v1629_v18, %v1629_v18  ;;  %v651_v41 = vmul.f32 %v373_v15, %v373_v15  ;;  %v527_v51 = vsel %vm503_vm1, %v373_v15, 0.0 }
 0x100   :  { %v879_v15 = vpack.c.bf16 %v1694_v4, %v1694_v4 }
 0x101   :  { %914 = vst.msk [vmem:[%s2123_s2 + $0x30] sm:$0xf] %vm901_vm0, %v849_v20  ;;  %v717_v20 = vadd.f32 %v716_v35, %v715_v6  ;;  %v1724_v35 = vpop.f32.mrf.mxu3 }
 0x102   :  { %930 = vst.msk [vmem:[%s2123_s2 + $0x70] sm:$0xf] %vm901_vm0, %v865_v27  ;;  %v520_v27 = vadd.f32 %v519_v60, %v518_v7 }
 0x103   :  { %v719_v33 = vadd.f32 %v718_v14, %v717_v20  ;;  %944 = vst.msk [vmem:[%s2123_s2 + $0xa8] sm:$0xf] %vm901_vm0, %v879_v15  ;;  %v880_v20 = vpack.c.bf16 %v1722_v62, %v1722_v62 }
 0x104   :  { %v522_v34 = vadd.f32 %v521_v19, %v520_v27  ;;  %v891_v19 = vpack.c.bf16 %v1696_v22, %v1696_v22 }
 0x105   :  { %v721_v42 = vadd.f32 %v720_v28, %v719_v33  ;;  %945 = vst.msk [vmem:[%s2123_s2 + $0xac] sm:$0xf] %vm901_vm0, %v880_v20  ;;  %v658_v20 = vmul.f32 %v1386_v1, %v1386_v1 }
 0x106   :  { %v375_v56 = vpop.f32.mrf.mxu0  ;;  %v1683_v59 = vpop.f32.mrf.mxu1  ;;  %v524_v43 = vadd.f32 %v523_v53, %v522_v34  ;;  %956 = vst.msk [vmem:[%s2123_s2 + $0xd8] sm:$0xf] %vm901_vm0, %v891_v19  ;;  %v892_v53 = vpack.c.bf16 %v1724_v35, %v1724_v35 }
 0x107   :  { %v850_v0 = vpack.c.bf16 %v375_v56, %v375_v56  ;;  %v866_v10 = vpack.c.bf16 %v1683_v59, %v1683_v59  ;;  %v652_v17 = vmul.f32 %v375_v56, %v375_v56  ;;  %v723_v60 = vadd.f32 %v722_v23, %v721_v42 }
 0x108   :  { %v526_v61 = vadd.f32 %v525_v38, %v524_v43  ;;  %v529_v6 = vsel %vm503_vm1, %v375_v56, 0.0  ;;  %957 = vst.msk [vmem:[%s2123_s2 + $0xdc] sm:$0xf] %vm901_vm0, %v892_v53 }
 0x109   :  { %915 = vst.msk [vmem:[%s2123_s2 + $0x34] sm:$0xf] %vm901_vm0, %v850_v0  ;;  %v726_v0 = vsel %vm503_vm1, %v651_v41, 0.0  ;;  %v728_v56 = vsel %vm503_vm1, %v652_v17, 0.0  ;;  %v655_v41 = vmul.f32 %v1335_v37, %v1335_v37 }
 0x10a   :  { %931 = vst.msk [vmem:[%s2123_s2 + $0x74] sm:$0xf] %vm901_vm0, %v866_v10  ;;  %v725_v10 = vadd.f32 %v724_v50, %v723_v60  ;;  %v528_v14 = vadd.f32 %v527_v51, %v526_v61  ;;  %v1770_v50 = vpop.f32.mrf.mxu2  ;;  %v1772_v51 = vpop.f32.mrf.mxu3  ;;  %v535_v61 = vsel %vm503_vm1, %v1335_v37, 0.0  ;;  %v537_v37 = vsel %vm503_vm1, %v1353_v44, 0.0 }
 0x10b   :  { %v734_v15 = vsel %vm503_vm1, %v655_v41, 0.0 }
 0x10c   :  { %v727_v27 = vadd.f32 %v726_v0, %v725_v10  ;;  %v530_v28 = vadd.f32 %v529_v6, %v528_v14  ;;  %v657_v10 = vmul.f32 %v1369_v55, %v1369_v55 }
 0x10e   :  { %v378_v29 = vpop.f32.mrf.mxu0  ;;  %v1718_v47 = vpop.f32.mrf.mxu1  ;;  %v729_v33 = vadd.f32 %v728_v56, %v727_v27  ;;  %v738_v53 = vsel %vm503_vm1, %v657_v10, 0.0 }
 0x10f   :  { %v851_v52 = vpack.c.bf16 %v378_v29, %v378_v29  ;;  %v867_v8 = vpack.c.bf16 %v1718_v47, %v1718_v47  ;;  %v653_v7 = vmul.f32 %v378_v29, %v378_v29  ;;  %v531_v45 = vsel %vm503_vm1, %v378_v29, 0.0 }
 0x110   :  { %v532_v34 = vadd.f32 %v531_v45, %v530_v28  ;;  %v539_v45 = vsel %vm503_vm1, %v1369_v55, 0.0 }
 0x111   :  { %916 = vst.msk [vmem:[%s2123_s2 + $0x38] sm:$0xf] %vm901_vm0, %v851_v52  ;;  %v730_v31 = vsel %vm503_vm1, %v653_v7, 0.0 }
 0x112   :  { %932 = vst.msk [vmem:[%s2123_s2 + $0x78] sm:$0xf] %vm901_vm0, %v867_v8  ;;  %v731_v17 = vadd.f32 %v730_v31, %v729_v33  ;;  %v656_v8 = vmul.f32 %v1353_v44, %v1353_v44  ;;  %v541_v44 = vsel %vm503_vm1, %v1386_v1, 0.0  ;;  %v659_v31 = vmul.f32 %v1408_v12, %v1408_v12 }
 0x113   :  { %v881_v33 = vpack.c.bf16 %v1770_v50, %v1770_v50  ;;  %v543_v1 = vsel %vm503_vm1, %v1408_v12, 0.0 }
 0x114   :  { %v736_v56 = vsel %vm503_vm1, %v656_v8, 0.0  ;;  %v742_v12 = vsel %vm503_vm1, %v659_v31, 0.0  ;;  %v661_v8 = vmul.f32 %v1463_v30, %v1463_v30  ;;  %v664_v31 = vmul.f32 %v1551_v54, %v1551_v54 }
 0x115   :  { %946 = vst.msk [vmem:[%s2123_s2 + $0xb0] sm:$0xf] %vm901_vm0, %v881_v33 }
 0x116   :  { %v380_v23 = vpop.f32.mrf.mxu0  ;;  %v1761_v38 = vpop.f32.mrf.mxu1 }
 0x117   :  { %v533_v42 = vsel %vm503_vm1, %v380_v23, 0.0  ;;  %v654_v43 = vmul.f32 %v380_v23, %v380_v23  ;;  %v852_v29 = vpack.c.bf16 %v380_v23, %v380_v23  ;;  %v868_v60 = vpack.c.bf16 %v1761_v38, %v1761_v38  ;;  %v1808_v23 = vpop.f32.mrf.mxu3 }
 0x118   :  { %v534_v52 = vadd.f32 %v533_v42, %v532_v34  ;;  %v1806_v34 = vpop.f32.mrf.mxu2  ;;  %v893_v42 = vpack.c.bf16 %v1772_v51, %v1772_v51 }
 0x119   :  { %v732_v0 = vsel %vm503_vm1, %v654_v43, 0.0  ;;  %917 = vst.msk [vmem:[%s2123_s2 + $0x3c] sm:$0xf] %vm901_vm0, %v852_v29  ;;  %v740_v43 = vsel %vm503_vm1, %v658_v20, 0.0  ;;  %v660_v29 = vmul.f32 %v1439_v24, %v1439_v24 }
 0x11a   :  { %v536_v6 = vadd.f32 %v535_v61, %v534_v52  ;;  %v733_v7 = vadd.f32 %v732_v0, %v731_v17  ;;  %933 = vst.msk [vmem:[%s2123_s2 + $0x7c] sm:$0xf] %vm901_vm0, %v868_v60  ;;  %v882_v17 = vpack.c.bf16 %v1806_v34, %v1806_v34  ;;  %v545_v61 = vsel %vm503_vm1, %v1439_v24, 0.0 }
 0x11b   :  { %958 = vst.msk [vmem:[%s2123_s2 + $0xe0] sm:$0xf] %vm901_vm0, %v893_v42  ;;  %v894_v0 = vpack.c.bf16 %v1808_v23, %v1808_v23  ;;  %v662_v24 = vmul.f32 %v1487_v36, %v1487_v36  ;;  %v665_v42 = vmul.f32 %v1579_v63, %v1579_v63 }
 0x11c   :  { %v538_v14 = vadd.f32 %v537_v37, %v536_v6  ;;  %v735_v19 = vadd.f32 %v734_v15, %v733_v7  ;;  %947 = vst.msk [vmem:[%s2123_s2 + $0xb4] sm:$0xf] %vm901_vm0, %v882_v17  ;;  %v744_v15 = vsel %vm503_vm1, %v660_v29, 0.0  ;;  %v547_v37 = vsel %vm503_vm1, %v1463_v30, 0.0 }
 0x11d   :  { %959 = vst.msk [vmem:[%s2123_s2 + $0xe4] sm:$0xf] %vm901_vm0, %v894_v0  ;;  %v752_v29 = vsel %vm503_vm1, %v664_v31, 0.0  ;;  %v666_v17 = vmul.f32 %v1613_v9, %v1613_v9  ;;  %v563_v31 = vsel %vm503_vm1, %v1718_v47, 0.0 }
 0x11e   :  { %v540_v27 = vadd.f32 %v539_v45, %v538_v14  ;;  %v737_v28 = vadd.f32 %v736_v56, %v735_v19  ;;  %v746_v19 = vsel %vm503_vm1, %v661_v8, 0.0  ;;  %v549_v56 = vsel %vm503_vm1, %v1487_v36, 0.0 }
 0x11f   :  { %v663_v45 = vmul.f32 %v1515_v46, %v1515_v46  ;;  %v1854_v30 = vpop.f32.mrf.mxu3 }
 0x120   :  { %v542_v55 = vadd.f32 %v541_v44, %v540_v27  ;;  %v739_v41 = vadd.f32 %v738_v53, %v737_v28  ;;  %v1852_v20 = vpop.f32.mrf.mxu2  ;;  %v748_v53 = vsel %vm503_vm1, %v662_v24, 0.0  ;;  %v551_v44 = vsel %vm503_vm1, %v1515_v46, 0.0 }
 0x121   :  { %v750_v36 = vsel %vm503_vm1, %v663_v45, 0.0  ;;  %v555_v46 = vsel %vm503_vm1, %v1579_v63, 0.0  ;;  %v883_v8 = vpack.c.bf16 %v1852_v20, %v1852_v20  ;;  %v668_v24 = vmul.f32 %v1683_v59, %v1683_v59 }
 0x122   :  { %v544_v52 = vadd.f32 %v543_v1, %v542_v55  ;;  %v741_v60 = vadd.f32 %v740_v43, %v739_v41  ;;  %v553_v41 = vsel %vm503_vm1, %v1551_v54, 0.0  ;;  %v557_v54 = vsel %vm503_vm1, %v1613_v9, 0.0 }
 0x123   :  { %v559_v9 = vsel %vm503_vm1, %v1629_v18, 0.0  ;;  %948 = vst.msk [vmem:[%s2123_s2 + $0xb8] sm:$0xf] %vm901_vm0, %v883_v8  ;;  %v669_v45 = vmul.f32 %v1718_v47, %v1718_v47 }
 0x124   :  { %v546_v6 = vadd.f32 %v545_v61, %v544_v52  ;;  %v743_v7 = vadd.f32 %v742_v12, %v741_v60  ;;  %v754_v12 = vsel %vm503_vm1, %v665_v42, 0.0  ;;  %v667_v61 = vmul.f32 %v1629_v18, %v1629_v18 }
 0x125   :  { %v565_v42 = vsel %vm503_vm1, %v1761_v38, 0.0 }
 0x126   :  { %v745_v10 = vadd.f32 %v744_v15, %v743_v7  ;;  %v548_v14 = vadd.f32 %v547_v37, %v546_v6  ;;  %v895_v15 = vpack.c.bf16 %v1854_v30, %v1854_v30  ;;  %v756_v37 = vsel %vm503_vm1, %v666_v17, 0.0 }
 0x127   :  { %v1880_v6 = vpop.f32.mrf.mxu3  ;;  %v758_v18 = vsel %vm503_vm1, %v667_v61, 0.0 }
 0x128   :  { %v550_v27 = vadd.f32 %v549_v56, %v548_v14  ;;  %v747_v28 = vadd.f32 %v746_v19, %v745_v10  ;;  %v1878_v0 = vpop.f32.mrf.mxu2  ;;  %960 = vst.msk [vmem:[%s2123_s2 + $0xe8] sm:$0xf] %vm901_vm0, %v895_v15  ;;  %v561_v56 = vsel %vm503_vm1, %v1683_v59, 0.0  ;;  %v670_v59 = vmul.f32 %v1761_v38, %v1761_v38 }
 0x129   :  { %v884_v10 = vpack.c.bf16 %v1878_v0, %v1878_v0  ;;  %v673_v38 = vmul.f32 %v1443_v26, %v1443_v26 }
 0x12a   :  { %v552_v33 = vadd.f32 %v551_v44, %v550_v27  ;;  %v749_v55 = vadd.f32 %v748_v53, %v747_v28  ;;  %v896_v27 = vpack.c.bf16 %v1880_v6, %v1880_v6  ;;  %v760_v44 = vsel %vm503_vm1, %v668_v24, 0.0 }
 0x12b   :  { %949 = vst.msk [vmem:[%s2123_s2 + $0xbc] sm:$0xf] %vm901_vm0, %v884_v10  ;;  %v764_v17 = vsel %vm503_vm1, %v670_v59, 0.0  ;;  %v675_v24 = vmul.f32 %v1491_v39, %v1491_v39 }
 0x12c   :  { %v554_v43 = vadd.f32 %v553_v41, %v552_v33  ;;  %v751_v1 = vadd.f32 %v750_v36, %v749_v55  ;;  %961 = vst.msk [vmem:[%s2123_s2 + $0xec] sm:$0xf] %vm901_vm0, %v896_v27  ;;  %v671_v36 = vmul.f32 %v1389_v5, %v1389_v5  ;;  %v762_v41 = vsel %vm503_vm1, %v669_v45, 0.0 }
 0x12d   :  { %v676_v45 = vmul.f32 %v1523_v48, %v1523_v48 }
 0x12e   :  { %v556_v52 = vadd.f32 %v555_v46, %v554_v43  ;;  %v753_v60 = vadd.f32 %v752_v29, %v751_v1  ;;  %v567_v29 = vsel %vm503_vm1, %v1389_v5, 0.0  ;;  %v672_v46 = vmul.f32 %v1411_v16, %v1411_v16 }
 0x12f   :  { %v1924_v43 = vpop.f32.mrf.mxu3  ;;  %v571_v5 = vsel %vm503_vm1, %v1443_v26, 0.0 }
 0x130   :  { %v558_v63 = vadd.f32 %v557_v54, %v556_v52  ;;  %v755_v7 = vadd.f32 %v754_v12, %v753_v60  ;;  %v766_v12 = vsel %vm503_vm1, %v671_v36, 0.0  ;;  %v569_v54 = vsel %vm503_vm1, %v1411_v16, 0.0 }
 0x131   :  { %v573_v16 = vsel %vm503_vm1, %v1467_v32, 0.0  ;;  %v897_v10 = vpack.c.bf16 %v1924_v43, %v1924_v43  ;;  %v678_v36 = vmul.f32 %v1587_v2, %v1587_v2 }
 0x132   :  { %v560_v14 = vadd.f32 %v559_v9, %v558_v63  ;;  %v757_v19 = vadd.f32 %v756_v37, %v755_v7  ;;  %v768_v63 = vsel %vm503_vm1, %v672_v46, 0.0  ;;  %v674_v7 = vmul.f32 %v1467_v32, %v1467_v32 }
 0x133   :  { %v770_v9 = vsel %vm503_vm1, %v673_v38, 0.0  ;;  %962 = vst.msk [vmem:[%s2123_s2 + $0xf0] sm:$0xf] %vm901_vm0, %v897_v10 }
 0x134   :  { %v759_v28 = vadd.f32 %v758_v18, %v757_v19  ;;  %v562_v53 = vadd.f32 %v561_v56, %v560_v14  ;;  %v772_v18 = vsel %vm503_vm1, %v674_v7, 0.0  ;;  %v575_v56 = vsel %vm503_vm1, %v1491_v39, 0.0 }
 0x135   :  { %v677_v39 = vmul.f32 %v1555_v57, %v1555_v57  ;;  %v682_v7 = vmul.f32 %v1722_v62, %v1722_v62 }
 0x136   :  { %v761_v33 = vadd.f32 %v760_v44, %v759_v28  ;;  %v564_v55 = vadd.f32 %v563_v31, %v562_v53  ;;  %v774_v53 = vsel %vm503_vm1, %v675_v24, 0.0  ;;  %v577_v44 = vsel %vm503_vm1, %v1523_v48, 0.0 }
 0x137   :  { %v1948_v14 = vpop.f32.mrf.mxu3 }
 0x138   :  { %v763_v47 = vadd.f32 %v762_v41, %v761_v33  ;;  %v566_v1 = vadd.f32 %v565_v42, %v564_v55  ;;  %v898_v32 = vpack.c.bf16 %v1948_v14, %v1948_v14  ;;  %v776_v33 = vsel %vm503_vm1, %v676_v45, 0.0 }
 0x139   :  { %v579_v55 = vsel %vm503_vm1, %v1555_v57, 0.0  ;;  %v778_v42 = vsel %vm503_vm1, %v677_v39, 0.0  ;;  %v583_v57 = vsel %vm503_vm1, %v1615_v11, 0.0 }
 0x13a   :  { %v568_v52 = vadd.f32 %v567_v29, %v566_v1  ;;  %v765_v60 = vadd.f32 %v764_v17, %v763_v47  ;;  %963 = vst.msk [vmem:[%s2123_s2 + $0xf4] sm:$0xf] %vm901_vm0, %v898_v32  ;;  %v581_v47 = vsel %vm503_vm1, %v1587_v2, 0.0  ;;  %v679_v1 = vmul.f32 %v1615_v11, %v1615_v11 }
 0x13b   :  { %v585_v2 = vsel %vm503_vm1, %v1633_v21, 0.0  ;;  %v587_v11 = vsel %vm503_vm1, %v1694_v4, 0.0 }
 0x13c   :  { %v570_v61 = vadd.f32 %v569_v54, %v568_v52  ;;  %v767_v8 = vadd.f32 %v766_v12, %v765_v60  ;;  %v780_v52 = vsel %vm503_vm1, %v678_v36, 0.0  ;;  %v680_v60 = vmul.f32 %v1633_v21, %v1633_v21 }
 0x13d   :  { %v782_v38 = vsel %vm503_vm1, %v679_v1, 0.0  ;;  %v589_v21 = vsel %vm503_vm1, %v1722_v62, 0.0 }
 0x13e   :  { %v572_v15 = vadd.f32 %v571_v5, %v570_v61  ;;  %v769_v37 = vadd.f32 %v768_v63, %v767_v8  ;;  %v681_v61 = vmul.f32 %v1694_v4, %v1694_v4  ;;  %v784_v5 = vsel %vm503_vm1, %v680_v60, 0.0 }
 0x13f   :  { %v1980_v29 = vpop.f32.mrf.mxu3 }
 0x140   :  { %v574_v19 = vadd.f32 %v573_v16, %v572_v15  ;;  %v771_v26 = vadd.f32 %v770_v9, %v769_v37  ;;  %v786_v9 = vsel %vm503_vm1, %v681_v61, 0.0  ;;  %v683_v16 = vmul.f32 %v1770_v50, %v1770_v50 }
 0x141   :  { %v899_v24 = vpack.c.bf16 %v1980_v29, %v1980_v29 }
 0x142   :  { %v576_v27 = vadd.f32 %v575_v56, %v574_v19  ;;  %v773_v28 = vadd.f32 %v772_v18, %v771_v26  ;;  %v788_v26 = vsel %vm503_vm1, %v682_v7, 0.0  ;;  %v591_v18 = vsel %vm503_vm1, %v1770_v50, 0.0 }
 0x143   :  { %v684_v56 = vmul.f32 %v1806_v34, %v1806_v34  ;;  %964 = vst.msk [vmem:[%s2123_s2 + $0xf8] sm:$0xf] %vm901_vm0, %v899_v24  ;;  %v685_v50 = vmul.f32 %v1852_v20, %v1852_v20 }
 0x144   :  { %v578_v31 = vadd.f32 %v577_v44, %v576_v27  ;;  %v775_v59 = vadd.f32 %v774_v53, %v773_v28  ;;  %v790_v27 = vsel %vm503_vm1, %v683_v16, 0.0  ;;  %v593_v28 = vsel %vm503_vm1, %v1806_v34, 0.0 }
 0x145   :  { %v792_v39 = vsel %vm503_vm1, %v684_v56, 0.0  ;;  %v794_v36 = vsel %vm503_vm1, %v685_v50, 0.0  ;;  %v693_v16 = vmul.f32 %v1696_v22, %v1696_v22  ;;  %v696_v50 = vmul.f32 %v1808_v23, %v1808_v23 }
 0x146   :  { %v777_v41 = vadd.f32 %v776_v33, %v775_v59  ;;  %v580_v48 = vadd.f32 %v579_v55, %v578_v31  ;;  %v595_v31 = vsel %vm503_vm1, %v1852_v20, 0.0  ;;  %v686_v59 = vmul.f32 %v1878_v0, %v1878_v0 }
 0x147   :  { %v2004_v10 = vpop.f32.mrf.mxu3  ;;  %v687_v55 = vmul.f32 %v1493_v40, %v1493_v40  ;;  %v688_v20 = vmul.f32 %v1525_v49, %v1525_v49 }
 0x148   :  { %v582_v46 = vadd.f32 %v581_v47, %v580_v48  ;;  %v779_v17 = vadd.f32 %v778_v42, %v777_v41  ;;  %v900_v62 = vpack.c.bf16 %v2004_v10, %v2004_v10  ;;  %v597_v41 = vsel %vm503_vm1, %v1878_v0, 0.0 }
 0x149   :  { %v599_v47 = vsel %vm503_vm1, %v1493_v40, 0.0  ;;  %v796_v1 = vsel %vm503_vm1, %v686_v59, 0.0  ;;  %v689_v0 = vmul.f32 %v1557_v58, %v1557_v58  ;;  %v603_v40 = vsel %vm503_vm1, %v1557_v58, 0.0 }
 0x14a   :  { %v584_v12 = vadd.f32 %v583_v57, %v582_v46  ;;  %v781_v54 = vadd.f32 %v780_v52, %v779_v17  ;;  %965 = vst.msk [vmem:[%s2123_s2 + $0xfc] sm:$0xf] %vm901_vm0, %v900_v62  ;;  %v798_v52 = vsel %vm503_vm1, %v687_v55, 0.0  ;;  %v601_v57 = vsel %vm503_vm1, %v1525_v49, 0.0 }
 0x14b   :  { %v605_v49 = vsel %vm503_vm1, %v1589_v3, 0.0  ;;  %v607_v58 = vsel %vm503_vm1, %v1617_v13, 0.0  ;;  %v810_v62 = vsel %vm503_vm1, %v693_v16, 0.0  ;;  %v698_v55 = vmul.f32 %v1880_v6, %v1880_v6 }
 0x14c   :  { %v586_v8 = vadd.f32 %v585_v2, %v584_v12  ;;  %v783_v63 = vadd.f32 %v782_v38, %v781_v54  ;;  %v800_v54 = vsel %vm503_vm1, %v688_v20, 0.0  ;;  %v690_v38 = vmul.f32 %v1589_v3, %v1589_v3 }
 0x14d   :  { %v609_v3 = vsel %vm503_vm1, %v1635_v25, 0.0 }
 0x14e   :  { %v588_v15 = vadd.f32 %v587_v11, %v586_v8  ;;  %v785_v37 = vadd.f32 %v784_v5, %v783_v63  ;;  %v802_v8 = vsel %vm503_vm1, %v689_v0, 0.0  ;;  %v691_v63 = vmul.f32 %v1617_v13, %v1617_v13 }
 0x14f   :  { %v804_v7 = vsel %vm503_vm1, %v690_v38, 0.0  ;;  %v611_v13 = vsel %vm503_vm1, %v1696_v22, 0.0  ;;  %v615_v22 = vsel %vm503_vm1, %v1772_v51, 0.0  ;;  %v701_v0 = vmul.f32 %v1980_v29, %v1980_v29 }
 0x150   :  { %v590_v19 = vadd.f32 %v589_v21, %v588_v15  ;;  %v787_v4 = vadd.f32 %v786_v9, %v785_v37  ;;  %v692_v15 = vmul.f32 %v1635_v25, %v1635_v25  ;;  %v806_v21 = vsel %vm503_vm1, %v691_v63, 0.0 }
 0x151   :  { %v613_v25 = vsel %vm503_vm1, %v1724_v35, 0.0 }
 0x152   :  { %v789_v45 = vadd.f32 %v788_v26, %v787_v4  ;;  %v592_v32 = vadd.f32 %v591_v18, %v590_v19  ;;  %v808_v4 = vsel %vm503_vm1, %v692_v15, 0.0  ;;  %v694_v26 = vmul.f32 %v1724_v35, %v1724_v35 }
 0x153   :  { %v617_v35 = vsel %vm503_vm1, %v1808_v23, 0.0  ;;  %v621_v23 = vsel %vm503_vm1, %v1880_v6, 0.0  ;;  %v625_v6 = vsel %vm503_vm1, %v1948_v14, 0.0 }
 0x154   :  { %v791_v53 = vadd.f32 %v790_v27, %v789_v45  ;;  %v594_v44 = vadd.f32 %v593_v28, %v592_v32  ;;  %v695_v45 = vmul.f32 %v1772_v51, %v1772_v51  ;;  %v812_v28 = vsel %vm503_vm1, %v694_v26, 0.0 }
 0x155   :  { %v619_v51 = vsel %vm503_vm1, %v1854_v30, 0.0 }
 0x156   :  { %v793_v33 = vadd.f32 %v792_v39, %v791_v53  ;;  %v596_v34 = vadd.f32 %v595_v31, %v594_v44  ;;  %v814_v39 = vsel %vm503_vm1, %v695_v45, 0.0  ;;  %v697_v31 = vmul.f32 %v1854_v30, %v1854_v30 }
 0x157   :  { %v623_v30 = vsel %vm503_vm1, %v1924_v43, 0.0 }
 0x158   :  { %v795_v48 = vadd.f32 %v794_v36, %v793_v33  ;;  %v598_v42 = vadd.f32 %v597_v41, %v596_v34  ;;  %v816_v34 = vsel %vm503_vm1, %v696_v50, 0.0 }
 0x15a   :  { %v600_v46 = vadd.f32 %v599_v47, %v598_v42  ;;  %v797_v17 = vadd.f32 %v796_v1, %v795_v48  ;;  %v818_v48 = vsel %vm503_vm1, %v697_v31, 0.0  ;;  %v699_v42 = vmul.f32 %v1924_v43, %v1924_v43 }
 0x15b   :  { %v820_v1 = vsel %vm503_vm1, %v698_v55, 0.0  ;;  %v627_v43 = vsel %vm503_vm1, %v1980_v29, 0.0 }
 0x15c   :  { %v602_v60 = vadd.f32 %v601_v57, %v600_v46  ;;  %v799_v12 = vadd.f32 %v798_v52, %v797_v17  ;;  %v700_v46 = vmul.f32 %v1948_v14, %v1948_v14  ;;  %v822_v57 = vsel %vm503_vm1, %v699_v42, 0.0 }
 0x15d   :  { %v629_v14 = vsel %vm503_vm1, %v2004_v10, 0.0 }
 0x15e   :  { %v604_v2 = vadd.f32 %v603_v40, %v602_v60  ;;  %v801_v61 = vadd.f32 %v800_v54, %v799_v12  ;;  %v824_v54 = vsel %vm503_vm1, %v700_v46, 0.0  ;;  %v702_v40 = vmul.f32 %v2004_v10, %v2004_v10 }
 0x160   :  { %v606_v5 = vadd.f32 %v605_v49, %v604_v2  ;;  %v803_v11 = vadd.f32 %v802_v8, %v801_v61  ;;  %v826_v61 = vsel %vm503_vm1, %v701_v0, 0.0  ;;  %v828_v63 = vsel %vm503_vm1, %v702_v40, 0.0 }
 0x162   :  { %v608_v37 = vadd.f32 %v607_v58, %v606_v5  ;;  %v805_v9 = vadd.f32 %v804_v7, %v803_v11 }
 0x164   :  { %v610_v24 = vadd.f32 %v609_v3, %v608_v37  ;;  %v807_v19 = vadd.f32 %v806_v21, %v805_v9 }
 0x166   :  { %v809_v18 = vadd.f32 %v808_v4, %v807_v19  ;;  %v612_v56 = vadd.f32 %v611_v13, %v610_v24 }
 0x168   :  { %v614_v32 = vadd.f32 %v613_v25, %v612_v56  ;;  %v811_v27 = vadd.f32 %v810_v62, %v809_v18 }
 0x16a   :  { %v616_v53 = vadd.f32 %v615_v22, %v614_v32  ;;  %v813_v44 = vadd.f32 %v812_v28, %v811_v27 }
 0x16c   :  { %v618_v59 = vadd.f32 %v617_v35, %v616_v53  ;;  %v815_v33 = vadd.f32 %v814_v39, %v813_v44 }
 0x16e   :  { %v620_v36 = vadd.f32 %v619_v51, %v618_v59  ;;  %v817_v41 = vadd.f32 %v816_v34, %v815_v33 }
 0x170   :  { %v622_v47 = vadd.f32 %v621_v23, %v620_v36  ;;  %v819_v20 = vadd.f32 %v818_v48, %v817_v41 }
 0x172   :  { %v821_v17 = vadd.f32 %v820_v1, %v819_v20  ;;  %v624_v52 = vadd.f32 %v623_v30, %v622_v47 }
 0x174   :  { %v823_v60 = vadd.f32 %v822_v57, %v821_v17  ;;  %v626_v12 = vadd.f32 %v625_v6, %v624_v52 }
 0x176   :  { %v825_v38 = vadd.f32 %v824_v54, %v823_v60  ;;  %v628_v2 = vadd.f32 %v627_v43, %v626_v12 }
 0x178   :  { %v827_v8 = vadd.f32 %v826_v61, %v825_v38  ;;  %v630_v49 = vadd.f32 %v629_v14, %v628_v2 }
 0x17a   :  { %v631_v5 = vrot.slane %v630_v49, 4  ;;  %v829_v11 = vadd.f32 %v828_v63, %v827_v8 }
 0x17c   :  { %v632_v7 = vadd.f32 %v631_v5, %v630_v49  ;;  %v830_v58 = vrot.slane %v829_v11, 4 }
 0x17e   :  { %v633_v15 = vrot.slane %v632_v7, 2  ;;  %v831_v29 = vadd.f32 %v830_v58, %v829_v11 }
 0x180   :  { %v634_v37 = vadd.f32 %v633_v15, %v632_v7  ;;  %v832_v9 = vrot.slane %v831_v29, 2 }
 0x182   :  { %v635_v21 = vrot.slane %v634_v37, 1  ;;  %v833_v3 = vadd.f32 %v832_v9, %v831_v29 }
 0x184   :  { %v636_v16 = vadd.f32 %v635_v21, %v634_v37  ;;  %v834_v24 = vrot.slane %v833_v3, 1 }
 0x186   :  { %638 = vst.msk [vmem:[%s2124_s3] sm:$0x1] %vm637_vm2, %v636_v16  ;;  %v835_v10 = vadd.f32 %v834_v24, %v833_v3 }
 0x188   :  { %836 = vst.msk [vmem:[%s2125_s4] sm:$0x1] %vm637_vm2, %v835_v10 }

// kernel: _lambda_.10
= control target key start
LH: loop header
LB: loop body
LE: loop exit
PB: predicated region body
PF: predicated region fallthrough
CT: control target
= control target key end

     0   :  { %vm534_vm0 = vcmask 125952   ;;  %s1282_s0 = inlined_call_operand.vmem [shape: bf16[512,16], index: 0, kind: input, shape index: {}]   ;;  %s1283_s1 = inlined_call_operand.vmem [shape: f32[1,16], index: 1, kind: input, shape index: {}]   ;;  %s1284_s2 = inlined_call_operand.vmem [shape: f32[1,16], index: 2, kind: input, shape index: {}]   ;;  %s1285_s3 = inlined_call_operand.vmem [shape: bf16[512,16], index: 3, kind: output, shape index: {}]  }
   0x1   :  { %v604_v0 = vld [vmem:[%s1282_s0] sm:$0xff]   ;;  %v731_v5 = vld [vmem:[%s1282_s0 + $0x8] sm:$0xff]   ;;  %v732_v8 = vld [vmem:[%s1282_s0 + $0x10] sm:$0xff]  }
   0x2   :  { %v792_v1 = vld [vmem:[%s1283_s1] ss:$0 sm:$0xff]  ;;  %v605_v2 = vunpack.c.l.bf16 %v604_v0  ;;  %v606_v4 = vunpack.c.h.bf16 %v604_v0  ;;  %v609_v6 = vunpack.c.l.bf16 %v731_v5  ;;  %v610_v7 = vunpack.c.h.bf16 %v731_v5  ;;  %v733_v9 = vld [vmem:[%s1282_s0 + $0x18] sm:$0xff]   ;;  %v735_v39 = vld [vmem:[%s1282_s0 + $0x28] sm:$0xff]  }
   0x3   :  { %v797_v3 = vld [vmem:[%s1284_s2] ss:$0 sm:$0xff]  ;;  %v613_v12 = vunpack.c.l.bf16 %v732_v8  ;;  %v614_v13 = vunpack.c.h.bf16 %v732_v8  ;;  %v617_v16 = vunpack.c.l.bf16 %v733_v9  ;;  %v618_v17 = vunpack.c.h.bf16 %v733_v9  ;;  %v736_v53 = vld [vmem:[%s1282_s0 + $0x30] sm:$0xff]  }
   0x4   :  { %v146_v10 = vmul.f32 %v792_v1, %v605_v2  ;;  %v147_v11 = vmul.f32 %v792_v1, %v606_v4  ;;  %v148_v14 = vmul.f32 %v792_v1, %v609_v6  ;;  %v149_v15 = vmul.f32 %v792_v1, %v610_v7  ;;  %v734_v38 = vld [vmem:[%s1282_s0 + $0x20] sm:$0xff]  }
   0x5   :  { %v150_v20 = vmul.f32 %v792_v1, %v613_v12  ;;  %v151_v21 = vmul.f32 %v792_v1, %v614_v13  ;;  %v152_v24 = vmul.f32 %v792_v1, %v617_v16  ;;  %v153_v25 = vmul.f32 %v792_v1, %v618_v17  ;;  %v737_v16 = vld [vmem:[%s1282_s0 + $0x38] sm:$0xff]  }
   0x6   :  { %v214_v18 = vadd.f32 %v797_v3, %v146_v10  ;;  %v215_v19 = vadd.f32 %v797_v3, %v147_v11  ;;  %v216_v22 = vadd.f32 %v797_v3, %v148_v14  ;;  %v217_v23 = vadd.f32 %v797_v3, %v149_v15 }
   0x7   :  { %v218_v32 = vadd.f32 %v797_v3, %v150_v20  ;;  %v219_v33 = vadd.f32 %v797_v3, %v151_v21  ;;  %v220_v44 = vadd.f32 %v797_v3, %v152_v24  ;;  %v221_v45 = vadd.f32 %v797_v3, %v153_v25  ;;  %v738_v20 = vld [vmem:[%s1282_s0 + $0x40] sm:$0xff]  }
   0x8   :  { %vm278_vm1 = vcmp.ge.f32.partialorder %v214_v18, 0.0  ;;  %v342_v26 = vmul.f32 0.2, %v214_v18  ;;  %vm279_vm2 = vcmp.ge.f32.partialorder %v215_v19, 0.0  ;;  %v343_v27 = vmul.f32 0.2, %v215_v19 }
   0x9   :  { %vm280_vm3 = vcmp.ge.f32.partialorder %v216_v22, 0.0  ;;  %v344_v28 = vmul.f32 0.2, %v216_v22  ;;  %vm281_vm4 = vcmp.ge.f32.partialorder %v217_v23, 0.0  ;;  %v345_v29 = vmul.f32 0.2, %v217_v23 }
   0xa   :  { %v406_v30 = vsel %vm278_vm1, %v214_v18, %v342_v26  ;;  %v407_v31 = vsel %vm279_vm2, %v215_v19, %v343_v27  ;;  %vm282_vm5 = vcmp.ge.f32.partialorder %v218_v32, 0.0  ;;  %v346_v42 = vmul.f32 0.2, %v218_v32 }
   0xb   :  { %v470_v34 = vpack.c.bf16 %v406_v30, %v406_v30  ;;  %v471_v35 = vpack.c.bf16 %v407_v31, %v407_v31  ;;  %v408_v36 = vsel %vm280_vm3, %v216_v22, %v344_v28  ;;  %v409_v37 = vsel %vm281_vm4, %v217_v23, %v345_v29  ;;  %v739_v28 = vld [vmem:[%s1282_s0 + $0x48] sm:$0xff]  }
   0xc   :  { %v472_v40 = vpack.c.bf16 %v408_v36, %v408_v36  ;;  %v473_v41 = vpack.c.bf16 %v409_v37, %v409_v37  ;;  %vm283_vm6 = vcmp.ge.f32.partialorder %v219_v33, 0.0  ;;  %v347_v43 = vmul.f32 0.2, %v219_v33 }
   0xd   :  { %535 = vst.msk [vmem:[%s1285_s3] sm:$0xf] %vm534_vm0, %v470_v34  ;;  %v410_v46 = vsel %vm282_vm5, %v218_v32, %v346_v42  ;;  %v621_v47 = vunpack.c.l.bf16 %v734_v38  ;;  %v622_v48 = vunpack.c.h.bf16 %v734_v38  ;;  %v625_v49 = vunpack.c.l.bf16 %v735_v39 }
   0xe   :  { %536 = vst.msk [vmem:[%s1285_s3 + $0x4] sm:$0xf] %vm534_vm0, %v471_v35  ;;  %v474_v50 = vpack.c.bf16 %v410_v46, %v410_v46  ;;  %v411_v51 = vsel %vm283_vm6, %v219_v33, %v347_v43  ;;  %vm284_vm7 = vcmp.ge.f32.partialorder %v220_v44, 0.0  ;;  %v348_v52 = vmul.f32 0.2, %v220_v44  ;;  %v897_v33 = vld [vmem:[%s1282_s0 + $0x50] sm:$0xff]  }
   0xf   :  { %537 = vst.msk [vmem:[%s1285_s3 + $0x8] sm:$0xf] %vm534_vm0, %v472_v40  ;;  %v475_v54 = vpack.c.bf16 %v411_v51, %v411_v51  ;;  %vm285_vm8 = vcmp.ge.f32.partialorder %v221_v45, 0.0  ;;  %v349_v55 = vmul.f32 0.2, %v221_v45  ;;  %v154_v56 = vmul.f32 %v792_v1, %v621_v47 }
  0x10   :  { %538 = vst.msk [vmem:[%s1285_s3 + $0xc] sm:$0xf] %vm534_vm0, %v473_v41  ;;  %v412_v57 = vsel %vm284_vm7, %v220_v44, %v348_v52  ;;  %v155_v58 = vmul.f32 %v792_v1, %v622_v48  ;;  %v156_v59 = vmul.f32 %v792_v1, %v625_v49  ;;  %v626_v60 = vunpack.c.h.bf16 %v735_v39 }
  0x11   :  { %539 = vst.msk [vmem:[%s1285_s3 + $0x10] sm:$0xf] %vm534_vm0, %v474_v50  ;;  %v476_v61 = vpack.c.bf16 %v412_v57, %v412_v57  ;;  %v413_v62 = vsel %vm285_vm8, %v221_v45, %v349_v55  ;;  %v222_v63 = vadd.f32 %v797_v3, %v154_v56  ;;  %v629_v0 = vunpack.c.l.bf16 %v736_v53 }
  0x12   :  { %540 = vst.msk [vmem:[%s1285_s3 + $0x14] sm:$0xf] %vm534_vm0, %v475_v54  ;;  %v477_v2 = vpack.c.bf16 %v413_v62, %v413_v62  ;;  %v223_v4 = vadd.f32 %v797_v3, %v155_v58  ;;  %v224_v5 = vadd.f32 %v797_v3, %v156_v59  ;;  %v157_v6 = vmul.f32 %v792_v1, %v626_v60 }
  0x13   :  { %541 = vst.msk [vmem:[%s1285_s3 + $0x18] sm:$0xf] %vm534_vm0, %v476_v61  ;;  %vm286_vm9 = vcmp.ge.f32.partialorder %v222_v63, 0.0  ;;  %v350_v7 = vmul.f32 0.2, %v222_v63  ;;  %v158_v8 = vmul.f32 %v792_v1, %v629_v0  ;;  %v630_v9 = vunpack.c.h.bf16 %v736_v53  ;;  %v741_v0 = vld [vmem:[%s1282_s0 + $0x58] sm:$0xff]  }
  0x14   :  { %542 = vst.msk [vmem:[%s1285_s3 + $0x1c] sm:$0xf] %vm534_vm0, %v477_v2  ;;  %vm287_vm10 = vcmp.ge.f32.partialorder %v223_v4, 0.0  ;;  %v351_v10 = vmul.f32 0.2, %v223_v4  ;;  %vm288_vm11 = vcmp.ge.f32.partialorder %v224_v5, 0.0  ;;  %v225_v11 = vadd.f32 %v797_v3, %v157_v6 }
  0x15   :  { %v414_v12 = vsel %vm286_vm9, %v222_v63, %v350_v7  ;;  %v352_v13 = vmul.f32 0.2, %v224_v5  ;;  %v226_v14 = vadd.f32 %v797_v3, %v158_v8  ;;  %v159_v15 = vmul.f32 %v792_v1, %v630_v9  ;;  %v742_v6 = vld [vmem:[%s1282_s0 + $0x60] sm:$0xff]  }
  0x16   :  { %v478_v17 = vpack.c.bf16 %v414_v12, %v414_v12  ;;  %v415_v18 = vsel %vm287_vm10, %v223_v4, %v351_v10  ;;  %vm289_vm12 = vcmp.ge.f32.partialorder %v225_v11, 0.0  ;;  %v353_v19 = vmul.f32 0.2, %v225_v11 }
  0x17   :  { %v479_v21 = vpack.c.bf16 %v415_v18, %v415_v18  ;;  %v416_v22 = vsel %vm288_vm11, %v224_v5, %v352_v13  ;;  %vm290_vm13 = vcmp.ge.f32.partialorder %v226_v14, 0.0  ;;  %v354_v23 = vmul.f32 0.2, %v226_v14 }
  0x18   :  { %543 = vst.msk [vmem:[%s1285_s3 + $0x20] sm:$0xf] %vm534_vm0, %v478_v17  ;;  %v480_v24 = vpack.c.bf16 %v416_v22, %v416_v22  ;;  %v417_v25 = vsel %vm289_vm12, %v225_v11, %v353_v19  ;;  %v227_v26 = vadd.f32 %v797_v3, %v159_v15  ;;  %v633_v27 = vunpack.c.l.bf16 %v737_v16  ;;  %v743_v11 = vld [vmem:[%s1282_s0 + $0x68] sm:$0xff]  }
  0x19   :  { %544 = vst.msk [vmem:[%s1285_s3 + $0x24] sm:$0xf] %vm534_vm0, %v479_v21  ;;  %v481_v29 = vpack.c.bf16 %v417_v25, %v417_v25  ;;  %v418_v30 = vsel %vm290_vm13, %v226_v14, %v354_v23  ;;  %v634_v31 = vunpack.c.h.bf16 %v737_v16  ;;  %v637_v32 = vunpack.c.l.bf16 %v738_v20 }
  0x1a   :  { %545 = vst.msk [vmem:[%s1285_s3 + $0x28] sm:$0xf] %vm534_vm0, %v480_v24  ;;  %v482_v34 = vpack.c.bf16 %v418_v30, %v418_v30  ;;  %vm291_vm14 = vcmp.ge.f32.partialorder %v227_v26, 0.0  ;;  %v355_v35 = vmul.f32 0.2, %v227_v26  ;;  %v160_v36 = vmul.f32 %v792_v1, %v633_v27 }
  0x1b   :  { %546 = vst.msk [vmem:[%s1285_s3 + $0x2c] sm:$0xf] %vm534_vm0, %v481_v29  ;;  %v161_v37 = vmul.f32 %v792_v1, %v634_v31  ;;  %v162_v38 = vmul.f32 %v792_v1, %v637_v32  ;;  %v638_v39 = vunpack.c.h.bf16 %v738_v20  ;;  %v641_v40 = vunpack.c.l.bf16 %v739_v28 }
  0x1c   :  { %547 = vst.msk [vmem:[%s1285_s3 + $0x30] sm:$0xf] %vm534_vm0, %v482_v34  ;;  %v419_v41 = vsel %vm291_vm14, %v227_v26, %v355_v35  ;;  %v228_v42 = vadd.f32 %v797_v3, %v160_v36  ;;  %v642_v43 = vunpack.c.h.bf16 %v739_v28  ;;  %v645_v44 = vunpack.c.l.bf16 %v897_v33 }
  0x1d   :  { %v483_v45 = vpack.c.bf16 %v419_v41, %v419_v41  ;;  %v229_v46 = vadd.f32 %v797_v3, %v161_v37  ;;  %v230_v47 = vadd.f32 %v797_v3, %v162_v38  ;;  %v163_v48 = vmul.f32 %v792_v1, %v638_v39 }
  0x1e   :  { %vm292_vm15 = vcmp.ge.f32.partialorder %v228_v42, 0.0  ;;  %v356_v49 = vmul.f32 0.2, %v228_v42  ;;  %v164_v50 = vmul.f32 %v792_v1, %v641_v40  ;;  %v165_v51 = vmul.f32 %v792_v1, %v642_v43  ;;  %v744_v43 = vld [vmem:[%s1282_s0 + $0x70] sm:$0xff]  }
  0x1f   :  { %548 = vst.msk [vmem:[%s1285_s3 + $0x34] sm:$0xf] %vm534_vm0, %v483_v45  ;;  %vm293_vm1 = vcmp.ge.f32.partialorder %v229_v46, 0.0  ;;  %v357_v52 = vmul.f32 0.2, %v229_v46  ;;  %vm294_vm2 = vcmp.ge.f32.partialorder %v230_v47, 0.0  ;;  %v231_v53 = vadd.f32 %v797_v3, %v163_v48 }
  0x20   :  { %v420_v54 = vsel %vm292_vm15, %v228_v42, %v356_v49  ;;  %v358_v55 = vmul.f32 0.2, %v230_v47  ;;  %v232_v56 = vadd.f32 %v797_v3, %v164_v50  ;;  %v233_v57 = vadd.f32 %v797_v3, %v165_v51  ;;  %v745_v48 = vld [vmem:[%s1282_s0 + $0x78] sm:$0xff]  }
  0x21   :  { %v484_v58 = vpack.c.bf16 %v420_v54, %v420_v54  ;;  %v421_v59 = vsel %vm293_vm1, %v229_v46, %v357_v52  ;;  %vm295_vm3 = vcmp.ge.f32.partialorder %v231_v53, 0.0  ;;  %v359_v60 = vmul.f32 0.2, %v231_v53 }
  0x22   :  { %v485_v61 = vpack.c.bf16 %v421_v59, %v421_v59  ;;  %v422_v62 = vsel %vm294_vm2, %v230_v47, %v358_v55  ;;  %vm296_vm4 = vcmp.ge.f32.partialorder %v232_v56, 0.0  ;;  %v360_v63 = vmul.f32 0.2, %v232_v56  ;;  %v746_v59 = vld [vmem:[%s1282_s0 + $0x80] sm:$0xff]  }
  0x23   :  { %549 = vst.msk [vmem:[%s1285_s3 + $0x38] sm:$0xf] %vm534_vm0, %v484_v58  ;;  %v486_v2 = vpack.c.bf16 %v422_v62, %v422_v62  ;;  %v423_v4 = vsel %vm295_vm3, %v231_v53, %v359_v60  ;;  %vm297_vm5 = vcmp.ge.f32.partialorder %v233_v57, 0.0  ;;  %v361_v5 = vmul.f32 0.2, %v233_v57 }
  0x24   :  { %550 = vst.msk [vmem:[%s1285_s3 + $0x3c] sm:$0xf] %vm534_vm0, %v485_v61  ;;  %v487_v7 = vpack.c.bf16 %v423_v4, %v423_v4  ;;  %v424_v8 = vsel %vm296_vm4, %v232_v56, %v360_v63  ;;  %v166_v9 = vmul.f32 %v792_v1, %v645_v44  ;;  %v646_v10 = vunpack.c.h.bf16 %v897_v33 }
  0x25   :  { %551 = vst.msk [vmem:[%s1285_s3 + $0x40] sm:$0xf] %vm534_vm0, %v486_v2  ;;  %v488_v12 = vpack.c.bf16 %v424_v8, %v424_v8  ;;  %v425_v13 = vsel %vm297_vm5, %v233_v57, %v361_v5  ;;  %v649_v14 = vunpack.c.l.bf16 %v741_v0  ;;  %v650_v15 = vunpack.c.h.bf16 %v741_v0 }
  0x26   :  { %552 = vst.msk [vmem:[%s1285_s3 + $0x44] sm:$0xf] %vm534_vm0, %v487_v7  ;;  %v489_v16 = vpack.c.bf16 %v425_v13, %v425_v13  ;;  %v234_v17 = vadd.f32 %v797_v3, %v166_v9  ;;  %v167_v18 = vmul.f32 %v792_v1, %v646_v10  ;;  %v653_v19 = vunpack.c.l.bf16 %v742_v6 }
  0x27   :  { %553 = vst.msk [vmem:[%s1285_s3 + $0x48] sm:$0xf] %vm534_vm0, %v488_v12  ;;  %v168_v20 = vmul.f32 %v792_v1, %v649_v14  ;;  %v169_v21 = vmul.f32 %v792_v1, %v650_v15  ;;  %v654_v22 = vunpack.c.h.bf16 %v742_v6  ;;  %v657_v23 = vunpack.c.l.bf16 %v743_v11 }
  0x28   :  { %554 = vst.msk [vmem:[%s1285_s3 + $0x4c] sm:$0xf] %vm534_vm0, %v489_v16  ;;  %vm298_vm6 = vcmp.ge.f32.partialorder %v234_v17, 0.0  ;;  %v362_v24 = vmul.f32 0.2, %v234_v17  ;;  %v235_v25 = vadd.f32 %v797_v3, %v167_v18  ;;  %v170_v26 = vmul.f32 %v792_v1, %v653_v19  ;;  %v747_v18 = vld [vmem:[%s1282_s0 + $0x88] sm:$0xff]  }
  0x29   :  { %v236_v27 = vadd.f32 %v797_v3, %v168_v20  ;;  %v237_v28 = vadd.f32 %v797_v3, %v169_v21  ;;  %v171_v29 = vmul.f32 %v792_v1, %v654_v22  ;;  %v172_v30 = vmul.f32 %v792_v1, %v657_v23 }
  0x2a   :  { %v426_v31 = vsel %vm298_vm6, %v234_v17, %v362_v24  ;;  %vm299_vm7 = vcmp.ge.f32.partialorder %v235_v25, 0.0  ;;  %v363_v32 = vmul.f32 0.2, %v235_v25  ;;  %v238_v33 = vadd.f32 %v797_v3, %v170_v26  ;;  %v748_v26 = vld [vmem:[%s1282_s0 + $0x90] sm:$0xff]  }
  0x2b   :  { %v490_v34 = vpack.c.bf16 %v426_v31, %v426_v31  ;;  %vm300_vm8 = vcmp.ge.f32.partialorder %v236_v27, 0.0  ;;  %v364_v35 = vmul.f32 0.2, %v236_v27  ;;  %vm301_vm9 = vcmp.ge.f32.partialorder %v237_v28, 0.0  ;;  %v749_v31 = vld [vmem:[%s1282_s0 + $0x98] sm:$0xff]  }
  0x2c   :  { %v427_v36 = vsel %vm299_vm7, %v235_v25, %v363_v32  ;;  %v365_v37 = vmul.f32 0.2, %v237_v28  ;;  %vm302_vm10 = vcmp.ge.f32.partialorder %v238_v33, 0.0  ;;  %v366_v38 = vmul.f32 0.2, %v238_v33 }
  0x2d   :  { %555 = vst.msk [vmem:[%s1285_s3 + $0x50] sm:$0xf] %vm534_vm0, %v490_v34  ;;  %v491_v39 = vpack.c.bf16 %v427_v36, %v427_v36  ;;  %v428_v40 = vsel %vm300_vm8, %v236_v27, %v364_v35  ;;  %v239_v41 = vadd.f32 %v797_v3, %v171_v29  ;;  %v240_v42 = vadd.f32 %v797_v3, %v172_v30 }
  0x2e   :  { %v492_v44 = vpack.c.bf16 %v428_v40, %v428_v40  ;;  %v429_v45 = vsel %vm301_vm9, %v237_v28, %v365_v37  ;;  %v430_v46 = vsel %vm302_vm10, %v238_v33, %v366_v38  ;;  %v658_v47 = vunpack.c.h.bf16 %v743_v11 }
  0x2f   :  { %556 = vst.msk [vmem:[%s1285_s3 + $0x54] sm:$0xf] %vm534_vm0, %v491_v39  ;;  %v493_v49 = vpack.c.bf16 %v429_v45, %v429_v45  ;;  %v494_v50 = vpack.c.bf16 %v430_v46, %v430_v46  ;;  %vm303_vm11 = vcmp.ge.f32.partialorder %v239_v41, 0.0  ;;  %v367_v51 = vmul.f32 0.2, %v239_v41 }
  0x30   :  { %557 = vst.msk [vmem:[%s1285_s3 + $0x58] sm:$0xf] %vm534_vm0, %v492_v44  ;;  %vm304_vm12 = vcmp.ge.f32.partialorder %v240_v42, 0.0  ;;  %v368_v52 = vmul.f32 0.2, %v240_v42  ;;  %v173_v53 = vmul.f32 %v792_v1, %v658_v47  ;;  %v661_v54 = vunpack.c.l.bf16 %v744_v43 }
  0x31   :  { %558 = vst.msk [vmem:[%s1285_s3 + $0x5c] sm:$0xf] %vm534_vm0, %v493_v49  ;;  %v431_v55 = vsel %vm303_vm11, %v239_v41, %v367_v51  ;;  %v662_v56 = vunpack.c.h.bf16 %v744_v43  ;;  %v665_v57 = vunpack.c.l.bf16 %v745_v48  ;;  %v666_v58 = vunpack.c.h.bf16 %v745_v48 }
  0x32   :  { %559 = vst.msk [vmem:[%s1285_s3 + $0x60] sm:$0xf] %vm534_vm0, %v494_v50  ;;  %v495_v60 = vpack.c.bf16 %v431_v55, %v431_v55  ;;  %v432_v61 = vsel %vm304_vm12, %v240_v42, %v368_v52  ;;  %v241_v62 = vadd.f32 %v797_v3, %v173_v53  ;;  %v174_v63 = vmul.f32 %v792_v1, %v661_v54  ;;  %v750_v50 = vld [vmem:[%s1282_s0 + $0xa0] sm:$0xff]  }
  0x33   :  { %v496_v0 = vpack.c.bf16 %v432_v61, %v432_v61  ;;  %v175_v2 = vmul.f32 %v792_v1, %v662_v56  ;;  %v176_v4 = vmul.f32 %v792_v1, %v665_v57  ;;  %v177_v5 = vmul.f32 %v792_v1, %v666_v58 }
  0x34   :  { %560 = vst.msk [vmem:[%s1285_s3 + $0x64] sm:$0xf] %vm534_vm0, %v495_v60  ;;  %vm305_vm13 = vcmp.ge.f32.partialorder %v241_v62, 0.0  ;;  %v369_v6 = vmul.f32 0.2, %v241_v62  ;;  %v242_v7 = vadd.f32 %v797_v3, %v174_v63  ;;  %v669_v8 = vunpack.c.l.bf16 %v746_v59 }
  0x35   :  { %561 = vst.msk [vmem:[%s1285_s3 + $0x68] sm:$0xf] %vm534_vm0, %v496_v0  ;;  %v243_v9 = vadd.f32 %v797_v3, %v175_v2  ;;  %v244_v10 = vadd.f32 %v797_v3, %v176_v4  ;;  %v245_v11 = vadd.f32 %v797_v3, %v177_v5  ;;  %v670_v12 = vunpack.c.h.bf16 %v746_v59 }
  0x36   :  { %v433_v13 = vsel %vm305_vm13, %v241_v62, %v369_v6  ;;  %vm306_vm14 = vcmp.ge.f32.partialorder %v242_v7, 0.0  ;;  %v370_v14 = vmul.f32 0.2, %v242_v7  ;;  %v178_v15 = vmul.f32 %v792_v1, %v669_v8 }
  0x37   :  { %v497_v16 = vpack.c.bf16 %v433_v13, %v433_v13  ;;  %vm307_vm15 = vcmp.ge.f32.partialorder %v243_v9, 0.0  ;;  %v371_v17 = vmul.f32 0.2, %v243_v9  ;;  %vm308_vm1 = vcmp.ge.f32.partialorder %v244_v10, 0.0 }
  0x38   :  { %v434_v19 = vsel %vm306_vm14, %v242_v7, %v370_v14  ;;  %v372_v20 = vmul.f32 0.2, %v244_v10  ;;  %vm309_vm2 = vcmp.ge.f32.partialorder %v245_v11, 0.0  ;;  %v373_v21 = vmul.f32 0.2, %v245_v11  ;;  %v751_v7 = vld [vmem:[%s1282_s0 + $0xa8] sm:$0xff]  }
  0x39   :  { %562 = vst.msk [vmem:[%s1285_s3 + $0x6c] sm:$0xf] %vm534_vm0, %v497_v16  ;;  %v498_v22 = vpack.c.bf16 %v434_v19, %v434_v19  ;;  %v435_v23 = vsel %vm307_vm15, %v243_v9, %v371_v17  ;;  %v246_v24 = vadd.f32 %v797_v3, %v178_v15  ;;  %v179_v25 = vmul.f32 %v792_v1, %v670_v12  ;;  %v752_v16 = vld [vmem:[%s1282_s0 + $0xb0] sm:$0xff]  }
  0x3a   :  { %v499_v27 = vpack.c.bf16 %v435_v23, %v435_v23  ;;  %v436_v28 = vsel %vm308_vm1, %v244_v10, %v372_v20  ;;  %v437_v29 = vsel %vm309_vm2, %v245_v11, %v373_v21  ;;  %v673_v30 = vunpack.c.l.bf16 %v747_v18  ;;  %v753_v21 = vld [vmem:[%s1282_s0 + $0xb8] sm:$0xff]  }
  0x3b   :  { %563 = vst.msk [vmem:[%s1285_s3 + $0x70] sm:$0xf] %vm534_vm0, %v498_v22  ;;  %v500_v32 = vpack.c.bf16 %v436_v28, %v436_v28  ;;  %v501_v33 = vpack.c.bf16 %v437_v29, %v437_v29  ;;  %vm310_vm3 = vcmp.ge.f32.partialorder %v246_v24, 0.0  ;;  %v374_v34 = vmul.f32 0.2, %v246_v24 }
  0x3c   :  { %564 = vst.msk [vmem:[%s1285_s3 + $0x74] sm:$0xf] %vm534_vm0, %v499_v27  ;;  %v247_v35 = vadd.f32 %v797_v3, %v179_v25  ;;  %v180_v36 = vmul.f32 %v792_v1, %v673_v30  ;;  %v674_v37 = vunpack.c.h.bf16 %v747_v18  ;;  %v677_v38 = vunpack.c.l.bf16 %v748_v26 }
  0x3d   :  { %565 = vst.msk [vmem:[%s1285_s3 + $0x78] sm:$0xf] %vm534_vm0, %v500_v32  ;;  %v438_v39 = vsel %vm310_vm3, %v246_v24, %v374_v34  ;;  %v678_v40 = vunpack.c.h.bf16 %v748_v26  ;;  %v681_v41 = vunpack.c.l.bf16 %v749_v31  ;;  %v682_v42 = vunpack.c.h.bf16 %v749_v31 }
  0x3e   :  { %566 = vst.msk [vmem:[%s1285_s3 + $0x7c] sm:$0xf] %vm534_vm0, %v501_v33  ;;  %v502_v43 = vpack.c.bf16 %v438_v39, %v438_v39  ;;  %vm311_vm4 = vcmp.ge.f32.partialorder %v247_v35, 0.0  ;;  %v375_v44 = vmul.f32 0.2, %v247_v35  ;;  %v248_v45 = vadd.f32 %v797_v3, %v180_v36 }
  0x3f   :  { %v181_v46 = vmul.f32 %v792_v1, %v674_v37  ;;  %v182_v47 = vmul.f32 %v792_v1, %v677_v38  ;;  %v183_v48 = vmul.f32 %v792_v1, %v678_v40  ;;  %v184_v49 = vmul.f32 %v792_v1, %v681_v41 }
  0x40   :  { %567 = vst.msk [vmem:[%s1285_s3 + $0x80] sm:$0xf] %vm534_vm0, %v502_v43  ;;  %v439_v51 = vsel %vm311_vm4, %v247_v35, %v375_v44  ;;  %vm312_vm5 = vcmp.ge.f32.partialorder %v248_v45, 0.0  ;;  %v376_v52 = vmul.f32 0.2, %v248_v45  ;;  %v185_v53 = vmul.f32 %v792_v1, %v682_v42 }
  0x41   :  { %v503_v54 = vpack.c.bf16 %v439_v51, %v439_v51  ;;  %v249_v55 = vadd.f32 %v797_v3, %v181_v46  ;;  %v250_v56 = vadd.f32 %v797_v3, %v182_v47  ;;  %v251_v57 = vadd.f32 %v797_v3, %v183_v48 }
  0x42   :  { %v440_v58 = vsel %vm312_vm5, %v248_v45, %v376_v52  ;;  %v252_v59 = vadd.f32 %v797_v3, %v184_v49  ;;  %v253_v60 = vadd.f32 %v797_v3, %v185_v53  ;;  %v685_v61 = vunpack.c.l.bf16 %v750_v50  ;;  %v754_v52 = vld [vmem:[%s1282_s0 + $0xc0] sm:$0xff]   ;;  %v755_v53 = vld [vmem:[%s1282_s0 + $0xc8] sm:$0xff]  }
  0x43   :  { %568 = vst.msk [vmem:[%s1285_s3 + $0x84] sm:$0xf] %vm534_vm0, %v503_v54  ;;  %v504_v62 = vpack.c.bf16 %v440_v58, %v440_v58  ;;  %vm313_vm6 = vcmp.ge.f32.partialorder %v249_v55, 0.0  ;;  %v377_v63 = vmul.f32 0.2, %v249_v55  ;;  %vm314_vm7 = vcmp.ge.f32.partialorder %v250_v56, 0.0 }
  0x44   :  { %v378_v0 = vmul.f32 0.2, %v250_v56  ;;  %vm315_vm8 = vcmp.ge.f32.partialorder %v251_v57, 0.0  ;;  %v379_v2 = vmul.f32 0.2, %v251_v57  ;;  %vm316_vm9 = vcmp.ge.f32.partialorder %v252_v59, 0.0 }
  0x45   :  { %569 = vst.msk [vmem:[%s1285_s3 + $0x88] sm:$0xf] %vm534_vm0, %v504_v62  ;;  %v441_v4 = vsel %vm313_vm6, %v249_v55, %v377_v63  ;;  %v380_v5 = vmul.f32 0.2, %v252_v59  ;;  %vm317_vm10 = vcmp.ge.f32.partialorder %v253_v60, 0.0  ;;  %v186_v6 = vmul.f32 %v792_v1, %v685_v61 }
  0x46   :  { %v505_v8 = vpack.c.bf16 %v441_v4, %v441_v4  ;;  %v442_v9 = vsel %vm314_vm7, %v250_v56, %v378_v0  ;;  %v443_v10 = vsel %vm315_vm8, %v251_v57, %v379_v2  ;;  %v381_v11 = vmul.f32 0.2, %v253_v60  ;;  %v756_v2 = vld [vmem:[%s1282_s0 + $0xd0] sm:$0xff]  }
  0x47   :  { %v506_v12 = vpack.c.bf16 %v442_v9, %v442_v9  ;;  %v507_v13 = vpack.c.bf16 %v443_v10, %v443_v10  ;;  %v444_v14 = vsel %vm316_vm9, %v252_v59, %v380_v5  ;;  %v254_v15 = vadd.f32 %v797_v3, %v186_v6 }
  0x48   :  { %570 = vst.msk [vmem:[%s1285_s3 + $0x8c] sm:$0xf] %vm534_vm0, %v505_v8  ;;  %v508_v17 = vpack.c.bf16 %v444_v14, %v444_v14  ;;  %v445_v18 = vsel %vm317_vm10, %v253_v60, %v381_v11  ;;  %v686_v19 = vunpack.c.h.bf16 %v750_v50  ;;  %v689_v20 = vunpack.c.l.bf16 %v751_v7  ;;  %v757_v11 = vld [vmem:[%s1282_s0 + $0xd8] sm:$0xff]  }
  0x49   :  { %571 = vst.msk [vmem:[%s1285_s3 + $0x90] sm:$0xf] %vm534_vm0, %v506_v12  ;;  %v509_v22 = vpack.c.bf16 %v445_v18, %v445_v18  ;;  %vm318_vm11 = vcmp.ge.f32.partialorder %v254_v15, 0.0  ;;  %v382_v23 = vmul.f32 0.2, %v254_v15  ;;  %v690_v24 = vunpack.c.h.bf16 %v751_v7 }
  0x4a   :  { %572 = vst.msk [vmem:[%s1285_s3 + $0x94] sm:$0xf] %vm534_vm0, %v507_v13  ;;  %v187_v25 = vmul.f32 %v792_v1, %v686_v19  ;;  %v188_v26 = vmul.f32 %v792_v1, %v689_v20  ;;  %v693_v27 = vunpack.c.l.bf16 %v752_v16  ;;  %v694_v28 = vunpack.c.h.bf16 %v752_v16 }
  0x4b   :  { %573 = vst.msk [vmem:[%s1285_s3 + $0x98] sm:$0xf] %vm534_vm0, %v508_v17  ;;  %v446_v29 = vsel %vm318_vm11, %v254_v15, %v382_v23  ;;  %v189_v30 = vmul.f32 %v792_v1, %v690_v24  ;;  %v697_v31 = vunpack.c.l.bf16 %v753_v21  ;;  %v698_v32 = vunpack.c.h.bf16 %v753_v21 }
  0x4c   :  { %574 = vst.msk [vmem:[%s1285_s3 + $0x9c] sm:$0xf] %vm534_vm0, %v509_v22  ;;  %v510_v33 = vpack.c.bf16 %v446_v29, %v446_v29  ;;  %v255_v34 = vadd.f32 %v797_v3, %v187_v25  ;;  %v256_v35 = vadd.f32 %v797_v3, %v188_v26  ;;  %v190_v36 = vmul.f32 %v792_v1, %v693_v27 }
  0x4d   :  { %v257_v37 = vadd.f32 %v797_v3, %v189_v30  ;;  %v191_v38 = vmul.f32 %v792_v1, %v694_v28  ;;  %v192_v39 = vmul.f32 %v792_v1, %v697_v31  ;;  %v193_v40 = vmul.f32 %v792_v1, %v698_v32 }
  0x4e   :  { %575 = vst.msk [vmem:[%s1285_s3 + $0xa0] sm:$0xf] %vm534_vm0, %v510_v33  ;;  %vm319_vm12 = vcmp.ge.f32.partialorder %v255_v34, 0.0  ;;  %v383_v41 = vmul.f32 0.2, %v255_v34  ;;  %vm320_vm13 = vcmp.ge.f32.partialorder %v256_v35, 0.0  ;;  %v258_v42 = vadd.f32 %v797_v3, %v190_v36 }
  0x4f   :  { %v384_v43 = vmul.f32 0.2, %v256_v35  ;;  %vm321_vm14 = vcmp.ge.f32.partialorder %v257_v37, 0.0  ;;  %v385_v44 = vmul.f32 0.2, %v257_v37  ;;  %v259_v45 = vadd.f32 %v797_v3, %v191_v38  ;;  %v758_v36 = vld [vmem:[%s1282_s0 + $0xe0] sm:$0xff]  }
  0x50   :  { %v447_v46 = vsel %vm319_vm12, %v255_v34, %v383_v41  ;;  %vm322_vm15 = vcmp.ge.f32.partialorder %v258_v42, 0.0  ;;  %v386_v47 = vmul.f32 0.2, %v258_v42  ;;  %v260_v48 = vadd.f32 %v797_v3, %v192_v39 }
  0x51   :  { %v511_v49 = vpack.c.bf16 %v447_v46, %v447_v46  ;;  %v448_v50 = vsel %vm320_vm13, %v256_v35, %v384_v43  ;;  %v449_v51 = vsel %vm321_vm14, %v257_v37, %v385_v44  ;;  %vm323_vm1 = vcmp.ge.f32.partialorder %v259_v45, 0.0 }
  0x52   :  { %v512_v54 = vpack.c.bf16 %v448_v50, %v448_v50  ;;  %v513_v55 = vpack.c.bf16 %v449_v51, %v449_v51  ;;  %v450_v56 = vsel %vm322_vm15, %v258_v42, %v386_v47  ;;  %v387_v57 = vmul.f32 0.2, %v259_v45  ;;  %v759_v47 = vld [vmem:[%s1282_s0 + $0xe8] sm:$0xff]  }
  0x53   :  { %576 = vst.msk [vmem:[%s1285_s3 + $0xa4] sm:$0xf] %vm534_vm0, %v511_v49  ;;  %v514_v58 = vpack.c.bf16 %v450_v56, %v450_v56  ;;  %vm324_vm2 = vcmp.ge.f32.partialorder %v260_v48, 0.0  ;;  %v388_v59 = vmul.f32 0.2, %v260_v48  ;;  %v261_v60 = vadd.f32 %v797_v3, %v193_v40 }
  0x54   :  { %577 = vst.msk [vmem:[%s1285_s3 + $0xa8] sm:$0xf] %vm534_vm0, %v512_v54  ;;  %v451_v61 = vsel %vm323_vm1, %v259_v45, %v387_v57  ;;  %v701_v62 = vunpack.c.l.bf16 %v754_v52  ;;  %v702_v63 = vunpack.c.h.bf16 %v754_v52  ;;  %v705_v0 = vunpack.c.l.bf16 %v755_v53 }
  0x55   :  { %578 = vst.msk [vmem:[%s1285_s3 + $0xac] sm:$0xf] %vm534_vm0, %v513_v55  ;;  %v515_v4 = vpack.c.bf16 %v451_v61, %v451_v61  ;;  %v452_v5 = vsel %vm324_vm2, %v260_v48, %v388_v59  ;;  %vm325_vm3 = vcmp.ge.f32.partialorder %v261_v60, 0.0  ;;  %v389_v6 = vmul.f32 0.2, %v261_v60  ;;  %v760_v55 = vld [vmem:[%s1282_s0 + $0xf0] sm:$0xff]  }
  0x56   :  { %579 = vst.msk [vmem:[%s1285_s3 + $0xb0] sm:$0xf] %vm534_vm0, %v514_v58  ;;  %v516_v7 = vpack.c.bf16 %v452_v5, %v452_v5  ;;  %v194_v8 = vmul.f32 %v792_v1, %v701_v62  ;;  %v195_v9 = vmul.f32 %v792_v1, %v702_v63  ;;  %v196_v10 = vmul.f32 %v792_v1, %v705_v0 }
  0x57   :  { %580 = vst.msk [vmem:[%s1285_s3 + $0xb4] sm:$0xf] %vm534_vm0, %v515_v4  ;;  %v453_v12 = vsel %vm325_vm3, %v261_v60, %v389_v6  ;;  %v706_v13 = vunpack.c.h.bf16 %v755_v53  ;;  %v709_v14 = vunpack.c.l.bf16 %v756_v2  ;;  %v710_v15 = vunpack.c.h.bf16 %v756_v2 }
  0x58   :  { %581 = vst.msk [vmem:[%s1285_s3 + $0xb8] sm:$0xf] %vm534_vm0, %v516_v7  ;;  %v517_v16 = vpack.c.bf16 %v453_v12, %v453_v12  ;;  %v262_v17 = vadd.f32 %v797_v3, %v194_v8  ;;  %v263_v18 = vadd.f32 %v797_v3, %v195_v9  ;;  %v264_v19 = vadd.f32 %v797_v3, %v196_v10 }
  0x59   :  { %v197_v20 = vmul.f32 %v792_v1, %v706_v13  ;;  %v198_v21 = vmul.f32 %v792_v1, %v709_v14  ;;  %v199_v22 = vmul.f32 %v792_v1, %v710_v15  ;;  %v713_v23 = vunpack.c.l.bf16 %v757_v11  ;;  %v761_v15 = vld [vmem:[%s1282_s0 + $0xf8] sm:$0xff]  }
  0x5a   :  { %582 = vst.msk [vmem:[%s1285_s3 + $0xbc] sm:$0xf] %vm534_vm0, %v517_v16  ;;  %vm326_vm4 = vcmp.ge.f32.partialorder %v262_v17, 0.0  ;;  %v390_v24 = vmul.f32 0.2, %v262_v17  ;;  %vm327_vm5 = vcmp.ge.f32.partialorder %v263_v18, 0.0  ;;  %v714_v25 = vunpack.c.h.bf16 %v757_v11 }
  0x5b   :  { %v391_v26 = vmul.f32 0.2, %v263_v18  ;;  %vm328_vm6 = vcmp.ge.f32.partialorder %v264_v19, 0.0  ;;  %v392_v27 = vmul.f32 0.2, %v264_v19  ;;  %v265_v28 = vadd.f32 %v797_v3, %v197_v20 }
  0x5c   :  { %v454_v29 = vsel %vm326_vm4, %v262_v17, %v390_v24  ;;  %v266_v30 = vadd.f32 %v797_v3, %v198_v21  ;;  %v267_v31 = vadd.f32 %v797_v3, %v199_v22  ;;  %v200_v32 = vmul.f32 %v792_v1, %v713_v23 }
  0x5d   :  { %v518_v33 = vpack.c.bf16 %v454_v29, %v454_v29  ;;  %v455_v34 = vsel %vm327_vm5, %v263_v18, %v391_v26  ;;  %v456_v35 = vsel %vm328_vm6, %v264_v19, %v392_v27  ;;  %vm329_vm7 = vcmp.ge.f32.partialorder %v265_v28, 0.0 }
  0x5e   :  { %v519_v37 = vpack.c.bf16 %v455_v34, %v455_v34  ;;  %v520_v38 = vpack.c.bf16 %v456_v35, %v456_v35  ;;  %v393_v39 = vmul.f32 0.2, %v265_v28  ;;  %vm330_vm8 = vcmp.ge.f32.partialorder %v266_v30, 0.0  ;;  %v765_v35 = vld [vmem:[%s1284_s2] ss:$0 sm:$0xff] }
  0x5f   :  { %583 = vst.msk [vmem:[%s1285_s3 + $0xc0] sm:$0xf] %vm534_vm0, %v518_v33  ;;  %v394_v40 = vmul.f32 0.2, %v266_v30  ;;  %vm331_vm9 = vcmp.ge.f32.partialorder %v267_v31, 0.0  ;;  %v268_v41 = vadd.f32 %v797_v3, %v200_v32  ;;  %v201_v42 = vmul.f32 %v792_v1, %v714_v25 }
  0x60   :  { %584 = vst.msk [vmem:[%s1285_s3 + $0xc4] sm:$0xf] %vm534_vm0, %v519_v37  ;;  %v457_v43 = vsel %vm329_vm7, %v265_v28, %v393_v39  ;;  %v395_v44 = vmul.f32 0.2, %v267_v31  ;;  %v717_v45 = vunpack.c.l.bf16 %v758_v36  ;;  %v718_v46 = vunpack.c.h.bf16 %v758_v36  ;;  %v764_v28 = vld [vmem:[%s1283_s1] ss:$0 sm:$0xff] }
  0x61   :  { %585 = vst.msk [vmem:[%s1285_s3 + $0xc8] sm:$0xf] %vm534_vm0, %v520_v38  ;;  %v521_v48 = vpack.c.bf16 %v457_v43, %v457_v43  ;;  %v458_v49 = vsel %vm330_vm8, %v266_v30, %v394_v40  ;;  %vm332_vm10 = vcmp.ge.f32.partialorder %v268_v41, 0.0  ;;  %v396_v50 = vmul.f32 0.2, %v268_v41 }
  0x62   :  { %v522_v51 = vpack.c.bf16 %v458_v49, %v458_v49  ;;  %v459_v52 = vsel %vm331_vm9, %v267_v31, %v395_v44  ;;  %v269_v53 = vadd.f32 %v797_v3, %v201_v42  ;;  %v202_v54 = vmul.f32 %v792_v1, %v717_v45 }
  0x63   :  { %586 = vst.msk [vmem:[%s1285_s3 + $0xcc] sm:$0xf] %vm534_vm0, %v521_v48  ;;  %v523_v56 = vpack.c.bf16 %v459_v52, %v459_v52  ;;  %v460_v57 = vsel %vm332_vm10, %v268_v41, %v396_v50  ;;  %v203_v58 = vmul.f32 %v792_v1, %v718_v46  ;;  %v721_v59 = vunpack.c.l.bf16 %v759_v47 }
  0x64   :  { %587 = vst.msk [vmem:[%s1285_s3 + $0xd0] sm:$0xf] %vm534_vm0, %v522_v51  ;;  %v524_v60 = vpack.c.bf16 %v460_v57, %v460_v57  ;;  %vm333_vm11 = vcmp.ge.f32.partialorder %v269_v53, 0.0  ;;  %v397_v61 = vmul.f32 0.2, %v269_v53  ;;  %v270_v62 = vadd.f32 %v797_v3, %v202_v54 }
  0x65   :  { %588 = vst.msk [vmem:[%s1285_s3 + $0xd4] sm:$0xf] %vm534_vm0, %v523_v56  ;;  %v271_v63 = vadd.f32 %v797_v3, %v203_v58  ;;  %v204_v0 = vmul.f32 %v792_v1, %v721_v59  ;;  %v722_v2 = vunpack.c.h.bf16 %v759_v47  ;;  %v725_v4 = vunpack.c.l.bf16 %v760_v55 }
  0x66   :  { %589 = vst.msk [vmem:[%s1285_s3 + $0xd8] sm:$0xf] %vm534_vm0, %v524_v60  ;;  %v461_v5 = vsel %vm333_vm11, %v269_v53, %v397_v61  ;;  %vm334_vm12 = vcmp.ge.f32.partialorder %v270_v62, 0.0  ;;  %v398_v6 = vmul.f32 0.2, %v270_v62  ;;  %v726_v7 = vunpack.c.h.bf16 %v760_v55 }
  0x67   :  { %v525_v8 = vpack.c.bf16 %v461_v5, %v461_v5  ;;  %vm335_vm13 = vcmp.ge.f32.partialorder %v271_v63, 0.0  ;;  %v399_v9 = vmul.f32 0.2, %v271_v63  ;;  %v272_v10 = vadd.f32 %v797_v3, %v204_v0 }
  0x68   :  { %v462_v11 = vsel %vm334_vm12, %v270_v62, %v398_v6  ;;  %v205_v12 = vmul.f32 %v792_v1, %v722_v2  ;;  %v206_v13 = vmul.f32 %v792_v1, %v725_v4  ;;  %v207_v14 = vmul.f32 %v792_v1, %v726_v7 }
  0x69   :  { %590 = vst.msk [vmem:[%s1285_s3 + $0xdc] sm:$0xf] %vm534_vm0, %v525_v8  ;;  %v526_v16 = vpack.c.bf16 %v462_v11, %v462_v11  ;;  %v463_v17 = vsel %vm335_vm13, %v271_v63, %v399_v9  ;;  %vm336_vm14 = vcmp.ge.f32.partialorder %v272_v10, 0.0  ;;  %v400_v18 = vmul.f32 0.2, %v272_v10 }
  0x6a   :  { %v527_v19 = vpack.c.bf16 %v463_v17, %v463_v17  ;;  %v273_v20 = vadd.f32 %v797_v3, %v205_v12  ;;  %v274_v21 = vadd.f32 %v797_v3, %v206_v13  ;;  %v275_v1 = vadd.f32 %v797_v3, %v207_v14 }
  0x6b   :  { %591 = vst.msk [vmem:[%s1285_s3 + $0xe0] sm:$0xf] %vm534_vm0, %v526_v16  ;;  %v464_v22 = vsel %vm336_vm14, %v272_v10, %v400_v18  ;;  %v729_v23 = vunpack.c.l.bf16 %v761_v15  ;;  %v730_v24 = vunpack.c.h.bf16 %v761_v15 }
  0x6c   :  { %592 = vst.msk [vmem:[%s1285_s3 + $0xe4] sm:$0xf] %vm534_vm0, %v527_v19  ;;  %v528_v25 = vpack.c.bf16 %v464_v22, %v464_v22  ;;  %vm337_vm15 = vcmp.ge.f32.partialorder %v273_v20, 0.0  ;;  %v401_v26 = vmul.f32 0.2, %v273_v20  ;;  %vm338_vm1 = vcmp.ge.f32.partialorder %v274_v21, 0.0 }
  0x6d   :  { %v402_v27 = vmul.f32 0.2, %v274_v21  ;;  %vm339_vm2 = vcmp.ge.f32.partialorder %v275_v1, 0.0  ;;  %v403_v3 = vmul.f32 0.2, %v275_v1  ;;  %v208_v29 = vmul.f32 %v764_v28, %v729_v23 }
  0x6e   :  { %593 = vst.msk [vmem:[%s1285_s3 + $0xe8] sm:$0xf] %vm534_vm0, %v528_v25  ;;  %v465_v30 = vsel %vm337_vm15, %v273_v20, %v401_v26  ;;  %v209_v31 = vmul.f32 %v764_v28, %v730_v24 }
  0x6f   :  { %v529_v32 = vpack.c.bf16 %v465_v30, %v465_v30  ;;  %v466_v33 = vsel %vm338_vm1, %v274_v21, %v402_v27  ;;  %v467_v34 = vsel %vm339_vm2, %v275_v1, %v403_v3  ;;  %v276_v36 = vadd.f32 %v765_v35, %v208_v29 }
  0x70   :  { %v530_v37 = vpack.c.bf16 %v466_v33, %v466_v33  ;;  %v531_v38 = vpack.c.bf16 %v467_v34, %v467_v34  ;;  %v277_v39 = vadd.f32 %v765_v35, %v209_v31 }
  0x71   :  { %594 = vst.msk [vmem:[%s1285_s3 + $0xec] sm:$0xf] %vm534_vm0, %v529_v32  ;;  %vm340_vm3 = vcmp.ge.f32.partialorder %v276_v36, 0.0  ;;  %v404_v40 = vmul.f32 0.2, %v276_v36 }
  0x72   :  { %595 = vst.msk [vmem:[%s1285_s3 + $0xf0] sm:$0xf] %vm534_vm0, %v530_v37  ;;  %vm341_vm4 = vcmp.ge.f32.partialorder %v277_v39, 0.0  ;;  %v405_v41 = vmul.f32 0.2, %v277_v39 }
  0x73   :  { %596 = vst.msk [vmem:[%s1285_s3 + $0xf4] sm:$0xf] %vm534_vm0, %v531_v38  ;;  %v468_v42 = vsel %vm340_vm3, %v276_v36, %v404_v40 }
  0x74   :  { %v532_v43 = vpack.c.bf16 %v468_v42, %v468_v42  ;;  %v469_v44 = vsel %vm341_vm4, %v277_v39, %v405_v41 }
  0x75   :  { %v533_v45 = vpack.c.bf16 %v469_v44, %v469_v44 }
  0x76   :  { %597 = vst.msk [vmem:[%s1285_s3 + $0xf8] sm:$0xf] %vm534_vm0, %v532_v43 }
  0x77   :  { %598 = vst.msk [vmem:[%s1285_s3 + $0xfc] sm:$0xf] %vm534_vm0, %v533_v45 }

// kernel: _lambda_.11
= control target key start
LH: loop header
LB: loop body
LE: loop exit
PB: predicated region body
PF: predicated region fallthrough
CT: control target
= control target key end

     0   :  { %vm446_vm0 = vcmask 257024   ;;  %vm336_vm1 = vcmask 261120   ;;  %vm374_vm2 = vcmask 253952   ;;  %s964_s1 = inlined_call_operand.vmem [shape: bf16[256,32], index: 1, kind: input, shape index: {}]   ;;  %s965_s0 = inlined_call_operand.vmem [shape: bf16[128,256], index: 0, kind: input, shape index: {}]   ;;  %s966_s2 = inlined_call_operand.vmem [shape: bf16[128,32], index: 2, kind: output, shape index: {0}]   ;;  %s967_s3 = inlined_call_operand.vmem [shape: f32[1,1,32], index: 3, kind: output, shape index: {1}]   ;;  %s968_s4 = inlined_call_operand.vmem [shape: f32[1,1,32], index: 4, kind: output, shape index: {2}]  }
   0x1   :  { %v626_v0 = vld [vmem:[%s964_s1 + $0x38] sm:$0xff]  ;;  %v625_v2 = vld [vmem:[%s964_s1 + $0x30] sm:$0xff]  ;;  %v624_v4 = vld [vmem:[%s964_s1 + $0x28] sm:$0xff] }
   0x2   :  { %v634_v1 = vld [vmem:[%s964_s1 + $0x78] sm:$0xff]  ;;  %238 = vmatpush.bf16.msra.mxu0 %v626_v0  ;;  %v633_v3 = vld [vmem:[%s964_s1 + $0x70] sm:$0xff]  ;;  %635 = vmatpush.bf16.msra.mxu2 %v626_v0  ;;  %v632_v5 = vld [vmem:[%s964_s1 + $0x68] sm:$0xff] }
   0x3   :  { %287 = vmatpush.bf16.msra.mxu1 %v634_v1  ;;  %643 = vmatpush.bf16.msra.mxu3 %v634_v1  ;;  %v623_v6 = vld [vmem:[%s964_s1 + $0x20] sm:$0xff]  ;;  %v622_v8 = vld [vmem:[%s964_s1 + $0x18] sm:$0xff]  ;;  %v621_v10 = vld [vmem:[%s964_s1 + $0x10] sm:$0xff] }
   0x4   :  { %v631_v7 = vld [vmem:[%s964_s1 + $0x60] sm:$0xff]  ;;  %v630_v9 = vld [vmem:[%s964_s1 + $0x58] sm:$0xff]  ;;  %v629_v11 = vld [vmem:[%s964_s1 + $0x50] sm:$0xff] }
   0x5   :  { %v620_v12 = vld [vmem:[%s964_s1 + $0x8] sm:$0xff]  ;;  %v619_v14 = vld [vmem:[%s964_s1] sm:$0xff]  ;;  %v485_v28 = vld [vmem:[%s965_s0 + $0x10] sm:$0xf] }
   0x6   :  { %239 = vmatpush.bf16.msra.mxu0 %v625_v2  ;;  %636 = vmatpush.bf16.msra.mxu2 %v625_v2  ;;  %v628_v13 = vld [vmem:[%s964_s1 + $0x48] sm:$0xff]  ;;  %v627_v15 = vld [vmem:[%s964_s1 + $0x40] sm:$0xff]  ;;  %v606_v29 = vld [vmem:[%s965_s0 + $0x14] sm:$0xf0] }
   0x7   :  { %288 = vmatpush.bf16.msra.mxu1 %v633_v3  ;;  %644 = vmatpush.bf16.msra.mxu3 %v633_v3  ;;  %v477_v16 = vld [vmem:[%s965_s0] sm:$0xf]  ;;  %v604_v17 = vld [vmem:[%s965_s0 + $0x4] sm:$0xf0]  ;;  %v603_v18 = vld [vmem:[%s965_s0 + $0x4] sm:$0xf]  ;;  %v486_v36 = vor.u32 %v606_v29, %v485_v28 }
   0x8   :  { %v479_v19 = vld [vmem:[%s965_s0 + $0x8] sm:$0xf0]  ;;  %v509_v20 = vld [vmem:[%s965_s0 + $0x40] sm:$0xf]  ;;  %v612_v21 = vld [vmem:[%s965_s0 + $0x44] sm:$0xf0]  ;;  %v478_v24 = vor.u32 %v604_v17, %v477_v16 }
   0x9   :  { %v611_v22 = vld [vmem:[%s965_s0 + $0x44] sm:$0xf]  ;;  %v511_v23 = vld [vmem:[%s965_s0 + $0x48] sm:$0xf0]  ;;  %v482_v25 = vor.u32 %v603_v18, %v479_v19  ;;  %v510_v26 = vor.u32 %v612_v21, %v509_v20  ;;  %v605_v30 = vld [vmem:[%s965_s0 + $0x14] sm:$0xf] }
   0xa   :  { %240 = vmatpush.bf16.msra.mxu0 %v624_v4  ;;  %637 = vmatpush.bf16.msra.mxu2 %v624_v4  ;;  %v514_v27 = vor.u32 %v611_v22, %v511_v23  ;;  %v487_v31 = vld [vmem:[%s965_s0 + $0x18] sm:$0xf0]  ;;  %v517_v32 = vld [vmem:[%s965_s0 + $0x50] sm:$0xf]  ;;  %v614_v33 = vld [vmem:[%s965_s0 + $0x54] sm:$0xf0] }
   0xb   :  { %289 = vmatpush.bf16.msra.mxu1 %v632_v5  ;;  %645 = vmatpush.bf16.msra.mxu3 %v632_v5  ;;  %v613_v34 = vld [vmem:[%s965_s0 + $0x54] sm:$0xf]  ;;  %v519_v35 = vld [vmem:[%s965_s0 + $0x58] sm:$0xf0]  ;;  %v490_v37 = vor.u32 %v605_v30, %v487_v31  ;;  %v518_v38 = vor.u32 %v614_v33, %v517_v32  ;;  %v493_v40 = vld [vmem:[%s965_s0 + $0x20] sm:$0xf] }
   0xc   :  { %v522_v39 = vor.u32 %v613_v34, %v519_v35  ;;  %v608_v41 = vld [vmem:[%s965_s0 + $0x24] sm:$0xf0]  ;;  %v607_v42 = vld [vmem:[%s965_s0 + $0x24] sm:$0xf]  ;;  %v495_v43 = vld [vmem:[%s965_s0 + $0x28] sm:$0xf0] }
   0xd   :  { %v525_v44 = vld [vmem:[%s965_s0 + $0x60] sm:$0xf]  ;;  %v616_v45 = vld [vmem:[%s965_s0 + $0x64] sm:$0xf0]  ;;  %v615_v46 = vld [vmem:[%s965_s0 + $0x64] sm:$0xf]  ;;  %v494_v48 = vor.u32 %v608_v41, %v493_v40  ;;  %v498_v49 = vor.u32 %v607_v42, %v495_v43 }
   0xe   :  { %241 = vmatpush.bf16.msra.mxu0 %v623_v6  ;;  %638 = vmatpush.bf16.msra.mxu2 %v623_v6  ;;  %v527_v47 = vld [vmem:[%s965_s0 + $0x68] sm:$0xf0]  ;;  %v526_v50 = vor.u32 %v616_v45, %v525_v44  ;;  %v501_v52 = vld [vmem:[%s965_s0 + $0x30] sm:$0xf]  ;;  %v610_v53 = vld [vmem:[%s965_s0 + $0x34] sm:$0xf0] }
   0xf   :  { %290 = vmatpush.bf16.msra.mxu1 %v631_v7  ;;  %646 = vmatpush.bf16.msra.mxu3 %v631_v7  ;;  %v530_v51 = vor.u32 %v615_v46, %v527_v47  ;;  %v609_v54 = vld [vmem:[%s965_s0 + $0x34] sm:$0xf]  ;;  %v503_v55 = vld [vmem:[%s965_s0 + $0x38] sm:$0xf0]  ;;  %v533_v56 = vld [vmem:[%s965_s0 + $0x70] sm:$0xf]  ;;  %v502_v60 = vor.u32 %v610_v53, %v501_v52 }
  0x10   :  { %v618_v57 = vld [vmem:[%s965_s0 + $0x74] sm:$0xf0]  ;;  %v617_v58 = vld [vmem:[%s965_s0 + $0x74] sm:$0xf]  ;;  %v535_v59 = vld [vmem:[%s965_s0 + $0x78] sm:$0xf0]  ;;  %v506_v61 = vor.u32 %v609_v54, %v503_v55 }
  0x11   :  { %v534_v62 = vor.u32 %v618_v57, %v533_v56  ;;  %v538_v63 = vor.u32 %v617_v58, %v535_v59 }
  0x12   :  { %242 = vmatpush.bf16.msra.mxu0 %v622_v8  ;;  %639 = vmatpush.bf16.msra.mxu2 %v622_v8 }
  0x13   :  { %291 = vmatpush.bf16.msra.mxu1 %v630_v9  ;;  %647 = vmatpush.bf16.msra.mxu3 %v630_v9 }
  0x16   :  { %243 = vmatpush.bf16.msra.mxu0 %v621_v10  ;;  %640 = vmatpush.bf16.msra.mxu2 %v621_v10 }
  0x17   :  { %292 = vmatpush.bf16.msra.mxu1 %v629_v11  ;;  %648 = vmatpush.bf16.msra.mxu3 %v629_v11 }
  0x1a   :  { %244 = vmatpush.bf16.msra.mxu0 %v620_v12  ;;  %641 = vmatpush.bf16.msra.mxu2 %v620_v12 }
  0x1b   :  { %293 = vmatpush.bf16.msra.mxu1 %v628_v13  ;;  %649 = vmatpush.bf16.msra.mxu3 %v628_v13 }
  0x1e   :  { %245 = vmatpush.bf16.msra.mxu0 %v619_v14  ;;  %642 = vmatpush.bf16.msra.mxu2 %v619_v14 }
  0x1f   :  { %294 = vmatpush.bf16.msra.mxu1 %v627_v15  ;;  %650 = vmatpush.bf16.msra.mxu3 %v627_v15 }
  0x21   :  { %246 = vmatmul.bf16.vlgmr.msra.gmra.mxu0 %v478_v24  ;;  %266 = vmatmul.bf16.vlgmr.msra.gmra.mxu2 %v510_v26 }
  0x22   :  { %295 = vmatmul.bf16.vlgmr.msra.gmra.mxu1 %v482_v25  ;;  %315 = vmatmul.bf16.vlgmr.msra.gmra.mxu3 %v514_v27 }
  0x31   :  { %251 = vmatmul.bf16.gmra.mxu0 %v486_v36  ;;  %271 = vmatmul.bf16.gmra.mxu2 %v518_v38 }
  0x32   :  { %300 = vmatmul.bf16.gmra.mxu1 %v490_v37  ;;  %320 = vmatmul.bf16.gmra.mxu3 %v522_v39 }
  0x41   :  { %256 = vmatmul.bf16.gmra.mxu0 %v494_v48  ;;  %276 = vmatmul.bf16.gmra.mxu2 %v526_v50 }
  0x42   :  { %305 = vmatmul.bf16.gmra.mxu1 %v498_v49  ;;  %325 = vmatmul.bf16.gmra.mxu3 %v530_v51 }
  0x51   :  { %261 = vmatmul.bf16.gmra.mxu0 %v502_v60  ;;  %281 = vmatmul.bf16.gmra.mxu2 %v534_v62 }
  0x52   :  { %310 = vmatmul.bf16.gmra.mxu1 %v506_v61  ;;  %330 = vmatmul.bf16.gmra.mxu3 %v538_v63 }
  0x9e   :  { %v247_v0 = vpop.f32.mrf.mxu0 }
  0x9f   :  { %v296_v1 = vpop.f32.mrf.mxu1 }
  0xa0   :  { %v297_v2 = vadd.f32 %v296_v1, %v247_v0 }
  0xa2   :  { %v430_v3 = vpack.c.bf16 %v297_v2, %v297_v2  ;;  %v376_v45 = vmul.f32 %v297_v2, %v297_v2  ;;  %v337_v48 = vsel %vm336_vm1, %v297_v2, 0.0 }
  0xa4   :  { %447 = vst.msk [vmem:[%s966_s2] sm:$0xf] %vm446_vm0, %v430_v3  ;;  %v267_v4 = vpop.f32.mrf.mxu2  ;;  %v392_v54 = vsel %vm336_vm1, %v376_v45, 0.0 }
  0xa5   :  { %v316_v5 = vpop.f32.mrf.mxu3 }
  0xa6   :  { %v249_v6 = vpop.f32.mrf.mxu0  ;;  %v824_v8 = vadd.f32 %v316_v5, %v267_v4 }
  0xa7   :  { %v298_v7 = vpop.f32.mrf.mxu1 }
  0xa8   :  { %v299_v9 = vadd.f32 %v298_v7, %v249_v6  ;;  %v438_v10 = vpack.c.bf16 %v824_v8, %v824_v8 }
  0xaa   :  { %v431_v11 = vpack.c.bf16 %v299_v9, %v299_v9  ;;  %455 = vst.msk [vmem:[%s966_s2 + $0x20] sm:$0xf] %vm446_vm0, %v438_v10  ;;  %v377_v43 = vmul.f32 %v299_v9, %v299_v9  ;;  %v338_v46 = vsel %vm336_vm1, %v299_v9, 0.0 }
  0xab   :  { %v339_v55 = vadd.f32 %v338_v46, %v337_v48 }
  0xac   :  { %448 = vst.msk [vmem:[%s966_s2 + $0x4] sm:$0xf] %vm446_vm0, %v431_v11  ;;  %v269_v12 = vpop.f32.mrf.mxu2  ;;  %v393_v49 = vsel %vm336_vm1, %v377_v43, 0.0 }
  0xad   :  { %v318_v13 = vpop.f32.mrf.mxu3  ;;  %v394_v63 = vadd.f32 %v393_v49, %v392_v54 }
  0xae   :  { %v252_v14 = vpop.f32.mrf.mxu0  ;;  %v836_v16 = vadd.f32 %v318_v13, %v269_v12 }
  0xaf   :  { %v301_v15 = vpop.f32.mrf.mxu1 }
  0xb0   :  { %v302_v17 = vadd.f32 %v301_v15, %v252_v14  ;;  %v439_v18 = vpack.c.bf16 %v836_v16, %v836_v16 }
  0xb2   :  { %v432_v19 = vpack.c.bf16 %v302_v17, %v302_v17  ;;  %456 = vst.msk [vmem:[%s966_s2 + $0x24] sm:$0xf] %vm446_vm0, %v439_v18  ;;  %v378_v47 = vmul.f32 %v302_v17, %v302_v17  ;;  %v340_v50 = vsel %vm336_vm1, %v302_v17, 0.0 }
  0xb3   :  { %v341_v0 = vadd.f32 %v340_v50, %v339_v55 }
  0xb4   :  { %449 = vst.msk [vmem:[%s966_s2 + $0x8] sm:$0xf] %vm446_vm0, %v432_v19  ;;  %v272_v20 = vpop.f32.mrf.mxu2  ;;  %v395_v59 = vsel %vm336_vm1, %v378_v47, 0.0 }
  0xb5   :  { %v321_v21 = vpop.f32.mrf.mxu3  ;;  %v396_v6 = vadd.f32 %v395_v59, %v394_v63 }
  0xb6   :  { %v254_v22 = vpop.f32.mrf.mxu0  ;;  %v848_v24 = vadd.f32 %v321_v21, %v272_v20 }
  0xb7   :  { %v303_v23 = vpop.f32.mrf.mxu1 }
  0xb8   :  { %v304_v25 = vadd.f32 %v303_v23, %v254_v22  ;;  %v440_v26 = vpack.c.bf16 %v848_v24, %v848_v24 }
  0xba   :  { %v433_v27 = vpack.c.bf16 %v304_v25, %v304_v25  ;;  %457 = vst.msk [vmem:[%s966_s2 + $0x28] sm:$0xf] %vm446_vm0, %v440_v26  ;;  %v379_v51 = vmul.f32 %v304_v25, %v304_v25  ;;  %v342_v60 = vsel %vm336_vm1, %v304_v25, 0.0 }
  0xbb   :  { %v343_v7 = vadd.f32 %v342_v60, %v341_v0 }
  0xbc   :  { %450 = vst.msk [vmem:[%s966_s2 + $0xc] sm:$0xf] %vm446_vm0, %v433_v27  ;;  %v274_v28 = vpop.f32.mrf.mxu2  ;;  %v397_v2 = vsel %vm336_vm1, %v379_v51, 0.0  ;;  %v356_v51 = vsel %vm336_vm1, %v848_v24, 0.0 }
  0xbd   :  { %v323_v29 = vpop.f32.mrf.mxu3  ;;  %v398_v12 = vadd.f32 %v397_v2, %v396_v6 }
  0xbe   :  { %v257_v30 = vpop.f32.mrf.mxu0  ;;  %v860_v32 = vadd.f32 %v323_v29, %v274_v28 }
  0xbf   :  { %v306_v31 = vpop.f32.mrf.mxu1 }
  0xc0   :  { %v307_v33 = vadd.f32 %v306_v31, %v257_v30  ;;  %v441_v34 = vpack.c.bf16 %v860_v32, %v860_v32  ;;  %v384_v30 = vmul.f32 %v824_v8, %v824_v8  ;;  %v358_v55 = vsel %vm336_vm1, %v860_v32, 0.0 }
  0xc2   :  { %v434_v35 = vpack.c.bf16 %v307_v33, %v307_v33  ;;  %458 = vst.msk [vmem:[%s966_s2 + $0x2c] sm:$0xf] %vm446_vm0, %v441_v34  ;;  %v380_v61 = vmul.f32 %v307_v33, %v307_v33  ;;  %v344_v3 = vsel %vm336_vm1, %v307_v33, 0.0  ;;  %v407_v43 = vsel %vm336_vm1, %v384_v30, 0.0 }
  0xc3   :  { %v345_v13 = vadd.f32 %v344_v3, %v343_v7 }
  0xc4   :  { %451 = vst.msk [vmem:[%s966_s2 + $0x10] sm:$0xf] %vm446_vm0, %v434_v35  ;;  %v277_v36 = vpop.f32.mrf.mxu2  ;;  %v399_v9 = vsel %vm336_vm1, %v380_v61, 0.0 }
  0xc5   :  { %v326_v37 = vpop.f32.mrf.mxu3  ;;  %v400_v19 = vadd.f32 %v399_v9, %v398_v12 }
  0xc6   :  { %v259_v38 = vpop.f32.mrf.mxu0  ;;  %v872_v40 = vadd.f32 %v326_v37, %v277_v36  ;;  %v352_v37 = vsel %vm336_vm1, %v824_v8, 0.0  ;;  %v386_v8 = vmul.f32 %v848_v24, %v848_v24 }
  0xc7   :  { %v308_v39 = vpop.f32.mrf.mxu1 }
  0xc8   :  { %v309_v41 = vadd.f32 %v308_v39, %v259_v38  ;;  %v442_v42 = vpack.c.bf16 %v872_v40, %v872_v40  ;;  %v385_v38 = vmul.f32 %v836_v16, %v836_v16  ;;  %v360_v24 = vsel %vm336_vm1, %v872_v40, 0.0 }
  0xca   :  { %v435_v44 = vpack.c.bf16 %v309_v41, %v309_v41  ;;  %459 = vst.msk [vmem:[%s966_s2 + $0x30] sm:$0xf] %vm446_vm0, %v442_v42  ;;  %v381_v4 = vmul.f32 %v309_v41, %v309_v41  ;;  %v346_v10 = vsel %vm336_vm1, %v309_v41, 0.0  ;;  %v409_v50 = vsel %vm336_vm1, %v385_v38, 0.0 }
  0xcb   :  { %v347_v20 = vadd.f32 %v346_v10, %v345_v13 }
  0xcc   :  { %452 = vst.msk [vmem:[%s966_s2 + $0x14] sm:$0xf] %vm446_vm0, %v435_v44  ;;  %v279_v52 = vpop.f32.mrf.mxu2  ;;  %v401_v14 = vsel %vm336_vm1, %v381_v4, 0.0  ;;  %v354_v44 = vsel %vm336_vm1, %v836_v16, 0.0  ;;  %v411_v16 = vsel %vm336_vm1, %v386_v8, 0.0 }
  0xcd   :  { %v328_v53 = vpop.f32.mrf.mxu3  ;;  %v402_v27 = vadd.f32 %v401_v14, %v400_v19 }
  0xce   :  { %v262_v56 = vpop.f32.mrf.mxu0  ;;  %v889_v58 = vadd.f32 %v328_v53, %v279_v52  ;;  %v387_v52 = vmul.f32 %v860_v32, %v860_v32 }
  0xcf   :  { %v311_v57 = vpop.f32.mrf.mxu1 }
  0xd0   :  { %v312_v62 = vadd.f32 %v311_v57, %v262_v56  ;;  %v443_v1 = vpack.c.bf16 %v889_v58, %v889_v58  ;;  %v388_v56 = vmul.f32 %v872_v40, %v872_v40  ;;  %v413_v61 = vsel %vm336_vm1, %v387_v52, 0.0 }
  0xd2   :  { %v436_v5 = vpack.c.bf16 %v312_v62, %v312_v62  ;;  %460 = vst.msk [vmem:[%s966_s2 + $0x34] sm:$0xf] %vm446_vm0, %v443_v1  ;;  %v382_v11 = vmul.f32 %v312_v62, %v312_v62  ;;  %v348_v15 = vsel %vm336_vm1, %v312_v62, 0.0  ;;  %v389_v62 = vmul.f32 %v889_v58, %v889_v58 }
  0xd3   :  { %v349_v28 = vadd.f32 %v348_v15, %v347_v20  ;;  %v415_v0 = vsel %vm336_vm1, %v388_v56, 0.0  ;;  %v362_v1 = vsel %vm336_vm1, %v889_v58, 0.0 }
  0xd4   :  { %453 = vst.msk [vmem:[%s966_s2 + $0x18] sm:$0xf] %vm446_vm0, %v436_v5  ;;  %v282_v17 = vpop.f32.mrf.mxu2  ;;  %v403_v25 = vsel %vm336_vm1, %v382_v11, 0.0  ;;  %v417_v40 = vsel %vm336_vm1, %v389_v62, 0.0 }
  0xd5   :  { %v331_v18 = vpop.f32.mrf.mxu3  ;;  %v404_v35 = vadd.f32 %v403_v25, %v402_v27 }
  0xd6   :  { %v264_v21 = vpop.f32.mrf.mxu0  ;;  %v332_v23 = vadd.f32 %v331_v18, %v282_v17 }
  0xd7   :  { %v313_v22 = vpop.f32.mrf.mxu1 }
  0xd8   :  { %v314_v26 = vadd.f32 %v313_v22, %v264_v21  ;;  %v444_v29 = vpack.c.bf16 %v332_v23, %v332_v23  ;;  %v390_v2 = vmul.f32 %v332_v23, %v332_v23  ;;  %v364_v5 = vsel %vm336_vm1, %v332_v23, 0.0 }
  0xda   :  { %v350_v31 = vsel %vm336_vm1, %v314_v26, 0.0  ;;  %v383_v33 = vmul.f32 %v314_v26, %v314_v26  ;;  %v437_v34 = vpack.c.bf16 %v314_v26, %v314_v26  ;;  %461 = vst.msk [vmem:[%s966_s2 + $0x38] sm:$0xf] %vm446_vm0, %v444_v29  ;;  %v419_v10 = vsel %vm336_vm1, %v390_v2, 0.0 }
  0xdb   :  { %v351_v36 = vadd.f32 %v350_v31, %v349_v28 }
  0xdc   :  { %v405_v39 = vsel %vm336_vm1, %v383_v33, 0.0  ;;  %454 = vst.msk [vmem:[%s966_s2 + $0x1c] sm:$0xf] %vm446_vm0, %v437_v34  ;;  %v284_v45 = vpop.f32.mrf.mxu2 }
  0xdd   :  { %v353_v41 = vadd.f32 %v352_v37, %v351_v36  ;;  %v406_v42 = vadd.f32 %v405_v39, %v404_v35  ;;  %v333_v46 = vpop.f32.mrf.mxu3 }
  0xde   :  { %v334_v49 = vadd.f32 %v333_v46, %v284_v45 }
  0xdf   :  { %v355_v47 = vadd.f32 %v354_v44, %v353_v41  ;;  %v408_v48 = vadd.f32 %v407_v43, %v406_v42 }
  0xe0   :  { %v445_v57 = vpack.c.bf16 %v334_v49, %v334_v49  ;;  %v391_v6 = vmul.f32 %v334_v49, %v334_v49  ;;  %v366_v11 = vsel %vm336_vm1, %v334_v49, 0.0 }
  0xe1   :  { %v357_v53 = vadd.f32 %v356_v51, %v355_v47  ;;  %v410_v54 = vadd.f32 %v409_v50, %v408_v48 }
  0xe2   :  { %462 = vst.msk [vmem:[%s966_s2 + $0x3c] sm:$0xf] %vm446_vm0, %v445_v57  ;;  %v421_v14 = vsel %vm336_vm1, %v391_v6, 0.0 }
  0xe3   :  { %v412_v59 = vadd.f32 %v411_v16, %v410_v54  ;;  %v359_v60 = vadd.f32 %v358_v55, %v357_v53 }
  0xe5   :  { %v361_v32 = vadd.f32 %v360_v24, %v359_v60  ;;  %v414_v63 = vadd.f32 %v413_v61, %v412_v59 }
  0xe7   :  { %v363_v3 = vadd.f32 %v362_v1, %v361_v32  ;;  %v416_v4 = vadd.f32 %v415_v0, %v414_v63 }
  0xe9   :  { %v365_v7 = vadd.f32 %v364_v5, %v363_v3  ;;  %v418_v9 = vadd.f32 %v417_v40, %v416_v4 }
  0xeb   :  { %v420_v12 = vadd.f32 %v419_v10, %v418_v9  ;;  %v367_v13 = vadd.f32 %v366_v11, %v365_v7 }
  0xed   :  { %v368_v15 = vrot.slane %v367_v13, 4  ;;  %v422_v58 = vadd.f32 %v421_v14, %v420_v12 }
  0xef   :  { %v369_v17 = vadd.f32 %v368_v15, %v367_v13  ;;  %v423_v18 = vrot.slane %v422_v58, 4 }
  0xf1   :  { %v370_v19 = vrot.slane %v369_v17, 2  ;;  %v424_v20 = vadd.f32 %v423_v18, %v422_v58 }
  0xf3   :  { %v371_v21 = vadd.f32 %v370_v19, %v369_v17  ;;  %v425_v22 = vrot.slane %v424_v20, 2 }
  0xf5   :  { %v372_v23 = vrot.slane %v371_v21, 1  ;;  %v426_v25 = vadd.f32 %v425_v22, %v424_v20 }
  0xf7   :  { %v373_v26 = vadd.f32 %v372_v23, %v371_v21  ;;  %v427_v27 = vrot.slane %v426_v25, 1 }
  0xf9   :  { %375 = vst.msk [vmem:[%s967_s3] sm:$0x1] %vm374_vm2, %v373_v26  ;;  %v428_v28 = vadd.f32 %v427_v27, %v426_v25 }
  0xfb   :  { %429 = vst.msk [vmem:[%s968_s4] sm:$0x1] %vm374_vm2, %v428_v28 }

// kernel: _lambda_.12
= control target key start
LH: loop header
LB: loop body
LE: loop exit
PB: predicated region body
PF: predicated region fallthrough
CT: control target
= control target key end

     0   :  { %vm150_vm0 = vcmask 257024   ;;  %s362_s0 = inlined_call_operand.vmem [shape: bf16[128,32], index: 0, kind: input, shape index: {}]   ;;  %s363_s1 = inlined_call_operand.vmem [shape: f32[1,32], index: 1, kind: input, shape index: {}]   ;;  %s364_s2 = inlined_call_operand.vmem [shape: f32[1,32], index: 2, kind: input, shape index: {}]   ;;  %s365_s3 = inlined_call_operand.vmem [shape: bf16[128,32], index: 3, kind: output, shape index: {}]  }
   0x1   :  { %v172_v0 = vld [vmem:[%s362_s0] sm:$0xff]   ;;  %v203_v5 = vld [vmem:[%s362_s0 + $0x8] sm:$0xff]   ;;  %v204_v8 = vld [vmem:[%s362_s0 + $0x10] sm:$0xff]  }
   0x2   :  { %v238_v1 = vld [vmem:[%s363_s1] ss:$0 sm:$0xff]  ;;  %v173_v2 = vunpack.c.l.bf16 %v172_v0  ;;  %v174_v4 = vunpack.c.h.bf16 %v172_v0  ;;  %v177_v6 = vunpack.c.l.bf16 %v203_v5  ;;  %v178_v7 = vunpack.c.h.bf16 %v203_v5  ;;  %v205_v9 = vld [vmem:[%s362_s0 + $0x18] sm:$0xff]   ;;  %v207_v39 = vld [vmem:[%s362_s0 + $0x28] sm:$0xff]  }
   0x3   :  { %v243_v3 = vld [vmem:[%s364_s2] ss:$0 sm:$0xff]  ;;  %v181_v12 = vunpack.c.l.bf16 %v204_v8  ;;  %v182_v13 = vunpack.c.h.bf16 %v204_v8  ;;  %v185_v16 = vunpack.c.l.bf16 %v205_v9  ;;  %v186_v17 = vunpack.c.h.bf16 %v205_v9  ;;  %v208_v53 = vld [vmem:[%s362_s0 + $0x30] sm:$0xff]  }
   0x4   :  { %v50_v10 = vmul.f32 %v238_v1, %v173_v2  ;;  %v51_v11 = vmul.f32 %v238_v1, %v174_v4  ;;  %v52_v14 = vmul.f32 %v238_v1, %v177_v6  ;;  %v53_v15 = vmul.f32 %v238_v1, %v178_v7  ;;  %v206_v38 = vld [vmem:[%s362_s0 + $0x20] sm:$0xff]  }
   0x5   :  { %v54_v20 = vmul.f32 %v238_v1, %v181_v12  ;;  %v55_v21 = vmul.f32 %v238_v1, %v182_v13  ;;  %v56_v24 = vmul.f32 %v238_v1, %v185_v16  ;;  %v57_v25 = vmul.f32 %v238_v1, %v186_v17  ;;  %v209_v16 = vld [vmem:[%s362_s0 + $0x38] sm:$0xff]  }
   0x6   :  { %v70_v18 = vadd.f32 %v243_v3, %v50_v10  ;;  %v71_v19 = vadd.f32 %v243_v3, %v51_v11  ;;  %v72_v22 = vadd.f32 %v243_v3, %v52_v14  ;;  %v73_v23 = vadd.f32 %v243_v3, %v53_v15 }
   0x7   :  { %v74_v32 = vadd.f32 %v243_v3, %v54_v20  ;;  %v75_v33 = vadd.f32 %v243_v3, %v55_v21  ;;  %v76_v44 = vadd.f32 %v243_v3, %v56_v24  ;;  %v77_v45 = vadd.f32 %v243_v3, %v57_v25 }
   0x8   :  { %vm86_vm1 = vcmp.ge.f32.partialorder %v70_v18, 0.0  ;;  %v102_v26 = vmul.f32 0.2, %v70_v18  ;;  %vm87_vm2 = vcmp.ge.f32.partialorder %v71_v19, 0.0  ;;  %v103_v27 = vmul.f32 0.2, %v71_v19 }
   0x9   :  { %vm88_vm3 = vcmp.ge.f32.partialorder %v72_v22, 0.0  ;;  %v104_v28 = vmul.f32 0.2, %v72_v22  ;;  %vm89_vm4 = vcmp.ge.f32.partialorder %v73_v23, 0.0  ;;  %v105_v29 = vmul.f32 0.2, %v73_v23 }
   0xa   :  { %v118_v30 = vsel %vm86_vm1, %v70_v18, %v102_v26  ;;  %v119_v31 = vsel %vm87_vm2, %v71_v19, %v103_v27  ;;  %vm90_vm5 = vcmp.ge.f32.partialorder %v74_v32, 0.0  ;;  %v106_v42 = vmul.f32 0.2, %v74_v32 }
   0xb   :  { %v134_v34 = vpack.c.bf16 %v118_v30, %v118_v30  ;;  %v135_v35 = vpack.c.bf16 %v119_v31, %v119_v31  ;;  %v120_v36 = vsel %vm88_vm3, %v72_v22, %v104_v28  ;;  %v121_v37 = vsel %vm89_vm4, %v73_v23, %v105_v29 }
   0xc   :  { %v136_v40 = vpack.c.bf16 %v120_v36, %v120_v36  ;;  %v137_v41 = vpack.c.bf16 %v121_v37, %v121_v37  ;;  %vm91_vm6 = vcmp.ge.f32.partialorder %v75_v33, 0.0  ;;  %v107_v43 = vmul.f32 0.2, %v75_v33 }
   0xd   :  { %151 = vst.msk [vmem:[%s365_s3] sm:$0xf] %vm150_vm0, %v134_v34  ;;  %v122_v46 = vsel %vm90_vm5, %v74_v32, %v106_v42  ;;  %v189_v47 = vunpack.c.l.bf16 %v206_v38  ;;  %v190_v48 = vunpack.c.h.bf16 %v206_v38  ;;  %v193_v49 = vunpack.c.l.bf16 %v207_v39 }
   0xe   :  { %152 = vst.msk [vmem:[%s365_s3 + $0x4] sm:$0xf] %vm150_vm0, %v135_v35  ;;  %v138_v50 = vpack.c.bf16 %v122_v46, %v122_v46  ;;  %v123_v51 = vsel %vm91_vm6, %v75_v33, %v107_v43  ;;  %vm92_vm7 = vcmp.ge.f32.partialorder %v76_v44, 0.0  ;;  %v108_v52 = vmul.f32 0.2, %v76_v44 }
   0xf   :  { %153 = vst.msk [vmem:[%s365_s3 + $0x8] sm:$0xf] %vm150_vm0, %v136_v40  ;;  %v139_v54 = vpack.c.bf16 %v123_v51, %v123_v51  ;;  %vm93_vm8 = vcmp.ge.f32.partialorder %v77_v45, 0.0  ;;  %v109_v55 = vmul.f32 0.2, %v77_v45  ;;  %v58_v56 = vmul.f32 %v238_v1, %v189_v47 }
  0x10   :  { %154 = vst.msk [vmem:[%s365_s3 + $0xc] sm:$0xf] %vm150_vm0, %v137_v41  ;;  %v124_v57 = vsel %vm92_vm7, %v76_v44, %v108_v52  ;;  %v59_v58 = vmul.f32 %v238_v1, %v190_v48  ;;  %v60_v59 = vmul.f32 %v238_v1, %v193_v49  ;;  %v194_v60 = vunpack.c.h.bf16 %v207_v39 }
  0x11   :  { %155 = vst.msk [vmem:[%s365_s3 + $0x10] sm:$0xf] %vm150_vm0, %v138_v50  ;;  %v140_v61 = vpack.c.bf16 %v124_v57, %v124_v57  ;;  %v125_v62 = vsel %vm93_vm8, %v77_v45, %v109_v55  ;;  %v78_v63 = vadd.f32 %v243_v3, %v58_v56  ;;  %v197_v0 = vunpack.c.l.bf16 %v208_v53 }
  0x12   :  { %156 = vst.msk [vmem:[%s365_s3 + $0x14] sm:$0xf] %vm150_vm0, %v139_v54  ;;  %v141_v2 = vpack.c.bf16 %v125_v62, %v125_v62  ;;  %v79_v4 = vadd.f32 %v243_v3, %v59_v58  ;;  %v80_v5 = vadd.f32 %v243_v3, %v60_v59  ;;  %v61_v6 = vmul.f32 %v238_v1, %v194_v60 }
  0x13   :  { %157 = vst.msk [vmem:[%s365_s3 + $0x18] sm:$0xf] %vm150_vm0, %v140_v61  ;;  %vm94_vm9 = vcmp.ge.f32.partialorder %v78_v63, 0.0  ;;  %v110_v7 = vmul.f32 0.2, %v78_v63  ;;  %v62_v8 = vmul.f32 %v238_v1, %v197_v0  ;;  %v198_v9 = vunpack.c.h.bf16 %v208_v53 }
  0x14   :  { %158 = vst.msk [vmem:[%s365_s3 + $0x1c] sm:$0xf] %vm150_vm0, %v141_v2  ;;  %vm95_vm10 = vcmp.ge.f32.partialorder %v79_v4, 0.0  ;;  %v111_v10 = vmul.f32 0.2, %v79_v4  ;;  %vm96_vm11 = vcmp.ge.f32.partialorder %v80_v5, 0.0  ;;  %v81_v11 = vadd.f32 %v243_v3, %v61_v6 }
  0x15   :  { %v126_v12 = vsel %vm94_vm9, %v78_v63, %v110_v7  ;;  %v112_v13 = vmul.f32 0.2, %v80_v5  ;;  %v82_v14 = vadd.f32 %v243_v3, %v62_v8  ;;  %v63_v15 = vmul.f32 %v238_v1, %v198_v9 }
  0x16   :  { %v142_v17 = vpack.c.bf16 %v126_v12, %v126_v12  ;;  %v127_v18 = vsel %vm95_vm10, %v79_v4, %v111_v10  ;;  %vm97_vm12 = vcmp.ge.f32.partialorder %v81_v11, 0.0  ;;  %v113_v19 = vmul.f32 0.2, %v81_v11 }
  0x17   :  { %v143_v20 = vpack.c.bf16 %v127_v18, %v127_v18  ;;  %v128_v21 = vsel %vm96_vm11, %v80_v5, %v112_v13  ;;  %vm98_vm13 = vcmp.ge.f32.partialorder %v82_v14, 0.0  ;;  %v114_v22 = vmul.f32 0.2, %v82_v14 }
  0x18   :  { %159 = vst.msk [vmem:[%s365_s3 + $0x20] sm:$0xf] %vm150_vm0, %v142_v17  ;;  %v144_v23 = vpack.c.bf16 %v128_v21, %v128_v21  ;;  %v129_v24 = vsel %vm97_vm12, %v81_v11, %v113_v19  ;;  %v83_v25 = vadd.f32 %v243_v3, %v63_v15  ;;  %v201_v26 = vunpack.c.l.bf16 %v209_v16 }
  0x19   :  { %160 = vst.msk [vmem:[%s365_s3 + $0x24] sm:$0xf] %vm150_vm0, %v143_v20  ;;  %v145_v27 = vpack.c.bf16 %v129_v24, %v129_v24  ;;  %v130_v28 = vsel %vm98_vm13, %v82_v14, %v114_v22  ;;  %v202_v29 = vunpack.c.h.bf16 %v209_v16 }
  0x1a   :  { %161 = vst.msk [vmem:[%s365_s3 + $0x28] sm:$0xf] %vm150_vm0, %v144_v23  ;;  %v146_v30 = vpack.c.bf16 %v130_v28, %v130_v28  ;;  %vm99_vm14 = vcmp.ge.f32.partialorder %v83_v25, 0.0  ;;  %v115_v31 = vmul.f32 0.2, %v83_v25  ;;  %v64_v32 = vmul.f32 %v238_v1, %v201_v26 }
  0x1b   :  { %162 = vst.msk [vmem:[%s365_s3 + $0x2c] sm:$0xf] %vm150_vm0, %v145_v27  ;;  %v65_v33 = vmul.f32 %v238_v1, %v202_v29 }
  0x1c   :  { %163 = vst.msk [vmem:[%s365_s3 + $0x30] sm:$0xf] %vm150_vm0, %v146_v30  ;;  %v131_v34 = vsel %vm99_vm14, %v83_v25, %v115_v31  ;;  %v84_v35 = vadd.f32 %v243_v3, %v64_v32 }
  0x1d   :  { %v147_v36 = vpack.c.bf16 %v131_v34, %v131_v34  ;;  %v85_v37 = vadd.f32 %v243_v3, %v65_v33 }
  0x1e   :  { %vm100_vm15 = vcmp.ge.f32.partialorder %v84_v35, 0.0  ;;  %v116_v38 = vmul.f32 0.2, %v84_v35 }
  0x1f   :  { %164 = vst.msk [vmem:[%s365_s3 + $0x34] sm:$0xf] %vm150_vm0, %v147_v36  ;;  %vm101_vm1 = vcmp.ge.f32.partialorder %v85_v37, 0.0  ;;  %v117_v1 = vmul.f32 0.2, %v85_v37 }
  0x20   :  { %v132_v39 = vsel %vm100_vm15, %v84_v35, %v116_v38 }
  0x21   :  { %v148_v40 = vpack.c.bf16 %v132_v39, %v132_v39  ;;  %v133_v41 = vsel %vm101_vm1, %v85_v37, %v117_v1 }
  0x22   :  { %v149_v42 = vpack.c.bf16 %v133_v41, %v133_v41 }
  0x23   :  { %165 = vst.msk [vmem:[%s365_s3 + $0x38] sm:$0xf] %vm150_vm0, %v148_v40 }
  0x24   :  { %166 = vst.msk [vmem:[%s365_s3 + $0x3c] sm:$0xf] %vm150_vm0, %v149_v42 }

// kernel: _lambda_.13
= control target key start
LH: loop header
LB: loop body
LE: loop exit
PB: predicated region body
PF: predicated region fallthrough
CT: control target
= control target key end

     0   :  { %vm432_vm0 = vcmask 519168   ;;  %vm394_vm1 = vcmask 523264   ;;  %vm408_vm2 = vcmask 516096   ;;  %s848_s1 = inlined_call_operand.vmem [shape: bf16[512,64], index: 1, kind: input, shape index: {}]   ;;  %s849_s0 = inlined_call_operand.vmem [shape: bf16[32,512], index: 0, kind: input, shape index: {}]   ;;  %s850_s2 = inlined_call_operand.vmem [shape: bf16[32,64], index: 2, kind: output, shape index: {0}]   ;;  %s851_s3 = inlined_call_operand.vmem [shape: f32[1,1,64], index: 3, kind: output, shape index: {1}]   ;;  %s852_s4 = inlined_call_operand.vmem [shape: f32[1,1,64], index: 4, kind: output, shape index: {2}]  }
   0x1   :  { %v624_v0 = vld [vmem:[%s848_s1 + $0x38] sm:$0xff]  ;;  %v623_v4 = vld [vmem:[%s848_s1 + $0x30] sm:$0xff]  ;;  %v622_v8 = vld [vmem:[%s848_s1 + $0x28] sm:$0xff] }
   0x2   :  { %v632_v1 = vld [vmem:[%s848_s1 + $0x78] sm:$0xff]  ;;  %318 = vmatpush.bf16.msra.mxu0 %v624_v0  ;;  %v631_v5 = vld [vmem:[%s848_s1 + $0x70] sm:$0xff]  ;;  %v630_v9 = vld [vmem:[%s848_s1 + $0x68] sm:$0xff] }
   0x3   :  { %v640_v2 = vld [vmem:[%s848_s1 + $0xb8] sm:$0xff]  ;;  %337 = vmatpush.bf16.msra.mxu1 %v632_v1  ;;  %v639_v6 = vld [vmem:[%s848_s1 + $0xb0] sm:$0xff]  ;;  %v638_v10 = vld [vmem:[%s848_s1 + $0xa8] sm:$0xff] }
   0x4   :  { %v648_v3 = vld [vmem:[%s848_s1 + $0xf8] sm:$0xff]  ;;  %356 = vmatpush.bf16.msra.mxu2 %v640_v2  ;;  %v647_v7 = vld [vmem:[%s848_s1 + $0xf0] sm:$0xff]  ;;  %v646_v11 = vld [vmem:[%s848_s1 + $0xe8] sm:$0xff] }
   0x5   :  { %375 = vmatpush.bf16.msra.mxu3 %v648_v3  ;;  %v621_v12 = vld [vmem:[%s848_s1 + $0x20] sm:$0xff]  ;;  %v620_v16 = vld [vmem:[%s848_s1 + $0x18] sm:$0xff]  ;;  %v619_v20 = vld [vmem:[%s848_s1 + $0x10] sm:$0xff] }
   0x6   :  { %319 = vmatpush.bf16.msra.mxu0 %v623_v4  ;;  %v629_v13 = vld [vmem:[%s848_s1 + $0x60] sm:$0xff]  ;;  %v628_v17 = vld [vmem:[%s848_s1 + $0x58] sm:$0xff]  ;;  %v627_v21 = vld [vmem:[%s848_s1 + $0x50] sm:$0xff] }
   0x7   :  { %338 = vmatpush.bf16.msra.mxu1 %v631_v5  ;;  %v637_v14 = vld [vmem:[%s848_s1 + $0xa0] sm:$0xff]  ;;  %v636_v18 = vld [vmem:[%s848_s1 + $0x98] sm:$0xff]  ;;  %v635_v22 = vld [vmem:[%s848_s1 + $0x90] sm:$0xff] }
   0x8   :  { %357 = vmatpush.bf16.msra.mxu2 %v639_v6  ;;  %v645_v15 = vld [vmem:[%s848_s1 + $0xe0] sm:$0xff]  ;;  %v644_v19 = vld [vmem:[%s848_s1 + $0xd8] sm:$0xff]  ;;  %v643_v23 = vld [vmem:[%s848_s1 + $0xd0] sm:$0xff] }
   0x9   :  { %376 = vmatpush.bf16.msra.mxu3 %v647_v7  ;;  %v618_v24 = vld [vmem:[%s848_s1 + $0x8] sm:$0xff]  ;;  %v617_v28 = vld [vmem:[%s848_s1] sm:$0xff]  ;;  %v611_v33 = vld [vmem:[%s849_s0 + $0xc] sm:$0xf0] }
   0xa   :  { %320 = vmatpush.bf16.msra.mxu0 %v622_v8  ;;  %v626_v25 = vld [vmem:[%s848_s1 + $0x48] sm:$0xff]  ;;  %v625_v29 = vld [vmem:[%s848_s1 + $0x40] sm:$0xff]  ;;  %v453_v35 = vld [vmem:[%s849_s0 + $0x10] sm:$0xf0] }
   0xb   :  { %339 = vmatpush.bf16.msra.mxu1 %v630_v9  ;;  %v634_v26 = vld [vmem:[%s848_s1 + $0x88] sm:$0xff]  ;;  %v633_v30 = vld [vmem:[%s848_s1 + $0x80] sm:$0xff]  ;;  %v612_v37 = vld [vmem:[%s849_s0 + $0x14] sm:$0xf0] }
   0xc   :  { %358 = vmatpush.bf16.msra.mxu2 %v638_v10  ;;  %v642_v27 = vld [vmem:[%s848_s1 + $0xc8] sm:$0xff]  ;;  %v641_v31 = vld [vmem:[%s848_s1 + $0xc0] sm:$0xff]  ;;  %v461_v39 = vld [vmem:[%s849_s0 + $0x18] sm:$0xf0] }
   0xd   :  { %377 = vmatpush.bf16.msra.mxu3 %v646_v11  ;;  %v451_v32 = vld [vmem:[%s849_s0] sm:$0xf]  ;;  %v609_v34 = vld [vmem:[%s849_s0 + $0x4] sm:$0xf]  ;;  %v459_v36 = vld [vmem:[%s849_s0 + $0x8] sm:$0xf] }
   0xe   :  { %321 = vmatpush.bf16.msra.mxu0 %v621_v12  ;;  %v610_v38 = vld [vmem:[%s849_s0 + $0xc] sm:$0xf]  ;;  %v452_v40 = vor.u32 %v611_v33, %v451_v32  ;;  %v456_v41 = vor.u32 %v609_v34, %v453_v35  ;;  %v460_v42 = vor.u32 %v612_v37, %v459_v36  ;;  %v467_v44 = vld [vmem:[%s849_s0 + $0x20] sm:$0xf]  ;;  %v615_v45 = vld [vmem:[%s849_s0 + $0x2c] sm:$0xf0] }
   0xf   :  { %340 = vmatpush.bf16.msra.mxu1 %v629_v13  ;;  %v464_v43 = vor.u32 %v610_v38, %v461_v39  ;;  %v613_v46 = vld [vmem:[%s849_s0 + $0x24] sm:$0xf]  ;;  %v469_v47 = vld [vmem:[%s849_s0 + $0x30] sm:$0xf0]  ;;  %v475_v48 = vld [vmem:[%s849_s0 + $0x28] sm:$0xf]  ;;  %v468_v52 = vor.u32 %v615_v45, %v467_v44 }
  0x10   :  { %359 = vmatpush.bf16.msra.mxu2 %v637_v14  ;;  %v616_v49 = vld [vmem:[%s849_s0 + $0x34] sm:$0xf0]  ;;  %v614_v50 = vld [vmem:[%s849_s0 + $0x2c] sm:$0xf]  ;;  %v477_v51 = vld [vmem:[%s849_s0 + $0x38] sm:$0xf0]  ;;  %v472_v53 = vor.u32 %v613_v46, %v469_v47 }
  0x11   :  { %378 = vmatpush.bf16.msra.mxu3 %v645_v15  ;;  %v476_v54 = vor.u32 %v616_v49, %v475_v48  ;;  %v480_v55 = vor.u32 %v614_v50, %v477_v51 }
  0x12   :  { %322 = vmatpush.bf16.msra.mxu0 %v620_v16 }
  0x13   :  { %341 = vmatpush.bf16.msra.mxu1 %v628_v17 }
  0x14   :  { %360 = vmatpush.bf16.msra.mxu2 %v636_v18 }
  0x15   :  { %379 = vmatpush.bf16.msra.mxu3 %v644_v19 }
  0x16   :  { %323 = vmatpush.bf16.msra.mxu0 %v619_v20 }
  0x17   :  { %342 = vmatpush.bf16.msra.mxu1 %v627_v21 }
  0x18   :  { %361 = vmatpush.bf16.msra.mxu2 %v635_v22 }
  0x19   :  { %380 = vmatpush.bf16.msra.mxu3 %v643_v23 }
  0x1a   :  { %324 = vmatpush.bf16.msra.mxu0 %v618_v24 }
  0x1b   :  { %343 = vmatpush.bf16.msra.mxu1 %v626_v25 }
  0x1c   :  { %362 = vmatpush.bf16.msra.mxu2 %v634_v26 }
  0x1d   :  { %381 = vmatpush.bf16.msra.mxu3 %v642_v27 }
  0x1e   :  { %325 = vmatpush.bf16.msra.mxu0 %v617_v28 }
  0x1f   :  { %344 = vmatpush.bf16.msra.mxu1 %v625_v29 }
  0x20   :  { %363 = vmatpush.bf16.msra.mxu2 %v633_v30 }
  0x21   :  { %382 = vmatpush.bf16.msra.mxu3 %v641_v31  ;;  %326 = vmatmul.bf16.vlgmr.msra.gmra.mxu0 %v452_v40 }
  0x22   :  { %345 = vmatmul.bf16.vlgmr.msra.gmra.mxu1 %v456_v41 }
  0x23   :  { %364 = vmatmul.bf16.vlgmr.msra.gmra.mxu2 %v460_v42 }
  0x24   :  { %383 = vmatmul.bf16.vlgmr.msra.gmra.mxu3 %v464_v43 }
  0x31   :  { %331 = vmatmul.bf16.gmra.mxu0 %v468_v52 }
  0x32   :  { %350 = vmatmul.bf16.gmra.mxu1 %v472_v53 }
  0x33   :  { %369 = vmatmul.bf16.gmra.mxu2 %v476_v54 }
  0x34   :  { %388 = vmatmul.bf16.gmra.mxu3 %v480_v55 }
  0x9e   :  { %v327_v56 = vpop.f32.mrf.mxu0 }
  0x9f   :  { %v346_v57 = vpop.f32.mrf.mxu1 }
  0xa0   :  { %v347_v58 = vadd.f32 %v346_v57, %v327_v56 }
  0xa6   :  { %v365_v59 = vpop.f32.mrf.mxu2  ;;  %v329_v62 = vpop.f32.mrf.mxu0 }
  0xa7   :  { %v384_v60 = vpop.f32.mrf.mxu3  ;;  %v366_v61 = vadd.f32 %v365_v59, %v347_v58  ;;  %v348_v63 = vpop.f32.mrf.mxu1 }
  0xa8   :  { %v349_v2 = vadd.f32 %v348_v63, %v329_v62 }
  0xa9   :  { %v385_v0 = vadd.f32 %v384_v60, %v366_v61 }
  0xab   :  { %v428_v1 = vpack.c.bf16 %v385_v0, %v385_v0  ;;  %v410_v19 = vmul.f32 %v385_v0, %v385_v0  ;;  %v395_v24 = vsel %vm394_vm1, %v385_v0, 0.0 }
  0xad   :  { %433 = vst.msk [vmem:[%s850_s2] sm:$0xf] %vm432_vm0, %v428_v1  ;;  %v414_v30 = vsel %vm394_vm1, %v410_v19, 0.0 }
  0xae   :  { %v367_v3 = vpop.f32.mrf.mxu2  ;;  %v332_v6 = vpop.f32.mrf.mxu0 }
  0xaf   :  { %v386_v4 = vpop.f32.mrf.mxu3  ;;  %v368_v5 = vadd.f32 %v367_v3, %v349_v2  ;;  %v351_v7 = vpop.f32.mrf.mxu1 }
  0xb0   :  { %v352_v10 = vadd.f32 %v351_v7, %v332_v6 }
  0xb1   :  { %v387_v8 = vadd.f32 %v386_v4, %v368_v5 }
  0xb3   :  { %v429_v9 = vpack.c.bf16 %v387_v8, %v387_v8  ;;  %v411_v17 = vmul.f32 %v387_v8, %v387_v8  ;;  %v396_v20 = vsel %vm394_vm1, %v387_v8, 0.0 }
  0xb4   :  { %v397_v28 = vadd.f32 %v396_v20, %v395_v24 }
  0xb5   :  { %434 = vst.msk [vmem:[%s850_s2 + $0x4] sm:$0xf] %vm432_vm0, %v429_v9  ;;  %v415_v25 = vsel %vm394_vm1, %v411_v17, 0.0 }
  0xb6   :  { %v370_v11 = vpop.f32.mrf.mxu2  ;;  %v334_v15 = vpop.f32.mrf.mxu0  ;;  %v416_v33 = vadd.f32 %v415_v25, %v414_v30 }
  0xb7   :  { %v389_v12 = vpop.f32.mrf.mxu3  ;;  %v371_v13 = vadd.f32 %v370_v11, %v352_v10  ;;  %v353_v16 = vpop.f32.mrf.mxu1 }
  0xb8   :  { %v354_v22 = vadd.f32 %v353_v16, %v334_v15 }
  0xb9   :  { %v390_v14 = vadd.f32 %v389_v12, %v371_v13 }
  0xbb   :  { %v430_v18 = vpack.c.bf16 %v390_v14, %v390_v14  ;;  %v412_v21 = vmul.f32 %v390_v14, %v390_v14  ;;  %v398_v26 = vsel %vm394_vm1, %v390_v14, 0.0 }
  0xbc   :  { %v399_v34 = vadd.f32 %v398_v26, %v397_v28 }
  0xbd   :  { %435 = vst.msk [vmem:[%s850_s2 + $0x8] sm:$0xf] %vm432_vm0, %v430_v18  ;;  %v417_v31 = vsel %vm394_vm1, %v412_v21, 0.0 }
  0xbe   :  { %v372_v23 = vpop.f32.mrf.mxu2  ;;  %v418_v38 = vadd.f32 %v417_v31, %v416_v33 }
  0xbf   :  { %v373_v27 = vadd.f32 %v372_v23, %v354_v22  ;;  %v391_v29 = vpop.f32.mrf.mxu3 }
  0xc1   :  { %v392_v32 = vadd.f32 %v391_v29, %v373_v27 }
  0xc3   :  { %v400_v35 = vsel %vm394_vm1, %v392_v32, 0.0  ;;  %v413_v36 = vmul.f32 %v392_v32, %v392_v32  ;;  %v431_v37 = vpack.c.bf16 %v392_v32, %v392_v32 }
  0xc4   :  { %v401_v39 = vadd.f32 %v400_v35, %v399_v34 }
  0xc5   :  { %v419_v40 = vsel %vm394_vm1, %v413_v36, 0.0  ;;  %436 = vst.msk [vmem:[%s850_s2 + $0xc] sm:$0xf] %vm432_vm0, %v431_v37 }
  0xc6   :  { %v402_v41 = vrot.slane %v401_v39, 4  ;;  %v420_v42 = vadd.f32 %v419_v40, %v418_v38 }
  0xc8   :  { %v403_v43 = vadd.f32 %v402_v41, %v401_v39  ;;  %v421_v44 = vrot.slane %v420_v42, 4 }
  0xca   :  { %v404_v45 = vrot.slane %v403_v43, 2  ;;  %v422_v46 = vadd.f32 %v421_v44, %v420_v42 }
  0xcc   :  { %v405_v47 = vadd.f32 %v404_v45, %v403_v43  ;;  %v423_v48 = vrot.slane %v422_v46, 2 }
  0xce   :  { %v406_v49 = vrot.slane %v405_v47, 1  ;;  %v424_v50 = vadd.f32 %v423_v48, %v422_v46 }
  0xd0   :  { %v407_v51 = vadd.f32 %v406_v49, %v405_v47  ;;  %v425_v52 = vrot.slane %v424_v50, 1 }
  0xd2   :  { %409 = vst.msk [vmem:[%s851_s3] sm:$0x1] %vm408_vm2, %v407_v51  ;;  %v426_v53 = vadd.f32 %v425_v52, %v424_v50 }
  0xd4   :  { %427 = vst.msk [vmem:[%s852_s4] sm:$0x1] %vm408_vm2, %v426_v53 }

// kernel: _lambda_.14
= control target key start
LH: loop header
LB: loop body
LE: loop exit
PB: predicated region body
PF: predicated region fallthrough
CT: control target
= control target key end

     0   :  { %vm54_vm4 = vcmask 519168   ;;  %s118_s0 = inlined_call_operand.vmem [shape: bf16[32,64], index: 0, kind: input, shape index: {}]   ;;  %s119_s1 = inlined_call_operand.vmem [shape: f32[1,64], index: 1, kind: input, shape index: {}]   ;;  %s120_s2 = inlined_call_operand.vmem [shape: f32[1,64], index: 2, kind: input, shape index: {}]   ;;  %s121_s3 = inlined_call_operand.vmem [shape: bf16[32,64], index: 3, kind: output, shape index: {}]  }
   0x1   :  { %v64_v0 = vld [vmem:[%s118_s0] sm:$0xff]   ;;  %v71_v5 = vld [vmem:[%s118_s0 + $0x8] sm:$0xff]  }
   0x2   :  { %v72_v1 = vld [vmem:[%s119_s1] ss:$0 sm:$0xff]  ;;  %v65_v2 = vunpack.c.l.bf16 %v64_v0  ;;  %v66_v4 = vunpack.c.h.bf16 %v64_v0  ;;  %v69_v6 = vunpack.c.l.bf16 %v71_v5  ;;  %v70_v7 = vunpack.c.h.bf16 %v71_v5 }
   0x3   :  { %v73_v3 = vld [vmem:[%s120_s2] ss:$0 sm:$0xff] }
   0x4   :  { %v26_v8 = vmul.f32 %v72_v1, %v65_v2  ;;  %v27_v9 = vmul.f32 %v72_v1, %v66_v4  ;;  %v28_v10 = vmul.f32 %v72_v1, %v69_v6  ;;  %v29_v11 = vmul.f32 %v72_v1, %v70_v7 }
   0x6   :  { %v34_v12 = vadd.f32 %v73_v3, %v26_v8  ;;  %v35_v13 = vadd.f32 %v73_v3, %v27_v9  ;;  %v36_v14 = vadd.f32 %v73_v3, %v28_v10  ;;  %v37_v15 = vadd.f32 %v73_v3, %v29_v11 }
   0x8   :  { %vm38_vm0 = vcmp.ge.f32.partialorder %v34_v12, 0.0  ;;  %v42_v16 = vmul.f32 0.2, %v34_v12  ;;  %vm39_vm1 = vcmp.ge.f32.partialorder %v35_v13, 0.0  ;;  %v43_v17 = vmul.f32 0.2, %v35_v13 }
   0x9   :  { %vm40_vm2 = vcmp.ge.f32.partialorder %v36_v14, 0.0  ;;  %v44_v18 = vmul.f32 0.2, %v36_v14  ;;  %vm41_vm3 = vcmp.ge.f32.partialorder %v37_v15, 0.0  ;;  %v45_v19 = vmul.f32 0.2, %v37_v15 }
   0xa   :  { %v46_v20 = vsel %vm38_vm0, %v34_v12, %v42_v16  ;;  %v47_v21 = vsel %vm39_vm1, %v35_v13, %v43_v17 }
   0xb   :  { %v50_v22 = vpack.c.bf16 %v46_v20, %v46_v20  ;;  %v51_v23 = vpack.c.bf16 %v47_v21, %v47_v21  ;;  %v48_v24 = vsel %vm40_vm2, %v36_v14, %v44_v18  ;;  %v49_v25 = vsel %vm41_vm3, %v37_v15, %v45_v19 }
   0xc   :  { %v52_v26 = vpack.c.bf16 %v48_v24, %v48_v24  ;;  %v53_v27 = vpack.c.bf16 %v49_v25, %v49_v25 }
   0xd   :  { %55 = vst.msk [vmem:[%s121_s3] sm:$0xf] %vm54_vm4, %v50_v22 }
   0xe   :  { %56 = vst.msk [vmem:[%s121_s3 + $0x4] sm:$0xf] %vm54_vm4, %v51_v23 }
   0xf   :  { %57 = vst.msk [vmem:[%s121_s3 + $0x8] sm:$0xf] %vm54_vm4, %v52_v26 }
  0x10   :  { %58 = vst.msk [vmem:[%s121_s3 + $0xc] sm:$0xf] %vm54_vm4, %v53_v27 }

// kernel: _lambda_.15
= control target key start
LH: loop header
LB: loop body
LE: loop exit
PB: predicated region body
PF: predicated region fallthrough
CT: control target
= control target key end

     0   :  { %s1208_s1 = inlined_call_operand.vmem [shape: bf16[1024,128], index: 1, kind: input, shape index: {}]   ;;  %s1209_s0 = inlined_call_operand.vmem [shape: bf16[2,1024], index: 0, kind: input, shape index: {}]   ;;  %s1210_s2 = inlined_call_operand.vmem [shape: f32[2,128], index: 2, kind: output, shape index: {}]  }
   0x1   :  { %v934_v0 = vld [vmem:[%s1208_s1 + $0x38] sm:$0xff]  ;;  %v933_v4 = vld [vmem:[%s1208_s1 + $0x30] sm:$0xff]  ;;  %v932_v8 = vld [vmem:[%s1208_s1 + $0x28] sm:$0xff] }
   0x2   :  { %v942_v1 = vld [vmem:[%s1208_s1 + $0x78] sm:$0xff]  ;;  %542 = vmatpush.bf16.msra.mxu0 %v934_v0  ;;  %v941_v5 = vld [vmem:[%s1208_s1 + $0x70] sm:$0xff]  ;;  %v940_v9 = vld [vmem:[%s1208_s1 + $0x68] sm:$0xff] }
   0x3   :  { %v950_v2 = vld [vmem:[%s1208_s1 + $0xb8] sm:$0xff]  ;;  %555 = vmatpush.bf16.msra.mxu1 %v942_v1  ;;  %v949_v6 = vld [vmem:[%s1208_s1 + $0xb0] sm:$0xff]  ;;  %v948_v10 = vld [vmem:[%s1208_s1 + $0xa8] sm:$0xff] }
   0x4   :  { %v958_v3 = vld [vmem:[%s1208_s1 + $0xf8] sm:$0xff]  ;;  %568 = vmatpush.bf16.msra.mxu2 %v950_v2  ;;  %v957_v7 = vld [vmem:[%s1208_s1 + $0xf0] sm:$0xff]  ;;  %v956_v11 = vld [vmem:[%s1208_s1 + $0xe8] sm:$0xff] }
   0x5   :  { %581 = vmatpush.bf16.msra.mxu3 %v958_v3  ;;  %v931_v12 = vld [vmem:[%s1208_s1 + $0x20] sm:$0xff]  ;;  %v930_v17 = vld [vmem:[%s1208_s1 + $0x18] sm:$0xff]  ;;  %v929_v21 = vld [vmem:[%s1208_s1 + $0x10] sm:$0xff] }
   0x6   :  { %543 = vmatpush.bf16.msra.mxu0 %v933_v4  ;;  %v939_v13 = vld [vmem:[%s1208_s1 + $0x60] sm:$0xff]  ;;  %v938_v18 = vld [vmem:[%s1208_s1 + $0x58] sm:$0xff]  ;;  %v937_v22 = vld [vmem:[%s1208_s1 + $0x50] sm:$0xff] }
   0x7   :  { %556 = vmatpush.bf16.msra.mxu1 %v941_v5  ;;  %v947_v14 = vld [vmem:[%s1208_s1 + $0xa0] sm:$0xff]  ;;  %v946_v19 = vld [vmem:[%s1208_s1 + $0x98] sm:$0xff]  ;;  %v945_v23 = vld [vmem:[%s1208_s1 + $0x90] sm:$0xff] }
   0x8   :  { %569 = vmatpush.bf16.msra.mxu2 %v949_v6  ;;  %v955_v15 = vld [vmem:[%s1208_s1 + $0xe0] sm:$0xff]  ;;  %v954_v20 = vld [vmem:[%s1208_s1 + $0xd8] sm:$0xff]  ;;  %v953_v24 = vld [vmem:[%s1208_s1 + $0xd0] sm:$0xff] }
   0x9   :  { %582 = vmatpush.bf16.msra.mxu3 %v957_v7  ;;  %v11_v16 = vld [vmem:[%s1209_s0] sm:$0xff]  ;;  %v928_v25 = vld [vmem:[%s1208_s1 + $0x8] sm:$0xff]  ;;  %v966_v33 = vld [vmem:[%s1208_s1 + $0x138] sm:$0xff] }
   0xa   :  { %544 = vmatpush.bf16.msra.mxu0 %v932_v8  ;;  %141 = vst [vmem:[#allocation1] ss:$9 sm:$0xff] %v11_v16  ;;  %v936_v26 = vld [vmem:[%s1208_s1 + $0x48] sm:$0xff]  ;;  %v927_v29 = vld [vmem:[%s1208_s1] sm:$0xff]  ;;  %v974_v34 = vld [vmem:[%s1208_s1 + $0x178] sm:$0xff] }
   0xb   :  { %557 = vmatpush.bf16.msra.mxu1 %v940_v9  ;;  %v944_v27 = vld [vmem:[%s1208_s1 + $0x88] sm:$0xff]  ;;  %v935_v30 = vld [vmem:[%s1208_s1 + $0x40] sm:$0xff]  ;;  %v982_v35 = vld [vmem:[%s1208_s1 + $0x1b8] sm:$0xff] }
   0xc   :  { %570 = vmatpush.bf16.msra.mxu2 %v948_v10  ;;  %v952_v28 = vld [vmem:[%s1208_s1 + $0xc8] sm:$0xff]  ;;  %v943_v31 = vld [vmem:[%s1208_s1 + $0x80] sm:$0xff]  ;;  %v990_v36 = vld [vmem:[%s1208_s1 + $0x1f8] sm:$0xff] }
   0xd   :  { %583 = vmatpush.bf16.msra.mxu3 %v956_v11  ;;  %v951_v32 = vld [vmem:[%s1208_s1 + $0xc0] sm:$0xff]  ;;  %v965_v37 = vld [vmem:[%s1208_s1 + $0x130] sm:$0xff]  ;;  %v964_v45 = vld [vmem:[%s1208_s1 + $0x128] sm:$0xff] }
   0xe   :  { %545 = vmatpush.bf16.msra.mxu0 %v931_v12  ;;  %v973_v40 = vld [vmem:[%s1208_s1 + $0x170] sm:$0xff]  ;;  %v972_v46 = vld [vmem:[%s1208_s1 + $0x168] sm:$0xff]  ;;  %v963_v49 = vld [vmem:[%s1208_s1 + $0x120] sm:$0xff] }
   0xf   :  { %558 = vmatpush.bf16.msra.mxu1 %v939_v13  ;;  %v981_v43 = vld [vmem:[%s1208_s1 + $0x1b0] sm:$0xff]  ;;  %v980_v47 = vld [vmem:[%s1208_s1 + $0x1a8] sm:$0xff]  ;;  %v971_v50 = vld [vmem:[%s1208_s1 + $0x160] sm:$0xff] }
  0x10   :  { %571 = vmatpush.bf16.msra.mxu2 %v947_v14  ;;  %v989_v44 = vld [vmem:[%s1208_s1 + $0x1f0] sm:$0xff]  ;;  %v988_v48 = vld [vmem:[%s1208_s1 + $0x1e8] sm:$0xff]  ;;  %v979_v51 = vld [vmem:[%s1208_s1 + $0x1a0] sm:$0xff] }
  0x11   :  { %584 = vmatpush.bf16.msra.mxu3 %v955_v15  ;;  %v144_v38 = vld [vmem:[#allocation1 + $0x12] sm:$0xff]  ;;  %v142_v39 = vld [vmem:[#allocation1] sm:$0xff]  ;;  %v143_v42 = vld [vmem:[#allocation1 + $0x9] sm:$0xff] }
  0x12   :  { %546 = vmatpush.bf16.msra.mxu0 %v930_v17  ;;  %v145_v41 = vld [vmem:[#allocation1 + $0x1b] sm:$0xff]  ;;  %v961_v57 = vld [vmem:[%s1208_s1 + $0x110] sm:$0xff]  ;;  %v960_v61 = vld [vmem:[%s1208_s1 + $0x108] sm:$0xff] }
  0x13   :  { %559 = vmatpush.bf16.msra.mxu1 %v938_v18  ;;  %v987_v52 = vld [vmem:[%s1208_s1 + $0x1e0] sm:$0xff]  ;;  %v962_v53 = vld [vmem:[%s1208_s1 + $0x118] sm:$0xff]  ;;  %v969_v58 = vld [vmem:[%s1208_s1 + $0x150] sm:$0xff] }
  0x14   :  { %572 = vmatpush.bf16.msra.mxu2 %v946_v19  ;;  %v970_v54 = vld [vmem:[%s1208_s1 + $0x158] sm:$0xff]  ;;  %v977_v59 = vld [vmem:[%s1208_s1 + $0x190] sm:$0xff]  ;;  %v968_v62 = vld [vmem:[%s1208_s1 + $0x148] sm:$0xff] }
  0x15   :  { %585 = vmatpush.bf16.msra.mxu3 %v954_v20  ;;  %v978_v55 = vld [vmem:[%s1208_s1 + $0x198] sm:$0xff]  ;;  %v985_v60 = vld [vmem:[%s1208_s1 + $0x1d0] sm:$0xff]  ;;  %v976_v63 = vld [vmem:[%s1208_s1 + $0x188] sm:$0xff] }
  0x16   :  { %547 = vmatpush.bf16.msra.mxu0 %v929_v21  ;;  %v986_v56 = vld [vmem:[%s1208_s1 + $0x1d8] sm:$0xff]  ;;  %v984_v0 = vld [vmem:[%s1208_s1 + $0x1c8] sm:$0xff]  ;;  %v959_v1 = vld [vmem:[%s1208_s1 + $0x100] sm:$0xff] }
  0x17   :  { %560 = vmatpush.bf16.msra.mxu1 %v937_v22  ;;  %v967_v2 = vld [vmem:[%s1208_s1 + $0x140] sm:$0xff]  ;;  %v147_v6 = vld [vmem:[#allocation1 + $0x2d] sm:$0xff]  ;;  %v148_v7 = vld [vmem:[#allocation1 + $0x36] sm:$0xff] }
  0x18   :  { %573 = vmatpush.bf16.msra.mxu2 %v945_v23  ;;  %v975_v3 = vld [vmem:[%s1208_s1 + $0x180] sm:$0xff] }
  0x19   :  { %586 = vmatpush.bf16.msra.mxu3 %v953_v24  ;;  %v983_v4 = vld [vmem:[%s1208_s1 + $0x1c0] sm:$0xff] }
  0x1a   :  { %548 = vmatpush.bf16.msra.mxu0 %v928_v25  ;;  %v146_v5 = vld [vmem:[#allocation1 + $0x24] sm:$0xff] }
  0x1b   :  { %561 = vmatpush.bf16.msra.mxu1 %v936_v26  ;;  %v149_v8 = vld [vmem:[#allocation1 + $0x3f] sm:$0xff] }
  0x1c   :  { %574 = vmatpush.bf16.msra.mxu2 %v944_v27 }
  0x1d   :  { %587 = vmatpush.bf16.msra.mxu3 %v952_v28 }
  0x1e   :  { %549 = vmatpush.bf16.msra.mxu0 %v927_v29 }
  0x1f   :  { %562 = vmatpush.bf16.msra.mxu1 %v935_v30 }
  0x20   :  { %575 = vmatpush.bf16.msra.mxu2 %v943_v31 }
  0x21   :  { %588 = vmatpush.bf16.msra.mxu3 %v951_v32  ;;  %550 = vmatmul.bf16.vlgmr.msra.gmra.mxu0 %v142_v39 }
  0x22   :  { %594 = vmatpush.bf16.msrb.mxu0 %v966_v33  ;;  %563 = vmatmul.bf16.vlgmr.msra.gmra.mxu1 %v143_v42 }
  0x23   :  { %607 = vmatpush.bf16.msrb.mxu1 %v974_v34  ;;  %576 = vmatmul.bf16.vlgmr.msra.gmra.mxu2 %v144_v38 }
  0x24   :  { %620 = vmatpush.bf16.msrb.mxu2 %v982_v35  ;;  %589 = vmatmul.bf16.vlgmr.msra.gmra.mxu3 %v145_v41 }
  0x25   :  { %633 = vmatpush.bf16.msrb.mxu3 %v990_v36 }
  0x26   :  { %595 = vmatpush.bf16.msrb.mxu0 %v965_v37 }
  0x27   :  { %608 = vmatpush.bf16.msrb.mxu1 %v973_v40 }
  0x28   :  { %621 = vmatpush.bf16.msrb.mxu2 %v981_v43 }
  0x29   :  { %634 = vmatpush.bf16.msrb.mxu3 %v989_v44 }
  0x2a   :  { %596 = vmatpush.bf16.msrb.mxu0 %v964_v45 }
  0x2b   :  { %609 = vmatpush.bf16.msrb.mxu1 %v972_v46 }
  0x2c   :  { %622 = vmatpush.bf16.msrb.mxu2 %v980_v47 }
  0x2d   :  { %635 = vmatpush.bf16.msrb.mxu3 %v988_v48 }
  0x2e   :  { %597 = vmatpush.bf16.msrb.mxu0 %v963_v49 }
  0x2f   :  { %610 = vmatpush.bf16.msrb.mxu1 %v971_v50 }
  0x30   :  { %623 = vmatpush.bf16.msrb.mxu2 %v979_v51 }
  0x31   :  { %636 = vmatpush.bf16.msrb.mxu3 %v987_v52 }
  0x32   :  { %598 = vmatpush.bf16.msrb.mxu0 %v962_v53 }
  0x33   :  { %611 = vmatpush.bf16.msrb.mxu1 %v970_v54 }
  0x34   :  { %624 = vmatpush.bf16.msrb.mxu2 %v978_v55 }
  0x35   :  { %637 = vmatpush.bf16.msrb.mxu3 %v986_v56 }
  0x36   :  { %599 = vmatpush.bf16.msrb.mxu0 %v961_v57 }
  0x37   :  { %612 = vmatpush.bf16.msrb.mxu1 %v969_v58 }
  0x38   :  { %625 = vmatpush.bf16.msrb.mxu2 %v977_v59 }
  0x39   :  { %638 = vmatpush.bf16.msrb.mxu3 %v985_v60 }
  0x3a   :  { %600 = vmatpush.bf16.msrb.mxu0 %v960_v61 }
  0x3b   :  { %613 = vmatpush.bf16.msrb.mxu1 %v968_v62 }
  0x3c   :  { %626 = vmatpush.bf16.msrb.mxu2 %v976_v63 }
  0x3d   :  { %639 = vmatpush.bf16.msrb.mxu3 %v984_v0 }
  0x3e   :  { %601 = vmatpush.bf16.msrb.mxu0 %v959_v1 }
  0x3f   :  { %614 = vmatpush.bf16.msrb.mxu1 %v967_v2 }
  0x40   :  { %627 = vmatpush.bf16.msrb.mxu2 %v975_v3 }
  0x41   :  { %640 = vmatpush.bf16.msrb.mxu3 %v983_v4  ;;  %602 = vmatmul.bf16.vlgmr.msrb.gmra.mxu0 %v146_v5 }
  0x42   :  { %615 = vmatmul.bf16.vlgmr.msrb.gmra.mxu1 %v147_v6 }
  0x43   :  { %628 = vmatmul.bf16.vlgmr.msrb.gmra.mxu2 %v148_v7 }
  0x44   :  { %641 = vmatmul.bf16.vlgmr.msrb.gmra.mxu3 %v149_v8 }
  0x9e   :  { %v551_v9 = vpop.f32.mrf.mxu0 }
  0x9f   :  { %v564_v10 = vpop.f32.mrf.mxu1 }
  0xa0   :  { %v565_v17 = vadd.f32 %v564_v10, %v551_v9 }
  0xa6   :  { %v577_v11 = vpop.f32.mrf.mxu2  ;;  %v553_v13 = vpop.f32.mrf.mxu0 }
  0xa7   :  { %v590_v12 = vpop.f32.mrf.mxu3  ;;  %v566_v14 = vpop.f32.mrf.mxu1  ;;  %v578_v18 = vadd.f32 %v577_v11, %v565_v17 }
  0xa9   :  { %v591_v19 = vadd.f32 %v590_v12, %v578_v18 }
  0xae   :  { %v579_v15 = vpop.f32.mrf.mxu2 }
  0xaf   :  { %v592_v16 = vpop.f32.mrf.mxu3 }
  0xbe   :  { %v603_v20 = vpop.f32.mrf.mxu0 }
  0xbf   :  { %v616_v21 = vpop.f32.mrf.mxu1  ;;  %v604_v22 = vadd.f32 %v603_v20, %v591_v19 }
  0xc1   :  { %v617_v23 = vadd.f32 %v616_v21, %v604_v22 }
  0xc6   :  { %v629_v24 = vpop.f32.mrf.mxu2  ;;  %v605_v27 = vpop.f32.mrf.mxu0 }
  0xc7   :  { %v642_v25 = vpop.f32.mrf.mxu3  ;;  %v630_v26 = vadd.f32 %v629_v24, %v617_v23  ;;  %v618_v28 = vpop.f32.mrf.mxu1 }
  0xc9   :  { %v643_v29 = vadd.f32 %v642_v25, %v630_v26 }
  0xcb   :  { %v926_v30 = vmul.f32 -1.442695, %v643_v29 }
  0xcd   :  { %991 = vpow2.f32 %v926_v30 }
  0xce   :  { %v631_v31 = vpop.f32.mrf.mxu2 }
  0xcf   :  { %v644_v32 = vpop.f32.mrf.mxu3 }
  0xd3   :  { %v992_v33 = vpop.eup %991 }
  0xd4   :  { %v649_v34 = vadd.f32 1.0, %v992_v33 }
  0xd6   :  { %993 = vrcp.f32 %v649_v34  ;;  %v661_v38 = vand.u32 2147483648, %v649_v34  ;;  %v659_v40 = vand.u32 2147483647, %v649_v34  ;;  %vm655_vm1 = vweird.f32 %v649_v34 }
  0xd8   :  { %v662_v42 = vor.u32 1.1754944e-38, %v661_v38  ;;  %vm660_vm3 = vcmp.eq.f32.partialorder %v659_v40, 8.507059e+37 }
  0xdc   :  { %v994_v35 = vpop.eup %993 }
  0xdd   :  { %v651_v36 = vmul.f32 %v994_v35, %v649_v34  ;;  %vm656_vm0 = vweird.f32 %v994_v35 }
  0xde   :  { %vm657_vm2 = vmor %vm655_vm1, %vm656_vm0 }
  0xdf   :  { %v652_v37 = vsub.f32 1.0, %v651_v36 }
  0xe1   :  { %v653_v39 = vmul.f32 %v994_v35, %v652_v37 }
  0xe3   :  { %v654_v41 = vadd.f32 %v994_v35, %v653_v39 }
  0xe5   :  { %v658_v43 = vsel %vm657_vm2, %v994_v35, %v654_v41 }
  0xe6   :  { %v663_v44 = vsel %vm660_vm3, %v662_v42, %v658_v43 }
  0xe7   :  { %665 = vst [vmem:[%s1210_s2] sm:$0x3] %v663_v44 }

</bundles_post_ra>
